<compile_context>
chip_gen: v7x
topology: tpu7x:2x2x1
jax: 0.10.0
libtpu: 0.0.40
codegen_flags: <defaults>
</compile_context>

<pallas_src>
import functools

import jax
import jax.numpy as jnp
from jax.experimental import pallas as pl
from jax.experimental.pallas import tpu as pltpu


# ----------------------------------------------------------------------------
# In-kernel helpers (values; channels live on the 128-lane axis, NHWC)
# ----------------------------------------------------------------------------
def _upsample2x(x):
    """Nearest-neighbour 2x upsample of an (N, H, W, C) value (rank kept <=4)."""
    N, H, W, C = x.shape
    x = x.reshape(N * H, W, C)
    x = jnp.broadcast_to(x[:, :, None, :], (N * H, W, 2, C)).reshape(N * H, 2 * W, C)
    x = jnp.broadcast_to(x[:, None, :, :], (N * H, 2, 2 * W, C)).reshape(N * 2 * H, 2 * W, C)
    return x.reshape(N, 2 * H, 2 * W, C)


def _zero_pad1(x):
    """Zero-pad an (N, H, W, C) value by 1 on each side of H and W."""
    N, H, W, C = x.shape
    xr = x.reshape(N * H, W, C)
    zc = jnp.zeros((N * H, 1, C), x.dtype)
    xr = jnp.concatenate([zc, xr, zc], axis=1).reshape(N, H, W + 2, C)
    zr = jnp.zeros((N, 1, W + 2, C), x.dtype)
    return jnp.concatenate([zr, xr, zr], axis=1)


def _conv3x3(x, w_flat):
    """3x3 'same' conv via im2col -> single MXU matmul.

    x: (N, H, W, Cin) bf16 (Cin lane-aligned = 128), w_flat: (9*Cin, Cout) bf16.
    Returns (N*H*W, Cout) f32 accumulation, rows in (n, h, w) row-major order.
    """
    N, H, W, Cin = x.shape
    xp = _zero_pad1(x)                                              # bf16, cast already done once upstream
    slabs = [
        xp[:, kh:kh + H, kw:kw + W, :].reshape(N * H * W, Cin)
        for kh in range(3) for kw in range(3)
    ]
    patches = jnp.concatenate(slabs, axis=-1)                       # (N*H*W, 9*Cin), lane-aligned concat
    return jnp.dot(patches, w_flat, preferred_element_type=jnp.float32)


# ----------------------------------------------------------------------------
# Fused conv-tail kernel (one grid step = TB batch elements)
# ----------------------------------------------------------------------------
def generator_kernel(x0_ref, wc1_ref, sc1_ref, bi1_ref,
                     wc2_ref, sc2_ref, bi2_ref,
                     wc3_ref, b3_ref, out_ref, *, init_size, tb):
    s = init_size

    # x0: (TB, s, s, 128) bf16, already = BN0(l1(label_emb*noise).view) in NHWC.
    x = x0_ref[...]

    # --- Upsample 2x -> Conv(128->128) -> BN(eps=0.8) -> LeakyReLU(0.2) ---
    x = _upsample2x(x)                                              # (TB, 2s, 2s, 128) bf16
    y = _conv3x3(x, wc1_ref[...])                                   # (TB*4*s*s, 128) f32
    y = y * sc1_ref[0, :] + bi1_ref[0, :]
    y = jnp.where(y > 0, y, 0.2 * y).astype(jnp.bfloat16)           # single cast per layer
    x = y.reshape(tb, 2 * s, 2 * s, 128)

    # --- Upsample 2x -> Conv(128->64, lane-padded to 128) -> BN -> LReLU ---
    x = _upsample2x(x)                                              # (TB, 4s, 4s, 128) bf16
    y = _conv3x3(x, wc2_ref[...])                                   # (TB*16*s*s, 128) f32
    y = y * sc2_ref[0, :] + bi2_ref[0, :]                           # padded lanes: scale=bias=0 -> stay 0
    y = jnp.where(y > 0, y, 0.2 * y).astype(jnp.bfloat16)
    x = y.reshape(tb, 4 * s, 4 * s, 128)

    # --- Conv(64->channels, Cin/Cout lane-padded to 128) -> Tanh ---
    y = _conv3x3(x, wc3_ref[...])                                   # (TB*16*s*s, 128) f32
    y = jnp.tanh(y + b3_ref[0, :])
    out_ref[...] = y.reshape(tb, 16 * s * s, 128).astype(out_ref.dtype)  # lane-dense bf16 store


# ----------------------------------------------------------------------------
# Parameter construction (deterministic, synthetic) + preparation
# ----------------------------------------------------------------------------
def make_params(key, num_classes, latent_dim, init_size, channels):
    ks = jax.random.split(key, 24)
    k = iter(ks)
    n = lambda shape, s=0.05: s * jax.random.normal(next(k), shape, jnp.float32)

    p = {}
    p["emb"] = n((num_classes, latent_dim), 1.0)
    out1 = 128 * init_size * init_size
    p["l1_w"] = n((latent_dim, out1))
    p["l1_b"] = n((out1,))

    def bn(c):
        return dict(gamma=1.0 + n((c,), 0.1), beta=n((c,), 0.1),
                    mean=n((c,), 0.1), var=1.0 + jnp.abs(n((c,), 0.1)))

    p["bn0"] = bn(128)                       # BatchNorm2d(128), eps=1e-5
    p["conv1_w"] = n((3, 3, 128, 128))       # HWIO
    p["conv1_b"] = n((128,))
    p["bn1"] = bn(128)                       # eps=0.8
    p["conv2_w"] = n((3, 3, 128, 64))
    p["conv2_b"] = n((64,))
    p["bn2"] = bn(64)                        # eps=0.8
    p["conv3_w"] = n((3, 3, 64, channels))
    p["conv3_b"] = n((channels,))
    return p


def prepare_params(params, *, init_size, channels, lane_pad=128):
    """Fold eval-mode BN into scale/bias, lane-pad the conv tail, cast weights."""
    f32, bf16 = jnp.float32, jnp.bfloat16

    # BN0 (eps=1e-5) folded to per-channel scale/bias (applied in XLA pre-stage).
    bn0 = params["bn0"]
    sc0 = bn0["gamma"] * jax.lax.rsqrt(bn0["var"] + 1e-5)          # (128,)
    b0 = bn0["beta"] - bn0["mean"] * sc0                           # (128,)

    def fold(bn, conv_b, eps, c_real, c_pad):
        sc = bn["gamma"] * jax.lax.rsqrt(bn["var"] + eps)
        bi = (conv_b - bn["mean"]) * sc + bn["beta"]
        scp = jnp.zeros((1, c_pad), f32).at[0, :c_real].set(sc)    # padded lanes -> 0
        bip = jnp.zeros((1, c_pad), f32).at[0, :c_real].set(bi)    # padded lanes -> 0
        return scp, bip

    sc1, bi1 = fold(params["bn1"], params["conv1_b"], 0.8, 128, 128)
    sc2, bi2 = fold(params["bn2"], params["conv2_b"], 0.8, 64, lane_pad)

    wc1 = params["conv1_w"].reshape(9 * 128, 128)
    # conv2: lane-pad Cout 64 -> 128 (zero output lanes) so the tail stays 128-lane.
    wc2 = jnp.zeros((9 * 128, lane_pad), f32).at[:, :64].set(
        params["conv2_w"].reshape(9 * 128, 64))
    # conv3: lane-pad Cin 64 -> 128 (zero rows for the padded input channels) and
    # Cout channels -> 128, so it takes the single im2col-matmul path and the
    # output store is lane-dense (padded lanes stay exactly 0 through tanh).
    wc3 = jnp.zeros((9, lane_pad, lane_pad), f32).at[:, :64, :channels].set(
        params["conv3_w"].reshape(9, 64, channels)).reshape(9 * lane_pad, lane_pad)
    b3 = jnp.zeros((1, lane_pad), f32).at[0, :channels].set(params["conv3_b"])

    return dict(
        emb=params["emb"].astype(f32),
        l1_w=params["l1_w"].astype(f32),     # linear stays f32, runs in XLA (M=B)
        l1_b=params["l1_b"].astype(f32),
        sc0=sc0.astype(f32), b0=b0.astype(f32),
        wc1=wc1.astype(bf16), sc1=sc1, bi1=bi1,
        wc2=wc2.astype(bf16), sc2=sc2, bi2=bi2,
        wc3=wc3.astype(bf16), b3=b3,
    )


# ----------------------------------------------------------------------------
# Generator forward: XLA pre-stage (embedding gather + l1 + BN0) + fused kernel
# ----------------------------------------------------------------------------
@functools.partial(jax.jit, static_argnames=("init_size", "channels", "tb"))
def generator_forward(prep, noise, labels, *, init_size, channels, tb=8):
    s = init_size
    B, _ = noise.shape
    H = 4 * s
    lane_pad = prep["b3"].shape[-1]

    # --- XLA pre-stage (tiny): gen_input = emb(labels)*noise; l1; view; BN0 ---
    g = prep["emb"][labels] * noise                                  # (B, L)
    lin = g @ prep["l1_w"] + prep["l1_b"]                            # (B, 128*s*s), f32
    x0 = lin.reshape(B, 128, s, s)                                   # PyTorch .view semantics
    x0 = x0 * prep["sc0"][None, :, None, None] + prep["b0"][None, :, None, None]
    x0 = jnp.transpose(x0, (0, 2, 3, 1)).astype(jnp.bfloat16)        # NHWC, (B, s, s, 128)

    # Batch tiling: TB elements per grid step (pad B up to a multiple of TB).
    # NOTE (v7x): pick tb so the grid length is >=2 to keep both TCs busy.
    TB = min(tb, B)
    Bp = TB * ((B + TB - 1) // TB)
    if Bp != B:
        x0 = jnp.pad(x0, ((0, Bp - B), (0, 0), (0, 0), (0, 0)))

    kern = functools.partial(generator_kernel, init_size=s, tb=TB)
    c2 = lambda i: (0, 0)                                            # resident weights / scale / bias

    out = pl.pallas_call(
        kern,
        out_shape=jax.ShapeDtypeStruct((Bp, H * H, lane_pad), jnp.bfloat16),
        grid=(Bp // TB,),
        in_specs=[
            pl.BlockSpec((TB, s, s, 128), lambda i: (i, 0, 0, 0)),   # x0 (per-step batch slab)
            pl.BlockSpec(prep["wc1"].shape, c2),                     # conv1 weight (bf16)
            pl.BlockSpec((1, 128), c2),                              # bn1 scale
            pl.BlockSpec((1, 128), c2),                              # bn1 bias
            pl.BlockSpec(prep["wc2"].shape, c2),                     # conv2 weight (bf16, Cout padded)
            pl.BlockSpec((1, lane_pad), c2),                         # bn2 scale (padded)
            pl.BlockSpec((1, lane_pad), c2),                         # bn2 bias (padded)
            pl.BlockSpec(prep["wc3"].shape, c2),                     # conv3 weight (bf16, Cin/Cout padded)
            pl.BlockSpec((1, lane_pad), c2),                         # conv3 bias (padded)
        ],
        out_specs=pl.BlockSpec((TB, H * H, lane_pad), lambda i: (i, 0, 0)),
        compiler_params=pltpu.CompilerParams(
            dimension_semantics=("parallel",),
            vmem_limit_bytes=32 * 1024 * 1024),
    )(x0, prep["wc1"], prep["sc1"], prep["bi1"],
      prep["wc2"], prep["sc2"], prep["bi2"],
      prep["wc3"], prep["b3"])

    # (Bp, H*H, 128) bf16 -> (B, channels, H, H) f32 (tiny slice/reshape in XLA)
    img = out[:B, :, :channels].reshape(B, H, H, channels)
    return jnp.transpose(img, (0, 3, 1, 2)).astype(jnp.float32)


# ----------------------------------------------------------------------------
# Pure-JAX reference (mirrors the PyTorch module, f32) for a sanity check
# ----------------------------------------------------------------------------
def generator_reference(params, noise, labels, *, init_size, channels):
    B = noise.shape[0]
    s = init_size
    g = params["emb"][labels] * noise
    out = g @ params["l1_w"] + params["l1_b"]
    x = out.reshape(B, 128, s, s)

    def bn(x, p, eps):
        sc = p["gamma"] / jnp.sqrt(p["var"] + eps)
        return (x - p["mean"][None, :, None, None]) * sc[None, :, None, None] \
            + p["beta"][None, :, None, None]

    def up2(x):
        return jnp.repeat(jnp.repeat(x, 2, axis=2), 2, axis=3)

    def conv(x, w_hwio, b):
        y = jax.lax.conv_general_dilated(
            x, w_hwio, window_strides=(1, 1), padding="SAME",
            dimension_numbers=("NCHW", "HWIO", "NCHW"))
        return y + b[None, :, None, None]

    x = bn(x, params["bn0"], 1e-5)
    x = up2(x)
    x = conv(x, params["conv1_w"], params["conv1_b"])
    x = bn(x, params["bn1"], 0.8)
    x = jnp.where(x > 0, x, 0.2 * x)
    x = up2(x)
    x = conv(x, params["conv2_w"], params["conv2_b"])
    x = bn(x, params["bn2"], 0.8)
    x = jnp.where(x > 0, x, 0.2 * x)
    x = conv(x, params["conv3_w"], params["conv3_b"])
    return jnp.tanh(x)


# ----------------------------------------------------------------------------
if __name__ == "__main__":
    # Small OPT consistent with the module:
    num_classes = 10
    latent_dim = 32
    image_size = 16
    channels = 3
    init_size = image_size // 4   # 4
    B = 2

    key = jax.random.PRNGKey(0)
    kp, kn, kl = jax.random.split(key, 3)
    params = make_params(kp, num_classes, latent_dim, init_size, channels)
    prep = prepare_params(params, init_size=init_size, channels=channels)

    noise = jax.random.normal(kn, (B, latent_dim), jnp.float32)
    labels = jax.random.randint(kl, (B,), 0, num_classes, jnp.int32)

    img = generator_forward(prep, noise, labels,
                            init_size=init_size, channels=channels, tb=8)
    img = jax.block_until_ready(img)

    assert img.shape == (B, channels, image_size, image_size), img.shape
    assert bool(jnp.all(jnp.isfinite(img)))

    # Loose numerical sanity check against the f32 reference (kernel uses bf16
    # matmul inputs and a bf16 output store, so allow a generous tolerance).
    ref = generator_reference(params, noise, labels,
                              init_size=init_size, channels=channels)
    max_err = float(jnp.max(jnp.abs(img - ref)))
    assert max_err < 0.12, f"max abs error vs reference: {max_err}"

    print("KERNEL_OK")
</pallas_src>

<mosaic_0001>
module attributes {stable_mosaic.version = 11 : i64} {
  func.func @generator_kernel(%arg0: i32, %arg1: memref<2x4x4x128xbf16, #tpu.memory_space<vmem>>, %arg2: memref<1152x128xbf16, #tpu.memory_space<vmem>>, %arg3: memref<1x128xf32, #tpu.memory_space<vmem>>, %arg4: memref<1x128xf32, #tpu.memory_space<vmem>>, %arg5: memref<1152x128xbf16, #tpu.memory_space<vmem>>, %arg6: memref<1x128xf32, #tpu.memory_space<vmem>>, %arg7: memref<1x128xf32, #tpu.memory_space<vmem>>, %arg8: memref<1152x128xbf16, #tpu.memory_space<vmem>>, %arg9: memref<1x128xf32, #tpu.memory_space<vmem>>, %arg10: memref<2x256x128xbf16, #tpu.memory_space<vmem>>) attributes {dimension_semantics = [#tpu.dimension_semantics<parallel>], iteration_bounds = array<i64: 1>, scalar_prefetch = 0 : i64, scratch_operands = 0 : i64, tpu.core_type = #tpu.core_type<tc>, window_params = [{transform_indices = @transform_0, window_bounds = array<i64: 2, 4, 4, 128>}, {pipeline_mode = #tpu.pipeline_mode<synchronous>, transform_indices = @transform_1, window_bounds = array<i64: 1152, 128>}, {pipeline_mode = #tpu.pipeline_mode<synchronous>, transform_indices = @transform_2, window_bounds = array<i64: 1, 128>}, {pipeline_mode = #tpu.pipeline_mode<synchronous>, transform_indices = @transform_3, window_bounds = array<i64: 1, 128>}, {pipeline_mode = #tpu.pipeline_mode<synchronous>, transform_indices = @transform_4, window_bounds = array<i64: 1152, 128>}, {pipeline_mode = #tpu.pipeline_mode<synchronous>, transform_indices = @transform_5, window_bounds = array<i64: 1, 128>}, {pipeline_mode = #tpu.pipeline_mode<synchronous>, transform_indices = @transform_6, window_bounds = array<i64: 1, 128>}, {pipeline_mode = #tpu.pipeline_mode<synchronous>, transform_indices = @transform_7, window_bounds = array<i64: 1152, 128>}, {pipeline_mode = #tpu.pipeline_mode<synchronous>, transform_indices = @transform_8, window_bounds = array<i64: 1, 128>}, {transform_indices = @transform_9, window_bounds = array<i64: 2, 256, 128>}]} {
    %c0 = arith.constant 0 : index
    %c0_0 = arith.constant 0 : index
    %c0_1 = arith.constant 0 : index
    %c0_2 = arith.constant 0 : index
    %0 = vector.load %arg1[%c0, %c0_0, %c0_1, %c0_2] : memref<2x4x4x128xbf16, #tpu.memory_space<vmem>>, vector<2x4x4x128xbf16>
    %1 = vector.shape_cast %0 : vector<2x4x4x128xbf16> to vector<8x4x128xbf16>
    %2 = vector.shape_cast %1 : vector<8x4x128xbf16> to vector<8x4x1x128xbf16>
    %3 = vector.shape_cast %2 : vector<8x4x1x128xbf16> to vector<8x4x1x128xbf16>
    %4 = vector.broadcast %3 : vector<8x4x1x128xbf16> to vector<8x4x2x128xbf16>
    %5 = vector.shape_cast %4 : vector<8x4x2x128xbf16> to vector<8x8x128xbf16>
    %6 = vector.shape_cast %5 : vector<8x8x128xbf16> to vector<8x1x8x128xbf16>
    %7 = vector.shape_cast %6 : vector<8x1x8x128xbf16> to vector<8x1x8x128xbf16>
    %8 = vector.broadcast %7 : vector<8x1x8x128xbf16> to vector<8x2x8x128xbf16>
    %9 = vector.shape_cast %8 : vector<8x2x8x128xbf16> to vector<16x8x128xbf16>
    %10 = vector.shape_cast %9 : vector<16x8x128xbf16> to vector<2x8x8x128xbf16>
    %c0_3 = arith.constant 0 : index
    %c0_4 = arith.constant 0 : index
    %11 = vector.load %arg2[%c0_3, %c0_4] : memref<1152x128xbf16, #tpu.memory_space<vmem>>, vector<1152x128xbf16>
    %12 = vector.shape_cast %10 : vector<2x8x8x128xbf16> to vector<16x8x128xbf16>
    %cst = arith.constant 0.000000e+00 : bf16
    %13 = vector.broadcast %cst : bf16 to vector<16x1x128xbf16>
    %14 = tpu.concatenate %13, %12, %13 in 1 : vector<16x1x128xbf16>, vector<16x8x128xbf16>, vector<16x1x128xbf16> -> vector<16x10x128xbf16>
    %15 = vector.shape_cast %14 : vector<16x10x128xbf16> to vector<2x8x10x128xbf16>
    %cst_5 = arith.constant 0.000000e+00 : bf16
    %16 = vector.broadcast %cst_5 : bf16 to vector<2x1x10x128xbf16>
    %17 = tpu.concatenate %16, %15, %16 in 1 : vector<2x1x10x128xbf16>, vector<2x8x10x128xbf16>, vector<2x1x10x128xbf16> -> vector<2x10x10x128xbf16>
    %18 = vector.extract_strided_slice %17 {offsets = [0, 0, 0, 0], sizes = [2, 8, 8, 128], strides = [1, 1, 1, 1]} : vector<2x10x10x128xbf16> to vector<2x8x8x128xbf16>
    %19 = vector.shape_cast %18 : vector<2x8x8x128xbf16> to vector<128x128xbf16>
    %20 = vector.extract_strided_slice %17 {offsets = [0, 0, 1, 0], sizes = [2, 8, 8, 128], strides = [1, 1, 1, 1]} : vector<2x10x10x128xbf16> to vector<2x8x8x128xbf16>
    %21 = vector.shape_cast %20 : vector<2x8x8x128xbf16> to vector<128x128xbf16>
    %22 = vector.extract_strided_slice %17 {offsets = [0, 0, 2, 0], sizes = [2, 8, 8, 128], strides = [1, 1, 1, 1]} : vector<2x10x10x128xbf16> to vector<2x8x8x128xbf16>
    %23 = vector.shape_cast %22 : vector<2x8x8x128xbf16> to vector<128x128xbf16>
    %24 = vector.extract_strided_slice %17 {offsets = [0, 1, 0, 0], sizes = [2, 8, 8, 128], strides = [1, 1, 1, 1]} : vector<2x10x10x128xbf16> to vector<2x8x8x128xbf16>
    %25 = vector.shape_cast %24 : vector<2x8x8x128xbf16> to vector<128x128xbf16>
    %26 = vector.extract_strided_slice %17 {offsets = [0, 1, 1, 0], sizes = [2, 8, 8, 128], strides = [1, 1, 1, 1]} : vector<2x10x10x128xbf16> to vector<2x8x8x128xbf16>
    %27 = vector.shape_cast %26 : vector<2x8x8x128xbf16> to vector<128x128xbf16>
    %28 = vector.extract_strided_slice %17 {offsets = [0, 1, 2, 0], sizes = [2, 8, 8, 128], strides = [1, 1, 1, 1]} : vector<2x10x10x128xbf16> to vector<2x8x8x128xbf16>
    %29 = vector.shape_cast %28 : vector<2x8x8x128xbf16> to vector<128x128xbf16>
    %30 = vector.extract_strided_slice %17 {offsets = [0, 2, 0, 0], sizes = [2, 8, 8, 128], strides = [1, 1, 1, 1]} : vector<2x10x10x128xbf16> to vector<2x8x8x128xbf16>
    %31 = vector.shape_cast %30 : vector<2x8x8x128xbf16> to vector<128x128xbf16>
    %32 = vector.extract_strided_slice %17 {offsets = [0, 2, 1, 0], sizes = [2, 8, 8, 128], strides = [1, 1, 1, 1]} : vector<2x10x10x128xbf16> to vector<2x8x8x128xbf16>
    %33 = vector.shape_cast %32 : vector<2x8x8x128xbf16> to vector<128x128xbf16>
    %34 = vector.extract_strided_slice %17 {offsets = [0, 2, 2, 0], sizes = [2, 8, 8, 128], strides = [1, 1, 1, 1]} : vector<2x10x10x128xbf16> to vector<2x8x8x128xbf16>
    %35 = vector.shape_cast %34 : vector<2x8x8x128xbf16> to vector<128x128xbf16>
    %36 = tpu.concatenate %19, %21, %23, %25, %27, %29, %31, %33, %35 in 1 : vector<128x128xbf16>, vector<128x128xbf16>, vector<128x128xbf16>, vector<128x128xbf16>, vector<128x128xbf16>, vector<128x128xbf16>, vector<128x128xbf16>, vector<128x128xbf16>, vector<128x128xbf16> -> vector<128x1152xbf16>
    %cst_6 = arith.constant dense<0.000000e+00> : vector<128x128xf32>
    %37 = tpu.matmul %36, %11, %cst_6 {dimension_numbers = #tpu.dot_dimension_numbers<[1], [0], [0], [1], [0, 0, 1, 1], [], []>} : vector<128x1152xbf16>, vector<1152x128xbf16>, vector<128x128xf32> -> vector<128x128xf32>
    %c0_7 = arith.constant 0 : index
    %c0_8 = arith.constant 0 : index
    %38 = vector.load %arg3[%c0_7, %c0_8] : memref<1x128xf32, #tpu.memory_space<vmem>>, vector<1x128xf32>
    %39 = vector.shape_cast %38 : vector<1x128xf32> to vector<128xf32>
    %40 = vector.shape_cast %39 : vector<128xf32> to vector<1x128xf32>
    %41 = vector.broadcast %40 : vector<1x128xf32> to vector<128x128xf32>
    %42 = arith.mulf %37, %41 : vector<128x128xf32>
    %c0_9 = arith.constant 0 : index
    %c0_10 = arith.constant 0 : index
    %43 = vector.load %arg4[%c0_9, %c0_10] : memref<1x128xf32, #tpu.memory_space<vmem>>, vector<1x128xf32>
    %44 = vector.shape_cast %43 : vector<1x128xf32> to vector<128xf32>
    %45 = vector.shape_cast %44 : vector<128xf32> to vector<1x128xf32>
    %46 = vector.broadcast %45 : vector<1x128xf32> to vector<128x128xf32>
    %47 = arith.addf %42, %46 : vector<128x128xf32>
    %cst_11 = arith.constant 0.000000e+00 : f32
    %48 = vector.broadcast %cst_11 : f32 to vector<128x128xf32>
    %49 = arith.cmpf ogt, %47, %48 : vector<128x128xf32>
    %cst_12 = arith.constant 2.000000e-01 : f32
    %50 = vector.broadcast %cst_12 : f32 to vector<128x128xf32>
    %51 = arith.mulf %50, %47 : vector<128x128xf32>
    %52 = arith.select %49, %47, %51 : vector<128x128xi1>, vector<128x128xf32>
    %53 = arith.truncf %52 : vector<128x128xf32> to vector<128x128xbf16>
    %54 = vector.shape_cast %53 : vector<128x128xbf16> to vector<2x8x8x128xbf16>
    %55 = vector.shape_cast %54 : vector<2x8x8x128xbf16> to vector<16x8x128xbf16>
    %56 = vector.shape_cast %55 : vector<16x8x128xbf16> to vector<16x8x1x128xbf16>
    %57 = vector.shape_cast %56 : vector<16x8x1x128xbf16> to vector<16x8x1x128xbf16>
    %58 = vector.broadcast %57 : vector<16x8x1x128xbf16> to vector<16x8x2x128xbf16>
    %59 = vector.shape_cast %58 : vector<16x8x2x128xbf16> to vector<16x16x128xbf16>
    %60 = vector.shape_cast %59 : vector<16x16x128xbf16> to vector<16x1x16x128xbf16>
    %61 = vector.shape_cast %60 : vector<16x1x16x128xbf16> to vector<16x1x16x128xbf16>
    %62 = vector.broadcast %61 : vector<16x1x16x128xbf16> to vector<16x2x16x128xbf16>
    %63 = vector.shape_cast %62 : vector<16x2x16x128xbf16> to vector<32x16x128xbf16>
    %64 = vector.shape_cast %63 : vector<32x16x128xbf16> to vector<2x16x16x128xbf16>
    %c0_13 = arith.constant 0 : index
    %c0_14 = arith.constant 0 : index
    %65 = vector.load %arg5[%c0_13, %c0_14] : memref<1152x128xbf16, #tpu.memory_space<vmem>>, vector<1152x128xbf16>
    %66 = vector.shape_cast %64 : vector<2x16x16x128xbf16> to vector<32x16x128xbf16>
    %cst_15 = arith.constant 0.000000e+00 : bf16
    %67 = vector.broadcast %cst_15 : bf16 to vector<32x1x128xbf16>
    %68 = tpu.concatenate %67, %66, %67 in 1 : vector<32x1x128xbf16>, vector<32x16x128xbf16>, vector<32x1x128xbf16> -> vector<32x18x128xbf16>
    %69 = vector.shape_cast %68 : vector<32x18x128xbf16> to vector<2x16x18x128xbf16>
    %cst_16 = arith.constant 0.000000e+00 : bf16
    %70 = vector.broadcast %cst_16 : bf16 to vector<2x1x18x128xbf16>
    %71 = tpu.concatenate %70, %69, %70 in 1 : vector<2x1x18x128xbf16>, vector<2x16x18x128xbf16>, vector<2x1x18x128xbf16> -> vector<2x18x18x128xbf16>
    %72 = vector.extract_strided_slice %71 {offsets = [0, 0, 0, 0], sizes = [2, 16, 16, 128], strides = [1, 1, 1, 1]} : vector<2x18x18x128xbf16> to vector<2x16x16x128xbf16>
    %73 = vector.shape_cast %72 : vector<2x16x16x128xbf16> to vector<512x128xbf16>
    %74 = vector.extract_strided_slice %71 {offsets = [0, 0, 1, 0], sizes = [2, 16, 16, 128], strides = [1, 1, 1, 1]} : vector<2x18x18x128xbf16> to vector<2x16x16x128xbf16>
    %75 = vector.shape_cast %74 : vector<2x16x16x128xbf16> to vector<512x128xbf16>
    %76 = vector.extract_strided_slice %71 {offsets = [0, 0, 2, 0], sizes = [2, 16, 16, 128], strides = [1, 1, 1, 1]} : vector<2x18x18x128xbf16> to vector<2x16x16x128xbf16>
    %77 = vector.shape_cast %76 : vector<2x16x16x128xbf16> to vector<512x128xbf16>
    %78 = vector.extract_strided_slice %71 {offsets = [0, 1, 0, 0], sizes = [2, 16, 16, 128], strides = [1, 1, 1, 1]} : vector<2x18x18x128xbf16> to vector<2x16x16x128xbf16>
    %79 = vector.shape_cast %78 : vector<2x16x16x128xbf16> to vector<512x128xbf16>
    %80 = vector.extract_strided_slice %71 {offsets = [0, 1, 1, 0], sizes = [2, 16, 16, 128], strides = [1, 1, 1, 1]} : vector<2x18x18x128xbf16> to vector<2x16x16x128xbf16>
    %81 = vector.shape_cast %80 : vector<2x16x16x128xbf16> to vector<512x128xbf16>
    %82 = vector.extract_strided_slice %71 {offsets = [0, 1, 2, 0], sizes = [2, 16, 16, 128], strides = [1, 1, 1, 1]} : vector<2x18x18x128xbf16> to vector<2x16x16x128xbf16>
    %83 = vector.shape_cast %82 : vector<2x16x16x128xbf16> to vector<512x128xbf16>
    %84 = vector.extract_strided_slice %71 {offsets = [0, 2, 0, 0], sizes = [2, 16, 16, 128], strides = [1, 1, 1, 1]} : vector<2x18x18x128xbf16> to vector<2x16x16x128xbf16>
    %85 = vector.shape_cast %84 : vector<2x16x16x128xbf16> to vector<512x128xbf16>
    %86 = vector.extract_strided_slice %71 {offsets = [0, 2, 1, 0], sizes = [2, 16, 16, 128], strides = [1, 1, 1, 1]} : vector<2x18x18x128xbf16> to vector<2x16x16x128xbf16>
    %87 = vector.shape_cast %86 : vector<2x16x16x128xbf16> to vector<512x128xbf16>
    %88 = vector.extract_strided_slice %71 {offsets = [0, 2, 2, 0], sizes = [2, 16, 16, 128], strides = [1, 1, 1, 1]} : vector<2x18x18x128xbf16> to vector<2x16x16x128xbf16>
    %89 = vector.shape_cast %88 : vector<2x16x16x128xbf16> to vector<512x128xbf16>
    %90 = tpu.concatenate %73, %75, %77, %79, %81, %83, %85, %87, %89 in 1 : vector<512x128xbf16>, vector<512x128xbf16>, vector<512x128xbf16>, vector<512x128xbf16>, vector<512x128xbf16>, vector<512x128xbf16>, vector<512x128xbf16>, vector<512x128xbf16>, vector<512x128xbf16> -> vector<512x1152xbf16>
    %cst_17 = arith.constant dense<0.000000e+00> : vector<512x128xf32>
    %91 = tpu.matmul %90, %65, %cst_17 {dimension_numbers = #tpu.dot_dimension_numbers<[1], [0], [0], [1], [0, 0, 1, 1], [], []>} : vector<512x1152xbf16>, vector<1152x128xbf16>, vector<512x128xf32> -> vector<512x128xf32>
    %c0_18 = arith.constant 0 : index
    %c0_19 = arith.constant 0 : index
    %92 = vector.load %arg6[%c0_18, %c0_19] : memref<1x128xf32, #tpu.memory_space<vmem>>, vector<1x128xf32>
    %93 = vector.shape_cast %92 : vector<1x128xf32> to vector<128xf32>
    %94 = vector.shape_cast %93 : vector<128xf32> to vector<1x128xf32>
    %95 = vector.broadcast %94 : vector<1x128xf32> to vector<512x128xf32>
    %96 = arith.mulf %91, %95 : vector<512x128xf32>
    %c0_20 = arith.constant 0 : index
    %c0_21 = arith.constant 0 : index
    %97 = vector.load %arg7[%c0_20, %c0_21] : memref<1x128xf32, #tpu.memory_space<vmem>>, vector<1x128xf32>
    %98 = vector.shape_cast %97 : vector<1x128xf32> to vector<128xf32>
    %99 = vector.shape_cast %98 : vector<128xf32> to vector<1x128xf32>
    %100 = vector.broadcast %99 : vector<1x128xf32> to vector<512x128xf32>
    %101 = arith.addf %96, %100 : vector<512x128xf32>
    %cst_22 = arith.constant 0.000000e+00 : f32
    %102 = vector.broadcast %cst_22 : f32 to vector<512x128xf32>
    %103 = arith.cmpf ogt, %101, %102 : vector<512x128xf32>
    %cst_23 = arith.constant 2.000000e-01 : f32
    %104 = vector.broadcast %cst_23 : f32 to vector<512x128xf32>
    %105 = arith.mulf %104, %101 : vector<512x128xf32>
    %106 = arith.select %103, %101, %105 : vector<512x128xi1>, vector<512x128xf32>
    %107 = arith.truncf %106 : vector<512x128xf32> to vector<512x128xbf16>
    %108 = vector.shape_cast %107 : vector<512x128xbf16> to vector<2x16x16x128xbf16>
    %c0_24 = arith.constant 0 : index
    %c0_25 = arith.constant 0 : index
    %109 = vector.load %arg8[%c0_24, %c0_25] : memref<1152x128xbf16, #tpu.memory_space<vmem>>, vector<1152x128xbf16>
    %110 = vector.shape_cast %108 : vector<2x16x16x128xbf16> to vector<32x16x128xbf16>
    %cst_26 = arith.constant 0.000000e+00 : bf16
    %111 = vector.broadcast %cst_26 : bf16 to vector<32x1x128xbf16>
    %112 = tpu.concatenate %111, %110, %111 in 1 : vector<32x1x128xbf16>, vector<32x16x128xbf16>, vector<32x1x128xbf16> -> vector<32x18x128xbf16>
    %113 = vector.shape_cast %112 : vector<32x18x128xbf16> to vector<2x16x18x128xbf16>
    %cst_27 = arith.constant 0.000000e+00 : bf16
    %114 = vector.broadcast %cst_27 : bf16 to vector<2x1x18x128xbf16>
    %115 = tpu.concatenate %114, %113, %114 in 1 : vector<2x1x18x128xbf16>, vector<2x16x18x128xbf16>, vector<2x1x18x128xbf16> -> vector<2x18x18x128xbf16>
    %116 = vector.extract_strided_slice %115 {offsets = [0, 0, 0, 0], sizes = [2, 16, 16, 128], strides = [1, 1, 1, 1]} : vector<2x18x18x128xbf16> to vector<2x16x16x128xbf16>
    %117 = vector.shape_cast %116 : vector<2x16x16x128xbf16> to vector<512x128xbf16>
    %118 = vector.extract_strided_slice %115 {offsets = [0, 0, 1, 0], sizes = [2, 16, 16, 128], strides = [1, 1, 1, 1]} : vector<2x18x18x128xbf16> to vector<2x16x16x128xbf16>
    %119 = vector.shape_cast %118 : vector<2x16x16x128xbf16> to vector<512x128xbf16>
    %120 = vector.extract_strided_slice %115 {offsets = [0, 0, 2, 0], sizes = [2, 16, 16, 128], strides = [1, 1, 1, 1]} : vector<2x18x18x128xbf16> to vector<2x16x16x128xbf16>
    %121 = vector.shape_cast %120 : vector<2x16x16x128xbf16> to vector<512x128xbf16>
    %122 = vector.extract_strided_slice %115 {offsets = [0, 1, 0, 0], sizes = [2, 16, 16, 128], strides = [1, 1, 1, 1]} : vector<2x18x18x128xbf16> to vector<2x16x16x128xbf16>
    %123 = vector.shape_cast %122 : vector<2x16x16x128xbf16> to vector<512x128xbf16>
    %124 = vector.extract_strided_slice %115 {offsets = [0, 1, 1, 0], sizes = [2, 16, 16, 128], strides = [1, 1, 1, 1]} : vector<2x18x18x128xbf16> to vector<2x16x16x128xbf16>
    %125 = vector.shape_cast %124 : vector<2x16x16x128xbf16> to vector<512x128xbf16>
    %126 = vector.extract_strided_slice %115 {offsets = [0, 1, 2, 0], sizes = [2, 16, 16, 128], strides = [1, 1, 1, 1]} : vector<2x18x18x128xbf16> to vector<2x16x16x128xbf16>
    %127 = vector.shape_cast %126 : vector<2x16x16x128xbf16> to vector<512x128xbf16>
    %128 = vector.extract_strided_slice %115 {offsets = [0, 2, 0, 0], sizes = [2, 16, 16, 128], strides = [1, 1, 1, 1]} : vector<2x18x18x128xbf16> to vector<2x16x16x128xbf16>
    %129 = vector.shape_cast %128 : vector<2x16x16x128xbf16> to vector<512x128xbf16>
    %130 = vector.extract_strided_slice %115 {offsets = [0, 2, 1, 0], sizes = [2, 16, 16, 128], strides = [1, 1, 1, 1]} : vector<2x18x18x128xbf16> to vector<2x16x16x128xbf16>
    %131 = vector.shape_cast %130 : vector<2x16x16x128xbf16> to vector<512x128xbf16>
    %132 = vector.extract_strided_slice %115 {offsets = [0, 2, 2, 0], sizes = [2, 16, 16, 128], strides = [1, 1, 1, 1]} : vector<2x18x18x128xbf16> to vector<2x16x16x128xbf16>
    %133 = vector.shape_cast %132 : vector<2x16x16x128xbf16> to vector<512x128xbf16>
    %134 = tpu.concatenate %117, %119, %121, %123, %125, %127, %129, %131, %133 in 1 : vector<512x128xbf16>, vector<512x128xbf16>, vector<512x128xbf16>, vector<512x128xbf16>, vector<512x128xbf16>, vector<512x128xbf16>, vector<512x128xbf16>, vector<512x128xbf16>, vector<512x128xbf16> -> vector<512x1152xbf16>
    %cst_28 = arith.constant dense<0.000000e+00> : vector<512x128xf32>
    %135 = tpu.matmul %134, %109, %cst_28 {dimension_numbers = #tpu.dot_dimension_numbers<[1], [0], [0], [1], [0, 0, 1, 1], [], []>} : vector<512x1152xbf16>, vector<1152x128xbf16>, vector<512x128xf32> -> vector<512x128xf32>
    %c0_29 = arith.constant 0 : index
    %c0_30 = arith.constant 0 : index
    %136 = vector.load %arg9[%c0_29, %c0_30] : memref<1x128xf32, #tpu.memory_space<vmem>>, vector<1x128xf32>
    %137 = vector.shape_cast %136 : vector<1x128xf32> to vector<128xf32>
    %138 = vector.shape_cast %137 : vector<128xf32> to vector<1x128xf32>
    %139 = vector.broadcast %138 : vector<1x128xf32> to vector<512x128xf32>
    %140 = arith.addf %135, %139 : vector<512x128xf32>
    %141 = math.tanh %140 : vector<512x128xf32>
    %142 = vector.shape_cast %141 : vector<512x128xf32> to vector<2x256x128xf32>
    %143 = arith.truncf %142 : vector<2x256x128xf32> to vector<2x256x128xbf16>
    %c0_31 = arith.constant 0 : index
    %c0_32 = arith.constant 0 : index
    %c0_33 = arith.constant 0 : index
    %144 = vector.load %arg10[%c0_31, %c0_32, %c0_33] : memref<2x256x128xbf16, #tpu.memory_space<vmem>>, vector<2x256x128xbf16>
    tpu.vector_store %arg10[%c0_31, %c0_32, %c0_33], %143 {strides = array<i32>} : memref<2x256x128xbf16, #tpu.memory_space<vmem>>, vector<2x256x128xbf16>,
    return
  }
  func.func @transform_0(%arg0: i32) -> (i32, i32, i32, i32) {
    %c0_i32 = arith.constant 0 : i32
    %c0_i32_0 = arith.constant 0 : i32
    %c0_i32_1 = arith.constant 0 : i32
    %c0_i32_2 = arith.constant 0 : i32
    return %arg0, %c0_i32, %c0_i32_0, %c0_i32_1 : i32, i32, i32, i32
  }
  func.func @transform_1(%arg0: i32) -> (i32, i32) {
    %c0_i32 = arith.constant 0 : i32
    %c0_i32_0 = arith.constant 0 : i32
    %c0_i32_1 = arith.constant 0 : i32
    return %c0_i32, %c0_i32_0 : i32, i32
  }
  func.func @transform_2(%arg0: i32) -> (i32, i32) {
    %c0_i32 = arith.constant 0 : i32
    %c0_i32_0 = arith.constant 0 : i32
    %c0_i32_1 = arith.constant 0 : i32
    return %c0_i32, %c0_i32_0 : i32, i32
  }
  func.func @transform_3(%arg0: i32) -> (i32, i32) {
    %c0_i32 = arith.constant 0 : i32
    %c0_i32_0 = arith.constant 0 : i32
    %c0_i32_1 = arith.constant 0 : i32
    return %c0_i32, %c0_i32_0 : i32, i32
  }
  func.func @transform_4(%arg0: i32) -> (i32, i32) {
    %c0_i32 = arith.constant 0 : i32
    %c0_i32_0 = arith.constant 0 : i32
    %c0_i32_1 = arith.constant 0 : i32
    return %c0_i32, %c0_i32_0 : i32, i32
  }
  func.func @transform_5(%arg0: i32) -> (i32, i32) {
    %c0_i32 = arith.constant 0 : i32
    %c0_i32_0 = arith.constant 0 : i32
    %c0_i32_1 = arith.constant 0 : i32
    return %c0_i32, %c0_i32_0 : i32, i32
  }
  func.func @transform_6(%arg0: i32) -> (i32, i32) {
    %c0_i32 = arith.constant 0 : i32
    %c0_i32_0 = arith.constant 0 : i32
    %c0_i32_1 = arith.constant 0 : i32
    return %c0_i32, %c0_i32_0 : i32, i32
  }
  func.func @transform_7(%arg0: i32) -> (i32, i32) {
    %c0_i32 = arith.constant 0 : i32
    %c0_i32_0 = arith.constant 0 : i32
    %c0_i32_1 = arith.constant 0 : i32
    return %c0_i32, %c0_i32_0 : i32, i32
  }
  func.func @transform_8(%arg0: i32) -> (i32, i32) {
    %c0_i32 = arith.constant 0 : i32
    %c0_i32_0 = arith.constant 0 : i32
    %c0_i32_1 = arith.constant 0 : i32
    return %c0_i32, %c0_i32_0 : i32, i32
  }
  func.func @transform_9(%arg0: i32) -> (i32, i32, i32) {
    %c0_i32 = arith.constant 0 : i32
    %c0_i32_0 = arith.constant 0 : i32
    %c0_i32_1 = arith.constant 0 : i32
    return %arg0, %c0_i32, %c0_i32_0 : i32, i32, i32
  }
}

</mosaic_0001>

<bundles_post_ra>
// kernel: generator_forward.1
= control target key start
LH: loop header
LB: loop body
LE: loop exit
PB: predicated region body
PF: predicated region fallthrough
CT: control target
= control target key end

     0   :  { %v18804_v16 = vmov 0   ;;  %v177_v27 = vlaneseq  ;;  %v14004_v39 = vmov 1966171168   ;;  %vm1028_vm0 = vsmask.f32 3328  ;;  %s18794_s1 = inlined_call_operand.vmem [shape: bf16[1152,128], index: 1, kind: input, shape index: {}]   ;;  %s18795_s0 = inlined_call_operand.vmem [shape: bf16[2,4,4,128], index: 0, kind: input, shape index: {}]   ;;  %s18796_s4 = inlined_call_operand.vmem [shape: bf16[1152,128], index: 4, kind: input, shape index: {}]   ;;  %s18797_s2 = inlined_call_operand.vmem [shape: f32[1,128], index: 2, kind: input, shape index: {}]   ;;  %s18798_s3 = inlined_call_operand.vmem [shape: f32[1,128], index: 3, kind: input, shape index: {}]   ;;  %s18799_s7 = inlined_call_operand.vmem [shape: bf16[1152,128], index: 7, kind: input, shape index: {}]   ;;  %s18800_s5 = inlined_call_operand.vmem [shape: f32[1,128], index: 5, kind: input, shape index: {}]   ;;  %s18801_s6 = inlined_call_operand.vmem [shape: f32[1,128], index: 6, kind: input, shape index: {}]   ;;  %s18802_s8 = inlined_call_operand.vmem [shape: f32[1,128], index: 8, kind: input, shape index: {}]   ;;  %s18803_s9 = inlined_call_operand.vmem [shape: bf16[2,256,128], index: 9, kind: output, shape index: {}]  }
   0x1   :  { %v13653_v0 = vld [vmem:[%s18794_s1 + $0x40] sm:$0xff]   ;;  %v13657_v4 = vld [vmem:[%s18794_s1 + $0x48] sm:$0xff]   ;;  %v13661_v8 = vld [vmem:[%s18794_s1 + $0x50] sm:$0xff]   ;;  %v14105_v17 = vcombine.low %v18804_v16, %v18804_v16  ;;  %v14135_v29 = vcombine.high %v18804_v16, %v18804_v16  ;;  %v708_v40 = vunpack.c.l.s4 %v14004_v39  ;;  %vm1029_vm1 = vsmask.f32 7440 }
   0x2   :  { %v13654_v1 = vld [vmem:[%s18794_s1] sm:$0xff]   ;;  %12275 = vmatprep.subr.bf16.mxu0 %v13653_v0  ;;  %v13658_v5 = vld [vmem:[%s18794_s1 + $0x8] sm:$0xff]   ;;  %v13662_v9 = vld [vmem:[%s18794_s1 + $0x10] sm:$0xff]   ;;  %v178_v35 = vshrl.u32 %v177_v27, 7  ;;  %vm1157_vm3 = vcmask 1042432   ;;  %vm1158_vm4 = vcmask 1046532  }
   0x3   :  { %v13655_v2 = vld [vmem:[%s18794_s1 + $0xc0] sm:$0xff]   ;;  %12276 = vmatpush3.bf16.msra.mxu0 %v13654_v1  ;;  %v13659_v6 = vld [vmem:[%s18794_s1 + $0xc8] sm:$0xff]   ;;  %v13663_v10 = vld [vmem:[%s18794_s1 + $0xd0] sm:$0xff]   ;;  %v1032_v22 = vshrl.u32 %v14105_v17, 16  ;;  %v1035_v24 = vshll.u32 %v14105_v17, 16  ;;  %v1041_v37 = vshll.u32 %v14135_v29, 16  ;;  %v709_v48 = vunpack.c.0.s8 %v708_v40 }
   0x4   :  { %v13656_v3 = vld [vmem:[%s18794_s1 + $0x80] sm:$0xff]   ;;  %12339 = vmatprep.subr.bf16.mxu1 %v13655_v2  ;;  %12277 = vmatprep.subr.bf16.mxu0 %v13657_v4  ;;  %v13660_v7 = vld [vmem:[%s18794_s1 + $0x88] sm:$0xff]   ;;  %v13664_v11 = vld [vmem:[%s18794_s1 + $0x90] sm:$0xff]   ;;  %v14159_v44 = vsub.s32 0, %v178_v35  ;;  %v11608_v50 = vrot.slane %v14105_v17, 9  ;;  %v1162_v55 = vrot.slane %v14135_v29, 5 }
   0x5   :  { %12340 = vmatpush3.bf16.msra.mxu1 %v13656_v3  ;;  %v13665_v12 = vld [vmem:[%s18794_s1 + $0x58] sm:$0xff]   ;;  %v13669_v18 = vld [vmem:[%s18794_s1 + $0x60] sm:$0xff]   ;;  %v13673_v23 = vld [vmem:[%s18794_s1 + $0x68] sm:$0xff]   ;;  %v1034_v30 = vrot.slane %v1032_v22, 4  ;;  %v1037_v32 = vrot.slane %v1035_v24, 5  ;;  %v1043_v46 = vrot.slane %v1041_v37, 5  ;;  %v14177_v61 = vsub.s32 %v709_v48, %v178_v35 }
   0x6   :  { %12341 = vmatprep.subr.bf16.mxu1 %v13659_v6  ;;  %v13666_v13 = vld [vmem:[%s18794_s1 + $0x18] sm:$0xff]   ;;  %v13670_v19 = vld [vmem:[%s18794_s1 + $0x20] sm:$0xff]   ;;  %v13674_v25 = vld [vmem:[%s18794_s1 + $0x28] sm:$0xff]   ;;  %vm961_vm5 = vcmask 1040384   ;;  %vm962_vm6 = vsmask.f32 256 }
   0x7   :  { %12278 = vmatpush3.bf16.msra.mxu0 %v13658_v5  ;;  %v13667_v14 = vld [vmem:[%s18794_s1 + $0xd8] sm:$0xff]   ;;  %v13671_v20 = vld [vmem:[%s18794_s1 + $0xe0] sm:$0xff]   ;;  %v13675_v26 = vld [vmem:[%s18794_s1 + $0xe8] sm:$0xff]   ;;  %v1038_v41 = vor.u32 %v1037_v32, %v1034_v30  ;;  %vm972_vm7 = vcmask 1044480   ;;  %vm973_vm8 = vsmask.f32 4352 }
   0x8   :  { %12279 = vmatprep.subr.bf16.mxu0 %v13661_v8  ;;  %v13668_v15 = vld [vmem:[%s18794_s1 + $0x98] sm:$0xff]   ;;  %v13672_v21 = vld [vmem:[%s18794_s1 + $0xa0] sm:$0xff]   ;;  %v13676_v28 = vld [vmem:[%s18794_s1 + $0xa8] sm:$0xff]  }
   0x9   :  { %12342 = vmatpush3.bf16.msra.mxu1 %v13660_v7  ;;  %v13677_v31 = vld [vmem:[%s18794_s1 + $0x70] sm:$0xff]   ;;  %v13681_v38 = vld [vmem:[%s18794_s1 + $0x78] sm:$0xff]   ;;  %v11566_v47 = vld.sshfl [vmem:[%s18795_s0] sm:$0x11 pattern:$0x75316420] }
   0xa   :  { %12343 = vmatprep.subr.bf16.mxu1 %v13663_v10  ;;  %v13678_v33 = vld [vmem:[%s18794_s1 + $0x30] sm:$0xff]   ;;  %v13682_v42 = vld [vmem:[%s18794_s1 + $0x38] sm:$0xff]   ;;  %v1039_v49 = vrot.slane %v1038_v41, 4  ;;  %v56_v51 = vcombine.high %v11566_v47, %v11566_v47  ;;  %v114_v52 = vunpack.i.h.s16 %v11566_v47  ;;  %v11574_v53 = vpack.i.b16 %v11566_v47, %v11566_v47  ;;  %v13685_v54 = vld [vmem:[%s18794_s1 + $0x140] sm:$0xff]  }
   0xb   :  { %12280 = vmatpush3.bf16.msra.mxu0 %v13662_v9  ;;  %v13679_v34 = vld [vmem:[%s18794_s1 + $0xf0] sm:$0xff]   ;;  %v13683_v43 = vld [vmem:[%s18794_s1 + $0xf8] sm:$0xff]   ;;  %vm14173_vm2 = vmor %vm1028_vm0, %vm1029_vm1 }
   0xc   :  { %12281 = vmatprep.subr.bf16.mxu0 %v13665_v12  ;;  %v13680_v36 = vld [vmem:[%s18794_s1 + $0xb0] sm:$0xff]   ;;  %v13684_v45 = vld [vmem:[%s18794_s1 + $0xb8] sm:$0xff]   ;;  %v116_v56 = vunpack.i.h.s16 %v56_v51  ;;  %v146_v57 = vpack.i.b16 %v114_v52, %v114_v52  ;;  %v11575_v58 = vpack.i.b16 %v56_v51, %v56_v51  ;;  %v180_v59 = vrot.slane %v11574_v53, %v14159_v44  ;;  %v11567_v62 = vld.sshfl [vmem:[%s18795_s0 + $0x2] sm:$0x11 pattern:$0x75316420] }
   0xd   :  { %12344 = vmatpush3.bf16.msra.mxu1 %v13664_v11  ;;  %v14186_v3 = vsel %vm14173_vm2, %v1039_v49, %v1043_v46  ;;  %v64_v4 = vcombine.high %v11567_v62, %v11567_v62  ;;  %v118_v5 = vunpack.i.h.s16 %v11567_v62  ;;  %v11576_v6 = vpack.i.b16 %v11567_v62, %v11567_v62  ;;  %v11568_v11 = vld.sshfl [vmem:[%s18795_s0 + $0x4] sm:$0x11 pattern:$0x75316420]  ;;  %vm14224_vm9 = vmor %vm1157_vm3, %vm1158_vm4 }
   0xe   :  { %12345 = vmatprep.subr.bf16.mxu1 %v13667_v14  ;;  %v148_v63 = vpack.i.b16 %v116_v56, %v116_v56  ;;  %v184_v0 = vrot.slane %v146_v57, %v14159_v44  ;;  %v188_v1 = vrot.slane %v11575_v58, %v14159_v44  ;;  %v306_v2 = vpack.i.b16 %v180_v59, %v180_v59  ;;  %v11569_v35 = vld.sshfl [vmem:[%s18795_s0 + $0x6] sm:$0x11 pattern:$0x75316420]  ;;  %vm14233_vm10 = vmand %vm961_vm5, %vm962_vm6 }
   0xf   :  { %12282 = vmatpush3.bf16.msra.mxu0 %v13666_v13  ;;  %v120_v12 = vunpack.i.h.s16 %v64_v4  ;;  %v150_v13 = vpack.i.b16 %v118_v5, %v118_v5  ;;  %v11577_v14 = vpack.i.b16 %v64_v4, %v64_v4  ;;  %v13695_v49 = vld [vmem:[%s18794_s1 + $0x1c0] sm:$0xff]   ;;  %vm14248_vm11 = vmand %vm972_vm7, %vm973_vm8 }
  0x10   :  { %12283 = vmatprep.subr.bf16.mxu0 %v13669_v18  ;;  %v192_v7 = vrot.slane %v148_v63, %v14159_v44  ;;  %v311_v8 = vrot.slane %v306_v2, %v14159_v44  ;;  %v313_v9 = vpack.i.b16 %v184_v0, %v184_v0  ;;  %v320_v10 = vpack.i.b16 %v188_v1, %v188_v1 }
  0x11   :  { %12346 = vmatpush3.bf16.msra.mxu1 %v13668_v15  ;;  %v196_v15 = vrot.slane %v11576_v6, %v14159_v44  ;;  %v152_v22 = vpack.i.b16 %v120_v12, %v120_v12  ;;  %v204_v24 = vrot.slane %v11577_v14, %v14159_v44  ;;  %v126_v1 = vunpack.i.h.s16 %v11569_v35 }
  0x12   :  { %12347 = vmatprep.subr.bf16.mxu1 %v13671_v20  ;;  %v318_v18 = vrot.slane %v313_v9, %v14159_v44  ;;  %v327_v20 = vpack.i.b16 %v192_v7, %v192_v7 }
  0x13   :  { %12284 = vmatpush3.bf16.msra.mxu0 %v13670_v19  ;;  %v325_v19 = vrot.slane %v320_v10, %v14159_v44  ;;  %v11580_v10 = vpack.i.b16 %v11569_v35, %v11569_v35 }
  0x14   :  { %12285 = vmatprep.subr.bf16.mxu0 %v13673_v23  ;;  %v200_v23 = vrot.slane %v150_v13, %v14159_v44  ;;  %v705_v27 = vcombine.low %v311_v8, %v318_v18 }
  0x15   :  { %12348 = vmatpush3.bf16.msra.mxu1 %v13672_v21  ;;  %v72_v21 = vcombine.high %v11568_v11, %v11568_v11 }
  0x16   :  { %12349 = vmatprep.subr.bf16.mxu1 %v13675_v26  ;;  %v332_v26 = vrot.slane %v327_v20, %v14159_v44  ;;  %v713_v37 = vrot.slane %v705_v27, %v14177_v61 }
  0x17   :  { %12286 = vmatpush3.bf16.msra.mxu0 %v13674_v25  ;;  %v334_v25 = vpack.i.b16 %v196_v15, %v196_v15  ;;  %v124_v30 = vunpack.i.h.s16 %v72_v21 }
  0x18   :  { %12287 = vmatprep.subr.bf16.mxu0 %v13677_v31  ;;  %v208_v31 = vrot.slane %v152_v22, %v14159_v44 }
  0x19   :  { %12350 = vmatpush3.bf16.msra.mxu1 %v13676_v28  ;;  %v122_v28 = vunpack.i.h.s16 %v11568_v11  ;;  %v339_v32 = vrot.slane %v334_v25, %v14159_v44  ;;  %v156_v46 = vpack.i.b16 %v124_v30, %v124_v30  ;;  %v228_v25 = vrot.slane %v11580_v10, %v14159_v44 }
  0x1a   :  { %12351 = vmatprep.subr.bf16.mxu1 %v13679_v34  ;;  %v348_v34 = vpack.i.b16 %v204_v24, %v204_v24 }
  0x1b   :  { %12288 = vmatpush3.bf16.msra.mxu0 %v13678_v33  ;;  %v341_v33 = vpack.i.b16 %v200_v23, %v200_v23  ;;  %v154_v39 = vpack.i.b16 %v122_v28, %v122_v28  ;;  %v224_v57 = vrot.slane %v156_v46, %v14159_v44 }
  0x1c   :  { %12289 = vmatprep.subr.bf16.mxu0 %v13681_v38  ;;  %v11578_v38 = vpack.i.b16 %v11568_v11, %v11568_v11  ;;  %v353_v41 = vrot.slane %v348_v34, %v14159_v44 }
  0x1d   :  { %12352 = vmatpush3.bf16.msra.mxu1 %v13680_v36  ;;  %v706_v36 = vcombine.low %v325_v19, %v332_v26  ;;  %v346_v40 = vrot.slane %v341_v33, %v14159_v44  ;;  %v216_v48 = vrot.slane %v154_v39, %v14159_v44  ;;  %v383_v6 = vpack.i.b16 %v224_v57, %v224_v57 }
  0x1e   :  { %12353 = vmatprep.subr.bf16.mxu1 %v13683_v43  ;;  %v11579_v43 = vpack.i.b16 %v72_v21, %v72_v21  ;;  %v212_v47 = vrot.slane %v11578_v38, %v14159_v44  ;;  %v158_v19 = vpack.i.b16 %v126_v1, %v126_v1  ;;  %v18962_v26 = vmov 0 }
  0x1f   :  { %12290 = vmatpush3.bf16.msra.mxu0 %v13682_v42  ;;  %v355_v42 = vpack.i.b16 %v208_v31, %v208_v31  ;;  %v729_v52 = vcombine.low %v339_v32, %v346_v40  ;;  %v369_v59 = vpack.i.b16 %v216_v48, %v216_v48  ;;  %v388_v14 = vrot.slane %v383_v6, %v14159_v44  ;;  %v14244_v32 = vld.sshfl [vmem:[%s18795_s0 + $0x8] sm:$0x11 pattern:$0x75316420] }
  0x20   :  { %12403 = vmatprep.subr.bf16.mxu0 %v13685_v54  ;;  %v220_v53 = vrot.slane %v11579_v43, %v14159_v44  ;;  %v80_v54 = vcombine.high %v11569_v35, %v11569_v35  ;;  %v362_v58 = vpack.i.b16 %v212_v47, %v212_v47  ;;  %v18963_v26 = vsel %vm14233_vm10, 4294967295, %v18962_v26 }
  0x21   :  { %12354 = vmatpush3.bf16.msra.mxu1 %v13684_v45  ;;  %v720_v45 = vrot.slane %v706_v36, %v14177_v61  ;;  %v360_v51 = vrot.slane %v355_v42, %v14159_v44  ;;  %v737_v63 = vrot.slane %v729_v52, %v14177_v61  ;;  %v374_v5 = vrot.slane %v369_v59, %v14159_v44 }
  0x22   :  { %12467 = vmatprep.subr.bf16.mxu1 %v13695_v49  ;;  %v376_v0 = vpack.i.b16 %v220_v53, %v220_v53  ;;  %v367_v4 = vrot.slane %v362_v58, %v14159_v44  ;;  %v128_v9 = vunpack.i.h.s16 %v80_v54  ;;  %v11581_v20 = vpack.i.b16 %v80_v54, %v80_v54  ;;  %18964 = vst [vmem:[#allocation2_spill] sm:$0xff] %v18963_v26 }
  0x23   :  { %v721_v56 = vcombine.low %v713_v37, %v720_v45  ;;  %v730_v62 = vcombine.low %v353_v41, %v360_v51  ;;  %v232_v28 = vrot.slane %v158_v19, %v14159_v44  ;;  %v14258_v35 = vsel %vm14224_vm9, %v11608_v50, %v1162_v55 }
  0x24   :  { %v381_v8 = vrot.slane %v376_v0, %v14159_v44  ;;  %v753_v15 = vcombine.low %v367_v4, %v374_v5  ;;  %v160_v21 = vpack.i.b16 %v128_v9, %v128_v9  ;;  %v236_v30 = vrot.slane %v11581_v20, %v14159_v44  ;;  %v13697_v20 = vld [vmem:[%s18794_s1 + $0x1c8] sm:$0xff]  }
  0x25   :  { %v728_v2 = vrot.slane %v721_v56, %v14177_v61  ;;  %v744_v7 = vrot.slane %v730_v62, %v14177_v61  ;;  %v390_v37 = vpack.i.b16 %v228_v25, %v228_v25  ;;  %v397_v40 = vpack.i.b16 %v232_v28, %v232_v28 }
  0x26   :  { %v754_v23 = vcombine.low %v381_v8, %v388_v14  ;;  %v761_v24 = vrot.slane %v753_v15, %v14177_v61  ;;  %v240_v31 = vrot.slane %v160_v21, %v14159_v44  ;;  %v404_v41 = vpack.i.b16 %v236_v30, %v236_v30 }
  0x27   :  { %v898_v11 = vshrl.u32 %v728_v2, 16  ;;  %v901_v12 = vshll.u32 %v728_v2, 16  ;;  %v745_v18 = vcombine.low %v737_v63, %v744_v7  ;;  %v395_v45 = vrot.slane %v390_v37, %v14159_v44 }
  0x28   :  { %v768_v36 = vrot.slane %v754_v23, %v14177_v61  ;;  %v411_v29 = vpack.i.b16 %v240_v31, %v240_v31  ;;  %v402_v50 = vrot.slane %v397_v40, %v14159_v44  ;;  %v14269_v55 = vcombine.high %v14244_v32, %v14244_v32  ;;  %v13686_v31 = vld [vmem:[%s18794_s1 + $0x100] sm:$0xff]  }
  0x29   :  { %v900_v22 = vrot.slane %v898_v11, 7  ;;  %v752_v27 = vrot.slane %v745_v18, %v14177_v61  ;;  %v409_v51 = vrot.slane %v404_v41, %v14159_v44  ;;  %v130_v2 = vunpack.i.h.s16 %v14244_v32 }
  0x2a   :  { %v769_v43 = vcombine.low %v761_v24, %v768_v36  ;;  %v416_v54 = vrot.slane %v411_v29, %v14159_v44  ;;  %v777_v56 = vcombine.low %v395_v45, %v402_v50  ;;  %v13701_v45 = vld [vmem:[%s18794_s1 + $0x1d0] sm:$0xff]  }
  0x2b   :  { %v903_v33 = vor.u32 %v901_v12, %v900_v22  ;;  %v905_v38 = vshrl.u32 %v752_v27, 16  ;;  %v908_v39 = vshll.u32 %v752_v27, 16  ;;  %v13696_v12 = vld [vmem:[%s18794_s1 + $0x180] sm:$0xff]  }
  0x2c   :  { %v776_v49 = vrot.slane %v769_v43, %v14177_v61  ;;  %v778_v19 = vcombine.low %v409_v51, %v416_v54  ;;  %v785_v30 = vrot.slane %v777_v56, %v14177_v61  ;;  %v132_v43 = vunpack.i.h.s16 %v14269_v55  ;;  %v13688_v56 = vld [vmem:[%s18794_s1 + $0x108] sm:$0xff]  }
  0x2d   :  { %v964_v42 = vsel %vm14233_vm10, 0, %v903_v33  ;;  %v907_v46 = vrot.slane %v905_v38, 7  ;;  %v162_v54 = vpack.i.b16 %v130_v2, %v130_v2  ;;  %v13703_v2 = vld [vmem:[%s18794_s1 + $0x1d8] sm:$0xff]  }
  0x2e   :  { %v975_v17 = vsel %vm14248_vm11, %v964_v42, 0  ;;  %v912_v1 = vshrl.u32 %v776_v49, 16  ;;  %v915_v7 = vshll.u32 %v776_v49, 16  ;;  %v792_v38 = vrot.slane %v778_v19, %v14177_v61 }
  0x2f   :  { %v11592_v47 = vcombine.low %v975_v17, %v975_v17  ;;  %v11593_v48 = vcombine.high %v975_v17, %v975_v17  ;;  %v14274_v52 = vcombine.low %v18804_v16, %v975_v17  ;;  %v910_v53 = vor.u32 %v908_v39, %v907_v46  ;;  %v13699_v39 = vld [vmem:[%s18794_s1 + $0x188] sm:$0xff]  }
  0x30   :  { %v914_v18 = vrot.slane %v912_v1, 7  ;;  %v793_v51 = vcombine.low %v785_v30, %v792_v38 }
  0x31   :  { %v1046_v57 = vshrl.u32 %v11592_v47, 16  ;;  %v1049_v58 = vshll.u32 %v11592_v47, 16  ;;  %v1055_v59 = vshll.u32 %v11593_v48, 16  ;;  %1875 = vmatprep.mubr.bf16.mxu1 %v11592_v47  ;;  %v11609_v62 = vrot.slane %v11592_v47, 9 }
  0x32   :  { %v1166_v63 = vrot.slane %v11593_v48, 5  ;;  %v965_v0 = vsel %vm14233_vm10, 0, %v910_v53  ;;  %v917_v28 = vor.u32 %v915_v7, %v914_v18  ;;  %v13687_v48 = vld [vmem:[%s18794_s1 + $0x148] sm:$0xff]   ;;  %v11582_v53 = vpack.i.b16 %v14244_v32, %v14244_v32  ;;  %v13702_v32 = vld [vmem:[%s18794_s1 + $0x190] sm:$0xff]  }
  0x33   :  { %v1048_v4 = vrot.slane %v1046_v57, 4  ;;  %v1051_v5 = vrot.slane %v1049_v58, 5  ;;  %v976_v6 = vsel %vm14248_vm11, %v965_v0, 0  ;;  %v1057_v8 = vrot.slane %v1055_v59, 5  ;;  %v13689_v7 = vld [vmem:[%s18794_s1 + $0x150] sm:$0xff]  }
  0x34   :  { %v14284_v9 = vsel %vm14224_vm9, %v11609_v62, %v1166_v63  ;;  %v11594_v10 = vcombine.low %v976_v6, %v976_v6  ;;  %v11595_v11 = vcombine.high %v976_v6, %v976_v6  ;;  %v966_v42 = vsel %vm14233_vm10, 0, %v917_v28 }
  0x35   :  { %v1052_v14 = vor.u32 %v1051_v5, %v1048_v4  ;;  %v11633_v15 = vcombine.low %v14258_v35, %v14284_v9  ;;  %v14318_v50 = vcombine.low %v975_v17, %v976_v6  ;;  %v14329_v49 = vsel %vm14248_vm11, %v966_v42, 0 }
  0x36   :  { %v1060_v21 = vshrl.u32 %v11594_v10, 16  ;;  %v1063_v22 = vshll.u32 %v11594_v10, 16  ;;  %v1069_v23 = vshll.u32 %v11595_v11, 16  ;;  %v11610_v24 = vrot.slane %v11594_v10, 9 }
  0x37   :  { %v1053_v25 = vrot.slane %v1052_v14, 4  ;;  %1876 = vmatmul.mubr.bf16.vlgmr.msra.gmra.mrb[0].mxu1 %v11633_v15  ;;  %v1170_v27 = vrot.slane %v11595_v11, 5  ;;  %v11596_v57 = vcombine.low %v14329_v49, %v14329_v49  ;;  %v11597_v58 = vcombine.high %v14329_v49, %v14329_v49  ;;  %v13705_v14 = vld [vmem:[%s18794_s1 + $0x198] sm:$0xff]  }
  0x38   :  { %v1062_v33 = vrot.slane %v1060_v21, 4  ;;  %v1065_v36 = vrot.slane %v1063_v22, 5  ;;  %v1071_v37 = vrot.slane %v1069_v23, 5  ;;  %1883 = vmatprep.mubr.bf16.mxu1 %v11594_v10  ;;  %12468 = vmatpush3.bf16.msra.mxu1 %v13696_v12  ;;  %v14341_v59 = vcombine.low %v976_v6, %v14329_v49 }
  0x39   :  { %v14304_v40 = vsel %vm14173_vm2, %v1053_v25, %v1057_v8  ;;  %v14308_v41 = vsel %vm14224_vm9, %v11610_v24, %v1170_v27  ;;  %12469 = vmatprep.subr.bf16.mxu1 %v13697_v20  ;;  %v800_v62 = vrot.slane %v793_v51, %v14177_v61  ;;  %v11583_v63 = vpack.i.b16 %v14269_v55, %v14269_v55  ;;  %v14364_v55 = vld.sshfl [vmem:[%s18795_s0 + $0xa] sm:$0x11 pattern:$0x75316420]  ;;  %v13690_v20 = vld [vmem:[%s18794_s1 + $0x110] sm:$0xff]   ;;  %v13707_v27 = vld [vmem:[%s18794_s1 + $0x1e0] sm:$0xff]  }
  0x3a   :  { %v11625_v29 = vcombine.low %v14186_v3, %v14304_v40  ;;  %v1066_v46 = vor.u32 %v1065_v36, %v1062_v33  ;;  %v14322_v47 = vcombine.low %v14284_v9, %v14308_v41  ;;  %v164_v0 = vpack.i.b16 %v132_v43, %v132_v43 }
  0x3b   :  { %v244_v1 = vrot.slane %v11582_v53, %v14159_v44  ;;  %v1074_v5 = vshrl.u32 %v11596_v57, 16  ;;  %v1077_v6 = vshll.u32 %v11596_v57, 16  ;;  %v11611_v10 = vrot.slane %v11596_v57, 9  ;;  %v13692_v53 = vld [vmem:[%s18794_s1 + $0x118] sm:$0xff]  }
  0x3c   :  { %1778 = vmatprep.mubr.bf16.mxu0 %v11625_v29  ;;  %v1067_v17 = vrot.slane %v1066_v46, 4  ;;  %12470 = vmatpush3.bf16.msra.mxu1 %v13699_v39  ;;  %v1174_v11 = vrot.slane %v11597_v58, 5  ;;  %v919_v12 = vshrl.u32 %v800_v62, 16  ;;  %v922_v21 = vshll.u32 %v800_v62, 16 }
  0x3d   :  { %1779 = vmatmul.mubr.bf16.vlgmr.msra.gmra.mrb[0].mxu0 %v14274_v52  ;;  %v1083_v52 = vshll.u32 %v11597_v58, 16  ;;  %12471 = vmatprep.subr.bf16.mxu1 %v13701_v45  ;;  %v1076_v15 = vrot.slane %v1074_v5, 4  ;;  %v1079_v18 = vrot.slane %v1077_v6, 5  ;;  %v248_v24 = vrot.slane %v162_v54, %v14159_v44  ;;  %v13693_v6 = vld [vmem:[%s18794_s1 + $0x160] sm:$0xff]  }
  0x3e   :  { %12404 = vmatpush3.bf16.msra.mxu0 %v13686_v31  ;;  %v14356_v4 = vsel %vm14173_vm2, %v1067_v17, %v1071_v37  ;;  %v14380_v22 = vsel %vm14224_vm9, %v11611_v10, %v1174_v11  ;;  %v921_v23 = vrot.slane %v919_v12, 7  ;;  %v252_v25 = vrot.slane %v11583_v63, %v14159_v44  ;;  %v13691_v37 = vld [vmem:[%s18794_s1 + $0x158] sm:$0xff]   ;;  %v14427_v63 = vld.sshfl [vmem:[%s18795_s0 + $0xc] sm:$0x11 pattern:$0x75316420] }
  0x3f   :  { %v14368_v8 = vcombine.low %v14304_v40, %v14356_v4  ;;  %12405 = vmatprep.subr.bf16.mxu0 %v13687_v48  ;;  %1884 = vmatmul.mubr.bf16.gmra.mrb[4].mxu1 %v14322_v47  ;;  %v1085_v19 = vrot.slane %v1083_v52, 5  ;;  %v1080_v28 = vor.u32 %v1079_v18, %v1076_v15  ;;  %v14389_v30 = vcombine.low %v14308_v41, %v14380_v22  ;;  %v13708_v48 = vld [vmem:[%s18794_s1 + $0x1a0] sm:$0xff]   ;;  %v13711_v12 = vld [vmem:[%s18794_s1 + $0x1a8] sm:$0xff]  }
  0x40   :  { %1891 = vmatprep.mubr.bf16.mxu1 %v11596_v57  ;;  %12472 = vmatpush3.bf16.msra.mxu1 %v13702_v32  ;;  %v256_v31 = vrot.slane %v164_v0, %v14159_v44  ;;  %v418_v33 = vpack.i.b16 %v244_v1, %v244_v1  ;;  %v924_v36 = vor.u32 %v922_v21, %v921_v23  ;;  %v134_v46 = vunpack.i.h.s16 %v14364_v55  ;;  %v13709_v0 = vld [vmem:[%s18794_s1 + $0x1e8] sm:$0xff]   ;;  %v13694_v23 = vld [vmem:[%s18794_s1 + $0x120] sm:$0xff]  }
  0x41   :  { %1786 = vmatprep.mubr.bf16.mxu0 %v14368_v8  ;;  %12473 = vmatprep.subr.bf16.mxu1 %v13703_v2  ;;  %v425_v38 = vpack.i.b16 %v248_v24, %v248_v24  ;;  %v432_v39 = vpack.i.b16 %v252_v25, %v252_v25  ;;  %v14397_v42 = vcombine.high %v14364_v55, %v14364_v55  ;;  %v1081_v43 = vrot.slane %v1080_v28, 4 }
  0x42   :  { %12406 = vmatpush3.bf16.msra.mxu0 %v13688_v56  ;;  %v423_v45 = vrot.slane %v418_v33, %v14159_v44  ;;  %v439_v29 = vpack.i.b16 %v256_v31, %v256_v31  ;;  %v967_v51 = vsel %vm14233_vm10, 0, %v924_v36  ;;  %v11584_v62 = vpack.i.b16 %v14364_v55, %v14364_v55  ;;  %v13698_v33 = vld [vmem:[%s18794_s1 + $0x168] sm:$0xff]  }
  0x43   :  { %12407 = vmatprep.subr.bf16.mxu0 %v13689_v7  ;;  %v430_v54 = vrot.slane %v425_v38, %v14159_v44  ;;  %v437_v17 = vrot.slane %v432_v39, %v14159_v44  ;;  %v136_v56 = vunpack.i.h.s16 %v14397_v42  ;;  %v14415_v57 = vsel %vm14173_vm2, %v1081_v43, %v1085_v19 }
  0x44   :  { %12474 = vmatpush3.bf16.msra.mxu1 %v13705_v14  ;;  %v14419_v58 = vsel %vm14248_vm11, %v967_v51, 0  ;;  %v444_v32 = vrot.slane %v439_v29, %v14159_v44  ;;  %v14434_v1 = vcombine.low %v14356_v4, %v14415_v57  ;;  %v138_v52 = vunpack.i.h.s16 %v14427_v63 }
  0x45   :  { %1787 = vmatmul.mubr.bf16.gmra.mrb[4].mxu0 %v14318_v50  ;;  %12475 = vmatprep.subr.bf16.mxu1 %v13707_v27  ;;  %v11598_v2 = vcombine.low %v14419_v58, %v14419_v58  ;;  %v11599_v5 = vcombine.high %v14419_v58, %v14419_v58  ;;  %v14447_v7 = vcombine.low %v14329_v49, %v14419_v58 }
  0x46   :  { %12408 = vmatpush3.bf16.msra.mxu0 %v13690_v20  ;;  %v801_v55 = vcombine.low %v423_v45, %v430_v54  ;;  %v802_v10 = vcombine.low %v437_v17, %v444_v32  ;;  %v166_v11 = vpack.i.b16 %v134_v46, %v134_v46  ;;  %1794 = vmatprep.mubr.bf16.mxu0 %v14434_v1  ;;  %v13700_v17 = vld [vmem:[%s18794_s1 + $0x128] sm:$0xff]   ;;  %v13715_v32 = vld [vmem:[%s18794_s1 + $0x1f8] sm:$0xff]  }
  0x47   :  { %1892 = vmatmul.mubr.bf16.gmra.mrb[8].mxu1 %v14389_v30  ;;  %12409 = vmatprep.subr.bf16.mxu0 %v13691_v37  ;;  %v1088_v14 = vshrl.u32 %v11598_v2, 16  ;;  %v1091_v15 = vshll.u32 %v11598_v2, 16  ;;  %v1097_v18 = vshll.u32 %v11599_v5, 16  ;;  %v11612_v19 = vrot.slane %v11598_v2, 9 }
  0x48   :  { %12476 = vmatpush3.bf16.msra.mxu1 %v13708_v48  ;;  %1899 = vmatprep.mubr.bf16.mxu1 %v11598_v2  ;;  %v1178_v20 = vrot.slane %v11599_v5, 5  ;;  %v809_v49 = vrot.slane %v801_v55, %v14177_v61  ;;  %v816_v21 = vrot.slane %v802_v10, %v14177_v61  ;;  %v11585_v24 = vpack.i.b16 %v14397_v42, %v14397_v42  ;;  %v13713_v42 = vld [vmem:[%s18794_s1 + $0x1f0] sm:$0xff]  }
  0x49   :  { %12477 = vmatprep.subr.bf16.mxu1 %v13709_v0  ;;  %v1090_v25 = vrot.slane %v1088_v14, 4  ;;  %v1093_v27 = vrot.slane %v1091_v15, 5  ;;  %v1099_v28 = vrot.slane %v1097_v18, 5  ;;  %v168_v31 = vpack.i.b16 %v136_v56, %v136_v56  ;;  %v13714_v48 = vld [vmem:[%s18794_s1 + $0x1b0] sm:$0xff]  }
  0x4a   :  { %12410 = vmatpush3.bf16.msra.mxu0 %v13692_v53  ;;  %v14465_v36 = vsel %vm14224_vm9, %v11612_v19, %v1178_v20  ;;  %v817_v37 = vcombine.low %v809_v49, %v816_v21  ;;  %v260_v38 = vrot.slane %v11584_v62, %v14159_v44  ;;  %v264_v39 = vrot.slane %v166_v11, %v14159_v44  ;;  %v14508_v20 = vld.sshfl [vmem:[%s18795_s0 + $0xe] sm:$0x11 pattern:$0x75316420] }
  0x4b   :  { %12411 = vmatprep.subr.bf16.mxu0 %v13693_v6  ;;  %v1094_v43 = vor.u32 %v1093_v27, %v1090_v25  ;;  %v14475_v45 = vcombine.low %v14380_v22, %v14465_v36  ;;  %v268_v29 = vrot.slane %v11585_v24, %v14159_v44  ;;  %v272_v46 = vrot.slane %v168_v31, %v14159_v44  ;;  %v13704_v6 = vld [vmem:[%s18794_s1 + $0x170] sm:$0xff]   ;;  %v13716_v27 = vld [vmem:[%s18794_s1 + $0x1b8] sm:$0xff]  }
  0x4c   :  { %12478 = vmatpush3.bf16.msra.mxu1 %v13711_v12  ;;  %v824_v51 = vrot.slane %v817_v37, %v14177_v61  ;;  %v446_v53 = vpack.i.b16 %v260_v38, %v260_v38  ;;  %v453_v54 = vpack.i.b16 %v264_v39, %v264_v39  ;;  %v104_v56 = vcombine.high %v14427_v63, %v14427_v63  ;;  %v13706_v25 = vld [vmem:[%s18794_s1 + $0x130] sm:$0xff]  }
  0x4d   :  { %1795 = vmatmul.mubr.bf16.gmra.mrb[8].mxu0 %v14341_v59  ;;  %v1095_v62 = vrot.slane %v1094_v43, 4  ;;  %v460_v0 = vpack.i.b16 %v268_v29, %v268_v29  ;;  %v467_v2 = vpack.i.b16 %v272_v46, %v272_v46  ;;  %v11586_v5 = vpack.i.b16 %v14427_v63, %v14427_v63  ;;  %12479 = vmatprep.subr.bf16.mxu1 %v13713_v42  ;;  %v13710_v63 = vld [vmem:[%s18794_s1 + $0x178] sm:$0xff]  }
  0x4e   :  { %12412 = vmatpush3.bf16.msra.mxu0 %v13694_v23  ;;  %v926_v55 = vshrl.u32 %v824_v51, 16  ;;  %v929_v10 = vshll.u32 %v824_v51, 16  ;;  %v451_v11 = vrot.slane %v446_v53, %v14159_v44  ;;  %v458_v12 = vrot.slane %v453_v54, %v14159_v44 }
  0x4f   :  { %1900 = vmatmul.mubr.bf16.gmra.mrb[12].mxu1 %v14475_v45  ;;  %12413 = vmatprep.subr.bf16.mxu0 %v13698_v33  ;;  %v14501_v14 = vsel %vm14173_vm2, %v1095_v62, %v1099_v28  ;;  %v465_v15 = vrot.slane %v460_v0, %v14159_v44  ;;  %v472_v18 = vrot.slane %v467_v2, %v14159_v44  ;;  %v140_v19 = vunpack.i.h.s16 %v104_v56  ;;  %v14549_v2 = vld [vmem:[%s18794_s1 + $0x200] sm:$0xff]  }
  0x50   :  { %12480 = vmatpush3.bf16.msra.mxu1 %v13714_v48  ;;  %v14512_v49 = vcombine.low %v14415_v57, %v14501_v14  ;;  %v928_v21 = vrot.slane %v926_v55, 7  ;;  %v825_v23 = vcombine.low %v451_v11, %v458_v12  ;;  %v170_v24 = vpack.i.b16 %v138_v52, %v138_v52 }
  0x51   :  { %12481 = vmatprep.subr.bf16.mxu1 %v13715_v32  ;;  %v826_v28 = vcombine.low %v465_v15, %v472_v18  ;;  %v11587_v31 = vpack.i.b16 %v104_v56, %v104_v56  ;;  %v172_v33 = vpack.i.b16 %v140_v19, %v140_v19  ;;  %v276_v37 = vrot.slane %v11586_v5, %v14159_v44 }
  0x52   :  { %12414 = vmatpush3.bf16.msra.mxu0 %v13700_v17  ;;  %1802 = vmatprep.mubr.bf16.mxu0 %v14512_v49  ;;  %v931_v52 = vor.u32 %v929_v10, %v928_v21  ;;  %v833_v38 = vrot.slane %v825_v23, %v14177_v61  ;;  %v280_v39 = vrot.slane %v170_v24, %v14159_v44  ;;  %v142_v54 = vunpack.i.h.s16 %v14508_v20  ;;  %v13712_v17 = vld [vmem:[%s18794_s1 + $0x138] sm:$0xff]  }
  0x53   :  { %12415 = vmatprep.subr.bf16.mxu0 %v13704_v6  ;;  %v112_v42 = vcombine.high %v14508_v20, %v14508_v20  ;;  %v840_v43 = vrot.slane %v826_v28, %v14177_v61  ;;  %v284_v29 = vrot.slane %v11587_v31, %v14159_v44  ;;  %v288_v46 = vrot.slane %v172_v33, %v14159_v44 }
  0x54   :  { %v474_v48 = vpack.i.b16 %v276_v37, %v276_v37  ;;  %v968_v51 = vsel %vm14233_vm10, 0, %v931_v52  ;;  %v481_v53 = vpack.i.b16 %v280_v39, %v280_v39  ;;  %12482 = vmatpush3.bf16.msra.mxu1 %v13716_v27  ;;  %v11588_v18 = vpack.i.b16 %v14508_v20, %v14508_v20 }
  0x55   :  { %1803 = vmatmul.mubr.bf16.gmra.mrb[12].mxu0 %v14447_v7  ;;  %v14544_v56 = vsel %vm14248_vm11, %v968_v51, 0  ;;  %v841_v32 = vcombine.low %v833_v38, %v840_v43  ;;  %v488_v62 = vpack.i.b16 %v284_v29, %v284_v29  ;;  %v144_v0 = vunpack.i.h.s16 %v112_v42  ;;  %6379 = vmatprep.subr.bf16.mxu1 %v18804_v16 }
  0x56   :  { %12416 = vmatpush3.bf16.msra.mxu0 %v13706_v25  ;;  %v11600_v5 = vcombine.low %v14544_v56, %v14544_v56  ;;  %v11601_v6 = vcombine.high %v14544_v56, %v14544_v56  ;;  %v479_v55 = vrot.slane %v474_v48, %v14159_v44  ;;  %v486_v10 = vrot.slane %v481_v53, %v14159_v44 }
  0x57   :  { %12417 = vmatprep.subr.bf16.mxu0 %v13710_v63  ;;  %v848_v11 = vrot.slane %v841_v32, %v14177_v61  ;;  %v493_v12 = vrot.slane %v488_v62, %v14159_v44  ;;  %v495_v15 = vpack.i.b16 %v288_v46, %v288_v46  ;;  %v174_v43 = vpack.i.b16 %v142_v54, %v142_v54 }
  0x58   :  { %v1102_v19 = vshrl.u32 %v11600_v5, 16  ;;  %v1105_v21 = vshll.u32 %v11600_v5, 16  ;;  %v1111_v23 = vshll.u32 %v11601_v6, 16  ;;  %1907 = vmatprep.mubr.bf16.mxu1 %v11600_v5  ;;  %v11613_v24 = vrot.slane %v11600_v5, 9 }
  0x59   :  { %v1182_v25 = vrot.slane %v11601_v6, 5  ;;  %v933_v27 = vshrl.u32 %v848_v11, 16  ;;  %v936_v28 = vshll.u32 %v848_v11, 16  ;;  %v500_v31 = vrot.slane %v495_v15, %v14159_v44 }
  0x5a   :  { %12418 = vmatpush3.bf16.msra.mxu0 %v13712_v17  ;;  %v1104_v33 = vrot.slane %v1102_v19, 4  ;;  %v1107_v37 = vrot.slane %v1105_v21, 5  ;;  %v1113_v63 = vrot.slane %v1111_v23, 5  ;;  %v849_v52 = vcombine.low %v479_v55, %v486_v10 }
  0x5b   :  { %12627 = vmatprep.subr.bf16.mxu0 %v14549_v2  ;;  %v14566_v20 = vsel %vm14224_vm9, %v11613_v24, %v1182_v25  ;;  %v935_v38 = vrot.slane %v933_v27, 7  ;;  %v850_v39 = vcombine.low %v493_v12, %v500_v31  ;;  %v11589_v51 = vpack.i.b16 %v112_v42, %v112_v42 }
  0x5c   :  { %v1108_v29 = vor.u32 %v1107_v37, %v1104_v33  ;;  %v11637_v46 = vcombine.low %v14258_v35, %v14566_v20  ;;  %v857_v48 = vrot.slane %v849_v52, %v14177_v61  ;;  %v176_v32 = vpack.i.b16 %v144_v0, %v144_v0 }
  0x5d   :  { %v938_v53 = vor.u32 %v936_v28, %v935_v38  ;;  %v864_v17 = vrot.slane %v850_v39, %v14177_v61  ;;  %v292_v62 = vrot.slane %v11588_v18, %v14159_v44  ;;  %v11621_v6 = vcombine.low %v18804_v16, %v14544_v56 }
  0x5e   :  { %v1109_v5 = vrot.slane %v1108_v29, 4  ;;  %1908 = vmatmul.mubr.bf16.gmra.mrb[16].mxu1 %v11637_v46  ;;  %v296_v54 = vrot.slane %v174_v43, %v14159_v44  ;;  %v300_v55 = vrot.slane %v11589_v51, %v14159_v44  ;;  %v304_v42 = vrot.slane %v176_v32, %v14159_v44 }
  0x5f   :  { %v969_v10 = vsel %vm14233_vm10, 0, %v938_v53  ;;  %v865_v11 = vcombine.low %v857_v48, %v864_v17  ;;  %v502_v12 = vpack.i.b16 %v292_v62, %v292_v62  ;;  %v11641_v60 = vcombine.low %v14304_v40, %v14304_v40 }
  0x60   :  { %v14582_v0 = vsel %vm14173_vm2, %v1109_v5, %v1113_v63  ;;  %v14586_v15 = vsel %vm14248_vm11, %v969_v10, 0  ;;  %v509_v18 = vpack.i.b16 %v296_v54, %v296_v54  ;;  %v516_v19 = vpack.i.b16 %v300_v55, %v300_v55 }
  0x61   :  { %v11629_v21 = vcombine.low %v14186_v3, %v14582_v0  ;;  %v11602_v23 = vcombine.low %v14586_v15, %v14586_v15  ;;  %v11603_v24 = vcombine.high %v14586_v15, %v14586_v15  ;;  %v872_v25 = vrot.slane %v865_v11, %v14177_v61 }
  0x62   :  { %v507_v27 = vrot.slane %v502_v12, %v14159_v44  ;;  %v514_v28 = vrot.slane %v509_v18, %v14159_v44  ;;  %v521_v31 = vrot.slane %v516_v19, %v14159_v44  ;;  %v523_v29 = vpack.i.b16 %v304_v42, %v304_v42 }
  0x63   :  { %1810 = vmatprep.mubr.bf16.mxu0 %v11629_v21  ;;  %v1116_v33 = vshrl.u32 %v11602_v23, 16  ;;  %v1119_v37 = vshll.u32 %v11602_v23, 16  ;;  %v1125_v63 = vshll.u32 %v11603_v24, 16  ;;  %1915 = vmatprep.mubr.bf16.mxu1 %v11602_v23  ;;  %v11614_v52 = vrot.slane %v11602_v23, 9 }
  0x64   :  { %1811 = vmatmul.mubr.bf16.gmra.mrb[16].mxu0 %v11621_v6  ;;  %v1186_v38 = vrot.slane %v11603_v24, 5  ;;  %v940_v39 = vshrl.u32 %v872_v25, 16  ;;  %v943_v43 = vshll.u32 %v872_v25, 16  ;;  %v873_v51 = vcombine.low %v507_v27, %v514_v28 }
  0x65   :  { %v1118_v46 = vrot.slane %v1116_v33, 4  ;;  %v1121_v48 = vrot.slane %v1119_v37, 5  ;;  %v528_v32 = vrot.slane %v523_v29, %v14159_v44  ;;  %v1127_v5 = vrot.slane %v1125_v63, 5 }
  0x66   :  { %v14600_v53 = vsel %vm14224_vm9, %v11614_v52, %v1186_v38  ;;  %v942_v17 = vrot.slane %v940_v39, 7  ;;  %v881_v11 = vrot.slane %v873_v51, %v14177_v61  ;;  %v14618_v19 = vcombine.low %v14544_v56, %v14586_v15 }
  0x67   :  { %v1122_v62 = vor.u32 %v1121_v48, %v1118_v46  ;;  %v14605_v54 = vcombine.low %v14566_v20, %v14600_v53  ;;  %v874_v55 = vcombine.low %v521_v31, %v528_v32  ;;  %v11642_v40 = vcombine.low %v14356_v4, %v14356_v4  ;;  %v13721_v4 = vld [vmem:[%s18794_s1 + $0x220] sm:$0xff]  }
  0x68   :  { %v945_v6 = vor.u32 %v943_v43, %v942_v17 }
  0x69   :  { %v1123_v10 = vrot.slane %v1122_v62, 4  ;;  %1916 = vmatmul.mubr.bf16.gmra.mrb[20].mxu1 %v14605_v54  ;;  %v888_v12 = vrot.slane %v874_v55, %v14177_v61 }
  0x6a   :  { %v970_v42 = vsel %vm14233_vm10, 0, %v945_v6 }
  0x6b   :  { %v14614_v18 = vsel %vm14173_vm2, %v1123_v10, %v1127_v5  ;;  %v981_v21 = vsel %vm14248_vm11, %v970_v42, 0  ;;  %v889_v27 = vcombine.low %v881_v11, %v888_v12 }
  0x6c   :  { %v14624_v23 = vcombine.low %v14582_v0, %v14614_v18  ;;  %v11604_v24 = vcombine.low %v981_v21, %v981_v21  ;;  %v11605_v25 = vcombine.high %v981_v21, %v981_v21  ;;  %v14643_v6 = vcombine.low %v14586_v15, %v981_v21 }
  0x6d   :  { %v896_v63 = vrot.slane %v889_v27, %v14177_v61 }
  0x6e   :  { %1818 = vmatprep.mubr.bf16.mxu0 %v14624_v23  ;;  %v1130_v28 = vshrl.u32 %v11604_v24, 16  ;;  %v1133_v31 = vshll.u32 %v11604_v24, 16  ;;  %v1139_v33 = vshll.u32 %v11605_v25, 16  ;;  %1923 = vmatprep.mubr.bf16.mxu1 %v11604_v24  ;;  %v11615_v37 = vrot.slane %v11604_v24, 9 }
  0x6f   :  { %1819 = vmatmul.mubr.bf16.gmra.mrb[20].mxu0 %v14618_v19  ;;  %v1190_v56 = vrot.slane %v11605_v25, 5  ;;  %v947_v43 = vshrl.u32 %v896_v63, 16  ;;  %v950_v29 = vshll.u32 %v896_v63, 16 }
  0x70   :  { %v1132_v52 = vrot.slane %v1130_v28, 4  ;;  %v1135_v38 = vrot.slane %v1133_v31, 5  ;;  %v1141_v48 = vrot.slane %v1139_v33, 5 }
  0x71   :  { %v14631_v39 = vsel %vm14224_vm9, %v11615_v37, %v1190_v56  ;;  %v949_v17 = vrot.slane %v947_v43, 7 }
  0x72   :  { %v1136_v46 = vor.u32 %v1135_v38, %v1132_v52  ;;  %v14635_v51 = vcombine.low %v14600_v53, %v14631_v39 }
  0x73   :  { %v952_v62 = vor.u32 %v950_v29, %v949_v17  ;;  %v11649_v29 = vcombine.low %v14284_v9, %v14284_v9  ;;  %v13719_v9 = vld [vmem:[%s18794_s1 + $0x210] sm:$0xff]  }
  0x74   :  { %v1137_v32 = vrot.slane %v1136_v46, 4  ;;  %1924 = vmatmul.mubr.bf16.gmra.mrb[24].mxu1 %v14635_v51  ;;  %v13724_v46 = vld [vmem:[%s18794_s1 + $0x238] sm:$0xff]  }
  0x75   :  { %v971_v10 = vsel %vm14233_vm10, 0, %v952_v62 }
  0x76   :  { %v14640_v5 = vsel %vm14173_vm2, %v1137_v32, %v1141_v48  ;;  %v14653_v11 = vsel %vm14248_vm11, %v971_v10, 0 }
  0x77   :  { %v14647_v55 = vcombine.low %v14614_v18, %v14640_v5  ;;  %v11606_v42 = vcombine.low %v14653_v11, %v14653_v11  ;;  %v11607_v15 = vcombine.high %v14653_v11, %v14653_v11  ;;  %v14676_v43 = vcombine.low %v981_v21, %v14653_v11  ;;  %v13718_v21 = vld [vmem:[%s18794_s1 + $0x208] sm:$0xff]  }
  0x79   :  { %1826 = vmatprep.mubr.bf16.mxu0 %v14647_v55  ;;  %v1144_v12 = vshrl.u32 %v11606_v42, 16  ;;  %v1147_v24 = vshll.u32 %v11606_v42, 16  ;;  %v1153_v25 = vshll.u32 %v11607_v15, 16  ;;  %1931 = vmatprep.mubr.bf16.mxu1 %v11606_v42  ;;  %v11616_v27 = vrot.slane %v11606_v42, 9 }
  0x7a   :  { %1827 = vmatmul.mubr.bf16.gmra.mrb[24].mxu0 %v14643_v6  ;;  %v1194_v28 = vrot.slane %v11607_v15, 5 }
  0x7b   :  { %v1146_v31 = vrot.slane %v1144_v12, 4  ;;  %v1149_v34 = vrot.slane %v1147_v24, 5  ;;  %v1155_v56 = vrot.slane %v1153_v25, 5  ;;  %v13725_v25 = vld [vmem:[%s18796_s4] sm:$0xff]  }
  0x7c   :  { %v14663_v33 = vsel %vm14224_vm9, %v11616_v27, %v1194_v28 }
  0x7d   :  { %v1150_v37 = vor.u32 %v1149_v34, %v1146_v31  ;;  %v14667_v63 = vcombine.low %v14631_v39, %v14663_v33  ;;  %v11662_v17 = vcombine.low %v14663_v33, %v14258_v35 }
  0x7f   :  { %v1151_v52 = vrot.slane %v1150_v37, 4  ;;  %1932 = vmatmul.mubr.bf16.gmra.mrb[28].mxu1 %v14667_v63 }
  0x80   :  { %2069 = vmatprep.mubr.bf16.mxu1 %v14368_v8  ;;  %v11650_v8 = vcombine.low %v14308_v41, %v14308_v41  ;;  %v11651_v41 = vcombine.low %v14380_v22, %v14380_v22  ;;  %v11643_v22 = vcombine.low %v14415_v57, %v14415_v57  ;;  %v13723_v57 = vld [vmem:[%s18794_s1 + $0x230] sm:$0xff]  }
  0x81   :  { %v14673_v38 = vsel %vm14173_vm2, %v1151_v52, %v1155_v56 }
  0x82   :  { %v11632_v13 = vcombine.low %v14640_v5, %v14673_v38  ;;  %v11660_v48 = vcombine.low %v14673_v38, %v14186_v3 }
  0x84   :  { %1834 = vmatprep.mubr.bf16.mxu0 %v11632_v13 }
  0x85   :  { %1835 = vmatmul.mubr.bf16.gmra.mrb[28].mxu0 %v14676_v43 }
  0x86   :  { %1972 = vmatprep.mubr.bf16.mxu0 %v11649_v29 }
  0x87   :  { %2070 = vmatmul.mubr.bf16.vlgmr.msra.gmra.mrb[32].mxu1 %v14318_v50  ;;  %v13720_v50 = vld [vmem:[%s18794_s1 + $0x218] sm:$0xff]  }
  0x88   :  { %2077 = vmatprep.mubr.bf16.mxu1 %v14434_v1  ;;  %v11652_v1 = vcombine.low %v14465_v36, %v14465_v36  ;;  %6380 = vmatpush1.bf16.msra.mxu1 %v13725_v25 }
  0x89   :  { %6381 = vmatprep.subr.bf16.mxu1 %v18804_v16 }
  0x8d   :  { %1973 = vmatmul.mubr.bf16.vlgmr.msra.gmra.mrb[32].mxu0 %v11641_v60 }
  0x8e   :  { %12628 = vmatpush3.bf16.msra.mxu0 %v14549_v2  ;;  %1980 = vmatprep.mubr.bf16.mxu0 %v11650_v8  ;;  %v11644_v2 = vcombine.low %v14501_v14, %v14501_v14 }
  0x8f   :  { %12629 = vmatprep.subr.bf16.mxu0 %v13718_v21  ;;  %2078 = vmatmul.mubr.bf16.gmra.mrb[36].mxu1 %v14341_v59  ;;  %v11659_v59 = vcombine.low %v14501_v14, %v14186_v3  ;;  %v11645_v14 = vcombine.low %v14582_v0, %v14582_v0  ;;  %v11647_v0 = vcombine.low %v14640_v5, %v14640_v5 }
  0x90   :  { %2085 = vmatprep.mubr.bf16.mxu1 %v14512_v49  ;;  %v11657_v49 = vcombine.low %v14419_v58, %v18804_v16  ;;  %v11653_v58 = vcombine.low %v14566_v20, %v14566_v20  ;;  %v11654_v20 = vcombine.low %v14600_v53, %v14600_v53  ;;  %v11656_v53 = vcombine.low %v14663_v33, %v14663_v33  ;;  %v13726_v33 = vld [vmem:[%s18796_s4 + $0x8] sm:$0xff]  }
  0x91   :  { %v11648_v3 = vcombine.low %v14673_v38, %v14673_v38  ;;  %6382 = vmatpush1.bf16.msra.mxu1 %v13726_v33 }
  0x92   :  { %12630 = vmatpush3.bf16.msra.mxu0 %v13718_v21  ;;  %6383 = vmatprep.subr.bf16.mxu1 %v18804_v16  ;;  %v13727_v21 = vld [vmem:[%s18796_s4 + $0x10] sm:$0xff]  }
  0x93   :  { %12631 = vmatprep.subr.bf16.mxu0 %v13719_v9 }
  0x95   :  { %1981 = vmatmul.mubr.bf16.gmra.mrb[36].mxu0 %v11642_v40  ;;  %6384 = vmatpush1.bf16.msra.mxu1 %v13727_v21 }
  0x96   :  { %1988 = vmatprep.mubr.bf16.mxu0 %v11651_v41  ;;  %12632 = vmatpush3.bf16.msra.mxu0 %v13719_v9 }
  0x97   :  { %2086 = vmatmul.mubr.bf16.gmra.mrb[40].mxu1 %v14447_v7  ;;  %12633 = vmatprep.subr.bf16.mxu0 %v13720_v50  ;;  %v13722_v7 = vld [vmem:[%s18794_s1 + $0x228] sm:$0xff]  }
  0x98   :  { %2093 = vmatprep.mubr.bf16.mxu1 %v11659_v59  ;;  %6385 = vmatprep.subr.bf16.mxu1 %v18804_v16  ;;  %v13728_v59 = vld [vmem:[%s18796_s4 + $0x18] sm:$0xff]  }
  0x99   :  { %6386 = vmatpush1.bf16.msra.mxu1 %v13728_v59 }
  0x9a   :  { %12634 = vmatpush3.bf16.msra.mxu0 %v13720_v50  ;;  %6387 = vmatprep.subr.bf16.mxu1 %v18804_v16 }
  0x9b   :  { %12635 = vmatprep.subr.bf16.mxu0 %v13721_v4 }
  0x9d   :  { %1989 = vmatmul.mubr.bf16.gmra.mrb[40].mxu0 %v11643_v22 }
  0x9e   :  { %1996 = vmatprep.mubr.bf16.mxu0 %v11652_v1  ;;  %12636 = vmatpush3.bf16.msra.mxu0 %v13721_v4 }
  0x9f   :  { %2094 = vmatmul.mubr.bf16.gmra.mrb[44].mxu1 %v11657_v49  ;;  %12637 = vmatprep.subr.bf16.mxu0 %v13722_v7 }
  0xa0   :  { %2101 = vmatprep.mubr.bf16.mxu1 %v14624_v23  ;;  %v11646_v23 = vcombine.low %v14614_v18, %v14614_v18  ;;  %v11658_v18 = vcombine.low %v14653_v11, %v18804_v16 }
  0xa2   :  { %12638 = vmatpush3.bf16.msra.mxu0 %v13722_v7 }
  0xa3   :  { %12639 = vmatprep.subr.bf16.mxu0 %v13723_v57 }
  0xa5   :  { %1997 = vmatmul.mubr.bf16.gmra.mrb[44].mxu0 %v11644_v2 }
  0xa6   :  { %2004 = vmatprep.mubr.bf16.mxu0 %v11653_v58  ;;  %12640 = vmatpush3.bf16.msra.mxu0 %v13723_v57 }
  0xa7   :  { %2102 = vmatmul.mubr.bf16.gmra.mrb[48].mxu1 %v14618_v19  ;;  %12641 = vmatprep.subr.bf16.mxu0 %v13724_v46  ;;  %v11655_v19 = vcombine.low %v14631_v39, %v14631_v39  ;;  %v11661_v39 = vcombine.low %v14465_v36, %v14258_v35 }
  0xa8   :  { %2109 = vmatprep.mubr.bf16.mxu1 %v14647_v55 }
  0xaa   :  { %12642 = vmatpush3.bf16.msra.mxu0 %v13724_v46 }
  0xad   :  { %2005 = vmatmul.mubr.bf16.gmra.mrb[48].mxu0 %v11645_v14 }
  0xae   :  { %2012 = vmatprep.mubr.bf16.mxu0 %v11654_v20 }
  0xaf   :  { %2110 = vmatmul.mubr.bf16.gmra.mrb[52].mxu1 %v14643_v6 }
  0xb0   :  { %2117 = vmatprep.mubr.bf16.mxu1 %v11632_v13 }
  0xb5   :  { %2013 = vmatmul.mubr.bf16.gmra.mrb[52].mxu0 %v11646_v23 }
  0xb6   :  { %2020 = vmatprep.mubr.bf16.mxu0 %v11655_v19 }
  0xb7   :  { %2118 = vmatmul.mubr.bf16.gmra.mrb[56].mxu1 %v14676_v43 }
  0xb8   :  { %2125 = vmatprep.mubr.bf16.mxu1 %v11660_v48 }
  0xbd   :  { %2021 = vmatmul.mubr.bf16.gmra.mrb[56].mxu0 %v11647_v0 }
  0xbe   :  { %2028 = vmatprep.mubr.bf16.mxu0 %v11656_v53 }
  0xbf   :  { %2126 = vmatmul.mubr.bf16.gmra.mrb[60].mxu1 %v11658_v18 }
  0xc5   :  { %2029 = vmatmul.mubr.bf16.gmra.mrb[60].mxu0 %v11648_v3 }
  0xc6   :  { %12643 = vmatprep.mubr.bf16.mxu0 %v14322_v47 }
  0xcd   :  { %12644 = vmatmul.mubr.bf16.vlgmr.msra.gmra.mrb[64].mxu0 %v14389_v30 }
  0xce   :  { %12647 = vmatprep.mubr.bf16.mxu0 %v14475_v45 }
  0xd5   :  { %12648 = vmatmul.mubr.bf16.gmra.mrb[68].mxu0 %v11661_v39 }
  0xd6   :  { %12651 = vmatprep.mubr.bf16.mxu0 %v14605_v54 }
  0xdd   :  { %12652 = vmatmul.mubr.bf16.gmra.mrb[72].mxu0 %v14635_v51 }
  0xde   :  { %12655 = vmatprep.mubr.bf16.mxu0 %v14667_v63 }
  0xe5   :  { %12656 = vmatmul.mubr.bf16.gmra.mrb[76].mxu0 %v11662_v17 }
 0x10a   :  { %v12355_v32 = vpop.f32.mrb[0].mxu1 }
 0x10b   :  { %v12356_v47 = vpop.f32.mrb[1].mxu1 }
 0x10c   :  { %v12357_v62 = vadd.f32 %v12356_v47, %v12355_v32  ;;  %v12358_v30 = vpop.f32.mrb[2].mxu1  ;;  %v13729_v32 = vld [vmem:[%s18796_s4 + $0x20] sm:$0xff]  }
 0x10d   :  { %v12359_v5 = vpop.f32.mrb[3].mxu1  ;;  %6388 = vmatpush1.bf16.msra.mxu1 %v13729_v32 }
 0x10e   :  { %v12360_v45 = vadd.f32 %v12359_v5, %v12358_v30  ;;  %6389 = vmatprep.subr.bf16.mxu1 %v18804_v16 }
 0x110   :  { %v12291_v6 = vpop.f32.mrb[0].mxu0 }
 0x111   :  { %v12292_v55 = vpop.f32.mrb[1].mxu0 }
 0x112   :  { %v12293_v36 = vadd.f32 %v12292_v55, %v12291_v6  ;;  %v12294_v10 = vpop.f32.mrb[2].mxu0  ;;  %v12361_v11 = vpop.f32.mrb[4].mxu1 }
 0x113   :  { %v12295_v54 = vpop.f32.mrb[3].mxu0  ;;  %v12362_v42 = vpop.f32.mrb[5].mxu1 }
 0x114   :  { %v14763_v51 = vadd.f32 %v12357_v62, %v12293_v36  ;;  %v12296_v15 = vadd.f32 %v12295_v54, %v12294_v10  ;;  %v12363_v12 = vadd.f32 %v12362_v42, %v12361_v11  ;;  %v12364_v24 = vpop.f32.mrb[6].mxu1 }
 0x115   :  { %v12365_v35 = vpop.f32.mrb[7].mxu1 }
 0x116   :  { %v14768_v27 = vadd.f32 %v12360_v45, %v12296_v15  ;;  %v12366_v28 = vadd.f32 %v12365_v35, %v12364_v24 }
 0x118   :  { %v12297_v31 = vpop.f32.mrb[4].mxu0 }
 0x119   :  { %v12298_v34 = vpop.f32.mrb[5].mxu0 }
 0x11a   :  { %v12299_v37 = vadd.f32 %v12298_v34, %v12297_v31  ;;  %v12300_v56 = vpop.f32.mrb[6].mxu0  ;;  %v12367_v63 = vpop.f32.mrb[8].mxu1 }
 0x11b   :  { %v12301_v52 = vpop.f32.mrb[7].mxu0  ;;  %v12368_v38 = vpop.f32.mrb[9].mxu1 }
 0x11c   :  { %v14774_v43 = vadd.f32 %v12363_v12, %v12299_v37  ;;  %v12302_v13 = vadd.f32 %v12301_v52, %v12300_v56  ;;  %v12369_v29 = vadd.f32 %v12368_v38, %v12367_v63  ;;  %v12370_v60 = vpop.f32.mrb[10].mxu1  ;;  %v13730_v38 = vld [vmem:[%s18796_s4 + $0x28] sm:$0xff]  }
 0x11d   :  { %v12371_v8 = vpop.f32.mrb[11].mxu1  ;;  %6390 = vmatpush1.bf16.msra.mxu1 %v13730_v38 }
 0x11e   :  { %v14780_v9 = vadd.f32 %v12366_v28, %v12302_v13  ;;  %v12372_v40 = vadd.f32 %v12371_v8, %v12370_v60  ;;  %6391 = vmatprep.subr.bf16.mxu1 %v18804_v16 }
 0x120   :  { %v12303_v41 = vpop.f32.mrb[8].mxu0 }
 0x121   :  { %v12304_v50 = vpop.f32.mrb[9].mxu0 }
 0x122   :  { %v12305_v4 = vadd.f32 %v12304_v50, %v12303_v41  ;;  %v12306_v22 = vpop.f32.mrb[10].mxu0  ;;  %v12373_v1 = vpop.f32.mrb[12].mxu1 }
 0x123   :  { %v12307_v49 = vpop.f32.mrb[11].mxu0  ;;  %v12374_v7 = vpop.f32.mrb[13].mxu1 }
 0x124   :  { %v14786_v57 = vadd.f32 %v12369_v29, %v12305_v4  ;;  %v12308_v2 = vadd.f32 %v12307_v49, %v12306_v22  ;;  %v12375_v58 = vadd.f32 %v12374_v7, %v12373_v1  ;;  %v12376_v46 = vpop.f32.mrb[14].mxu1 }
 0x125   :  { %v12377_v14 = vpop.f32.mrb[15].mxu1 }
 0x126   :  { %v14789_v20 = vadd.f32 %v12372_v40, %v12308_v2  ;;  %v12378_v23 = vadd.f32 %v12377_v14, %v12376_v46 }
 0x128   :  { %v12309_v19 = vpop.f32.mrb[12].mxu0 }
 0x129   :  { %v12310_v48 = vpop.f32.mrb[13].mxu0 }
 0x12a   :  { %v12311_v0 = vadd.f32 %v12310_v48, %v12309_v19  ;;  %v12312_v53 = vpop.f32.mrb[14].mxu0 }
 0x12b   :  { %v12313_v18 = vpop.f32.mrb[15].mxu0 }
 0x12c   :  { %v14791_v3 = vadd.f32 %v12375_v58, %v12311_v0  ;;  %v12314_v39 = vadd.f32 %v12313_v18, %v12312_v53 }
 0x12e   :  { %v14793_v17 = vadd.f32 %v12378_v23, %v12314_v39 }
 0x131   :  { %v12379_v47 = vpop.f32.mrb[16].mxu1 }
 0x132   :  { %v12380_v62 = vpop.f32.mrb[17].mxu1 }
 0x133   :  { %v12381_v30 = vadd.f32 %v12380_v62, %v12379_v47  ;;  %v12382_v5 = vpop.f32.mrb[18].mxu1 }
 0x134   :  { %v12383_v45 = vpop.f32.mrb[19].mxu1 }
 0x135   :  { %v12384_v6 = vadd.f32 %v12383_v45, %v12382_v5 }
 0x137   :  { %v12315_v55 = vpop.f32.mrb[16].mxu0 }
 0x138   :  { %v12316_v36 = vpop.f32.mrb[17].mxu0 }
 0x139   :  { %v12317_v10 = vadd.f32 %v12316_v36, %v12315_v55  ;;  %v12318_v11 = vpop.f32.mrb[18].mxu0 }
 0x13a   :  { %v12319_v54 = vpop.f32.mrb[19].mxu0 }
 0x13b   :  { %v14799_v42 = vadd.f32 %v12381_v30, %v12317_v10  ;;  %v12320_v15 = vadd.f32 %v12319_v54, %v12318_v11 }
 0x13c   :  { %v12385_v12 = vpop.f32.mrb[20].mxu1 }
 0x13d   :  { %v14801_v24 = vadd.f32 %v12384_v6, %v12320_v15  ;;  %v12386_v35 = vpop.f32.mrb[21].mxu1  ;;  %v13731_v15 = vld [vmem:[%s18796_s4 + $0x30] sm:$0xff]  }
 0x13e   :  { %v12387_v25 = vadd.f32 %v12386_v35, %v12385_v12  ;;  %v12388_v28 = vpop.f32.mrb[22].mxu1  ;;  %6392 = vmatpush1.bf16.msra.mxu1 %v13731_v15  ;;  %v13732_v15 = vld [vmem:[%s18796_s4 + $0x38] sm:$0xff]  }
 0x13f   :  { %v12389_v31 = vpop.f32.mrb[23].mxu1  ;;  %6393 = vmatprep.subr.bf16.mxu1 %v18804_v16 }
 0x140   :  { %v12390_v34 = vadd.f32 %v12389_v31, %v12388_v28 }
 0x142   :  { %v12321_v33 = vpop.f32.mrb[20].mxu0  ;;  %6394 = vmatpush1.bf16.msra.mxu1 %v13732_v15  ;;  %v13733_v15 = vld [vmem:[%s18796_s4 + $0x40] sm:$0xff]  }
 0x143   :  { %v12322_v37 = vpop.f32.mrb[21].mxu0  ;;  %6395 = vmatprep.subr.bf16.mxu1 %v18804_v16 }
 0x144   :  { %v12323_v56 = vadd.f32 %v12322_v37, %v12321_v33  ;;  %v12324_v63 = vpop.f32.mrb[22].mxu0 }
 0x145   :  { %v12325_v52 = vpop.f32.mrb[23].mxu0 }
 0x146   :  { %v14806_v13 = vadd.f32 %v12387_v25, %v12323_v56  ;;  %v12326_v29 = vadd.f32 %v12325_v52, %v12324_v63  ;;  %6396 = vmatpush1.bf16.msra.mxu1 %v13733_v15 }
 0x147   :  { %v12391_v60 = vpop.f32.mrb[24].mxu1  ;;  %6397 = vmatprep.subr.bf16.mxu1 %v18804_v16 }
 0x148   :  { %v14808_v8 = vadd.f32 %v12390_v34, %v12326_v29  ;;  %v12392_v21 = vpop.f32.mrb[25].mxu1 }
 0x149   :  { %v12393_v40 = vadd.f32 %v12392_v21, %v12391_v60  ;;  %v12394_v41 = vpop.f32.mrb[26].mxu1 }
 0x14a   :  { %v12395_v50 = vpop.f32.mrb[27].mxu1 }
 0x14b   :  { %v12396_v59 = vadd.f32 %v12395_v50, %v12394_v41 }
 0x14d   :  { %v12327_v4 = vpop.f32.mrb[24].mxu0 }
 0x14e   :  { %v12328_v22 = vpop.f32.mrb[25].mxu0 }
 0x14f   :  { %v12329_v1 = vadd.f32 %v12328_v22, %v12327_v4  ;;  %v12330_v49 = vpop.f32.mrb[26].mxu0 }
 0x150   :  { %v12331_v7 = vpop.f32.mrb[27].mxu0 }
 0x151   :  { %v14811_v2 = vadd.f32 %v12393_v40, %v12329_v1  ;;  %v12332_v58 = vadd.f32 %v12331_v7, %v12330_v49 }
 0x152   :  { %v12397_v14 = vpop.f32.mrb[28].mxu1 }
 0x153   :  { %v14813_v46 = vadd.f32 %v12396_v59, %v12332_v58  ;;  %v12398_v23 = vpop.f32.mrb[29].mxu1 }
 0x154   :  { %v12399_v19 = vadd.f32 %v12398_v23, %v12397_v14  ;;  %v12400_v48 = vpop.f32.mrb[30].mxu1 }
 0x155   :  { %v12401_v0 = vpop.f32.mrb[31].mxu1 }
 0x156   :  { %v12402_v53 = vadd.f32 %v12401_v0, %v12400_v48 }
 0x158   :  { %v12333_v18 = vpop.f32.mrb[28].mxu0 }
 0x159   :  { %v12334_v39 = vpop.f32.mrb[29].mxu0 }
 0x15a   :  { %v12335_v32 = vadd.f32 %v12334_v39, %v12333_v18  ;;  %v12336_v47 = vpop.f32.mrb[30].mxu0  ;;  %v12483_v62 = vpop.f32.mrb[32].mxu1 }
 0x15b   :  { %v12337_v30 = vpop.f32.mrb[31].mxu0  ;;  %v12484_v5 = vpop.f32.mrb[33].mxu1 }
 0x15c   :  { %v14815_v45 = vadd.f32 %v12399_v19, %v12335_v32  ;;  %v12338_v6 = vadd.f32 %v12337_v30, %v12336_v47  ;;  %v12485_v55 = vadd.f32 %v12484_v5, %v12483_v62  ;;  %v12486_v36 = vpop.f32.mrb[34].mxu1 }
 0x15d   :  { %v12487_v10 = vpop.f32.mrb[35].mxu1 }
 0x15e   :  { %v14817_v11 = vadd.f32 %v12402_v53, %v12338_v6  ;;  %v12488_v54 = vadd.f32 %v12487_v10, %v12486_v36 }
 0x160   :  { %v12419_v12 = vpop.f32.mrb[32].mxu0 }
 0x161   :  { %v12420_v35 = vpop.f32.mrb[33].mxu0 }
 0x162   :  { %v12421_v25 = vadd.f32 %v12420_v35, %v12419_v12  ;;  %v12422_v28 = vpop.f32.mrb[34].mxu0  ;;  %v12489_v31 = vpop.f32.mrb[36].mxu1 }
 0x163   :  { %v12423_v34 = vpop.f32.mrb[35].mxu0  ;;  %v12490_v33 = vpop.f32.mrb[37].mxu1 }
 0x164   :  { %v1975_v37 = vadd.f32 %v12421_v25, %v14763_v51  ;;  %v12424_v56 = vadd.f32 %v12423_v34, %v12422_v28  ;;  %v12491_v63 = vadd.f32 %v12490_v33, %v12489_v31  ;;  %v12492_v52 = vpop.f32.mrb[38].mxu1 }
 0x165   :  { %v12493_v38 = vpop.f32.mrb[39].mxu1 }
 0x166   :  { %v1978_v29 = vadd.f32 %v12424_v56, %v14768_v27  ;;  %v12494_v60 = vadd.f32 %v12493_v38, %v12492_v52  ;;  %v14825_v21 = vadd.f32 %v12485_v55, %v1975_v37 }
 0x168   :  { %v12425_v40 = vpop.f32.mrb[36].mxu0  ;;  %v14827_v41 = vadd.f32 %v12488_v54, %v1978_v29 }
 0x169   :  { %v12426_v50 = vpop.f32.mrb[37].mxu0 }
 0x16a   :  { %v12427_v59 = vadd.f32 %v12426_v50, %v12425_v40  ;;  %v12428_v4 = vpop.f32.mrb[38].mxu0  ;;  %v12495_v22 = vpop.f32.mrb[40].mxu1 }
 0x16b   :  { %v12429_v1 = vpop.f32.mrb[39].mxu0  ;;  %v12496_v49 = vpop.f32.mrb[41].mxu1 }
 0x16c   :  { %v1983_v51 = vadd.f32 %v12427_v59, %v14774_v43  ;;  %v12430_v7 = vadd.f32 %v12429_v1, %v12428_v4  ;;  %v12497_v58 = vadd.f32 %v12496_v49, %v12495_v22  ;;  %v12498_v14 = vpop.f32.mrb[42].mxu1 }
 0x16d   :  { %v12499_v23 = vpop.f32.mrb[43].mxu1 }
 0x16e   :  { %v1986_v27 = vadd.f32 %v12430_v7, %v14780_v9  ;;  %v12500_v19 = vadd.f32 %v12499_v23, %v12498_v14  ;;  %v14831_v48 = vadd.f32 %v12491_v63, %v1983_v51 }
 0x170   :  { %v12431_v0 = vpop.f32.mrb[40].mxu0  ;;  %v14833_v53 = vadd.f32 %v12494_v60, %v1986_v27 }
 0x171   :  { %v12432_v18 = vpop.f32.mrb[41].mxu0 }
 0x172   :  { %v12433_v39 = vadd.f32 %v12432_v18, %v12431_v0  ;;  %v12434_v32 = vpop.f32.mrb[42].mxu0  ;;  %v12501_v47 = vpop.f32.mrb[44].mxu1 }
 0x173   :  { %v12435_v62 = vpop.f32.mrb[43].mxu0  ;;  %v12502_v30 = vpop.f32.mrb[45].mxu1 }
 0x174   :  { %v1991_v43 = vadd.f32 %v12433_v39, %v14786_v57  ;;  %v12436_v5 = vadd.f32 %v12435_v62, %v12434_v32  ;;  %v12503_v6 = vadd.f32 %v12502_v30, %v12501_v47  ;;  %v12504_v55 = vpop.f32.mrb[46].mxu1 }
 0x175   :  { %v12505_v36 = vpop.f32.mrb[47].mxu1 }
 0x176   :  { %v1994_v9 = vadd.f32 %v12436_v5, %v14789_v20  ;;  %v12506_v10 = vadd.f32 %v12505_v36, %v12504_v55  ;;  %v14837_v54 = vadd.f32 %v12497_v58, %v1991_v43 }
 0x178   :  { %v12437_v12 = vpop.f32.mrb[44].mxu0  ;;  %v14842_v35 = vadd.f32 %v12500_v19, %v1994_v9 }
 0x179   :  { %v12438_v25 = vpop.f32.mrb[45].mxu0 }
 0x17a   :  { %v12439_v28 = vadd.f32 %v12438_v25, %v12437_v12  ;;  %v12440_v57 = vpop.f32.mrb[46].mxu0  ;;  %v12507_v31 = vpop.f32.mrb[48].mxu1 }
 0x17b   :  { %v12441_v34 = vpop.f32.mrb[47].mxu0  ;;  %v12508_v33 = vpop.f32.mrb[49].mxu1 }
 0x17c   :  { %v1999_v20 = vadd.f32 %v12439_v28, %v14791_v3  ;;  %v12442_v37 = vadd.f32 %v12441_v34, %v12440_v57  ;;  %v12509_v56 = vadd.f32 %v12508_v33, %v12507_v31  ;;  %v12510_v63 = vpop.f32.mrb[50].mxu1 }
 0x17d   :  { %v12511_v52 = vpop.f32.mrb[51].mxu1 }
 0x17e   :  { %v2002_v38 = vadd.f32 %v12442_v37, %v14793_v17  ;;  %v12512_v29 = vadd.f32 %v12511_v52, %v12510_v63  ;;  %v14847_v60 = vadd.f32 %v12503_v6, %v1999_v20 }
 0x180   :  { %v12443_v40 = vpop.f32.mrb[48].mxu0  ;;  %v14849_v50 = vadd.f32 %v12506_v10, %v2002_v38 }
 0x181   :  { %v12444_v59 = vpop.f32.mrb[49].mxu0 }
 0x182   :  { %v12445_v4 = vadd.f32 %v12444_v59, %v12443_v40  ;;  %v12446_v22 = vpop.f32.mrb[50].mxu0  ;;  %v12513_v1 = vpop.f32.mrb[52].mxu1 }
 0x183   :  { %v12447_v49 = vpop.f32.mrb[51].mxu0  ;;  %v12514_v51 = vpop.f32.mrb[53].mxu1 }
 0x184   :  { %v2007_v3 = vadd.f32 %v12445_v4, %v14799_v42  ;;  %v12448_v7 = vadd.f32 %v12447_v49, %v12446_v22  ;;  %v12515_v58 = vadd.f32 %v12514_v51, %v12513_v1  ;;  %v12516_v14 = vpop.f32.mrb[54].mxu1 }
 0x185   :  { %v12517_v23 = vpop.f32.mrb[55].mxu1 }
 0x186   :  { %v2010_v17 = vadd.f32 %v12448_v7, %v14801_v24  ;;  %v12518_v27 = vadd.f32 %v12517_v23, %v12516_v14  ;;  %v14853_v19 = vadd.f32 %v12509_v56, %v2007_v3 }
 0x188   :  { %v12449_v0 = vpop.f32.mrb[52].mxu0  ;;  %v14855_v18 = vadd.f32 %v12512_v29, %v2010_v17 }
 0x189   :  { %v12450_v39 = vpop.f32.mrb[53].mxu0 }
 0x18a   :  { %v12451_v32 = vadd.f32 %v12450_v39, %v12449_v0  ;;  %v12452_v47 = vpop.f32.mrb[54].mxu0  ;;  %v12519_v62 = vpop.f32.mrb[56].mxu1 }
 0x18b   :  { %v12453_v30 = vpop.f32.mrb[55].mxu0  ;;  %v12520_v43 = vpop.f32.mrb[57].mxu1 }
 0x18c   :  { %v2015_v42 = vadd.f32 %v12451_v32, %v14806_v13  ;;  %v12454_v5 = vadd.f32 %v12453_v30, %v12452_v47  ;;  %v12521_v6 = vadd.f32 %v12520_v43, %v12519_v62  ;;  %v12522_v55 = vpop.f32.mrb[58].mxu1 }
 0x18d   :  { %v12523_v36 = vpop.f32.mrb[59].mxu1 }
 0x18e   :  { %v2018_v24 = vadd.f32 %v12454_v5, %v14808_v8  ;;  %v12524_v9 = vadd.f32 %v12523_v36, %v12522_v55  ;;  %v14859_v10 = vadd.f32 %v12515_v58, %v2015_v42 }
 0x190   :  { %v12455_v12 = vpop.f32.mrb[56].mxu0  ;;  %v14864_v25 = vadd.f32 %v12518_v27, %v2018_v24 }
 0x191   :  { %v12456_v28 = vpop.f32.mrb[57].mxu0 }
 0x192   :  { %v12457_v13 = vadd.f32 %v12456_v28, %v12455_v12  ;;  %v12458_v57 = vpop.f32.mrb[58].mxu0  ;;  %v12525_v31 = vpop.f32.mrb[60].mxu1 }
 0x193   :  { %v12459_v34 = vpop.f32.mrb[59].mxu0  ;;  %v12526_v33 = vpop.f32.mrb[61].mxu1 }
 0x194   :  { %v2023_v8 = vadd.f32 %v12457_v13, %v14811_v2  ;;  %v12460_v20 = vadd.f32 %v12459_v34, %v12458_v57  ;;  %v12527_v37 = vadd.f32 %v12526_v33, %v12525_v31  ;;  %v12528_v56 = vpop.f32.mrb[62].mxu1 }
 0x195   :  { %v12529_v63 = vpop.f32.mrb[63].mxu1 }
 0x196   :  { %v2026_v52 = vadd.f32 %v12460_v20, %v14813_v46  ;;  %v12530_v38 = vadd.f32 %v12529_v63, %v12528_v56  ;;  %v14869_v29 = vadd.f32 %v12521_v6, %v2023_v8  ;;  %v14880_v46 = vld [vmem:[%s18797_s2] ss:$0 sm:$0xff] }
 0x198   :  { %v12461_v40 = vpop.f32.mrb[60].mxu0  ;;  %v14875_v7 = vadd.f32 %v12524_v9, %v2026_v52 }
 0x199   :  { %v12462_v59 = vpop.f32.mrb[61].mxu0 }
 0x19a   :  { %v12463_v4 = vadd.f32 %v12462_v59, %v12461_v40  ;;  %v12464_v22 = vpop.f32.mrb[62].mxu0 }
 0x19b   :  { %v12465_v1 = vpop.f32.mrb[63].mxu0 }
 0x19c   :  { %v2031_v49 = vadd.f32 %v12463_v4, %v14815_v45  ;;  %v12466_v51 = vadd.f32 %v12465_v1, %v12464_v22  ;;  %v14888_v45 = vld [vmem:[%s18798_s3] ss:$0 sm:$0xff] }
 0x19e   :  { %v2034_v3 = vadd.f32 %v12466_v51, %v14817_v11  ;;  %v14873_v2 = vadd.f32 %v12527_v37, %v2031_v49 }
 0x1a0   :  { %v12645_v58 = vpop.f32.mrb[64].mxu0  ;;  %v14882_v14 = vadd.f32 %v12530_v38, %v2034_v3 }
 0x1a1   :  { %v2177_v23 = vadd.f32 %v12645_v58, %v14831_v48  ;;  %v2168_v17 = vpop.f32.mrb[65].mxu0  ;;  %v13735_v48 = vld [vmem:[%s18796_s4 + $0x200] sm:$0xff]  }
 0x1a2   :  { %v2169_v11 = vadd.f32 %v2168_v17, %v14825_v21  ;;  %v12646_v27 = vpop.f32.mrb[66].mxu0  ;;  %v13734_v21 = vld [vmem:[%s18796_s4 + $0x48] sm:$0xff]   ;;  %12659 = vmatprep.subr.bf16.mxu0 %v13735_v48 }
 0x1a3   :  { %v2240_v0 = vmul.f32 %v14880_v46, %v2177_v23  ;;  %v2180_v39 = vadd.f32 %v12646_v27, %v14833_v53  ;;  %v2171_v32 = vpop.f32.mrb[67].mxu0  ;;  %6398 = vmatpush1.bf16.msra.mxu1 %v13734_v21  ;;  %12660 = vmatpush3.bf16.msra.mxu0 %v13735_v48 }
 0x1a4   :  { %v2238_v47 = vmul.f32 %v14880_v46, %v2169_v11  ;;  %v2172_v62 = vadd.f32 %v2171_v32, %v14827_v41  ;;  %6399 = vmatprep.subr.bf16.mxu1 %v18804_v16 }
 0x1a5   :  { %v2263_v30 = vadd.f32 %v14888_v45, %v2240_v0  ;;  %v2241_v43 = vmul.f32 %v14880_v46, %v2180_v39 }
 0x1a6   :  { %v2261_v42 = vadd.f32 %v14888_v45, %v2238_v47  ;;  %v2239_v53 = vmul.f32 %v14880_v46, %v2172_v62 }
 0x1a7   :  { %v2295_v5 = vmul.f32 0.2, %v2263_v30  ;;  %v2264_v41 = vadd.f32 %v14888_v45, %v2241_v43  ;;  %vm2279_vm12 = vcmp.gt.f32.partialorder %v2263_v30, 0.0 }
 0x1a8   :  { %v2293_v6 = vmul.f32 0.2, %v2261_v42  ;;  %v2262_v55 = vadd.f32 %v14888_v45, %v2239_v53  ;;  %v12649_v36 = vpop.f32.mrb[68].mxu0  ;;  %vm2277_vm13 = vcmp.gt.f32.partialorder %v2261_v42, 0.0 }
 0x1a9   :  { %vm2280_vm14 = vcmp.gt.f32.partialorder %v2264_v41, 0.0  ;;  %v2296_v24 = vmul.f32 0.2, %v2264_v41  ;;  %v2193_v9 = vadd.f32 %v12649_v36, %v14847_v60  ;;  %v2184_v15 = vpop.f32.mrb[69].mxu0  ;;  %v2311_v57 = vsel %vm2279_vm12, %v2263_v30, %v2295_v5 }
 0x1aa   :  { %vm2278_vm15 = vcmp.gt.f32.partialorder %v2262_v55, 0.0  ;;  %v2294_v12 = vmul.f32 0.2, %v2262_v55  ;;  %v2185_v28 = vadd.f32 %v2184_v15, %v14837_v54  ;;  %v12650_v13 = vpop.f32.mrb[70].mxu0  ;;  %v2309_v8 = vsel %vm2277_vm13, %v2261_v42, %v2293_v6 }
 0x1ab   :  { %v2312_v31 = vsel %vm2280_vm14, %v2264_v41, %v2296_v24  ;;  %v2196_v34 = vadd.f32 %v12650_v13, %v14849_v50  ;;  %v2187_v33 = vpop.f32.mrb[71].mxu0  ;;  %v2244_v49 = vmul.f32 %v14880_v46, %v2193_v9  ;;  %vm5879_vm13 = vcmask 1046528  }
 0x1ac   :  { %v2326_v20 = vpack.c.bf16 %v2312_v31, %v2311_v57  ;;  %v11738_v37 = vpack.c.bf16 %v2312_v31, %v2312_v31  ;;  %v2310_v56 = vsel %vm2278_vm15, %v2262_v55, %v2294_v12  ;;  %v14913_v60 = vadd.f32 %v2187_v33, %v14842_v35 }
 0x1ad   :  { %v2325_v63 = vpack.c.bf16 %v2310_v56, %v2309_v8  ;;  %v11737_v35 = vpack.c.bf16 %v2310_v56, %v2310_v56  ;;  %v14932_v17 = vadd.f32 %v14888_v45, %v2244_v49  ;;  %v2242_v11 = vmul.f32 %v14880_v46, %v2185_v28  ;;  %v13737_v8 = vld [vmem:[%s18796_s4 + $0x208] sm:$0xff]  }
 0x1ae   :  { %v2397_v52 = vrot.slane %v2326_v20, %v14177_v61  ;;  %v2404_v38 = vrot.slane %v11738_v37, %v14177_v61  ;;  %v14948_v42 = vmul.f32 %v14880_v46, %v2196_v34  ;;  %12661 = vmatprep.subr.bf16.mxu0 %v13737_v8  ;;  %vm5629_vm14 = vsmask.f32 7424 }
 0x1af   :  { %v14938_v32 = vrot.slane %v2325_v63, %v14177_v61  ;;  %v14943_v48 = vrot.slane %v11737_v35, %v14177_v61  ;;  %v14953_v41 = vmul.f32 0.2, %v14932_v17  ;;  %v14956_v6 = vadd.f32 %v14888_v45, %v2242_v11  ;;  %12662 = vmatpush3.bf16.msra.mxu0 %v13737_v8 }
 0x1b0   :  { %v14916_v40 = vpop.f32.mrb[72].mxu0  ;;  %v2405_v54 = vcombine.high %v2397_v52, %v2397_v52  ;;  %v2413_v50 = vrot.slane %v2397_v52, %v14177_v61  ;;  %v2406_v1 = vcombine.high %v2404_v38, %v2404_v38  ;;  %v2420_v3 = vrot.slane %v2404_v38, %v14177_v61  ;;  %v13736_v52 = vld [vmem:[%s18796_s4 + $0x50] sm:$0xff]  }
 0x1b1   :  { %v14918_v59 = vpop.f32.mrb[73].mxu0  ;;  %v2356_v9 = vcombine.high %v14938_v32, %v14938_v32  ;;  %v2357_v13 = vcombine.high %v14943_v48, %v14943_v48  ;;  %v14965_v33 = vrot.slane %v14938_v32, %v14177_v61  ;;  %v14973_v63 = vrot.slane %v14943_v48, %v14177_v61  ;;  %6400 = vmatpush1.bf16.msra.mxu1 %v13736_v52 }
 0x1b2   :  { %v14920_v4 = vpop.f32.mrb[74].mxu0  ;;  %v2427_v51 = vrot.slane %v2405_v54, %v14177_v61  ;;  %v2435_v58 = vcombine.high %v2413_v50, %v2413_v50  ;;  %v14929_v23 = vrot.slane %v2406_v1, %v14177_v61  ;;  %v2750_v39 = vunpack.i.h.s16 %v2413_v50  ;;  %6401 = vmatprep.subr.bf16.mxu1 %v18804_v16 }
 0x1b3   :  { %v14923_v22 = vpop.f32.mrb[75].mxu0  ;;  %v2436_v43 = vcombine.high %v2420_v3, %v2420_v3  ;;  %v11753_v5 = vpack.i.b16 %v2413_v50, %v2413_v50  ;;  %v2758_v15 = vunpack.i.h.s16 %v2420_v3  ;;  %v11757_v54 = vpack.i.b16 %v2420_v3, %v2420_v3 }
 0x1b4   :  { %v2437_v0 = vcombine.high %v2427_v51, %v2427_v51  ;;  %v2752_v62 = vunpack.i.h.s16 %v2427_v51  ;;  %v2754_v21 = vunpack.i.h.s16 %v2435_v58  ;;  %v2438_v53 = vcombine.high %v14929_v23, %v14929_v23 }
 0x1b5   :  { %v2878_v36 = vpack.i.b16 %v2750_v39, %v2750_v39  ;;  %v11754_v24 = vpack.i.b16 %v2427_v51, %v2427_v51  ;;  %v2760_v12 = vunpack.i.h.s16 %v14929_v23  ;;  %v2762_v57 = vunpack.i.h.s16 %v2436_v43 }
 0x1b6   :  { %v2756_v55 = vunpack.i.h.s16 %v2437_v0  ;;  %v2880_v28 = vpack.i.b16 %v2752_v62, %v2752_v62  ;;  %v11755_v31 = vpack.i.b16 %v2435_v58, %v2435_v58  ;;  %v2882_v34 = vpack.i.b16 %v2754_v21, %v2754_v21 }
 0x1b7   :  { %v2764_v20 = vunpack.i.h.s16 %v2438_v53  ;;  %v11756_v37 = vpack.i.b16 %v2437_v0, %v2437_v0  ;;  %v3056_v56 = vrot.slane %v11753_v5, %v14159_v44  ;;  %v3060_v50 = vrot.slane %v2878_v36, %v14159_v44 }
 0x1b8   :  { %v14935_v27 = vpop.f32.mrb[76].mxu0  ;;  %v2884_v38 = vpack.i.b16 %v2756_v55, %v2756_v55  ;;  %v3064_v1 = vrot.slane %v11754_v24, %v14159_v44  ;;  %v2886_v49 = vpack.i.b16 %v2758_v15, %v2758_v15  ;;  %v11758_v51 = vpack.i.b16 %v14929_v23, %v14929_v23 }
 0x1b9   :  { %v14940_v47 = vpop.f32.mrb[77].mxu0  ;;  %v2888_v35 = vpack.i.b16 %v2760_v12, %v2760_v12  ;;  %v3068_v58 = vrot.slane %v2880_v28, %v14159_v44  ;;  %v11759_v0 = vpack.i.b16 %v2436_v43, %v2436_v43  ;;  %v2890_v39 = vpack.i.b16 %v2762_v57, %v2762_v57 }
 0x1ba   :  { %v14945_v30 = vpop.f32.mrb[78].mxu0  ;;  %v3072_v32 = vrot.slane %v11755_v31, %v14159_v44  ;;  %v3076_v3 = vrot.slane %v2882_v34, %v14159_v44  ;;  %v11760_v62 = vpack.i.b16 %v2438_v53, %v2438_v53  ;;  %v2892_v48 = vpack.i.b16 %v2764_v20, %v2764_v20 }
 0x1bb   :  { %v14983_v11 = vpop.f32.mrb[79].mxu0  ;;  %v3080_v21 = vrot.slane %v11756_v37, %v14159_v44  ;;  %v3614_v5 = vpack.i.b16 %v3056_v56, %v3056_v56  ;;  %v3084_v23 = vrot.slane %v2884_v38, %v14159_v44  ;;  %v3088_v55 = vrot.slane %v11757_v54, %v14159_v44 }
 0x1bc   :  { %v3621_v36 = vpack.i.b16 %v3060_v50, %v3060_v50  ;;  %v3628_v24 = vpack.i.b16 %v3064_v1, %v3064_v1  ;;  %v3092_v43 = vrot.slane %v2886_v49, %v14159_v44  ;;  %v3096_v15 = vrot.slane %v11758_v51, %v14159_v44 }
 0x1bd   :  { %v3100_v12 = vrot.slane %v2888_v35, %v14159_v44  ;;  %v3635_v28 = vpack.i.b16 %v3068_v58, %v3068_v58  ;;  %v3104_v53 = vrot.slane %v11759_v0, %v14159_v44  ;;  %v3108_v57 = vrot.slane %v2890_v39, %v14159_v44 }
 0x1be   :  { %v3642_v31 = vpack.i.b16 %v3072_v32, %v3072_v32  ;;  %v3649_v34 = vpack.i.b16 %v3076_v3, %v3076_v3  ;;  %v3112_v8 = vrot.slane %v11760_v62, %v14159_v44  ;;  %v3116_v20 = vrot.slane %v2892_v48, %v14159_v44 }
 0x1bf   :  { %v14999_v37 = vrot.slane %v3614_v5, %v14159_v44  ;;  %v2378_v56 = vrot.slane %v2356_v9, %v14177_v61  ;;  %v15003_v52 = vrot.slane %v3621_v36, %v14159_v44  ;;  %v15006_v38 = vrot.slane %v3628_v24, %v14159_v44 }
 0x1c0   :  { %v3656_v54 = vpack.i.b16 %v3080_v21, %v3080_v21  ;;  %v3663_v50 = vpack.i.b16 %v3084_v23, %v3084_v23  ;;  %v15009_v1 = vrot.slane %v3635_v28, %v14159_v44  ;;  %v3670_v49 = vpack.i.b16 %v3088_v55, %v3088_v55 }
 0x1c1   :  { %18967 = vst [vmem:[#allocation3_spill] sm:$0xff] %v14999_v37  ;;  %18968 = vst [vmem:[#allocation4_spill] sm:$0xff] %v15003_v52  ;;  %v3677_v51 = vpack.i.b16 %v3092_v43, %v3092_v43  ;;  %v2385_v35 = vrot.slane %v2357_v13, %v14177_v61  ;;  %v15013_v58 = vrot.slane %v3642_v31, %v14159_v44  ;;  %v2734_v28 = vunpack.i.h.s16 %v14965_v33 }
 0x1c2   :  { %18969 = vst [vmem:[#allocation5_spill] sm:$0xff] %v15006_v38  ;;  %18970 = vst [vmem:[#allocation6_spill] sm:$0xff] %v15009_v1  ;;  %v15016_v9 = vrot.slane %v3649_v34, %v14159_v44  ;;  %v3684_v0 = vpack.i.b16 %v3096_v15, %v3096_v15  ;;  %v3691_v39 = vpack.i.b16 %v3100_v12, %v3100_v12  ;;  %vm2283_vm0 = vcmp.gt.f32.partialorder %v14932_v17, 0.0 }
 0x1c3   :  { %18971 = vst [vmem:[#allocation7_spill] sm:$0xff] %v15013_v58  ;;  %v3698_v32 = vpack.i.b16 %v3104_v53, %v3104_v53  ;;  %v3705_v3 = vpack.i.b16 %v3108_v57, %v3108_v57  ;;  %v2386_v62 = vcombine.high %v14965_v33, %v14965_v33  ;;  %v2388_v48 = vcombine.high %v2378_v56, %v2378_v56 }
 0x1c4   :  { %18972 = vst [vmem:[#allocation8_spill] sm:$0xff] %v15016_v9  ;;  %v15021_v21 = vrot.slane %v3656_v54, %v14159_v44  ;;  %v15024_v5 = vrot.slane %v3663_v50, %v14159_v44  ;;  %v3712_v13 = vpack.i.b16 %v3112_v8, %v3112_v8  ;;  %v3719_v23 = vpack.i.b16 %v3116_v20, %v3116_v20 }
 0x1c5   :  { %v15027_v55 = vrot.slane %v3670_v49, %v14159_v44  ;;  %v15030_v36 = vrot.slane %v3677_v51, %v14159_v44  ;;  %v2387_v24 = vcombine.high %v14973_v63, %v14973_v63  ;;  %v15034_v43 = vcombine.high %v2385_v35, %v2385_v35 }
 0x1c6   :  { %18973 = vst [vmem:[#allocation9_spill] sm:$0xff] %v15021_v21  ;;  %18974 = vst [vmem:[#allocation10_spill] sm:$0xff] %v15024_v5  ;;  %v15037_v15 = vrot.slane %v3684_v0, %v14159_v44  ;;  %v15040_v12 = vrot.slane %v3691_v39, %v14159_v44  ;;  %v2736_v53 = vunpack.i.h.s16 %v2378_v56  ;;  %v15044_v57 = vrot.slane %v3698_v32, %v14159_v44 }
 0x1c7   :  { %18975 = vst [vmem:[#allocation11_spill] sm:$0xff] %v15027_v55  ;;  %18976 = vst [vmem:[#allocation12_spill] sm:$0xff] %v15030_v36  ;;  %v15047_v31 = vrot.slane %v3705_v3, %v14159_v44  ;;  %v2738_v34 = vunpack.i.h.s16 %v2386_v62  ;;  %v2740_v8 = vunpack.i.h.s16 %v2388_v48  ;;  %v15050_v20 = vrot.slane %v3712_v13, %v14159_v44 }
 0x1c8   :  { %18977 = vst [vmem:[#allocation13_spill] sm:$0xff] %v15037_v15  ;;  %18978 = vst [vmem:[#allocation14_spill] sm:$0xff] %v15040_v12  ;;  %v15053_v54 = vrot.slane %v3719_v23, %v14159_v44  ;;  %v2742_v50 = vunpack.i.h.s16 %v14973_v63  ;;  %v2744_v49 = vunpack.i.h.s16 %v2385_v35  ;;  %v2746_v39 = vunpack.i.h.s16 %v2387_v24 }
 0x1c9   :  { %18979 = vst [vmem:[#allocation15_spill] sm:$0xff] %v15044_v57  ;;  %18980 = vst [vmem:[#allocation16_spill] sm:$0xff] %v15047_v31  ;;  %v2748_v32 = vunpack.i.h.s16 %v15034_v43  ;;  %v11745_v3 = vpack.i.b16 %v14965_v33, %v14965_v33  ;;  %v2862_v13 = vpack.i.b16 %v2734_v28, %v2734_v28  ;;  %v11746_v16 = vpack.i.b16 %v2378_v56, %v2378_v56 }
 0x1ca   :  { %18981 = vst [vmem:[#allocation17_spill] sm:$0xff] %v15050_v20  ;;  %18982 = vst [vmem:[#allocation18_spill] sm:$0xff] %v15053_v54  ;;  %v2864_v20 = vpack.i.b16 %v2736_v53, %v2736_v53  ;;  %v11747_v23 = vpack.i.b16 %v2386_v62, %v2386_v62  ;;  %v2866_v54 = vpack.i.b16 %v2738_v34, %v2738_v34  ;;  %vm2281_vm2 = vcmp.gt.f32.partialorder %v14956_v6, 0.0 }
 0x1cb   :  { %v11748_v57 = vpack.i.b16 %v2388_v48, %v2388_v48  ;;  %v2868_v31 = vpack.i.b16 %v2740_v8, %v2740_v8  ;;  %v11749_v51 = vpack.i.b16 %v14973_v63, %v14973_v63  ;;  %v2870_v15 = vpack.i.b16 %v2742_v50, %v2742_v50 }
 0x1cc   :  { %v11750_v0 = vpack.i.b16 %v2385_v35, %v2385_v35  ;;  %v2872_v36 = vpack.i.b16 %v2744_v49, %v2744_v49  ;;  %v11751_v55 = vpack.i.b16 %v2387_v24, %v2387_v24  ;;  %v2874_v12 = vpack.i.b16 %v2746_v39, %v2746_v39 }
 0x1cd   :  { %v11752_v33 = vpack.i.b16 %v15034_v43, %v15034_v43  ;;  %v2876_v28 = vpack.i.b16 %v2748_v32, %v2748_v32  ;;  %v2992_v56 = vrot.slane %v11745_v3, %v14159_v44  ;;  %v2996_v53 = vrot.slane %v2862_v13, %v14159_v44  ;;  %v13741_v32 = vld [vmem:[%s18796_s4 + $0x218] sm:$0xff]  }
 0x1ce   :  { %v3000_v62 = vrot.slane %v11746_v16, %v14159_v44  ;;  %v3004_v48 = vrot.slane %v2864_v20, %v14159_v44  ;;  %v15073_v34 = vrot.slane %v11747_v23, %v14159_v44  ;;  %v15076_v63 = vrot.slane %v2866_v54, %v14159_v44  ;;  %v13740_v23 = vld [vmem:[%s18796_s4 + $0x60] sm:$0xff]  }
 0x1cf   :  { %v15079_v35 = vrot.slane %v11748_v57, %v14159_v44  ;;  %v15082_v24 = vrot.slane %v2868_v31, %v14159_v44  ;;  %v15085_v43 = vrot.slane %v11749_v51, %v14159_v44  ;;  %v15088_v8 = vrot.slane %v2870_v15, %v14159_v44 }
 0x1d0   :  { %v15091_v16 = vrot.slane %v11750_v0, %v14159_v44  ;;  %v15094_v20 = vrot.slane %v2872_v36, %v14159_v44  ;;  %v2268_v54 = vadd.f32 %v14888_v45, %v14948_v42  ;;  %v2243_v57 = vmul.f32 %v14880_v46, %v14913_v60 }
 0x1d1   :  { %v2209_v31 = vadd.f32 %v14916_v40, %v14859_v10  ;;  %v2201_v50 = vadd.f32 %v14918_v59, %v14853_v19  ;;  %v15105_v15 = vrot.slane %v11751_v55, %v14159_v44  ;;  %v15109_v49 = vadd.f32 %v14920_v4, %v14864_v25  ;;  %v13739_v10 = vld [vmem:[%s18796_s4 + $0x210] sm:$0xff]   ;;  %v13738_v25 = vld [vmem:[%s18796_s4 + $0x58] sm:$0xff]  }
 0x1d2   :  { %v15113_v36 = vadd.f32 %v14923_v22, %v14855_v18  ;;  %v15117_v60 = vadd.f32 %v14935_v27, %v14873_v2  ;;  %v2297_v19 = vmul.f32 0.2, %v14956_v6  ;;  %vm2284_vm1 = vcmp.gt.f32.partialorder %v2268_v54, 0.0  ;;  %12663 = vmatprep.subr.bf16.mxu0 %v13739_v10  ;;  %6402 = vmatpush1.bf16.msra.mxu1 %v13738_v25 }
 0x1d3   :  { %v2300_v40 = vmul.f32 0.2, %v2268_v54  ;;  %v2266_v59 = vadd.f32 %v14888_v45, %v2243_v57  ;;  %v15128_v18 = vrot.slane %v2874_v12, %v14159_v44  ;;  %v3502_v4 = vpack.i.b16 %v2992_v56, %v2992_v56  ;;  %12664 = vmatpush3.bf16.msra.mxu0 %v13739_v10  ;;  %v13743_v10 = vld [vmem:[%s18796_s4 + $0x220] sm:$0xff]  }
 0x1d4   :  { %v3509_v2 = vpack.i.b16 %v2996_v53, %v2996_v53  ;;  %v2315_v22 = vsel %vm2283_vm0, %v14932_v17, %v14953_v41  ;;  %v3048_v55 = vrot.slane %v11752_v33, %v14159_v44  ;;  %v3516_v51 = vpack.i.b16 %v3000_v62, %v3000_v62  ;;  %12665 = vmatprep.subr.bf16.mxu0 %v13741_v32 }
 0x1d5   :  { %v2316_v27 = vsel %vm2284_vm1, %v2268_v54, %v2300_v40  ;;  %vm2282_vm3 = vcmp.gt.f32.partialorder %v2266_v59, 0.0  ;;  %v2298_v42 = vmul.f32 0.2, %v2266_v59  ;;  %v18983_v39 = vmov 0  }
 0x1d6   :  { %v2328_v12 = vpack.c.bf16 %v2316_v27, %v2315_v22  ;;  %v11740_v0 = vpack.c.bf16 %v2316_v27, %v2316_v27  ;;  %6403 = vmatprep.subr.bf16.mxu1 %v18983_v39  ;;  %v15141_v3 = vrot.slane %v2876_v28, %v14159_v44  ;;  %v3523_v17 = vpack.i.b16 %v3004_v48, %v3004_v48 }
 0x1d7   :  { %v15146_v41 = vsel %vm2281_vm2, %v14956_v6, %v2297_v19  ;;  %v15148_v13 = vsel %vm2282_vm3, %v2266_v59, %v2298_v42  ;;  %v3530_v33 = vpack.i.b16 %v15073_v34, %v15073_v34  ;;  %v3537_v56 = vpack.i.b16 %v15076_v63, %v15076_v63  ;;  %6404 = vmatpush1.bf16.msra.mxu1 %v13740_v23  ;;  %v13749_v63 = vld [vmem:[%s18796_s4 + $0x238] sm:$0xff]  }
 0x1d8   :  { %v2495_v28 = vrot.slane %v2328_v12, %v14177_v61  ;;  %v15161_v6 = vrot.slane %v3502_v4, %v14159_v44  ;;  %v15164_v62 = vrot.slane %v3509_v2, %v14159_v44  ;;  %12666 = vmatpush3.bf16.msra.mxu0 %v13741_v32  ;;  %v15169_v34 = vrot.slane %v3516_v51, %v14159_v44  ;;  %v13744_v32 = vld [vmem:[%s18796_s4 + $0x70] sm:$0xff]  }
 0x1d9   :  { %v2502_v54 = vrot.slane %v11740_v0, %v14177_v61  ;;  %v2248_v57 = vmul.f32 %v14880_v46, %v2209_v31  ;;  %6405 = vmatprep.subr.bf16.mxu1 %v18983_v39  ;;  %v15180_v19 = vrot.slane %v3523_v17, %v14159_v44  ;;  %v3558_v40 = vpack.i.b16 %v15085_v43, %v15085_v43  ;;  %v13742_v31 = vld [vmem:[%s18796_s4 + $0x68] sm:$0xff]  }
 0x1da   :  { %v3565_v59 = vpack.i.b16 %v15088_v8, %v15088_v8  ;;  %v2503_v25 = vcombine.high %v2495_v28, %v2495_v28  ;;  %v3572_v4 = vpack.i.b16 %v15091_v16, %v15091_v16  ;;  %v3579_v2 = vpack.i.b16 %v15094_v20, %v15094_v20  ;;  %12667 = vmatprep.subr.bf16.mxu0 %v13743_v10 }
 0x1db   :  { %v3586_v22 = vpack.i.b16 %v15105_v15, %v15105_v15  ;;  %v2246_v27 = vmul.f32 %v14880_v46, %v2201_v50  ;;  %v15197_v43 = vrot.slane %v3530_v33, %v14159_v44  ;;  %v3593_v8 = vpack.i.b16 %v15128_v18, %v15128_v18  ;;  %6406 = vmatpush1.bf16.msra.mxu1 %v13742_v31  ;;  %v13745_v50 = vld [vmem:[%s18796_s4 + $0x228] sm:$0xff]  }
 0x1dc   :  { %v3600_v42 = vpack.i.b16 %v3048_v55, %v3048_v55  ;;  %12668 = vmatpush3.bf16.msra.mxu0 %v13743_v10  ;;  %v15202_v16 = vrot.slane %v3537_v56, %v14159_v44  ;;  %v2504_v51 = vcombine.high %v2502_v54, %v2502_v54  ;;  %v15205_v20 = vrot.slane %v2495_v28, %v14177_v61 }
 0x1dd   :  { %v2271_v15 = vadd.f32 %v14888_v45, %v2248_v57  ;;  %6407 = vmatprep.subr.bf16.mxu1 %v18983_v39  ;;  %v15213_v18 = vrot.slane %v3558_v40, %v14159_v44  ;;  %v15216_v55 = vrot.slane %v3565_v59, %v14159_v44  ;;  %v3607_v12 = vpack.i.b16 %v15141_v3, %v15141_v3 }
 0x1de   :  { %v15221_v0 = vrot.slane %v2503_v25, %v14177_v61  ;;  %v15227_v17 = vrot.slane %v3572_v4, %v14159_v44  ;;  %v15230_v23 = vrot.slane %v3579_v2, %v14159_v44  ;;  %v15233_v33 = vrot.slane %v3586_v22, %v14159_v44  ;;  %12669 = vmatprep.subr.bf16.mxu0 %v13745_v50 }
 0x1df   :  { %18984 = vst [vmem:[#allocation19_spill] sm:$0xff] %v15216_v55  ;;  %v2269_v56 = vadd.f32 %v14888_v45, %v2246_v27  ;;  %v15237_v3 = vrot.slane %v3593_v8, %v14159_v44  ;;  %v15240_v28 = vrot.slane %v3600_v42, %v14159_v44  ;;  %v15243_v57 = vrot.slane %v2502_v54, %v14177_v61  ;;  %v13747_v54 = vld [vmem:[%s18796_s4 + $0x230] sm:$0xff]  }
 0x1e0   :  { %v2249_v10 = vmul.f32 %v14880_v46, %v15109_v49  ;;  %6408 = vmatpush1.bf16.msra.mxu1 %v13744_v32  ;;  %v15248_v40 = vrot.slane %v2504_v51, %v14177_v61  ;;  %v2533_v59 = vcombine.high %v15205_v20, %v15205_v20  ;;  %v2303_v25 = vmul.f32 0.2, %v2271_v15  ;;  %12670 = vmatpush3.bf16.msra.mxu0 %v13745_v50 }
 0x1e1   :  { %v2247_v31 = vmul.f32 %v14880_v46, %v15113_v36  ;;  %v15258_v4 = vrot.slane %v3607_v12, %v14159_v44  ;;  %v2535_v49 = vcombine.high %v15221_v0, %v15221_v0  ;;  %v2782_v2 = vunpack.i.h.s16 %v15205_v20  ;;  %6409 = vmatprep.subr.bf16.mxu1 %v18983_v39  ;;  %v13746_v36 = vld [vmem:[%s18796_s4 + $0x78] sm:$0xff]   ;;  %12671 = vmatprep.subr.bf16.mxu0 %v13747_v54 }
 0x1e2   :  { %vm2287_vm4 = vcmp.gt.f32.partialorder %v2271_v15, 0.0  ;;  %v11739_v27 = vpack.c.bf16 %v15148_v13, %v15148_v13  ;;  %v2301_v8 = vmul.f32 0.2, %v2269_v56  ;;  %v15273_v42 = vmul.f32 %v14880_v46, %v15117_v60 }
 0x1e3   :  { %v2534_v51 = vcombine.high %v15243_v57, %v15243_v57  ;;  %v2784_v50 = vunpack.i.h.s16 %v15221_v0  ;;  %vm2285_vm5 = vcmp.gt.f32.partialorder %v2269_v56, 0.0  ;;  %v15279_v12 = vadd.f32 %v14888_v45, %v2249_v10 }
 0x1e4   :  { %6410 = vmatpush1.bf16.msra.mxu1 %v13746_v36  ;;  %v2536_v32 = vcombine.high %v15248_v40, %v15248_v40  ;;  %v2786_v22 = vunpack.i.h.s16 %v2533_v59  ;;  %v15283_v48 = vsel %vm2287_vm4, %v2271_v15, %v2303_v25  ;;  %v15286_v60 = vadd.f32 %v14888_v45, %v2247_v31  ;;  %12672 = vmatpush3.bf16.msra.mxu0 %v13747_v54 }
 0x1e5   :  { %v2788_v53 = vunpack.i.h.s16 %v2535_v49  ;;  %v11769_v10 = vpack.i.b16 %v15205_v20, %v15205_v20  ;;  %v2910_v52 = vpack.i.b16 %v2782_v2, %v2782_v2  ;;  %v18985_v36 = vpack.c.bf16 %v15148_v13, %v15146_v41  ;;  %6668 = vmatprep.subr.bf16.mxu1 %v18983_v39  ;;  %12673 = vmatprep.subr.bf16.mxu0 %v13749_v63 }
 0x1e6   :  { %v2790_v15 = vunpack.i.h.s16 %v15243_v57  ;;  %v2792_v25 = vunpack.i.h.s16 %v15248_v40  ;;  %v2453_v31 = vrot.slane %v11739_v27, %v14177_v61  ;;  %v15302_v54 = vsel %vm2285_vm5, %v2269_v56, %v2301_v8 }
 0x1e7   :  { %v2446_v37 = vrot.slane %v18985_v36, %v14177_v61  ;;  %v2794_v26 = vunpack.i.h.s16 %v2534_v51  ;;  %v11770_v20 = vpack.i.b16 %v15221_v0, %v15221_v0  ;;  %v2912_v2 = vpack.i.b16 %v2784_v50, %v2784_v50 }
 0x1e8   :  { %v15307_v41 = vmul.f32 0.2, %v15279_v12  ;;  %v2796_v13 = vunpack.i.h.s16 %v2536_v32  ;;  %v11771_v36 = vpack.i.b16 %v2533_v59, %v2533_v59  ;;  %v2914_v21 = vpack.i.b16 %v2786_v22, %v2786_v22  ;;  %12674 = vmatpush3.bf16.msra.mxu0 %v13749_v63 }
 0x1e9   :  { %v11772_v5 = vpack.i.b16 %v2535_v49, %v2535_v49  ;;  %v2916_v58 = vpack.i.b16 %v2788_v53, %v2788_v53  ;;  %v11773_v27 = vpack.i.b16 %v15243_v57, %v15243_v57  ;;  %v3184_v56 = vrot.slane %v11769_v10, %v14159_v44  ;;  %9733 = vmatprep.subr.bf16.mxu0 %v18983_v39 }
 0x1ea   :  { %v3188_v8 = vrot.slane %v2910_v52, %v14159_v44  ;;  %v2918_v0 = vpack.i.b16 %v2790_v15, %v2790_v15  ;;  %v11774_v50 = vpack.i.b16 %v15248_v40, %v15248_v40  ;;  %v2920_v9 = vpack.i.b16 %v2792_v25, %v2792_v25 }
 0x1eb   :  { %v11775_v38 = vpack.i.b16 %v2534_v51, %v2534_v51  ;;  %v2922_v59 = vpack.i.b16 %v2794_v26, %v2794_v26  ;;  %v11776_v22 = vpack.i.b16 %v2536_v32, %v2536_v32  ;;  %v3192_v63 = vrot.slane %v11770_v20, %v14159_v44 }
 0x1ec   :  { %v3196_v53 = vrot.slane %v2912_v2, %v14159_v44  ;;  %v2924_v49 = vpack.i.b16 %v2796_v13, %v2796_v13  ;;  %v3200_v57 = vrot.slane %v11771_v36, %v14159_v44  ;;  %v3204_v10 = vrot.slane %v2914_v21, %v14159_v44 }
 0x1ed   :  { %v3208_v52 = vrot.slane %v11772_v5, %v14159_v44  ;;  %v3212_v15 = vrot.slane %v2916_v58, %v14159_v44  ;;  %v3216_v1 = vrot.slane %v11773_v27, %v14159_v44  ;;  %v3838_v40 = vpack.i.b16 %v3184_v56, %v3184_v56 }
 0x1ee   :  { %v3845_v25 = vpack.i.b16 %v3188_v8, %v3188_v8  ;;  %v3220_v26 = vrot.slane %v2918_v0, %v14159_v44  ;;  %v3224_v51 = vrot.slane %v11774_v50, %v14159_v44  ;;  %v3228_v32 = vrot.slane %v2920_v9, %v14159_v44 }
 0x1ef   :  { %v2454_v20 = vcombine.high %v2446_v37, %v2446_v37  ;;  %v3232_v2 = vrot.slane %v11775_v38, %v14159_v44  ;;  %v3236_v13 = vrot.slane %v2922_v59, %v14159_v44  ;;  %v3852_v21 = vpack.i.b16 %v3192_v63, %v3192_v63 }
 0x1f0   :  { %v3859_v36 = vpack.i.b16 %v3196_v53, %v3196_v53  ;;  %vm2288_vm6 = vcmp.gt.f32.partialorder %v15279_v12, 0.0  ;;  %v15330_v58 = vrot.slane %v11776_v22, %v14159_v44  ;;  %v15333_v5 = vrot.slane %v2924_v49, %v14159_v44 }
 0x1f1   :  { %v3866_v27 = vpack.i.b16 %v3200_v57, %v3200_v57  ;;  %v2455_v56 = vcombine.high %v2453_v31, %v2453_v31  ;;  %v15336_v8 = vrot.slane %v3838_v40, %v14159_v44  ;;  %v15339_v9 = vrot.slane %v3845_v25, %v14159_v44 }
 0x1f2   :  { %18986 = vst [vmem:[#allocation20_spill] sm:$0xff] %v15330_v58  ;;  %18987 = vst [vmem:[#allocation21_spill] sm:$0xff] %v15333_v5  ;;  %v3873_v38 = vpack.i.b16 %v3204_v10, %v3204_v10  ;;  %v2462_v0 = vrot.slane %v2446_v37, %v14177_v61  ;;  %v3880_v50 = vpack.i.b16 %v3208_v52, %v3208_v52  ;;  %vm2286_vm7 = vcmp.gt.f32.partialorder %v15286_v60, 0.0 }
 0x1f3   :  { %18988 = vst [vmem:[#allocation22_spill] sm:$0xff] %v15336_v8  ;;  %18989 = vst [vmem:[#allocation23_spill] sm:$0xff] %v15339_v9  ;;  %v3887_v59 = vpack.i.b16 %v3212_v15, %v3212_v15  ;;  %v3894_v63 = vpack.i.b16 %v3216_v1, %v3216_v1  ;;  %v2476_v22 = vrot.slane %v2454_v20, %v14177_v61 }
 0x1f4   :  { %v15344_v53 = vrot.slane %v3852_v21, %v14159_v44  ;;  %v15347_v49 = vrot.slane %v3859_v36, %v14159_v44  ;;  %v3901_v57 = vpack.i.b16 %v3220_v26, %v3220_v26  ;;  %v2469_v40 = vrot.slane %v2453_v31, %v14177_v61 }
 0x1f5   :  { %v15351_v25 = vrot.slane %v3866_v27, %v14159_v44  ;;  %v3908_v10 = vpack.i.b16 %v3224_v51, %v3224_v51  ;;  %v3915_v55 = vpack.i.b16 %v3228_v32, %v3228_v32  ;;  %v2483_v37 = vrot.slane %v2455_v56, %v14177_v61 }
 0x1f6   :  { %18990 = vst [vmem:[#allocation24_spill] sm:$0xff] %v15344_v53  ;;  %18991 = vst [vmem:[#allocation25_spill] sm:$0xff] %v15347_v49  ;;  %v15355_v1 = vrot.slane %v3873_v38, %v14159_v44  ;;  %v3922_v52 = vpack.i.b16 %v3232_v2, %v3232_v2  ;;  %v3929_v15 = vpack.i.b16 %v3236_v13, %v3236_v13 }
 0x1f7   :  { %18992 = vst [vmem:[#allocation26_spill] sm:$0xff] %v15351_v25  ;;  %v2484_v20 = vcombine.high %v2462_v0, %v2462_v0  ;;  %v15358_v21 = vrot.slane %v3880_v50, %v14159_v44  ;;  %v15361_v26 = vrot.slane %v3887_v59, %v14159_v44  ;;  %v15364_v31 = vrot.slane %v3894_v63, %v14159_v44 }
 0x1f8   :  { %18993 = vst [vmem:[#allocation27_spill] sm:$0xff] %v15355_v1  ;;  %v2486_v36 = vcombine.high %v2476_v22, %v2476_v22  ;;  %v15367_v51 = vrot.slane %v3901_v57, %v14159_v44  ;;  %v2485_v13 = vcombine.high %v2469_v40, %v2469_v40  ;;  %v15374_v27 = vrot.slane %v3908_v10, %v14159_v44 }
 0x1f9   :  { %18994 = vst [vmem:[#allocation28_spill] sm:$0xff] %v15358_v21  ;;  %18995 = vst [vmem:[#allocation29_spill] sm:$0xff] %v15361_v26  ;;  %v15377_v56 = vrot.slane %v3915_v55, %v14159_v44  ;;  %v2487_v38 = vcombine.high %v2483_v37, %v2483_v37  ;;  %v2766_v50 = vunpack.i.h.s16 %v2462_v0  ;;  %v15380_v59 = vrot.slane %v3922_v52, %v14159_v44 }
 0x1fa   :  { %18996 = vst [vmem:[#allocation30_spill] sm:$0xff] %v15364_v31  ;;  %18997 = vst [vmem:[#allocation31_spill] sm:$0xff] %v15367_v51  ;;  %v15383_v63 = vrot.slane %v3929_v15, %v14159_v44  ;;  %v2768_v57 = vunpack.i.h.s16 %v2476_v22  ;;  %v2770_v32 = vunpack.i.h.s16 %v2484_v20  ;;  %v2772_v31 = vunpack.i.h.s16 %v2486_v36 }
 0x1fb   :  { %18998 = vst [vmem:[#allocation32_spill] sm:$0xff] %v15374_v27  ;;  %18999 = vst [vmem:[#allocation33_spill] sm:$0xff] %v15377_v56  ;;  %v2774_v51 = vunpack.i.h.s16 %v2469_v40  ;;  %v2320_v55 = vsel %vm2288_vm6, %v15279_v12, %v15307_v41  ;;  %v2776_v10 = vunpack.i.h.s16 %v2483_v37  ;;  %v2778_v27 = vunpack.i.h.s16 %v2485_v13 }
 0x1fc   :  { %19000 = vst [vmem:[#allocation34_spill] sm:$0xff] %v15380_v59  ;;  %19001 = vst [vmem:[#allocation35_spill] sm:$0xff] %v15383_v63  ;;  %v11761_v56 = vpack.i.b16 %v2462_v0, %v2462_v0  ;;  %v2780_v52 = vunpack.i.h.s16 %v2487_v38  ;;  %v2894_v15 = vpack.i.b16 %v2766_v50, %v2766_v50  ;;  %v11762_v59 = vpack.i.b16 %v2476_v22, %v2476_v22 }
 0x1fd   :  { %v2302_v63 = vmul.f32 0.2, %v15286_v60  ;;  %v2896_v58 = vpack.i.b16 %v2768_v57, %v2768_v57  ;;  %v11763_v5 = vpack.i.b16 %v2484_v20, %v2484_v20  ;;  %v2898_v2 = vpack.i.b16 %v2770_v32, %v2770_v32 }
 0x1fe   :  { %v11764_v9 = vpack.i.b16 %v2486_v36, %v2486_v36  ;;  %v2900_v8 = vpack.i.b16 %v2772_v31, %v2772_v31  ;;  %v11765_v21 = vpack.i.b16 %v2469_v40, %v2469_v40  ;;  %v2902_v26 = vpack.i.b16 %v2774_v51, %v2774_v51 }
 0x1ff   :  { %v11766_v25 = vpack.i.b16 %v2483_v37, %v2483_v37  ;;  %v2904_v1 = vpack.i.b16 %v2776_v10, %v2776_v10  ;;  %v11767_v12 = vpack.i.b16 %v2485_v13, %v2485_v13  ;;  %v2906_v41 = vpack.i.b16 %v2778_v27, %v2778_v27 }
 0x200   :  { %v3120_v0 = vrot.slane %v11761_v56, %v14159_v44  ;;  %v11768_v53 = vpack.i.b16 %v2487_v38, %v2487_v38  ;;  %v2908_v49 = vpack.i.b16 %v2780_v52, %v2780_v52  ;;  %v3124_v50 = vrot.slane %v2894_v15, %v14159_v44 }
 0x201   :  { %v3128_v22 = vrot.slane %v11762_v59, %v14159_v44  ;;  %v3132_v57 = vrot.slane %v2896_v58, %v14159_v44  ;;  %v3136_v20 = vrot.slane %v11763_v5, %v14159_v44  ;;  %v3140_v31 = vrot.slane %v2898_v2, %v14159_v44 }
 0x202   :  { %v3144_v40 = vrot.slane %v11764_v9, %v14159_v44  ;;  %v3148_v37 = vrot.slane %v2900_v8, %v14159_v44  ;;  %v3152_v36 = vrot.slane %v11765_v21, %v14159_v44  ;;  %v3156_v51 = vrot.slane %v2902_v26, %v14159_v44 }
 0x203   :  { %v3160_v32 = vrot.slane %v11766_v25, %v14159_v44  ;;  %v3726_v13 = vpack.i.b16 %v3120_v0, %v3120_v0  ;;  %v2330_v27 = vpack.c.bf16 %v2320_v55, %v15283_v48  ;;  %v11742_v56 = vpack.c.bf16 %v2320_v55, %v2320_v55 }
 0x204   :  { %v2318_v58 = vsel %vm2286_vm7, %v15286_v60, %v2302_v63  ;;  %v3733_v5 = vpack.i.b16 %v3124_v50, %v3124_v50  ;;  %v2217_v8 = vadd.f32 %v14940_v47, %v14869_v29  ;;  %v2228_v9 = vadd.f32 %v14945_v30, %v14882_v14 }
 0x205   :  { %v2329_v2 = vpack.c.bf16 %v2318_v58, %v15302_v54  ;;  %v3164_v21 = vrot.slane %v2904_v1, %v14159_v44  ;;  %v3740_v25 = vpack.i.b16 %v3128_v22, %v3128_v22  ;;  %v3747_v26 = vpack.i.b16 %v3132_v57, %v3132_v57 }
 0x206   :  { %v2593_v48 = vrot.slane %v2330_v27, %v14177_v61  ;;  %v3168_v38 = vrot.slane %v11767_v12, %v14159_v44  ;;  %v3172_v59 = vrot.slane %v2906_v41, %v14159_v44  ;;  %v3754_v60 = vpack.i.b16 %v3136_v20, %v3136_v20 }
 0x207   :  { %v3761_v63 = vpack.i.b16 %v3140_v31, %v3140_v31  ;;  %v3176_v54 = vrot.slane %v11768_v53, %v14159_v44  ;;  %v3180_v55 = vrot.slane %v2908_v49, %v14159_v44  ;;  %v15420_v29 = vrot.slane %v3726_v13, %v14159_v44 }
 0x208   :  { %v2600_v14 = vrot.slane %v11742_v56, %v14177_v61  ;;  %v15424_v47 = vrot.slane %v3733_v5, %v14159_v44  ;;  %v3768_v30 = vpack.i.b16 %v3144_v40, %v3144_v40  ;;  %v3775_v1 = vpack.i.b16 %v3148_v37, %v3148_v37 }
 0x209   :  { %19002 = vst [vmem:[#allocation36_spill] sm:$0xff] %v15420_v29  ;;  %v2601_v10 = vcombine.high %v2593_v48, %v2593_v48  ;;  %v15427_v52 = vrot.slane %v3740_v25, %v14159_v44  ;;  %v15430_v15 = vrot.slane %v3747_v26, %v14159_v44  ;;  %v3782_v53 = vpack.i.b16 %v3152_v36, %v3152_v36 }
 0x20a   :  { %19003 = vst [vmem:[#allocation37_spill] sm:$0xff] %v15424_v47  ;;  %v3789_v12 = vpack.i.b16 %v3156_v51, %v3156_v51  ;;  %v15433_v49 = vrot.slane %v3754_v60, %v14159_v44  ;;  %v15436_v41 = vrot.slane %v3761_v63, %v14159_v44  ;;  %v3796_v0 = vpack.i.b16 %v3160_v32, %v3160_v32 }
 0x20b   :  { %v2609_v50 = vrot.slane %v2593_v48, %v14177_v61  ;;  %v3803_v22 = vpack.i.b16 %v3164_v21, %v3164_v21  ;;  %v3810_v57 = vpack.i.b16 %v3168_v38, %v3168_v38  ;;  %v3817_v20 = vpack.i.b16 %v3172_v59, %v3172_v59 }
 0x20c   :  { %v2602_v31 = vcombine.high %v2600_v14, %v2600_v14  ;;  %v15440_v40 = vrot.slane %v3768_v30, %v14159_v44  ;;  %v15443_v37 = vrot.slane %v3775_v1, %v14159_v44  ;;  %v3824_v36 = vpack.i.b16 %v3176_v54, %v3176_v54 }
 0x20d   :  { %v2623_v51 = vrot.slane %v2601_v10, %v14177_v61  ;;  %v15447_v13 = vrot.slane %v3782_v53, %v14159_v44  ;;  %v15450_v32 = vrot.slane %v3789_v12, %v14159_v44  ;;  %v3831_v27 = vpack.i.b16 %v3180_v55, %v3180_v55 }
 0x20e   :  { %v11741_v56 = vpack.c.bf16 %v2318_v58, %v2318_v58  ;;  %v15453_v5 = vrot.slane %v3796_v0, %v14159_v44  ;;  %v2616_v21 = vrot.slane %v2600_v14, %v14177_v61  ;;  %v2631_v25 = vcombine.high %v2609_v50, %v2609_v50 }
 0x20f   :  { %19004 = vst [vmem:[#allocation38_spill] sm:$0xff] %v15447_v13  ;;  %19005 = vst [vmem:[#allocation39_spill] sm:$0xff] %v15450_v32  ;;  %v15458_v26 = vadd.f32 %v14888_v45, %v15273_v42  ;;  %v15461_v48 = vrot.slane %v3803_v22, %v14159_v44  ;;  %v15464_v38 = vrot.slane %v3810_v57, %v14159_v44  ;;  %v2814_v54 = vunpack.i.h.s16 %v2609_v50 }
 0x210   :  { %19006 = vst [vmem:[#allocation40_spill] sm:$0xff] %v15453_v5  ;;  %v15467_v59 = vrot.slane %v3817_v20, %v14159_v44  ;;  %v2630_v58 = vrot.slane %v2602_v31, %v14177_v61  ;;  %v15471_v60 = vrot.slane %v3824_v36, %v14159_v44  ;;  %v2633_v63 = vcombine.high %v2623_v51, %v2623_v51 }
 0x211   :  { %19007 = vst [vmem:[#allocation41_spill] sm:$0xff] %v15461_v48  ;;  %19008 = vst [vmem:[#allocation42_spill] sm:$0xff] %v15464_v38  ;;  %v2544_v55 = vrot.slane %v2329_v2, %v14177_v61  ;;  %v15475_v45 = vrot.slane %v3831_v27, %v14159_v44  ;;  %v2816_v14 = vunpack.i.h.s16 %v2623_v51  ;;  %v15480_v30 = vrot.slane %v11741_v56, %v14177_v61 }
 0x212   :  { %19009 = vst [vmem:[#allocation43_spill] sm:$0xff] %v15467_v59  ;;  %19010 = vst [vmem:[#allocation44_spill] sm:$0xff] %v15471_v60  ;;  %v2632_v10 = vcombine.high %v2616_v21, %v2616_v21  ;;  %v2818_v53 = vunpack.i.h.s16 %v2631_v25  ;;  %v15485_v12 = vmul.f32 0.2, %v15458_v26  ;;  %v2634_v0 = vcombine.high %v2630_v58, %v2630_v58 }
 0x213   :  { %19011 = vst [vmem:[#allocation45_spill] sm:$0xff] %v15475_v45  ;;  %v11785_v2 = vpack.i.b16 %v2609_v50, %v2609_v50  ;;  %v15488_v22 = vmul.f32 %v14880_v46, %v2217_v8  ;;  %v15491_v57 = vmul.f32 %v14880_v46, %v2228_v9  ;;  %v2820_v20 = vunpack.i.h.s16 %v2633_v63 }
 0x214   :  { %v2942_v31 = vpack.i.b16 %v2814_v54, %v2814_v54  ;;  %v11786_v36 = vpack.i.b16 %v2623_v51, %v2623_v51  ;;  %v2552_v27 = vcombine.high %v2544_v55, %v2544_v55  ;;  %v2822_v56 = vunpack.i.h.s16 %v2616_v21 }
 0x215   :  { %v2824_v42 = vunpack.i.h.s16 %v2630_v58  ;;  %v2944_v1 = vpack.i.b16 %v2816_v14, %v2816_v14  ;;  %v2553_v32 = vcombine.high %v15480_v30, %v15480_v30  ;;  %v2826_v13 = vunpack.i.h.s16 %v2632_v10 }
 0x216   :  { %v11787_v60 = vpack.i.b16 %v2631_v25, %v2631_v25  ;;  %v2946_v45 = vpack.i.b16 %v2818_v53, %v2818_v53  ;;  %v15496_v50 = vrot.slane %v2544_v55, %v14177_v61  ;;  %v2828_v8 = vunpack.i.h.s16 %v2634_v0 }
 0x217   :  { %v11788_v38 = vpack.i.b16 %v2633_v63, %v2633_v63  ;;  %v3312_v46 = vrot.slane %v11785_v2, %v14159_v44  ;;  %v15501_v9 = vrot.slane %v15480_v30, %v14177_v61  ;;  %v2948_v51 = vpack.i.b16 %v2820_v20, %v2820_v20 }
 0x218   :  { %v11789_v54 = vpack.i.b16 %v2616_v21, %v2616_v21  ;;  %v3316_v14 = vrot.slane %v2942_v31, %v14159_v44  ;;  %v3320_v59 = vrot.slane %v11786_v36, %v14159_v44  ;;  %v2950_v5 = vpack.i.b16 %v2822_v56, %v2822_v56 }
 0x219   :  { %v11790_v25 = vpack.i.b16 %v2630_v58, %v2630_v58  ;;  %v2952_v53 = vpack.i.b16 %v2824_v42, %v2824_v42  ;;  %v3324_v55 = vrot.slane %v2944_v1, %v14159_v44  ;;  %v11791_v48 = vpack.i.b16 %v2632_v10, %v2632_v10 }
 0x21a   :  { %v2954_v47 = vpack.i.b16 %v2826_v13, %v2826_v13  ;;  %v3328_v63 = vrot.slane %v11787_v60, %v14159_v44  ;;  %v3332_v2 = vrot.slane %v2946_v45, %v14159_v44  ;;  %v11792_v29 = vpack.i.b16 %v2634_v0, %v2634_v0 }
 0x21b   :  { %v2956_v30 = vpack.i.b16 %v2828_v8, %v2828_v8  ;;  %v3336_v20 = vrot.slane %v11788_v38, %v14159_v44  ;;  %v4062_v21 = vpack.i.b16 %v3312_v46, %v3312_v46  ;;  %v3340_v31 = vrot.slane %v2948_v51, %v14159_v44 }
 0x21c   :  { %v3344_v36 = vrot.slane %v11789_v54, %v14159_v44  ;;  %v4069_v56 = vpack.i.b16 %v3316_v14, %v3316_v14  ;;  %v4076_v58 = vpack.i.b16 %v3320_v59, %v3320_v59  ;;  %v3348_v42 = vrot.slane %v2950_v5, %v14159_v44 }
 0x21d   :  { %v3352_v1 = vrot.slane %v11790_v25, %v14159_v44  ;;  %v3356_v13 = vrot.slane %v2952_v53, %v14159_v44  ;;  %v4083_v60 = vpack.i.b16 %v3324_v55, %v3324_v55  ;;  %v3360_v45 = vrot.slane %v11791_v48, %v14159_v44 }
 0x21e   :  { %v3364_v10 = vrot.slane %v2954_v47, %v14159_v44  ;;  %v4090_v0 = vpack.i.b16 %v3328_v63, %v3328_v63  ;;  %v4097_v38 = vpack.i.b16 %v3332_v2, %v3332_v2  ;;  %v3368_v8 = vrot.slane %v11792_v29, %v14159_v44 }
 0x21f   :  { %v3372_v46 = vrot.slane %v2956_v30, %v14159_v44  ;;  %v15519_v51 = vrot.slane %v4062_v21, %v14159_v44  ;;  %v2574_v5 = vrot.slane %v2552_v27, %v14177_v61  ;;  %v15523_v59 = vrot.slane %v4069_v56, %v14159_v44 }
 0x220   :  { %v15526_v54 = vrot.slane %v4076_v58, %v14159_v44  ;;  %v4104_v48 = vpack.i.b16 %v3336_v20, %v3336_v20  ;;  %v4111_v14 = vpack.i.b16 %v3340_v31, %v3340_v31  ;;  %v15529_v47 = vrot.slane %v4083_v60, %v14159_v44 }
 0x221   :  { %19012 = vst [vmem:[#allocation46_spill] sm:$0xff] %v15519_v51  ;;  %19013 = vst [vmem:[#allocation47_spill] sm:$0xff] %v15523_v59  ;;  %v4118_v25 = vpack.i.b16 %v3344_v36, %v3344_v36  ;;  %v4125_v29 = vpack.i.b16 %v3348_v42, %v3348_v42  ;;  %v4132_v53 = vpack.i.b16 %v3352_v1, %v3352_v1  ;;  %vm2291_vm8 = vcmp.gt.f32.partialorder %v15458_v26, 0.0 }
 0x222   :  { %19014 = vst [vmem:[#allocation48_spill] sm:$0xff] %v15526_v54  ;;  %19015 = vst [vmem:[#allocation49_spill] sm:$0xff] %v15529_v47  ;;  %v15532_v55 = vrot.slane %v4090_v0, %v14159_v44  ;;  %v15535_v63 = vrot.slane %v4097_v38, %v14159_v44  ;;  %v4139_v27 = vpack.i.b16 %v3356_v13, %v3356_v13  ;;  %v2798_v0 = vunpack.i.h.s16 %v15496_v50 }
 0x223   :  { %v2581_v2 = vrot.slane %v2553_v32, %v14177_v61  ;;  %v4146_v30 = vpack.i.b16 %v3360_v45, %v3360_v45  ;;  %v4153_v21 = vpack.i.b16 %v3364_v10, %v3364_v10  ;;  %v2582_v20 = vcombine.high %v15496_v50, %v15496_v50 }
 0x224   :  { %19016 = vst [vmem:[#allocation50_spill] sm:$0xff] %v15532_v55  ;;  %19017 = vst [vmem:[#allocation51_spill] sm:$0xff] %v15535_v63  ;;  %v2584_v31 = vcombine.high %v2574_v5, %v2574_v5  ;;  %v15541_v56 = vrot.slane %v4104_v48, %v14159_v44  ;;  %v15544_v36 = vrot.slane %v4111_v14, %v14159_v44  ;;  %v2800_v38 = vunpack.i.h.s16 %v2574_v5 }
 0x225   :  { %v4160_v58 = vpack.i.b16 %v3368_v8, %v3368_v8  ;;  %v4167_v42 = vpack.i.b16 %v3372_v46, %v3372_v46  ;;  %v15547_v1 = vrot.slane %v4118_v25, %v14159_v44  ;;  %v15550_v13 = vrot.slane %v4125_v29, %v14159_v44 }
 0x226   :  { %19018 = vst [vmem:[#allocation52_spill] sm:$0xff] %v15541_v56  ;;  %19019 = vst [vmem:[#allocation53_spill] sm:$0xff] %v15544_v36  ;;  %v15553_v32 = vrot.slane %v4132_v53, %v14159_v44  ;;  %v2583_v60 = vcombine.high %v15501_v9, %v15501_v9  ;;  %v15558_v45 = vrot.slane %v4139_v27, %v14159_v44  ;;  %v2802_v48 = vunpack.i.h.s16 %v2582_v20 }
 0x227   :  { %19020 = vst [vmem:[#allocation54_spill] sm:$0xff] %v15547_v1  ;;  %19021 = vst [vmem:[#allocation55_spill] sm:$0xff] %v15550_v13  ;;  %v2585_v10 = vcombine.high %v2581_v2, %v2581_v2  ;;  %v15562_v8 = vrot.slane %v4146_v30, %v14159_v44  ;;  %v15565_v46 = vrot.slane %v4153_v21, %v14159_v44  ;;  %v2804_v14 = vunpack.i.h.s16 %v2584_v31 }
 0x228   :  { %19022 = vst [vmem:[#allocation56_spill] sm:$0xff] %v15553_v32  ;;  %19023 = vst [vmem:[#allocation57_spill] sm:$0xff] %v15558_v45  ;;  %v15568_v25 = vrot.slane %v4160_v58, %v14159_v44  ;;  %v15571_v29 = vrot.slane %v4167_v42, %v14159_v44  ;;  %v2806_v53 = vunpack.i.h.s16 %v15501_v9  ;;  %v2808_v27 = vunpack.i.h.s16 %v2581_v2 }
 0x229   :  { %19024 = vst [vmem:[#allocation58_spill] sm:$0xff] %v15562_v8  ;;  %19025 = vst [vmem:[#allocation59_spill] sm:$0xff] %v15565_v46  ;;  %v2810_v8 = vunpack.i.h.s16 %v2583_v60  ;;  %v11777_v21 = vpack.i.b16 %v15496_v50, %v15496_v50  ;;  %v2812_v58 = vunpack.i.h.s16 %v2585_v10  ;;  %v11778_v46 = vpack.i.b16 %v2574_v5, %v2574_v5 }
 0x22a   :  { %19026 = vst [vmem:[#allocation60_spill] sm:$0xff] %v15568_v25  ;;  %19027 = vst [vmem:[#allocation61_spill] sm:$0xff] %v15571_v29  ;;  %v2926_v25 = vpack.i.b16 %v2798_v0, %v2798_v0  ;;  %v2928_v42 = vpack.i.b16 %v2800_v38, %v2800_v38  ;;  %v11779_v29 = vpack.i.b16 %v2582_v20, %v2582_v20 }
 0x22b   :  { %v2930_v45 = vpack.i.b16 %v2802_v48, %v2802_v48  ;;  %v11780_v56 = vpack.i.b16 %v2584_v31, %v2584_v31  ;;  %v2932_v36 = vpack.i.b16 %v2804_v14, %v2804_v14  ;;  %v11781_v32 = vpack.i.b16 %v15501_v9, %v15501_v9 }
 0x22c   :  { %v2934_v59 = vpack.i.b16 %v2806_v53, %v2806_v53  ;;  %v11782_v51 = vpack.i.b16 %v2581_v2, %v2581_v2  ;;  %v2936_v30 = vpack.i.b16 %v2808_v27, %v2808_v27  ;;  %v11783_v13 = vpack.i.b16 %v2583_v60, %v2583_v60 }
 0x22d   :  { %v2938_v1 = vpack.i.b16 %v2810_v8, %v2810_v8  ;;  %v11784_v55 = vpack.i.b16 %v2585_v10, %v2585_v10  ;;  %v3248_v50 = vrot.slane %v11777_v21, %v14159_v44  ;;  %v2940_v63 = vpack.i.b16 %v2812_v58, %v2812_v58 }
 0x22e   :  { %v3252_v0 = vrot.slane %v2926_v25, %v14159_v44  ;;  %v3256_v5 = vrot.slane %v11778_v46, %v14159_v44  ;;  %v3260_v20 = vrot.slane %v2928_v42, %v14159_v44  ;;  %v3264_v31 = vrot.slane %v11779_v29, %v14159_v44  ;;  %v15605_v46 = vld [vmem:[%s18798_s3] ss:$0 sm:$0xff] }
 0x22f   :  { %v3268_v38 = vrot.slane %v2930_v45, %v14159_v44  ;;  %v15590_v9 = vrot.slane %v11780_v56, %v14159_v44  ;;  %v15593_v2 = vrot.slane %v2932_v36, %v14159_v44  ;;  %v3280_v60 = vrot.slane %v11781_v32, %v14159_v44 }
 0x230   :  { %v15597_v10 = vrot.slane %v2934_v59, %v14159_v44  ;;  %v15600_v8 = vrot.slane %v11782_v51, %v14159_v44  ;;  %v2276_v56 = vadd.f32 %v15605_v46, %v15491_v57  ;;  %v15610_v45 = vrot.slane %v2936_v30, %v14159_v44  ;;  %v13748_v51 = vld [vmem:[%s18796_s4 + $0x80] sm:$0xff]  }
 0x231   :  { %v3950_v36 = vpack.i.b16 %v3248_v50, %v3248_v50  ;;  %v2220_v32 = vadd.f32 %v14983_v11, %v14875_v7  ;;  %v15615_v59 = vrot.slane %v18983_v39, 1  ;;  %v15621_v48 = vrot.slane %v11783_v13, %v14159_v44 }
 0x232   :  { %v3957_v14 = vpack.i.b16 %v3252_v0, %v3252_v0  ;;  %vm2292_vm9 = vcmp.gt.f32.partialorder %v2276_v56, 0.0  ;;  %v2308_v57 = vmul.f32 0.2, %v2276_v56  ;;  %v3300_v25 = vrot.slane %v2938_v1, %v14159_v44 }
 0x233   :  { %19028 = vst [vmem:[#allocation62_spill] sm:$0xff] %v15615_v59  ;;  %v3964_v29 = vpack.i.b16 %v3256_v5, %v3256_v5  ;;  %v3971_v53 = vpack.i.b16 %v3260_v20, %v3260_v20  ;;  %v3978_v27 = vpack.i.b16 %v3264_v31, %v3264_v31  ;;  %6411 = vmatprep.mubr.bf16.mxu1 %v15615_v59 }
 0x234   :  { %v15626_v7 = vrot.slane %v11784_v55, %v14159_v44  ;;  %v3985_v11 = vpack.i.b16 %v3268_v38, %v3268_v38  ;;  %v2323_v13 = vsel %vm2291_vm8, %v15458_v26, %v15485_v12  ;;  %v2324_v30 = vsel %vm2292_vm9, %v2276_v56, %v2308_v57  ;;  %6412 = vmatmul.mubr.bf16.vlgmr.msra.gmra.mrb[64].mxu1 %v18983_v39  ;;  %v13750_v55 = vld [vmem:[%s18796_s4 + $0x88] sm:$0xff]  }
 0x235   :  { %v15634_v21 = vrot.slane %v2940_v63, %v14159_v44  ;;  %v15637_v1 = vrot.slane %v3950_v36, %v14159_v44  ;;  %v2332_v58 = vpack.c.bf16 %v2324_v30, %v2323_v13  ;;  %v11744_v42 = vpack.c.bf16 %v2324_v30, %v2324_v30  ;;  %6669 = vmatpush1.bf16.msra.mxu1 %v13748_v51  ;;  %v19033_v12 = vld [vmem:[#allocation19_spill] sm:$0xff] }
 0x236   :  { %v15643_v50 = vrot.slane %v3957_v14, %v14159_v44  ;;  %v19029_v63 = vpack.i.b16 %v15082_v24, %v15082_v24  ;;  %6670 = vmatprep.subr.bf16.mxu1 %v18983_v39  ;;  %v15655_v5 = vrot.slane %v3964_v29, %v14159_v44  ;;  %v15658_v20 = vrot.slane %v3971_v53, %v14159_v44 }
 0x237   :  { %v15661_v31 = vrot.slane %v3978_v27, %v14159_v44  ;;  %v2691_v38 = vrot.slane %v2332_v58, %v14177_v61  ;;  %v15665_v56 = vrot.slane %v3985_v11, %v14159_v44  ;;  %v4006_v36 = vpack.i.b16 %v3280_v60, %v3280_v60  ;;  %v13998_v27 = vld [vmem:[%s18797_s2] ss:$0 sm:$0xff]  ;;  %v13751_v60 = vld [vmem:[%s18796_s4 + $0x90] sm:$0xff]  }
 0x238   :  { %v3556_v0 = vrot.slane %v19029_v63, %v14159_v44  ;;  %v2698_v24 = vrot.slane %v11744_v42, %v14177_v61  ;;  %v19030_v51 = vpack.i.b16 %v15079_v35, %v15079_v35  ;;  %v4013_v57 = vpack.i.b16 %v15597_v10, %v15597_v10 }
 0x239   :  { %v4020_v29 = vpack.i.b16 %v15600_v8, %v15600_v8  ;;  %v2699_v53 = vcombine.high %v2691_v38, %v2691_v38  ;;  %v2251_v11 = vmul.f32 %v13998_v27, %v2220_v32  ;;  %6671 = vmatpush1.bf16.msra.mxu1 %v13750_v55  ;;  %v4027_v35 = vpack.i.b16 %v15610_v45, %v15610_v45  ;;  %v13752_v55 = vld [vmem:[%s18796_s4 + $0x98] sm:$0xff]  }
 0x23a   :  { %v3549_v14 = vrot.slane %v19030_v51, %v14159_v44  ;;  %v4034_v10 = vpack.i.b16 %v15621_v48, %v15621_v48  ;;  %v4670_v8 = vcombine.low %v15169_v34, %v15180_v19  ;;  %6672 = vmatprep.subr.bf16.mxu1 %v18983_v39  ;;  %v4041_v30 = vpack.i.b16 %v3300_v25, %v3300_v25 }
 0x23b   :  { %v4048_v32 = vpack.i.b16 %v15626_v7, %v15626_v7  ;;  %v4055_v58 = vpack.i.b16 %v15634_v21, %v15634_v21  ;;  %v2273_v42 = vadd.f32 %v15605_v46, %v15488_v22  ;;  %v15696_v45 = vrot.slane %v4006_v36, %v14159_v44 }
 0x23c   :  { %v4672_v13 = vcombine.low %v3549_v14, %v3556_v0  ;;  %v2700_v48 = vcombine.high %v2698_v24, %v2698_v24  ;;  %v4669_v34 = vcombine.low %v15161_v6, %v15164_v62  ;;  %v4671_v19 = vcombine.low %v15197_v43, %v15202_v16 }
 0x23d   :  { %19031 = vst [vmem:[#allocation63_spill] sm:$0xff] %v15696_v45  ;;  %v15703_v25 = vrot.slane %v4013_v57, %v14159_v44  ;;  %v15706_v7 = vrot.slane %v2691_v38, %v14177_v61  ;;  %v15709_v21 = vrot.slane %v2699_v53, %v14177_v61  ;;  %v2274_v22 = vadd.f32 %v15605_v46, %v2251_v11 }
 0x23e   :  { %6673 = vmatpush1.bf16.msra.mxu1 %v13751_v60  ;;  %v15716_v6 = vrot.slane %v4020_v29, %v14159_v44  ;;  %v15719_v62 = vrot.slane %v4027_v35, %v14159_v44  ;;  %v4686_v43 = vrot.slane %v4670_v8, %v14177_v61  ;;  %v4700_v16 = vrot.slane %v4672_v13, %v14177_v61 }
 0x23f   :  { %19032 = vst [vmem:[#allocation64_spill] sm:$0xff] %v15703_v25  ;;  %6674 = vmatprep.subr.bf16.mxu1 %v18983_v39  ;;  %v15725_v63 = vrot.slane %v4034_v10, %v14159_v44  ;;  %v15728_v46 = vrot.slane %v4041_v30, %v14159_v44  ;;  %v2305_v0 = vmul.f32 0.2, %v2273_v42  ;;  %v15731_v38 = vrot.slane %v2698_v24, %v14177_v61  ;;  %v13753_v24 = vld [vmem:[%s18796_s4 + $0xa0] sm:$0xff]  }
 0x240   :  { %vm2289_vm11 = vcmp.gt.f32.partialorder %v2273_v42, 0.0  ;;  %v15734_v36 = vrot.slane %v2700_v48, %v14177_v61  ;;  %v4679_v51 = vrot.slane %v4669_v34, %v14177_v61  ;;  %v4693_v14 = vrot.slane %v4671_v19, %v14177_v61 }
 0x241   :  { %v15739_v57 = vrot.slane %v4048_v32, %v14159_v44  ;;  %v2729_v29 = vcombine.high %v15706_v7, %v15706_v7  ;;  %v2731_v53 = vcombine.high %v15709_v21, %v15709_v21  ;;  %v2306_v27 = vmul.f32 0.2, %v2274_v22 }
 0x242   :  { %6675 = vmatpush1.bf16.msra.mxu1 %v13752_v55  ;;  %v15749_v11 = vrot.slane %v4055_v58, %v14159_v44  ;;  %vm2290_vm12 = vcmp.gt.f32.partialorder %v2274_v22, 0.0  ;;  %v4701_v60 = vcombine.low %v4679_v51, %v4686_v43  ;;  %v4702_v35 = vcombine.low %v4693_v14, %v4700_v16  ;;  %v13754_v16 = vld [vmem:[%s18796_s4 + $0xa8] sm:$0xff]  }
 0x243   :  { %6676 = vmatprep.subr.bf16.mxu1 %v18983_v39  ;;  %v2321_v8 = vsel %vm2289_vm11, %v2273_v42, %v2305_v0  ;;  %v2730_v13 = vcombine.high %v15731_v38, %v15731_v38  ;;  %v2846_v30 = vunpack.i.h.s16 %v15706_v7  ;;  %v2732_v32 = vcombine.high %v15734_v36, %v15734_v36 }
 0x244   :  { %v2848_v58 = vunpack.i.h.s16 %v15709_v21  ;;  %v2850_v19 = vunpack.i.h.s16 %v2729_v29  ;;  %v2852_v55 = vunpack.i.h.s16 %v2731_v53  ;;  %v2322_v43 = vsel %vm2290_vm12, %v2274_v22, %v2306_v27 }
 0x245   :  { %v2854_v0 = vunpack.i.h.s16 %v15731_v38  ;;  %v2856_v51 = vunpack.i.h.s16 %v15734_v36  ;;  %v15773_v14 = vrot.slane %v4701_v60, %v14177_v61  ;;  %v4716_v10 = vrot.slane %v4702_v35, %v14177_v61 }
 0x246   :  { %6677 = vmatpush1.bf16.msra.mxu1 %v13753_v24  ;;  %v2858_v22 = vunpack.i.h.s16 %v2730_v13  ;;  %v11801_v27 = vpack.i.b16 %v15706_v7, %v15706_v7  ;;  %v2974_v24 = vpack.i.b16 %v2846_v30, %v2846_v30  ;;  %v19034_v26 = vcombine.low %v15213_v18, %v19033_v12 }
 0x247   :  { %6678 = vmatprep.subr.bf16.mxu1 %v18983_v39  ;;  %v2860_v42 = vunpack.i.h.s16 %v2732_v32  ;;  %v11802_v60 = vpack.i.b16 %v15709_v21, %v15709_v21  ;;  %v2976_v48 = vpack.i.b16 %v2848_v58, %v2848_v58  ;;  %v11803_v59 = vpack.i.b16 %v2729_v29, %v2729_v29 }
 0x248   :  { %v15783_v34 = vrot.slane %v19034_v26, %v14177_v61  ;;  %v2978_v35 = vpack.i.b16 %v2850_v19, %v2850_v19  ;;  %v11804_v54 = vpack.i.b16 %v2731_v53, %v2731_v53  ;;  %v2980_v47 = vpack.i.b16 %v2852_v55, %v2852_v55 }
 0x249   :  { %v11805_v25 = vpack.i.b16 %v15731_v38, %v15731_v38  ;;  %v2982_v7 = vpack.i.b16 %v2854_v0, %v2854_v0  ;;  %v11806_v30 = vpack.i.b16 %v15734_v36, %v15734_v36  ;;  %v2984_v18 = vpack.i.b16 %v2856_v51, %v2856_v51 }
 0x24a   :  { %6679 = vmatpush1.bf16.msra.mxu1 %v13754_v16  ;;  %v11807_v26 = vpack.i.b16 %v2730_v13, %v2730_v13  ;;  %v2986_v12 = vpack.i.b16 %v2858_v22, %v2858_v22  ;;  %v11808_v45 = vpack.i.b16 %v2732_v32, %v2732_v32  ;;  %v3440_v21 = vrot.slane %v11801_v27, %v14159_v44  ;;  %v13755_v32 = vld [vmem:[%s18796_s4 + $0xb0] sm:$0xff]  }
 0x24b   :  { %6680 = vmatprep.subr.bf16.mxu1 %v18983_v39  ;;  %v3444_v29 = vrot.slane %v2974_v24, %v14159_v44  ;;  %v2988_v53 = vpack.i.b16 %v2860_v42, %v2860_v42  ;;  %v3448_v58 = vrot.slane %v11802_v60, %v14159_v44  ;;  %v3452_v38 = vrot.slane %v2976_v48, %v14159_v44 }
 0x24c   :  { %v3456_v19 = vrot.slane %v11803_v59, %v14159_v44  ;;  %v3460_v55 = vrot.slane %v2978_v35, %v14159_v44  ;;  %v3464_v36 = vrot.slane %v11804_v54, %v14159_v44  ;;  %v3468_v13 = vrot.slane %v2980_v47, %v14159_v44 }
 0x24d   :  { %v15801_v16 = vrot.slane %v11805_v25, %v14159_v44  ;;  %v15807_v42 = vrot.slane %v2982_v7, %v14159_v44  ;;  %v15810_v48 = vrot.slane %v11806_v30, %v14159_v44  ;;  %v2331_v59 = vpack.c.bf16 %v2322_v43, %v2321_v8 }
 0x24e   :  { %v11743_v0 = vpack.c.bf16 %v2322_v43, %v2322_v43  ;;  %v15813_v51 = vrot.slane %v2984_v18, %v14159_v44  ;;  %v15816_v54 = vrot.slane %v11807_v26, %v14159_v44  ;;  %v4286_v47 = vpack.i.b16 %v3440_v21, %v3440_v21  ;;  %6681 = vmatpush1.bf16.msra.mxu1 %v13755_v32 }
 0x24f   :  { %19035 = vst [vmem:[#allocation19_spill] sm:$0xff] %v15801_v16  ;;  %19036 = vst [vmem:[#allocation65_spill] sm:$0xff] %v15807_v42  ;;  %v4293_v25 = vpack.i.b16 %v3444_v29, %v3444_v29  ;;  %v4300_v22 = vpack.i.b16 %v3448_v58, %v3448_v58  ;;  %v4307_v27 = vpack.i.b16 %v3452_v38, %v3452_v38  ;;  %6682 = vmatprep.subr.bf16.mxu1 %v18983_v39  ;;  %v19055_v16 = vld [vmem:[#allocation5_spill] sm:$0xff]  ;;  %v19070_v42 = vld [vmem:[#allocation16_spill] sm:$0xff] }
 0x250   :  { %19037 = vst [vmem:[#allocation66_spill] sm:$0xff] %v15810_v48  ;;  %19038 = vst [vmem:[#allocation67_spill] sm:$0xff] %v15813_v51  ;;  %v2642_v24 = vrot.slane %v2331_v59, %v14177_v61  ;;  %v2649_v60 = vrot.slane %v11743_v0, %v14177_v61  ;;  %v15822_v8 = vrot.slane %v2986_v12, %v14159_v44 }
 0x251   :  { %19039 = vst [vmem:[#allocation68_spill] sm:$0xff] %v15816_v54  ;;  %v15825_v43 = vrot.slane %v11808_v45, %v14159_v44  ;;  %v4314_v35 = vpack.i.b16 %v3456_v19, %v3456_v19  ;;  %v4321_v7 = vpack.i.b16 %v3460_v55, %v3460_v55  ;;  %v4328_v30 = vpack.i.b16 %v3464_v36, %v3464_v36 }
 0x252   :  { %19040 = vst [vmem:[#allocation69_spill] sm:$0xff] %v15822_v8  ;;  %v4335_v18 = vpack.i.b16 %v3468_v13, %v3468_v13  ;;  %v2650_v26 = vcombine.high %v2642_v24, %v2642_v24  ;;  %v2651_v21 = vcombine.high %v2649_v60, %v2649_v60  ;;  %v15828_v29 = vrot.slane %v2988_v53, %v14159_v44 }
 0x253   :  { %19041 = vst [vmem:[#allocation70_spill] sm:$0xff] %v15825_v43  ;;  %v15831_v58 = vrot.slane %v4286_v47, %v14159_v44  ;;  %v15834_v38 = vrot.slane %v4293_v25, %v14159_v44  ;;  %v2658_v12 = vrot.slane %v2642_v24, %v14177_v61  ;;  %v15838_v45 = vrot.slane %v4300_v22, %v14159_v44  ;;  %v19054_v24 = vld [vmem:[#allocation6_spill] sm:$0xff] }
 0x254   :  { %19042 = vst [vmem:[#allocation71_spill] sm:$0xff] %v15828_v29  ;;  %v15841_v19 = vrot.slane %v4307_v27, %v14159_v44  ;;  %v2672_v55 = vrot.slane %v2650_v26, %v14177_v61  ;;  %v15845_v36 = vcombine.low %v15773_v14, %v4716_v10  ;;  %v15848_v53 = vrot.slane %v4314_v35, %v14159_v44 }
 0x255   :  { %19043 = vst [vmem:[#allocation72_spill] sm:$0xff] %v15831_v58  ;;  %19044 = vst [vmem:[#allocation73_spill] sm:$0xff] %v15834_v38  ;;  %v15851_v13 = vrot.slane %v2649_v60, %v14177_v61  ;;  %v19048_v32 = vcombine.low %v15227_v17, %v15230_v23  ;;  %v19049_v0 = vcombine.low %v15240_v28, %v15258_v4  ;;  %v2830_v27 = vunpack.i.h.s16 %v2658_v12 }
 0x256   :  { %19045 = vst [vmem:[#allocation74_spill] sm:$0xff] %v15838_v45  ;;  %19046 = vst [vmem:[#allocation75_spill] sm:$0xff] %v15841_v19  ;;  %v15862_v25 = vrot.slane %v4321_v7, %v14159_v44  ;;  %v15865_v10 = vrot.slane %v4328_v30, %v14159_v44  ;;  %v15868_v14 = vrot.slane %v4335_v18, %v14159_v44  ;;  %v5454_v7 = vshrl.u32 %v15845_v36, 16  ;;  %v19059_v45 = vld [vmem:[#allocation9_spill] sm:$0xff] }
 0x257   :  { %19047 = vst [vmem:[#allocation76_spill] sm:$0xff] %v15848_v53  ;;  %v4735_v59 = vrot.slane %v19048_v32, %v14177_v61  ;;  %v4749_v47 = vrot.slane %v19049_v0, %v14177_v61  ;;  %v2679_v22 = vrot.slane %v2651_v21, %v14177_v61  ;;  %v2680_v23 = vcombine.high %v2658_v12, %v2658_v12 }
 0x258   :  { %19050 = vst [vmem:[#allocation77_spill] sm:$0xff] %v15862_v25  ;;  %19051 = vst [vmem:[#allocation78_spill] sm:$0xff] %v15865_v10  ;;  %v19053_v28 = vcombine.low %v15233_v33, %v15237_v3  ;;  %v2682_v35 = vcombine.high %v2672_v55, %v2672_v55  ;;  %v2681_v18 = vcombine.high %v15851_v13, %v15851_v13  ;;  %v2832_v32 = vunpack.i.h.s16 %v2672_v55  ;;  %v19056_v25 = vld [vmem:[#allocation8_spill] sm:$0xff] }
 0x259   :  { %19052 = vst [vmem:[#allocation79_spill] sm:$0xff] %v15868_v14  ;;  %v4750_v26 = vcombine.low %v15783_v34, %v4735_v59  ;;  %v2683_v3 = vcombine.high %v2679_v22, %v2679_v22  ;;  %v5457_v0 = vshll.u32 %v15845_v36, 16  ;;  %v11793_v17 = vpack.i.b16 %v2658_v12, %v2658_v12  ;;  %v19057_v34 = vld [vmem:[#allocation7_spill] sm:$0xff]  ;;  %v13756_v12 = vld [vmem:[%s18796_s4 + $0xb8] sm:$0xff]  }
 0x25a   :  { %v4742_v4 = vrot.slane %v19053_v28, %v14177_v61  ;;  %v2834_v28 = vunpack.i.h.s16 %v2680_v23  ;;  %v2958_v60 = vpack.i.b16 %v2830_v27, %v2830_v27  ;;  %v4768_v58 = vcombine.low %v19055_v16, %v19054_v24  ;;  %v19058_v24 = vld [vmem:[#allocation10_spill] sm:$0xff]  ;;  %6683 = vmatpush1.bf16.msra.mxu1 %v13756_v12 }
 0x25b   :  { %v2836_v30 = vunpack.i.h.s16 %v2682_v35  ;;  %v2838_v38 = vunpack.i.h.s16 %v15851_v13  ;;  %v5456_v53 = vrot.slane %v5454_v7, 7  ;;  %v4769_v59 = vcombine.low %v19057_v34, %v19056_v25  ;;  %6684 = vmatprep.subr.bf16.mxu1 %v18983_v39 }
 0x25c   :  { %v4751_v21 = vcombine.low %v4742_v4, %v4749_v47  ;;  %v2840_v47 = vunpack.i.h.s16 %v2679_v22  ;;  %v2842_v4 = vunpack.i.h.s16 %v2681_v18  ;;  %v4758_v33 = vrot.slane %v4750_v26, %v14177_v61 }
 0x25d   :  { %v2844_v36 = vunpack.i.h.s16 %v2683_v3  ;;  %v11794_v27 = vpack.i.b16 %v2672_v55, %v2672_v55  ;;  %v2960_v16 = vpack.i.b16 %v2832_v32, %v2832_v32  ;;  %v4770_v19 = vcombine.low %v19059_v45, %v19058_v24 }
 0x25e   :  { %v4765_v54 = vrot.slane %v4751_v21, %v14177_v61  ;;  %v11795_v7 = vpack.i.b16 %v2680_v23, %v2680_v23  ;;  %v2962_v51 = vpack.i.b16 %v2834_v28, %v2834_v28  ;;  %v3376_v25 = vrot.slane %v11793_v17, %v14159_v44 }
 0x25f   :  { %v3380_v34 = vrot.slane %v2958_v60, %v14159_v44  ;;  %v11796_v26 = vpack.i.b16 %v2682_v35, %v2682_v35  ;;  %v2964_v10 = vpack.i.b16 %v2836_v30, %v2836_v30  ;;  %v11797_v21 = vpack.i.b16 %v15851_v13, %v15851_v13 }
 0x260   :  { %v2966_v14 = vpack.i.b16 %v2838_v38, %v2838_v38  ;;  %v11798_v55 = vpack.i.b16 %v2679_v22, %v2679_v22  ;;  %v2968_v32 = vpack.i.b16 %v2840_v47, %v2840_v47  ;;  %v11799_v29 = vpack.i.b16 %v2681_v18, %v2681_v18 }
 0x261   :  { %v2970_v43 = vpack.i.b16 %v2842_v4, %v2842_v4  ;;  %v11800_v45 = vpack.i.b16 %v2683_v3, %v2683_v3  ;;  %v2972_v23 = vpack.i.b16 %v2844_v36, %v2844_v36  ;;  %v15908_v28 = vrot.slane %v11794_v27, %v14159_v44 }
 0x262   :  { %v15911_v17 = vrot.slane %v2960_v16, %v14159_v44  ;;  %v15914_v60 = vrot.slane %v11795_v7, %v14159_v44  ;;  %v15917_v38 = vrot.slane %v2962_v51, %v14159_v44  ;;  %v4174_v13 = vpack.i.b16 %v3376_v25, %v3376_v25 }
 0x263   :  { %v4181_v22 = vpack.i.b16 %v3380_v34, %v3380_v34  ;;  %v15920_v35 = vrot.slane %v11796_v26, %v14159_v44  ;;  %v15923_v30 = vrot.slane %v2964_v10, %v14159_v44  ;;  %v15926_v18 = vrot.slane %v11797_v21, %v14159_v44  ;;  %v13837_v34 = vld [vmem:[%s18799_s7 + $0x100] sm:$0xff]  }
 0x264   :  { %v15929_v3 = vrot.slane %v2966_v14, %v14159_v44  ;;  %v15932_v47 = vrot.slane %v11798_v55, %v14159_v44  ;;  %v15935_v51 = vrot.slane %v2968_v32, %v14159_v44  ;;  %v15938_v4 = vrot.slane %v11799_v29, %v14159_v44  ;;  %v19069_v14 = vld [vmem:[#allocation13_spill] sm:$0xff] }
 0x265   :  { %v15941_v12 = vrot.slane %v2970_v43, %v14159_v44  ;;  %v15944_v10 = vrot.slane %v11800_v45, %v14159_v44  ;;  %v15947_v36 = vrot.slane %v2972_v23, %v14159_v44  ;;  %v15954_v16 = vrot.slane %v4174_v13, %v14159_v44  ;;  %v19065_v45 = vld [vmem:[#allocation3_spill] sm:$0xff]  ;;  %v19066_v23 = vld [vmem:[#allocation4_spill] sm:$0xff] }
 0x266   :  { %v15957_v29 = vrot.slane %v4181_v22, %v14159_v44  ;;  %v5459_v25 = vor.u32 %v5457_v0, %v5456_v53  ;;  %v5613_v26 = vsel %vm14233_vm10, %v5456_v53, 0  ;;  %v4766_v21 = vcombine.low %v4758_v33, %v4765_v54 }
 0x267   :  { %19060 = vst [vmem:[#allocation6_spill] sm:$0xff] %v15944_v10  ;;  %19061 = vst [vmem:[#allocation5_spill] sm:$0xff] %v15947_v36  ;;  %v5883_v55 = vrot.slane %v5613_v26, 1  ;;  %v5646_v32 = vshll.u32 %v5613_v26, 16  ;;  %v19067_v13 = vcombine.low %v19065_v45, %v19066_v23  ;;  %v4784_v43 = vrot.slane %v4768_v58, %v14177_v61  ;;  %v13757_v58 = vld [vmem:[%s18796_s4 + $0xc0] sm:$0xff]  }
 0x268   :  { %19062 = vst [vmem:[#allocation8_spill] sm:$0xff] %v15954_v16  ;;  %19063 = vst [vmem:[#allocation7_spill] sm:$0xff] %v15957_v29  ;;  %v15974_v24 = vsel %vm14233_vm10, 0, %v5459_v25  ;;  %v5461_v27 = vshrl.u32 %v4766_v21, 16  ;;  %v4791_v0 = vrot.slane %v4769_v59, %v14177_v61  ;;  %v4798_v7 = vrot.slane %v4770_v19, %v14177_v61  ;;  %v19072_v16 = vld [vmem:[#allocation18_spill] sm:$0xff]  ;;  %v19073_v29 = vld [vmem:[#allocation17_spill] sm:$0xff]  ;;  %6685 = vmatpush1.bf16.msra.mxu1 %v13757_v58 }
 0x269   :  { %v4777_v22 = vrot.slane %v19067_v13, %v14177_v61  ;;  %v5882_v54 = vrot.slane %v15974_v24, 1  ;;  %v5464_v53 = vshll.u32 %v4766_v21, 16  ;;  %v5639_v33 = vshrl.u32 %v15974_v24, 16  ;;  %v19068_v13 = vld [vmem:[#allocation14_spill] sm:$0xff]  ;;  %v19071_v21 = vld [vmem:[#allocation15_spill] sm:$0xff]  ;;  %6686 = vmatprep.subr.bf16.mxu1 %v18983_v39 }
 0x26a   :  { %v5641_v26 = vshll.u32 %v15974_v24, 16  ;;  %v5463_v45 = vrot.slane %v5461_v27, 7  ;;  %v4800_v25 = vcombine.low %v4791_v0, %v4798_v7  ;;  %v4817_v48 = vcombine.low %v19069_v14, %v19068_v13  ;;  %v19074_v0 = vld [vmem:[#allocation11_spill] sm:$0xff] }
 0x26b   :  { %v4799_v23 = vcombine.low %v4777_v22, %v4784_v43  ;;  %v15987_v59 = vsel %vm5879_vm13, %v5882_v54, %v5883_v55  ;;  %v4818_v8 = vcombine.low %v19071_v21, %v19070_v42  ;;  %v4819_v36 = vcombine.low %v19073_v29, %v19072_v16  ;;  %v19075_v54 = vld [vmem:[#allocation12_spill] sm:$0xff] }
 0x26c   :  { %v5643_v19 = vrot.slane %v5641_v26, 1  ;;  %12675 = vmatprep.mubr.bf16.mxu0 %v15987_v59  ;;  %v5466_v10 = vor.u32 %v5464_v53, %v5463_v45  ;;  %v5614_v27 = vsel %vm14233_vm10, %v5463_v45, 0  ;;  %v4814_v14 = vrot.slane %v4800_v25, %v14177_v61 }
 0x26d   :  { %v4807_v43 = vrot.slane %v4799_v23, %v14177_v61  ;;  %v5886_v7 = vrot.slane %v5614_v27, 1  ;;  %v5648_v22 = vrot.slane %v5646_v32, 1  ;;  %v5658_v42 = vshll.u32 %v5614_v27, 16 }
 0x26e   :  { %v5644_v55 = vor.u32 %v5643_v19, %v5639_v33  ;;  %v16001_v16 = vsel %vm14233_vm10, 0, %v5466_v10  ;;  %v19076_v53 = vcombine.low %v19074_v0, %v19075_v54  ;;  %v4833_v58 = vrot.slane %v4817_v48, %v14177_v61 }
 0x26f   :  { %v4815_v29 = vcombine.low %v4807_v43, %v4814_v14  ;;  %v5885_v45 = vrot.slane %v16001_v16, 1  ;;  %v5653_v32 = vshll.u32 %v16001_v16, 16  ;;  %v4840_v33 = vrot.slane %v4818_v8, %v14177_v61 }
 0x270   :  { %v4826_v26 = vrot.slane %v19076_v53, %v14177_v61  ;;  %v16010_v23 = vsel %vm5629_vm14, %v5644_v55, %v5648_v22  ;;  %v5651_v13 = vshrl.u32 %v16001_v16, 16  ;;  %v4847_v19 = vrot.slane %v4819_v36, %v14177_v61 }
 0x271   :  { %19077 = vst [vmem:[#allocation10_spill] sm:$0xff] %v16010_v23  ;;  %6419 = vmatprep.mubr.bf16.mxu1 %v16010_v23  ;;  %v5468_v10 = vshrl.u32 %v4815_v29, 16  ;;  %v5471_v25 = vshll.u32 %v4815_v29, 16  ;;  %v16018_v21 = vsel %vm5879_vm13, %v5885_v45, %v5886_v7  ;;  %v5655_v48 = vrot.slane %v5653_v32, 1 }
 0x272   :  { %6420 = vmatmul.mubr.bf16.gmra.mrb[68].mxu1 %v15974_v24  ;;  %v4848_v27 = vcombine.low %v4826_v26, %v4833_v58  ;;  %v4866_v43 = vcombine.low %v15427_v52, %v15430_v15  ;;  %12676 = vmatmul.mubr.bf16.vlgmr.msra.gmra.mrb[80].mxu0 %v16018_v21  ;;  %v4849_v14 = vcombine.low %v4840_v33, %v4847_v19  ;;  %v19078_v52 = vld [vmem:[#allocation36_spill] sm:$0xff]  ;;  %v19079_v15 = vld [vmem:[#allocation37_spill] sm:$0xff] }
 0x273   :  { %6427 = vmatprep.mubr.bf16.mxu1 %v16010_v23  ;;  %v5470_v8 = vrot.slane %v5468_v10, 7  ;;  %v4867_v55 = vcombine.low %v15433_v49, %v15436_v41  ;;  %v4868_v36 = vcombine.low %v15440_v40, %v15443_v37  ;;  %12679 = vmatprep.mubr.bf16.mxu0 %v16018_v21  ;;  %v5656_v22 = vor.u32 %v5655_v48, %v5651_v13  ;;  %v19082_v13 = vld [vmem:[#allocation41_spill] sm:$0xff]  ;;  %v19083_v19 = vld [vmem:[#allocation40_spill] sm:$0xff] }
 0x274   :  { %v19080_v29 = vcombine.low %v19078_v52, %v19079_v15  ;;  %v4882_v54 = vrot.slane %v4866_v43, %v14177_v61  ;;  %v4856_v41 = vrot.slane %v4848_v27, %v14177_v61  ;;  %v4863_v40 = vrot.slane %v4849_v14, %v14177_v61 }
 0x275   :  { %v5473_v53 = vor.u32 %v5471_v25, %v5470_v8  ;;  %v16039_v49 = vsel %vm14233_vm10, %v5470_v8, 0  ;;  %v19081_v37 = vpack.i.b16 %v15908_v28, %v15908_v28  ;;  %v4889_v58 = vrot.slane %v4867_v55, %v14177_v61 }
 0x276   :  { %v4875_v0 = vrot.slane %v19080_v29, %v14177_v61  ;;  %v4896_v45 = vrot.slane %v4868_v36, %v14177_v61  ;;  %v5660_v10 = vrot.slane %v5658_v42, 1  ;;  %v4864_v25 = vcombine.low %v4856_v41, %v4863_v40  ;;  %v19090_v41 = vld [vmem:[#allocation45_spill] sm:$0xff] }
 0x277   :  { %v16047_v26 = vrot.slane %v19081_v37, %v14159_v44  ;;  %v16053_v33 = vsel %vm14233_vm10, 0, %v5473_v53  ;;  %v4915_v48 = vcombine.low %v19083_v19, %v19082_v13  ;;  %v19084_v28 = vpack.i.b16 %v15911_v17, %v15911_v17 }
 0x278   :  { %v4897_v32 = vcombine.low %v4875_v0, %v4882_v54  ;;  %v5888_v43 = vrot.slane %v16053_v33, 1  ;;  %v5889_v8 = vrot.slane %v16039_v49, 1  ;;  %v4898_v14 = vcombine.low %v4889_v58, %v4896_v45  ;;  %v19088_v0 = vld [vmem:[#allocation43_spill] sm:$0xff]  ;;  %v19089_v54 = vld [vmem:[#allocation42_spill] sm:$0xff] }
 0x279   :  { %v16061_v27 = vrot.slane %v19084_v28, %v14159_v44  ;;  %v19085_v55 = vpack.i.b16 %v15914_v60, %v15914_v60  ;;  %v16072_v36 = vsel %vm5629_vm14, %v5656_v22, %v5660_v10  ;;  %v5475_v52 = vshrl.u32 %v4864_v25, 16  ;;  %v19091_v60 = vld [vmem:[#allocation44_spill] sm:$0xff]  ;;  %v13758_v22 = vld [vmem:[%s18796_s4 + $0xc8] sm:$0xff]   ;;  %v19092_v45 = vld [vmem:[#allocation38_spill] sm:$0xff] }
 0x27a   :  { %19086 = vst [vmem:[#allocation9_spill] sm:$0xff] %v16072_v36  ;;  %v4905_v15 = vrot.slane %v4897_v32, %v14177_v61  ;;  %v16076_v17 = vsel %vm5879_vm13, %v5888_v43, %v5889_v8  ;;  %6428 = vmatmul.mubr.bf16.gmra.mrb[72].mxu1 %v15974_v24  ;;  %v4912_v29 = vrot.slane %v4898_v14, %v14177_v61  ;;  %v5478_v58 = vshll.u32 %v4864_v25, 16  ;;  %v19093_v32 = vld [vmem:[#allocation39_spill] sm:$0xff] }
 0x27b   :  { %v16069_v42 = vrot.slane %v19085_v55, %v14159_v44  ;;  %19087 = vst [vmem:[#allocation2_spill] sm:$0xff] %v16076_v17  ;;  %v4916_v53 = vcombine.low %v19089_v54, %v19088_v0  ;;  %v4917_v40 = vcombine.low %v19091_v60, %v19090_v41  ;;  %12680 = vmatmul.mubr.bf16.gmra.mrb[84].mxu0 %v16076_v17  ;;  %v5477_v37 = vrot.slane %v5475_v52, 7  ;;  %v19095_v0 = vld [vmem:[#allocation25_spill] sm:$0xff]  ;;  %v19096_v54 = vld [vmem:[#allocation24_spill] sm:$0xff] }
 0x27c   :  { %6435 = vmatprep.mubr.bf16.mxu1 %v16072_v36  ;;  %v19094_v10 = vcombine.low %v19092_v45, %v19093_v32  ;;  %v4931_v19 = vrot.slane %v4915_v48, %v14177_v61  ;;  %12683 = vmatprep.mubr.bf16.mxu0 %v16076_v17  ;;  %v4913_v28 = vcombine.low %v4905_v15, %v4912_v29  ;;  %v5665_v43 = vshll.u32 %v16053_v33, 16  ;;  %v19099_v45 = vld [vmem:[#allocation26_spill] sm:$0xff] }
 0x27d   :  { %v4938_v8 = vrot.slane %v4916_v53, %v14177_v61  ;;  %v4945_v14 = vrot.slane %v4917_v40, %v14177_v61  ;;  %v5480_v55 = vor.u32 %v5478_v58, %v5477_v37  ;;  %v16100_v25 = vsel %vm14233_vm10, %v5477_v37, 0  ;;  %6687 = vmatpush1.bf16.msra.mxu1 %v13758_v22  ;;  %v19098_v22 = vld [vmem:[#allocation27_spill] sm:$0xff] }
 0x27e   :  { %v4924_v13 = vrot.slane %v19094_v10, %v14177_v61  ;;  %v4964_v41 = vcombine.low %v19096_v54, %v19095_v0  ;;  %v19097_v48 = vpack.i.b16 %v15917_v38, %v15917_v38  ;;  %v5892_v29 = vrot.slane %v16100_v25, 1  ;;  %6688 = vmatprep.subr.bf16.mxu1 %v18983_v39  ;;  %v19101_v0 = vld [vmem:[#allocation28_spill] sm:$0xff] }
 0x27f   :  { %v5482_v53 = vshrl.u32 %v4913_v28, 16  ;;  %v4947_v60 = vcombine.low %v4938_v8, %v4945_v14  ;;  %v16114_v40 = vsel %vm14233_vm10, 0, %v5480_v55  ;;  %v5485_v37 = vshll.u32 %v4913_v28, 16  ;;  %v19102_v55 = vld [vmem:[#allocation22_spill] sm:$0xff] }
 0x280   :  { %v4946_v52 = vcombine.low %v4924_v13, %v4931_v19  ;;  %v16108_v15 = vrot.slane %v19097_v48, %v14159_v44  ;;  %v4965_v32 = vcombine.low %v19099_v45, %v19098_v22  ;;  %v5891_v38 = vrot.slane %v16114_v40, 1  ;;  %v19100_v19 = vld [vmem:[#allocation29_spill] sm:$0xff]  ;;  %v19103_v48 = vld [vmem:[#allocation23_spill] sm:$0xff] }
 0x281   :  { %v5484_v10 = vrot.slane %v5482_v53, 7  ;;  %v4961_v13 = vrot.slane %v4947_v60, %v14177_v61  ;;  %v4966_v8 = vcombine.low %v19101_v0, %v19100_v19  ;;  %v5667_v14 = vrot.slane %v5665_v43, 1 }
 0x282   :  { %v4954_v58 = vrot.slane %v4946_v52, %v14177_v61  ;;  %v5670_v54 = vshll.u32 %v16039_v49, 16  ;;  %v19104_v28 = vcombine.low %v19102_v55, %v19103_v48  ;;  %v4980_v52 = vrot.slane %v4964_v41, %v14177_v61  ;;  %6436 = vmatmul.mubr.bf16.gmra.mrb[76].mxu1 %v16001_v16 }
 0x283   :  { %v19105_v22 = vpack.i.b16 %v15920_v35, %v15920_v35  ;;  %v16136_v60 = vsel %vm5879_vm13, %v5891_v38, %v5892_v29  ;;  %v5487_v43 = vor.u32 %v5485_v37, %v5484_v10  ;;  %6443 = vmatprep.mubr.bf16.mxu1 %v16072_v36  ;;  %v5663_v45 = vshrl.u32 %v16053_v33, 16  ;;  %v19110_v37 = vld [vmem:[#allocation20_spill] sm:$0xff] }
 0x284   :  { %v4973_v7 = vrot.slane %v19104_v28, %v14177_v61  ;;  %19106 = vst [vmem:[#allocation3_spill] sm:$0xff] %v16136_v60  ;;  %v4962_v49 = vcombine.low %v4954_v58, %v4961_v13  ;;  %12684 = vmatmul.mubr.bf16.gmra.mrb[88].mxu0 %v16136_v60  ;;  %v4987_v41 = vrot.slane %v4965_v32, %v14177_v61  ;;  %v16159_v32 = vsel %vm14233_vm10, %v5484_v10, 0  ;;  %v19108_v28 = vld [vmem:[#allocation21_spill] sm:$0xff]  ;;  %v19115_v36 = vld [vmem:[#allocation32_spill] sm:$0xff] }
 0x285   :  { %v16133_v53 = vrot.slane %v19105_v22, %v14159_v44  ;;  %v4994_v19 = vrot.slane %v4966_v8, %v14177_v61  ;;  %v19107_v29 = vpack.i.b16 %v15923_v30, %v15923_v30  ;;  %12687 = vmatprep.mubr.bf16.mxu0 %v16136_v60  ;;  %v16155_v58 = vsel %vm14233_vm10, 0, %v5487_v43 }
 0x286   :  { %v4995_v35 = vcombine.low %v4973_v7, %v4980_v52  ;;  %v5489_v13 = vshrl.u32 %v4962_v49, 16  ;;  %v5668_v7 = vor.u32 %v5667_v14, %v5663_v45  ;;  %v5672_v0 = vrot.slane %v5670_v54, 1  ;;  %v19112_v54 = vld [vmem:[#allocation31_spill] sm:$0xff]  ;;  %v19113_v45 = vld [vmem:[#allocation30_spill] sm:$0xff] }
 0x287   :  { %v16148_v38 = vrot.slane %v19107_v29, %v14159_v44  ;;  %v4996_v8 = vcombine.low %v4987_v41, %v4994_v19  ;;  %v5894_v30 = vrot.slane %v16155_v58, 1  ;;  %v5492_v48 = vshll.u32 %v4962_v49, 16 }
 0x288   :  { %v5491_v55 = vrot.slane %v5489_v13, 7  ;;  %v19109_v52 = vpack.i.b16 %v19108_v28, %v19108_v28  ;;  %v5003_v43 = vrot.slane %v4995_v35, %v14177_v61  ;;  %v19111_v10 = vpack.i.b16 %v19110_v37, %v19110_v37  ;;  %v19114_v13 = vld [vmem:[#allocation33_spill] sm:$0xff]  ;;  %v19116_v28 = vld [vmem:[#allocation35_spill] sm:$0xff] }
 0x289   :  { %v5010_v29 = vrot.slane %v4996_v8, %v14177_v61  ;;  %v5012_v41 = vcombine.low %v19113_v45, %v19112_v54  ;;  %v5895_v19 = vrot.slane %v16159_v32, 1  ;;  %v5013_v23 = vcombine.low %v19115_v36, %v19114_v13 }
 0x28a   :  { %v3948_v22 = vrot.slane %v19109_v52, %v14159_v44  ;;  %v3941_v14 = vrot.slane %v19111_v10, %v14159_v44  ;;  %v5494_v49 = vor.u32 %v5492_v48, %v5491_v55  ;;  %v19117_v52 = vld [vmem:[#allocation34_spill] sm:$0xff]  ;;  %v16180_v35 = vsel %vm5629_vm14, %v5668_v7, %v5672_v0  ;;  %6444 = vmatmul.mubr.bf16.gmra.mrb[80].mxu1 %v16001_v16  ;;  %v13759_v7 = vld [vmem:[%s18796_s4 + $0xd0] sm:$0xff]  }
 0x28b   :  { %v5014_v60 = vcombine.low %v19117_v52, %v19116_v28  ;;  %v5011_v8 = vcombine.low %v5003_v43, %v5010_v29  ;;  %v5677_v17 = vshll.u32 %v16114_v40, 16  ;;  %v16184_v10 = vsel %vm5879_vm13, %v5894_v30, %v5895_v19  ;;  %6451 = vmatprep.mubr.bf16.mxu1 %v16180_v35  ;;  %6689 = vmatpush1.bf16.msra.mxu1 %v13759_v7 }
 0x28c   :  { %v5015_v37 = vcombine.low %v3941_v14, %v3948_v22  ;;  %v16189_v48 = vsel %vm14233_vm10, %v5491_v55, 0  ;;  %v5022_v36 = vrot.slane %v5012_v41, %v14177_v61  ;;  %v5029_v54 = vrot.slane %v5013_v23, %v14177_v61  ;;  %12688 = vmatmul.mubr.bf16.gmra.mrb[92].mxu0 %v16184_v10  ;;  %6690 = vmatprep.subr.bf16.mxu1 %v18983_v39 }
 0x28d   :  { %v16200_v0 = vsel %vm14233_vm10, 0, %v5494_v49  ;;  %v5496_v30 = vshrl.u32 %v5011_v8, 16  ;;  %v5036_v55 = vrot.slane %v5014_v60, %v14177_v61  ;;  %12691 = vmatprep.mubr.bf16.mxu0 %v16184_v10  ;;  %v19118_v43 = vpack.i.b16 %v15590_v9, %v15590_v9 }
 0x28e   :  { %v5043_v22 = vrot.slane %v5015_v37, %v14177_v61  ;;  %v5044_v23 = vcombine.low %v5022_v36, %v5029_v54  ;;  %v19119_v14 = vpack.i.b16 %v15593_v2, %v15593_v2  ;;  %v5061_v41 = vcombine.low %v15637_v1, %v15643_v50 }
 0x28f   :  { %v3997_v29 = vrot.slane %v19118_v43, %v14159_v44  ;;  %v5498_v19 = vrot.slane %v5496_v30, 7  ;;  %v5499_v60 = vshll.u32 %v5011_v8, 16  ;;  %v5062_v13 = vcombine.low %v15655_v5, %v15658_v20 }
 0x290   :  { %v4004_v45 = vrot.slane %v19119_v14, %v14159_v44  ;;  %v5045_v49 = vcombine.low %v5036_v55, %v5043_v22  ;;  %v5897_v28 = vrot.slane %v16200_v0, 1  ;;  %v5052_v9 = vrot.slane %v5044_v23, %v14177_v61 }
 0x291   :  { %v5063_v52 = vcombine.low %v15661_v31, %v15665_v56  ;;  %v5501_v2 = vor.u32 %v5499_v60, %v5498_v19  ;;  %v5071_v50 = vrot.slane %v5061_v41, %v14177_v61  ;;  %v5078_v8 = vrot.slane %v5062_v13, %v14177_v61 }
 0x292   :  { %v5064_v37 = vcombine.low %v3997_v29, %v4004_v45  ;;  %v5059_v1 = vrot.slane %v5045_v49, %v14177_v61  ;;  %v5898_v5 = vrot.slane %v16189_v48, 1  ;;  %v5679_v20 = vrot.slane %v5677_v17, 1  ;;  %6452 = vmatmul.mubr.bf16.gmra.mrb[84].mxu1 %v16053_v33 }
 0x293   :  { %v5085_v36 = vrot.slane %v5063_v52, %v14177_v61  ;;  %v4237_v31 = vpack.i.b16 %v15929_v3, %v15929_v3  ;;  %v4244_v56 = vpack.i.b16 %v15932_v47, %v15932_v47  ;;  %v5093_v30 = vcombine.low %v5071_v50, %v5078_v8  ;;  %6459 = vmatprep.mubr.bf16.mxu1 %v16180_v35  ;;  %v19120_v52 = vld [vmem:[#allocation63_spill] sm:$0xff]  ;;  %v19123_v8 = vld [vmem:[#allocation49_spill] sm:$0xff] }
 0x294   :  { %v5092_v54 = vrot.slane %v5064_v37, %v14177_v61  ;;  %v5060_v7 = vcombine.low %v5052_v9, %v5059_v1  ;;  %v16233_v55 = vsel %vm5879_vm13, %v5897_v28, %v5898_v5  ;;  %v5675_v22 = vshrl.u32 %v16114_v40, 16  ;;  %v19121_v37 = vld [vmem:[#allocation64_spill] sm:$0xff] }
 0x295   :  { %v5111_v23 = vcombine.low %v15716_v6, %v15719_v62  ;;  %v4251_v43 = vpack.i.b16 %v15935_v51, %v15935_v51  ;;  %12692 = vmatmul.mubr.bf16.gmra.mrb[96].mxu0 %v16233_v55  ;;  %v16245_v3 = vsel %vm14233_vm10, 0, %v5501_v2  ;;  %v5682_v29 = vshll.u32 %v16100_v25, 16  ;;  %v19124_v5 = vld [vmem:[#allocation48_spill] sm:$0xff] }
 0x296   :  { %v5094_v17 = vcombine.low %v5085_v36, %v5092_v54  ;;  %v5503_v14 = vshrl.u32 %v5060_v7, 16  ;;  %12695 = vmatprep.mubr.bf16.mxu0 %v16233_v55  ;;  %v5680_v45 = vor.u32 %v5679_v20, %v5675_v22  ;;  %v5101_v41 = vrot.slane %v5093_v30, %v14177_v61  ;;  %v19125_v22 = vld [vmem:[#allocation51_spill] sm:$0xff] }
 0x297   :  { %v5112_v62 = vcombine.low %v15725_v63, %v15728_v46  ;;  %v16255_v60 = vsel %vm14233_vm10, %v5498_v19, 0  ;;  %v5506_v13 = vshll.u32 %v5060_v7, 16  ;;  %v5113_v25 = vcombine.low %v15739_v57, %v15749_v11 }
 0x298   :  { %v5108_v6 = vrot.slane %v5094_v17, %v14177_v61  ;;  %v5505_v49 = vrot.slane %v5503_v14, 7  ;;  %v5900_v28 = vrot.slane %v16245_v3, 1  ;;  %v19122_v2 = vcombine.low %v19120_v52, %v19121_v37  ;;  %v19126_v17 = vld [vmem:[#allocation50_spill] sm:$0xff]  ;;  %v19127_v14 = vld [vmem:[#allocation53_spill] sm:$0xff] }
 0x299   :  { %v5127_v50 = vrot.slane %v5111_v23, %v14177_v61  ;;  %v5134_v46 = vrot.slane %v5112_v62, %v14177_v61  ;;  %v5141_v19 = vrot.slane %v5113_v25, %v14177_v61  ;;  %v5160_v20 = vcombine.low %v19124_v5, %v19123_v8  ;;  %v13760_v25 = vld [vmem:[%s18796_s4 + $0xd8] sm:$0xff]   ;;  %v19129_v37 = vld [vmem:[#allocation46_spill] sm:$0xff] }
 0x29a   :  { %v5109_v9 = vcombine.low %v5101_v41, %v5108_v6  ;;  %v5120_v1 = vrot.slane %v19122_v2, %v14177_v61  ;;  %v5508_v63 = vor.u32 %v5506_v13, %v5505_v49  ;;  %v5901_v57 = vrot.slane %v16255_v60, 1  ;;  %v19128_v41 = vld [vmem:[#allocation52_spill] sm:$0xff]  ;;  %6460 = vmatmul.mubr.bf16.gmra.mrb[88].mxu1 %v16053_v33 }
 0x29b   :  { %v5684_v11 = vrot.slane %v5682_v29, 1  ;;  %v4258_v7 = vpack.i.b16 %v15938_v4, %v15938_v4  ;;  %v5143_v30 = vcombine.low %v5134_v46, %v5141_v19  ;;  %v5161_v23 = vcombine.low %v19126_v17, %v19125_v22  ;;  %6691 = vmatpush1.bf16.msra.mxu1 %v13760_v25  ;;  %v19133_v22 = vld [vmem:[#allocation56_spill] sm:$0xff] }
 0x29c   :  { %v5510_v36 = vshrl.u32 %v5109_v9, 16  ;;  %v5142_v54 = vcombine.low %v5120_v1, %v5127_v50  ;;  %v5162_v6 = vcombine.low %v19128_v41, %v19127_v14  ;;  %v4265_v62 = vpack.i.b16 %v15941_v12, %v15941_v12  ;;  %6692 = vmatprep.subr.bf16.mxu1 %v18983_v39  ;;  %v19135_v41 = vld [vmem:[#allocation5_spill] sm:$0xff]  ;;  %v13761_v12 = vld [vmem:[%s18796_s4 + $0xe0] sm:$0xff]  }
 0x29d   :  { %v16279_v13 = vsel %vm5879_vm13, %v5900_v28, %v5901_v57  ;;  %v16283_v29 = vsel %vm5629_vm14, %v5680_v45, %v5684_v11  ;;  %v16293_v52 = vsel %vm14233_vm10, 0, %v5508_v63  ;;  %v5157_v28 = vrot.slane %v5143_v30, %v14177_v61  ;;  %v19130_v45 = vld [vmem:[#allocation47_spill] sm:$0xff] }
 0x29e   :  { %v5150_v4 = vrot.slane %v5142_v54, %v14177_v61  ;;  %12696 = vmatmul.mubr.bf16.gmra.mrb[100].mxu0 %v16279_v13  ;;  %6467 = vmatprep.mubr.bf16.mxu1 %v16283_v29  ;;  %v19131_v2 = vcombine.low %v19129_v37, %v19130_v45  ;;  %v5176_v50 = vrot.slane %v5160_v20, %v14177_v61  ;;  %v5512_v19 = vrot.slane %v5510_v36, 7  ;;  %v19132_v36 = vld [vmem:[#allocation57_spill] sm:$0xff]  ;;  %v19136_v37 = vld [vmem:[#allocation59_spill] sm:$0xff]  ;;  %v19137_v45 = vld [vmem:[#allocation58_spill] sm:$0xff] }
 0x29f   :  { %v16302_v46 = vrot.slane %v4237_v31, %v14159_v44  ;;  %12699 = vmatprep.mubr.bf16.mxu0 %v16279_v13  ;;  %v5183_v8 = vrot.slane %v5161_v23, %v14177_v61  ;;  %v5190_v63 = vrot.slane %v5162_v6, %v14177_v61  ;;  %v16309_v5 = vsel %vm14233_vm10, %v5505_v49, 0  ;;  %v19134_v49 = vld [vmem:[#allocation6_spill] sm:$0xff]  ;;  %6693 = vmatpush1.bf16.msra.mxu1 %v13761_v12 }
 0x2a0   :  { %v5169_v1 = vrot.slane %v19131_v2, %v14177_v61  ;;  %v5689_v57 = vshll.u32 %v16155_v58, 16  ;;  %v5158_v11 = vcombine.low %v5150_v4, %v5157_v28  ;;  %v5903_v31 = vrot.slane %v16293_v52, 1  ;;  %6694 = vmatprep.subr.bf16.mxu1 %v18983_v39 }
 0x2a1   :  { %v5513_v20 = vshll.u32 %v5109_v9, 16  ;;  %v5192_v30 = vcombine.low %v5183_v8, %v5190_v63  ;;  %v5209_v17 = vcombine.low %v19133_v22, %v19132_v36  ;;  %v16320_v23 = vrot.slane %v4244_v56, %v14159_v44  ;;  %v19139_v8 = vld [vmem:[#allocation60_spill] sm:$0xff]  ;;  %v19140_v36 = vld [vmem:[#allocation54_spill] sm:$0xff]  ;;  %v19141_v22 = vld [vmem:[#allocation55_spill] sm:$0xff] }
 0x2a2   :  { %v5191_v54 = vcombine.low %v5169_v1, %v5176_v50  ;;  %v4272_v14 = vpack.i.b16 %v19134_v49, %v19134_v49  ;;  %v4279_v6 = vpack.i.b16 %v19135_v41, %v19135_v41  ;;  %v5517_v4 = vshrl.u32 %v5158_v11, 16  ;;  %v19138_v50 = vld [vmem:[#allocation61_spill] sm:$0xff]  ;;  %6468 = vmatmul.mubr.bf16.gmra.mrb[92].mxu1 %v16114_v40 }
 0x2a3   :  { %v5904_v25 = vrot.slane %v16309_v5, 1  ;;  %v5515_v9 = vor.u32 %v5513_v20, %v5512_v19  ;;  %v5206_v28 = vrot.slane %v5192_v30, %v14177_v61  ;;  %v5210_v2 = vcombine.low %v19137_v45, %v19136_v37  ;;  %6475 = vmatprep.mubr.bf16.mxu1 %v16283_v29 }
 0x2a4   :  { %v16334_v47 = vrot.slane %v4251_v43, %v14159_v44  ;;  %v16337_v56 = vrot.slane %v4258_v7, %v14159_v44  ;;  %v5199_v1 = vrot.slane %v5191_v54, %v14177_v61  ;;  %v5211_v63 = vcombine.low %v19139_v8, %v19138_v50  ;;  %v19144_v50 = vld [vmem:[#allocation8_spill] sm:$0xff] }
 0x2a5   :  { %v16343_v20 = vsel %vm5879_vm13, %v5903_v31, %v5904_v25  ;;  %v5691_v30 = vrot.slane %v5689_v57, 1  ;;  %v19142_v51 = vcombine.low %v19140_v36, %v19141_v22  ;;  %v5225_v49 = vrot.slane %v5209_v17, %v14177_v61 }
 0x2a6   :  { %12700 = vmatmul.mubr.bf16.gmra.mrb[104].mxu0 %v16343_v20  ;;  %v5519_v7 = vrot.slane %v5517_v4, 7  ;;  %v5207_v54 = vcombine.low %v5199_v1, %v5206_v28  ;;  %v5232_v41 = vrot.slane %v5210_v2, %v14177_v61  ;;  %v5239_v31 = vrot.slane %v5211_v63, %v14177_v61  ;;  %v19143_v1 = vld [vmem:[#allocation7_spill] sm:$0xff] }
 0x2a7   :  { %v5218_v43 = vrot.slane %v19142_v51, %v14177_v61  ;;  %12703 = vmatprep.mubr.bf16.mxu0 %v16343_v20  ;;  %v16358_v57 = vsel %vm14233_vm10, 0, %v5515_v9  ;;  %v5687_v25 = vshrl.u32 %v16155_v58, 16  ;;  %v5694_v17 = vshll.u32 %v16159_v32, 16 }
 0x2a8   :  { %v5258_v37 = vcombine.low %v16047_v26, %v16061_v27  ;;  %v5520_v45 = vshll.u32 %v5158_v11, 16  ;;  %v5241_v28 = vcombine.low %v5232_v41, %v5239_v31  ;;  %v5259_v2 = vcombine.low %v16069_v42, %v16108_v15 }
 0x2a9   :  { %v5240_v4 = vcombine.low %v5218_v43, %v5225_v49  ;;  %v5257_v8 = vcombine.low %v19144_v50, %v19143_v1  ;;  %v16370_v9 = vsel %vm14233_vm10, %v5512_v19, 0  ;;  %v5692_v63 = vor.u32 %v5691_v30, %v5687_v25 }
 0x2aa   :  { %v5260_v32 = vcombine.low %v16133_v53, %v16148_v38  ;;  %v5906_v36 = vrot.slane %v16358_v57, 1  ;;  %v5522_v26 = vor.u32 %v5520_v45, %v5519_v7  ;;  %v5524_v27 = vshrl.u32 %v5207_v54, 16  ;;  %6476 = vmatmul.mubr.bf16.gmra.mrb[96].mxu1 %v16114_v40 }
 0x2ab   :  { %v5255_v11 = vrot.slane %v5241_v28, %v14177_v61  ;;  %v5696_v22 = vrot.slane %v5694_v17, 1  ;;  %v5274_v42 = vrot.slane %v5258_v37, %v14177_v61  ;;  %v5281_v15 = vrot.slane %v5259_v2, %v14177_v61 }
 0x2ac   :  { %v5288_v51 = vrot.slane %v5260_v32, %v14177_v61  ;;  %v4270_v19 = vrot.slane %v4265_v62, %v14159_v44  ;;  %v4284_v53 = vrot.slane %v4279_v6, %v14159_v44  ;;  %v5907_v38 = vrot.slane %v16370_v9, 1  ;;  %v19145_v62 = vld [vmem:[#allocation62_spill] sm:$0xff] }
 0x2ad   :  { %v5248_v30 = vrot.slane %v5240_v4, %v14177_v61  ;;  %v4277_v43 = vrot.slane %v4272_v14, %v14159_v44  ;;  %v16389_v49 = vsel %vm5629_vm14, %v5692_v63, %v5696_v22  ;;  %v5267_v41 = vrot.slane %v5257_v8, %v14177_v61 }
 0x2ae   :  { %v5290_v31 = vcombine.low %v5281_v15, %v5288_v51  ;;  %12704 = vmatmul.mubr.bf16.gmra.mrb[108].mxu0 %v19145_v62  ;;  %v16397_v6 = vsel %vm5879_vm13, %v5906_v36, %v5907_v38  ;;  %6483 = vmatprep.mubr.bf16.mxu1 %v16389_v49  ;;  %v16402_v14 = vsel %vm14233_vm10, 0, %v5522_v26  ;;  %v5526_v25 = vrot.slane %v5524_v27, 7  ;;  %v19150_v15 = vld [vmem:[#allocation66_spill] sm:$0xff] }
 0x2af   :  { %v5256_v17 = vcombine.low %v5248_v30, %v5255_v11  ;;  %v19146_v37 = vpack.i.b16 %v15926_v18, %v15926_v18  ;;  %12707 = vmatprep.mubr.bf16.mxu0 %v16397_v6  ;;  %v5289_v4 = vcombine.low %v5267_v41, %v5274_v42  ;;  %v5307_v28 = vcombine.low %v16320_v23, %v16334_v47  ;;  %v19147_v23 = vld [vmem:[#allocation69_spill] sm:$0xff]  ;;  %v19153_v30 = vld [vmem:[#allocation71_spill] sm:$0xff] }
 0x2b0   :  { %v16413_v2 = vsel %vm14233_vm10, %v5519_v7, 0  ;;  %v5527_v1 = vshll.u32 %v5207_v54, 16  ;;  %v5308_v50 = vcombine.low %v16337_v56, %v4270_v19  ;;  %v5309_v8 = vcombine.low %v4277_v43, %v4284_v53  ;;  %v19148_v56 = vld [vmem:[#allocation65_spill] sm:$0xff]  ;;  %v19152_v53 = vld [vmem:[#allocation70_spill] sm:$0xff] }
 0x2b1   :  { %v4235_v45 = vrot.slane %v19146_v37, %v14159_v44  ;;  %v5909_v63 = vrot.slane %v16402_v14, 1  ;;  %v5701_v32 = vshll.u32 %v16200_v0, 16  ;;  %v5304_v36 = vrot.slane %v5290_v31, %v14177_v61 }
 0x2b2   :  { %v4377_v47 = vpack.i.b16 %v19147_v23, %v19147_v23  ;;  %v5529_v26 = vor.u32 %v5527_v1, %v5526_v25  ;;  %v5531_v7 = vshrl.u32 %v5256_v17, 16  ;;  %v5337_v54 = vrot.slane %v5309_v8, %v14177_v61  ;;  %6484 = vmatmul.mubr.bf16.gmra.mrb[100].mxu1 %v16155_v58  ;;  %v19155_v8 = vld [vmem:[#allocation78_spill] sm:$0xff]  ;;  %v19156_v23 = vld [vmem:[#allocation67_spill] sm:$0xff] }
 0x2b3   :  { %v5306_v18 = vcombine.low %v4235_v45, %v16302_v46  ;;  %v19149_v27 = vpack.i.b16 %v19148_v56, %v19148_v56  ;;  %v5910_v46 = vrot.slane %v16413_v2, 1  ;;  %v5297_v22 = vrot.slane %v5289_v4, %v14177_v61  ;;  %6491 = vmatprep.mubr.bf16.mxu1 %v16389_v49 }
 0x2b4   :  { %v5323_v42 = vrot.slane %v5307_v28, %v14177_v61  ;;  %v19151_v51 = vpack.i.b16 %v19150_v15, %v19150_v15  ;;  %v4384_v38 = vpack.i.b16 %v19152_v53, %v19152_v53  ;;  %v4391_v43 = vpack.i.b16 %v19153_v30, %v19153_v30  ;;  %v19160_v15 = vld [vmem:[#allocation77_spill] sm:$0xff] }
 0x2b5   :  { %v16428_v11 = vrot.slane %v19149_v27, %v14159_v44  ;;  %v5330_v41 = vrot.slane %v5308_v50, %v14177_v61  ;;  %v16445_v31 = vsel %vm5879_vm13, %v5909_v63, %v5910_v46  ;;  %v5703_v12 = vrot.slane %v5701_v32, 1  ;;  %v19154_v50 = vld [vmem:[#allocation79_spill] sm:$0xff]  ;;  %v19159_v46 = vld [vmem:[#allocation74_spill] sm:$0xff]  ;;  %v19162_v30 = vld [vmem:[#allocation73_spill] sm:$0xff] }
 0x2b6   :  { %v16437_v19 = vrot.slane %v19151_v51, %v14159_v44  ;;  %v5305_v37 = vcombine.low %v5297_v22, %v5304_v36  ;;  %v5316_v45 = vrot.slane %v5306_v18, %v14177_v61  ;;  %12708 = vmatmul.mubr.bf16.gmra.mrb[112].mxu0 %v16445_v31  ;;  %v16453_v4 = vsel %vm14233_vm10, 0, %v5529_v26  ;;  %v19161_v51 = vld [vmem:[#allocation76_spill] sm:$0xff] }
 0x2b7   :  { %v5533_v28 = vrot.slane %v5531_v7, 7  ;;  %v5339_v1 = vcombine.low %v5330_v41, %v5337_v54  ;;  %v5358_v63 = vcombine.low %v19155_v8, %v19154_v50  ;;  %v19157_v32 = vpack.i.b16 %v19156_v23, %v19156_v23  ;;  %12711 = vmatprep.mubr.bf16.mxu0 %v16445_v31  ;;  %v19158_v54 = vld [vmem:[#allocation75_spill] sm:$0xff]  ;;  %v19163_v41 = vld [vmem:[#allocation72_spill] sm:$0xff] }
 0x2b8   :  { %v5699_v18 = vshrl.u32 %v16200_v0, 16  ;;  %v5706_v56 = vshll.u32 %v16189_v48, 16  ;;  %v5338_v27 = vcombine.low %v5316_v45, %v5323_v42  ;;  %v16466_v26 = vsel %vm14233_vm10, %v5526_v25, 0  ;;  %v19164_v48 = vld [vmem:[#allocation68_spill] sm:$0xff] }
 0x2b9   :  { %v4368_v36 = vrot.slane %v19157_v32, %v14159_v44  ;;  %v5534_v7 = vshll.u32 %v5256_v17, 16  ;;  %v5356_v22 = vcombine.low %v19159_v46, %v19158_v54  ;;  %v5357_v53 = vcombine.low %v19161_v51, %v19160_v15 }
 0x2ba   :  { %v5355_v50 = vcombine.low %v19163_v41, %v19162_v30  ;;  %v5912_v8 = vrot.slane %v16453_v4, 1  ;;  %v5704_v23 = vor.u32 %v5703_v12, %v5699_v18  ;;  %v5538_v32 = vshrl.u32 %v5305_v37, 16  ;;  %6492 = vmatmul.mubr.bf16.gmra.mrb[104].mxu1 %v16155_v58 }
 0x2bb   :  { %v19165_v42 = vpack.i.b16 %v19164_v48, %v19164_v48  ;;  %v5536_v45 = vor.u32 %v5534_v7, %v5533_v28  ;;  %v5353_v17 = vrot.slane %v5339_v1, %v14177_v61  ;;  %v5386_v54 = vrot.slane %v5358_v63, %v14177_v61 }
 0x2bc   :  { %v4382_v46 = vrot.slane %v4377_v47, %v14159_v44  ;;  %v5913_v15 = vrot.slane %v16466_v26, 1  ;;  %v5708_v51 = vrot.slane %v5706_v56, 1  ;;  %v5346_v30 = vrot.slane %v5338_v27, %v14177_v61  ;;  %v13762_v56 = vld [vmem:[%s18796_s4 + $0xe8] sm:$0xff]  }
 0x2bd   :  { %v4375_v25 = vrot.slane %v19165_v42, %v14159_v44  ;;  %v5372_v12 = vrot.slane %v5356_v22, %v14177_v61  ;;  %v5379_v18 = vrot.slane %v5357_v53, %v14177_v61  ;;  %v4389_v41 = vrot.slane %v4384_v38, %v14159_v44  ;;  %v19166_v53 = vld [vmem:[#allocation19_spill] sm:$0xff]  ;;  %6695 = vmatpush1.bf16.msra.mxu1 %v13762_v56 }
 0x2be   :  { %v4396_v48 = vrot.slane %v4391_v43, %v14159_v44  ;;  %v16489_v7 = vsel %vm5879_vm13, %v5912_v8, %v5913_v15  ;;  %v16493_v47 = vsel %vm5629_vm14, %v5704_v23, %v5708_v51  ;;  %v5540_v1 = vrot.slane %v5538_v32, 7  ;;  %6696 = vmatprep.subr.bf16.mxu1 %v18983_v39 }
 0x2bf   :  { %v5365_v63 = vrot.slane %v5355_v50, %v14177_v61  ;;  %12712 = vmatmul.mubr.bf16.gmra.mrb[116].mxu0 %v16489_v7  ;;  %6499 = vmatprep.mubr.bf16.mxu1 %v16493_v47  ;;  %v16503_v38 = vsel %vm14233_vm10, 0, %v5536_v45  ;;  %v5354_v43 = vcombine.low %v5346_v30, %v5353_v17  ;;  %v5388_v27 = vcombine.low %v5379_v18, %v5386_v54 }
 0x2c0   :  { %v5407_v22 = vcombine.low %v4389_v41, %v4396_v48  ;;  %v19167_v8 = vpack.i.b16 %v19166_v53, %v19166_v53  ;;  %12715 = vmatprep.mubr.bf16.mxu0 %v16489_v7  ;;  %v5541_v23 = vshll.u32 %v5305_v37, 16  ;;  %v16512_v32 = vsel %vm14233_vm10, %v5533_v28, 0 }
 0x2c1   :  { %v5387_v42 = vcombine.low %v5365_v63, %v5372_v12  ;;  %v5405_v45 = vcombine.low %v16437_v19, %v4368_v36  ;;  %v5406_v15 = vcombine.low %v4375_v25, %v4382_v46  ;;  %v5915_v17 = vrot.slane %v16503_v38, 1 }
 0x2c2   :  { %v4347_v50 = vrot.slane %v19167_v8, %v14159_v44  ;;  %v5543_v54 = vor.u32 %v5541_v23, %v5540_v1  ;;  %v5713_v51 = vshll.u32 %v16245_v3, 16  ;;  %v5545_v44 = vshrl.u32 %v5354_v43, 16  ;;  %6500 = vmatmul.mubr.bf16.gmra.mrb[108].mxu1 %v16200_v0 }
 0x2c3   :  { %v5402_v30 = vrot.slane %v5388_v27, %v14177_v61  ;;  %v5435_v18 = vrot.slane %v5407_v22, %v14177_v61  ;;  %v5916_v28 = vrot.slane %v16512_v32, 1  ;;  %v5395_v12 = vrot.slane %v5387_v42, %v14177_v61  ;;  %6507 = vmatprep.mubr.bf16.mxu1 %v16493_v47 }
 0x2c4   :  { %v5404_v37 = vcombine.low %v4347_v50, %v16428_v11  ;;  %v5421_v19 = vrot.slane %v5405_v45, %v14177_v61  ;;  %v5428_v36 = vrot.slane %v5406_v15, %v14177_v61  ;;  %v16531_v46 = vsel %vm14233_vm10, 0, %v5543_v54 }
 0x2c5   :  { %v16526_v25 = vsel %vm5879_vm13, %v5915_v17, %v5916_v28  ;;  %v5715_v11 = vrot.slane %v5713_v51, 1  ;;  %v5547_v41 = vrot.slane %v5545_v44, 7  ;;  %v5403_v48 = vcombine.low %v5395_v12, %v5402_v30 }
 0x2c6   :  { %v5414_v63 = vrot.slane %v5404_v37, %v14177_v61  ;;  %v5437_v56 = vcombine.low %v5428_v36, %v5435_v18  ;;  %v5711_v27 = vshrl.u32 %v16245_v3, 16  ;;  %v5718_v22 = vshll.u32 %v16255_v60, 16 }
 0x2c7   :  { %12716 = vmatmul.mubr.bf16.gmra.mrb[120].mxu0 %v16526_v25  ;;  %v16541_v53 = vsel %vm14233_vm10, %v5540_v1, 0  ;;  %v5548_v8 = vshll.u32 %v5354_v43, 16  ;;  %v5918_v23 = vrot.slane %v16531_v46, 1  ;;  %v5552_v15 = vshrl.u32 %v5403_v48, 16 }
 0x2c8   :  { %12719 = vmatprep.mubr.bf16.mxu0 %v16526_v25  ;;  %v5436_v50 = vcombine.low %v5414_v63, %v5421_v19  ;;  %v5716_v42 = vor.u32 %v5715_v11, %v5711_v27  ;;  %v5451_v17 = vrot.slane %v5437_v56, %v14177_v61  ;;  %v5919_v54 = vrot.slane %v16541_v53, 1  ;;  %v13763_v19 = vld [vmem:[%s18796_s4 + $0xf0] sm:$0xff]  }
 0x2c9   :  { %v5550_v45 = vor.u32 %v5548_v8, %v5547_v41  ;;  %v5720_v51 = vrot.slane %v5718_v22, 1  ;;  %v5554_v30 = vrot.slane %v5552_v15, 7  ;;  %v5555_v18 = vshll.u32 %v5403_v48, 16  ;;  %6697 = vmatpush1.bf16.msra.mxu1 %v13763_v19 }
 0x2ca   :  { %v5444_v44 = vrot.slane %v5436_v50, %v14177_v61  ;;  %v16548_v60 = vsel %vm5879_vm13, %v5918_v23, %v5919_v54  ;;  %6508 = vmatmul.mubr.bf16.gmra.mrb[112].mxu1 %v16200_v0  ;;  %v16563_v61 = vsel %vm14233_vm10, %v5547_v41, 0  ;;  %v5725_v12 = vshll.u32 %v16293_v52, 16  ;;  %6698 = vmatprep.subr.bf16.mxu1 %v18983_v39 }
 0x2cb   :  { %v16552_v1 = vsel %vm5629_vm14, %v5716_v42, %v5720_v51  ;;  %v16558_v43 = vsel %vm14233_vm10, 0, %v5550_v45  ;;  %v5557_v36 = vor.u32 %v5555_v18, %v5554_v30  ;;  %v5922_v63 = vrot.slane %v16563_v61, 1 }
 0x2cc   :  { %6515 = vmatprep.mubr.bf16.mxu1 %v16552_v1  ;;  %v5452_v37 = vcombine.low %v5444_v44, %v5451_v17  ;;  %v5921_v28 = vrot.slane %v16558_v43, 1  ;;  %v5727_v41 = vrot.slane %v5725_v12, 1  ;;  %v5723_v22 = vshrl.u32 %v16293_v52, 16 }
 0x2cd   :  { %v16580_v48 = vsel %vm14233_vm10, 0, %v5557_v36  ;;  %v5730_v8 = vshll.u32 %v16309_v5, 16  ;;  %v16587_v50 = vsel %vm14233_vm10, %v5554_v30, 0  ;;  %v5737_v18 = vshll.u32 %v16358_v57, 16 }
 0x2ce   :  { %v5559_v11 = vshrl.u32 %v5452_v37, 16  ;;  %v16573_v56 = vsel %vm5879_vm13, %v5921_v28, %v5922_v63  ;;  %v5562_v23 = vshll.u32 %v5452_v37, 16  ;;  %v5924_v42 = vrot.slane %v16580_v48, 1  ;;  %v13764_v28 = vld [vmem:[%s18796_s4 + $0xf8] sm:$0xff]  }
 0x2cf   :  { %12720 = vmatmul.mubr.bf16.gmra.mrb[124].mxu0 %v16548_v60  ;;  %v5728_v45 = vor.u32 %v5727_v41, %v5723_v22  ;;  %v5925_v17 = vrot.slane %v16587_v50, 1  ;;  %v5732_v54 = vrot.slane %v5730_v8, 1  ;;  %6699 = vmatpush1.bf16.msra.mxu1 %v13764_v28  ;;  %v5739_v36 = vrot.slane %v5737_v18, 1 }
 0x2d0   :  { %12723 = vmatprep.mubr.bf16.mxu0 %v16548_v60  ;;  %v5561_v27 = vrot.slane %v5559_v11, 7  ;;  %6957 = vmatprep.subr.bf16.mxu1 %v18983_v39  ;;  %v5735_v11 = vshrl.u32 %v16358_v57, 16  ;;  %v5742_v63 = vshll.u32 %v16370_v9, 16  ;;  %v5749_v8 = vshll.u32 %v16402_v14, 16 }
 0x2d1   :  { %v16592_v51 = vsel %vm5879_vm13, %v5924_v42, %v5925_v17  ;;  %v16596_v44 = vsel %vm5629_vm14, %v5728_v45, %v5732_v54  ;;  %v5747_v9 = vshrl.u32 %v16402_v14, 16  ;;  %v5754_v42 = vshll.u32 %v16413_v2, 16 }
 0x2d2   :  { %6516 = vmatmul.mubr.bf16.gmra.mrb[116].mxu1 %v16245_v3  ;;  %v5564_v15 = vor.u32 %v5562_v23, %v5561_v27  ;;  %v16607_v30 = vsel %vm14233_vm10, %v5561_v27, 0  ;;  %v5740_v41 = vor.u32 %v5739_v36, %v5735_v11  ;;  %v5744_v27 = vrot.slane %v5742_v63, 1 }
 0x2d3   :  { %6523 = vmatprep.mubr.bf16.mxu1 %v16552_v1  ;;  %v5928_v12 = vrot.slane %v16607_v30, 1  ;;  %v5751_v23 = vrot.slane %v5749_v8, 1  ;;  %v5761_v54 = vshll.u32 %v16453_v4, 16  ;;  %v5759_v18 = vshrl.u32 %v16453_v4, 16 }
 0x2d4   :  { %v16602_v5 = vsel %vm14233_vm10, 0, %v5564_v15  ;;  %v16627_v22 = vsel %vm5629_vm14, %v5740_v41, %v5744_v27  ;;  %v5756_v15 = vrot.slane %v5754_v42, 1  ;;  %v5766_v2 = vshll.u32 %v16466_v26, 16 }
 0x2d5   :  { %v5927_v37 = vrot.slane %v16602_v5, 1  ;;  %v5752_v45 = vor.u32 %v5751_v23, %v5747_v9  ;;  %v5773_v11 = vshll.u32 %v16503_v38, 16  ;;  %v5771_v41 = vshrl.u32 %v16503_v38, 16 }
 0x2d6   :  { %v5778_v26 = vshll.u32 %v16512_v32, 16  ;;  %v5785_v9 = vshll.u32 %v16531_v46, 16  ;;  %v5790_v32 = vshll.u32 %v16541_v53, 16  ;;  %v5802_v53 = vshll.u32 %v16563_v61, 16 }
 0x2d7   :  { %12724 = vmatmul.mubr.bf16.gmra.mrb[128].mxu0 %v16573_v56  ;;  %v16617_v19 = vsel %vm5879_vm13, %v5927_v37, %v5928_v12  ;;  %v16639_v17 = vsel %vm5629_vm14, %v5752_v45, %v5756_v15  ;;  %v5763_v37 = vrot.slane %v5761_v54, 1  ;;  %v5768_v12 = vrot.slane %v5766_v2, 1 }
 0x2d8   :  { %12727 = vmatprep.mubr.bf16.mxu0 %v16573_v56  ;;  %v5775_v63 = vrot.slane %v5773_v11, 1  ;;  %v5780_v8 = vrot.slane %v5778_v26, 1  ;;  %v5787_v42 = vrot.slane %v5785_v9, 1  ;;  %v5783_v45 = vshrl.u32 %v16531_v46, 16 }
 0x2d9   :  { %v5764_v28 = vor.u32 %v5763_v37, %v5759_v18  ;;  %v5792_v54 = vrot.slane %v5790_v32, 1  ;;  %v5797_v18 = vshll.u32 %v16558_v43, 16  ;;  %v5804_v11 = vrot.slane %v5802_v53, 1 }
 0x2da   :  { %6524 = vmatmul.mubr.bf16.gmra.mrb[120].mxu1 %v16245_v3  ;;  %v5776_v27 = vor.u32 %v5775_v63, %v5771_v41  ;;  %v5788_v15 = vor.u32 %v5787_v42, %v5783_v45  ;;  %v5809_v41 = vshll.u32 %v16580_v48, 16  ;;  %v5814_v61 = vshll.u32 %v16587_v50, 16 }
 0x2db   :  { %6531 = vmatprep.mubr.bf16.mxu1 %v16596_v44  ;;  %v16649_v36 = vsel %vm5629_vm14, %v5764_v28, %v5768_v12  ;;  %v5799_v2 = vrot.slane %v5797_v18, 1  ;;  %v5795_v28 = vshrl.u32 %v16558_v43, 16  ;;  %v5821_v50 = vshll.u32 %v16602_v5, 16 }
 0x2dc   :  { %v16659_v23 = vsel %vm5629_vm14, %v5776_v27, %v5780_v8  ;;  %v16669_v37 = vsel %vm5629_vm14, %v5788_v15, %v5792_v54  ;;  %v5811_v26 = vrot.slane %v5809_v41, 1  ;;  %v5807_v27 = vshrl.u32 %v16580_v48, 16 }
 0x2dd   :  { %v5800_v12 = vor.u32 %v5799_v2, %v5795_v28  ;;  %v5816_v32 = vrot.slane %v5814_v61, 1  ;;  %v5826_v41 = vshll.u32 %v16607_v30, 16 }
 0x2de   :  { %v5812_v9 = vor.u32 %v5811_v26, %v5807_v27 }
 0x2df   :  { %12728 = vmatmul.mubr.bf16.gmra.mrb[132].mxu0 %v16592_v51  ;;  %v16679_v63 = vsel %vm5629_vm14, %v5800_v12, %v5804_v11  ;;  %v5823_v12 = vrot.slane %v5821_v50, 1  ;;  %v5819_v11 = vshrl.u32 %v16602_v5, 16 }
 0x2e0   :  { %12731 = vmatprep.mubr.bf16.mxu0 %v16592_v51  ;;  %v16697_v54 = vsel %vm5629_vm14, %v5812_v9, %v5816_v32  ;;  %v5828_v32 = vrot.slane %v5826_v41, 1 }
 0x2e1   :  { %v5824_v27 = vor.u32 %v5823_v12, %v5819_v11 }
 0x2e2   :  { %6532 = vmatmul.mubr.bf16.gmra.mrb[124].mxu1 %v16293_v52 }
 0x2e3   :  { %6539 = vmatprep.mubr.bf16.mxu1 %v19145_v62  ;;  %v16723_v50 = vsel %vm5629_vm14, %v5824_v27, %v5828_v32  ;;  %v13765_v27 = vld [vmem:[%s18796_s4 + $0x100] sm:$0xff]  }
 0x2e7   :  { %12732 = vmatmul.mubr.bf16.gmra.mrb[136].mxu0 %v16617_v19 }
 0x2e8   :  { %12735 = vmatprep.mubr.bf16.mxu0 %v16617_v19 }
 0x2ea   :  { %6540 = vmatmul.mubr.bf16.gmra.mrb[128].mxu1 %v18983_v39 }
 0x2eb   :  { %6547 = vmatprep.mubr.bf16.mxu1 %v16627_v22 }
 0x2ef   :  { %12736 = vmatmul.mubr.bf16.gmra.mrb[140].mxu0 %v19145_v62 }
 0x2f0   :  { %9765 = vmatprep.mubr.bf16.mxu0 %v19145_v62 }
 0x2f2   :  { %6548 = vmatmul.mubr.bf16.gmra.mrb[132].mxu1 %v16358_v57 }
 0x2f3   :  { %6555 = vmatprep.mubr.bf16.mxu1 %v16627_v22 }
 0x2fa   :  { %6556 = vmatmul.mubr.bf16.gmra.mrb[136].mxu1 %v16358_v57 }
 0x2fb   :  { %6563 = vmatprep.mubr.bf16.mxu1 %v16639_v17 }
 0x302   :  { %6564 = vmatmul.mubr.bf16.gmra.mrb[140].mxu1 %v16402_v14 }
 0x303   :  { %6571 = vmatprep.mubr.bf16.mxu1 %v16639_v17 }
 0x30a   :  { %6572 = vmatmul.mubr.bf16.gmra.mrb[144].mxu1 %v16402_v14 }
 0x30b   :  { %6579 = vmatprep.mubr.bf16.mxu1 %v16649_v36 }
 0x312   :  { %6580 = vmatmul.mubr.bf16.gmra.mrb[148].mxu1 %v16453_v4 }
 0x313   :  { %6587 = vmatprep.mubr.bf16.mxu1 %v16649_v36 }
 0x31a   :  { %6588 = vmatmul.mubr.bf16.gmra.mrb[152].mxu1 %v16453_v4 }
 0x31b   :  { %6595 = vmatprep.mubr.bf16.mxu1 %v16659_v23 }
 0x322   :  { %6596 = vmatmul.mubr.bf16.gmra.mrb[156].mxu1 %v16503_v38 }
 0x323   :  { %6603 = vmatprep.mubr.bf16.mxu1 %v16659_v23 }
 0x32a   :  { %6604 = vmatmul.mubr.bf16.gmra.mrb[160].mxu1 %v16503_v38 }
 0x32b   :  { %6611 = vmatprep.mubr.bf16.mxu1 %v16669_v37 }
 0x332   :  { %6612 = vmatmul.mubr.bf16.gmra.mrb[164].mxu1 %v16531_v46 }
 0x333   :  { %6619 = vmatprep.mubr.bf16.mxu1 %v16669_v37 }
 0x33a   :  { %6620 = vmatmul.mubr.bf16.gmra.mrb[168].mxu1 %v16531_v46 }
 0x33b   :  { %6627 = vmatprep.mubr.bf16.mxu1 %v16679_v63 }
 0x342   :  { %6628 = vmatmul.mubr.bf16.gmra.mrb[172].mxu1 %v16558_v43 }
 0x343   :  { %6635 = vmatprep.mubr.bf16.mxu1 %v16679_v63 }
 0x345   :  { %v16687_v8 = vpop.f32.mrb[80].mxu0 }
 0x346   :  { %v16689_v42 = vpop.f32.mrb[81].mxu0 }
 0x347   :  { %v16691_v45 = vpop.f32.mrb[82].mxu0 }
 0x348   :  { %v16693_v15 = vpop.f32.mrb[83].mxu0 }
 0x34a   :  { %6636 = vmatmul.mubr.bf16.gmra.mrb[176].mxu1 %v16558_v43 }
 0x34b   :  { %6643 = vmatprep.mubr.bf16.mxu1 %v16697_v54 }
 0x34e   :  { %v16700_v18 = vpop.f32.mrb[84].mxu0 }
 0x34f   :  { %19168 = vst [vmem:[#allocation4_spill] sm:$0xff] %v16700_v18  ;;  %v16703_v2 = vpop.f32.mrb[85].mxu0 }
 0x350   :  { %v16705_v28 = vpop.f32.mrb[86].mxu0 }
 0x351   :  { %19169 = vst [vmem:[#allocation14_spill] sm:$0xff] %v16705_v28  ;;  %v16707_v53 = vpop.f32.mrb[87].mxu0 }
 0x352   :  { %6644 = vmatmul.mubr.bf16.gmra.mrb[180].mxu1 %v16580_v48 }
 0x353   :  { %6651 = vmatprep.mubr.bf16.mxu1 %v16697_v54 }
 0x357   :  { %v16713_v26 = vpop.f32.mrb[88].mxu0 }
 0x358   :  { %19170 = vst [vmem:[#allocation13_spill] sm:$0xff] %v16713_v26  ;;  %v16715_v61 = vpop.f32.mrb[89].mxu0 }
 0x359   :  { %v16717_v9 = vpop.f32.mrb[90].mxu0 }
 0x35a   :  { %19171 = vst [vmem:[#allocation16_spill] sm:$0xff] %v16717_v9  ;;  %v16719_v28 = vpop.f32.mrb[91].mxu0  ;;  %6652 = vmatmul.mubr.bf16.gmra.mrb[184].mxu1 %v16580_v48 }
 0x35b   :  { %19172 = vst [vmem:[#allocation15_spill] sm:$0xff] %v16719_v28  ;;  %6659 = vmatprep.mubr.bf16.mxu1 %v16723_v50 }
 0x35f   :  { %v16726_v18 = vpop.f32.mrb[92].mxu0 }
 0x360   :  { %19173 = vst [vmem:[#allocation18_spill] sm:$0xff] %v16726_v18  ;;  %v16728_v30 = vpop.f32.mrb[93].mxu0 }
 0x361   :  { %19174 = vst [vmem:[#allocation17_spill] sm:$0xff] %v16728_v30  ;;  %v16730_v26 = vpop.f32.mrb[94].mxu0 }
 0x362   :  { %19175 = vst [vmem:[#allocation11_spill] sm:$0xff] %v16730_v26  ;;  %v16732_v12 = vpop.f32.mrb[95].mxu0  ;;  %6660 = vmatmul.mubr.bf16.gmra.mrb[188].mxu1 %v16602_v5  ;;  %v13766_v26 = vld [vmem:[%s18796_s4 + $0x108] sm:$0xff]  }
 0x363   :  { %19176 = vst [vmem:[#allocation12_spill] sm:$0xff] %v16732_v12  ;;  %6700 = vmatprep.mubr.bf16.mxu1 %v15974_v24  ;;  %v19201_v12 = vld [vmem:[#allocation2_spill] sm:$0xff] }
 0x368   :  { %v16736_v11 = vpop.f32.mrb[96].mxu0 }
 0x369   :  { %19177 = vst [vmem:[#allocation36_spill] sm:$0xff] %v16736_v11  ;;  %v16738_v41 = vpop.f32.mrb[97].mxu0 }
 0x36a   :  { %19178 = vst [vmem:[#allocation37_spill] sm:$0xff] %v16738_v41  ;;  %v16743_v32 = vpop.f32.mrb[98].mxu0  ;;  %6701 = vmatmul.mubr.bf16.vlgmr.msra.gmra.mrb[64].mxu1 %v19145_v62 }
 0x36b   :  { %19179 = vst [vmem:[#allocation41_spill] sm:$0xff] %v16743_v32  ;;  %v16745_v18 = vpop.f32.mrb[99].mxu0  ;;  %6958 = vmatpush1.bf16.msra.mxu1 %v13765_v27  ;;  %6708 = vmatprep.mubr.bf16.mxu1 %v15974_v24  ;;  %v13767_v32 = vld [vmem:[%s18796_s4 + $0x110] sm:$0xff]  }
 0x36c   :  { %19180 = vst [vmem:[#allocation40_spill] sm:$0xff] %v16745_v18  ;;  %6959 = vmatprep.subr.bf16.mxu1 %v18983_v39 }
 0x36f   :  { %6960 = vmatpush1.bf16.msra.mxu1 %v13766_v26 }
 0x370   :  { %6961 = vmatprep.subr.bf16.mxu1 %v18983_v39 }
 0x371   :  { %v16753_v11 = vpop.f32.mrb[100].mxu0 }
 0x372   :  { %19181 = vst [vmem:[#allocation43_spill] sm:$0xff] %v16753_v11  ;;  %v16755_v41 = vpop.f32.mrb[101].mxu0  ;;  %6709 = vmatmul.mubr.bf16.gmra.mrb[68].mxu1 %v15987_v59  ;;  %v13768_v11 = vld [vmem:[%s18796_s4 + $0x118] sm:$0xff]  }
 0x373   :  { %19182 = vst [vmem:[#allocation42_spill] sm:$0xff] %v16755_v41  ;;  %v16760_v18 = vpop.f32.mrb[102].mxu0  ;;  %6716 = vmatprep.mubr.bf16.mxu1 %v16001_v16  ;;  %6962 = vmatpush1.bf16.msra.mxu1 %v13767_v32 }
 0x374   :  { %19183 = vst [vmem:[#allocation45_spill] sm:$0xff] %v16760_v18  ;;  %v16763_v27 = vpop.f32.mrb[103].mxu0  ;;  %6963 = vmatprep.subr.bf16.mxu1 %v18983_v39  ;;  %v13769_v18 = vld [vmem:[%s18796_s4 + $0x120] sm:$0xff]  }
 0x375   :  { %19184 = vst [vmem:[#allocation44_spill] sm:$0xff] %v16763_v27 }
 0x377   :  { %6964 = vmatpush1.bf16.msra.mxu1 %v13768_v11 }
 0x378   :  { %6965 = vmatprep.subr.bf16.mxu1 %v18983_v39 }
 0x379   :  { %v16771_v26 = vpop.f32.mrb[104].mxu0 }
 0x37a   :  { %19185 = vst [vmem:[#allocation38_spill] sm:$0xff] %v16771_v26  ;;  %v16773_v41 = vpop.f32.mrb[105].mxu0  ;;  %6717 = vmatmul.mubr.bf16.gmra.mrb[72].mxu1 %v15987_v59  ;;  %v13770_v26 = vld [vmem:[%s18796_s4 + $0x128] sm:$0xff]  }
 0x37b   :  { %19186 = vst [vmem:[#allocation39_spill] sm:$0xff] %v16773_v41  ;;  %v16778_v27 = vpop.f32.mrb[106].mxu0  ;;  %6724 = vmatprep.mubr.bf16.mxu1 %v16001_v16  ;;  %6966 = vmatpush1.bf16.msra.mxu1 %v13769_v18 }
 0x37c   :  { %19187 = vst [vmem:[#allocation25_spill] sm:$0xff] %v16778_v27  ;;  %v16781_v32 = vpop.f32.mrb[107].mxu0  ;;  %6967 = vmatprep.subr.bf16.mxu1 %v18983_v39  ;;  %v13771_v27 = vld [vmem:[%s18796_s4 + $0x130] sm:$0xff]  }
 0x37d   :  { %19188 = vst [vmem:[#allocation24_spill] sm:$0xff] %v16781_v32 }
 0x37f   :  { %6968 = vmatpush1.bf16.msra.mxu1 %v13770_v26 }
 0x380   :  { %6969 = vmatprep.subr.bf16.mxu1 %v18983_v39 }
 0x381   :  { %v16789_v11 = vpop.f32.mrb[108].mxu0 }
 0x382   :  { %19189 = vst [vmem:[#allocation27_spill] sm:$0xff] %v16789_v11  ;;  %v16791_v41 = vpop.f32.mrb[109].mxu0  ;;  %6725 = vmatmul.mubr.bf16.gmra.mrb[76].mxu1 %v16018_v21  ;;  %v13772_v11 = vld [vmem:[%s18796_s4 + $0x138] sm:$0xff]  }
 0x383   :  { %19190 = vst [vmem:[#allocation26_spill] sm:$0xff] %v16791_v41  ;;  %v16796_v32 = vpop.f32.mrb[110].mxu0  ;;  %6732 = vmatprep.mubr.bf16.mxu1 %v16053_v33  ;;  %6970 = vmatpush1.bf16.msra.mxu1 %v13771_v27 }
 0x384   :  { %19191 = vst [vmem:[#allocation29_spill] sm:$0xff] %v16796_v32  ;;  %v16799_v18 = vpop.f32.mrb[111].mxu0  ;;  %6971 = vmatprep.subr.bf16.mxu1 %v18983_v39  ;;  %v13773_v32 = vld [vmem:[%s18796_s4 + $0x140] sm:$0xff]  }
 0x385   :  { %19192 = vst [vmem:[#allocation28_spill] sm:$0xff] %v16799_v18 }
 0x387   :  { %6972 = vmatpush1.bf16.msra.mxu1 %v13772_v11 }
 0x388   :  { %6973 = vmatprep.subr.bf16.mxu1 %v18983_v39 }
 0x389   :  { %v16807_v26 = vpop.f32.mrb[112].mxu0 }
 0x38a   :  { %19193 = vst [vmem:[#allocation22_spill] sm:$0xff] %v16807_v26  ;;  %v16809_v41 = vpop.f32.mrb[113].mxu0  ;;  %6733 = vmatmul.mubr.bf16.gmra.mrb[80].mxu1 %v16018_v21  ;;  %v13774_v26 = vld [vmem:[%s18796_s4 + $0x148] sm:$0xff]  }
 0x38b   :  { %19194 = vst [vmem:[#allocation23_spill] sm:$0xff] %v16809_v41  ;;  %v16814_v18 = vpop.f32.mrb[114].mxu0  ;;  %6740 = vmatprep.mubr.bf16.mxu1 %v16053_v33  ;;  %6974 = vmatpush1.bf16.msra.mxu1 %v13773_v32 }
 0x38c   :  { %19195 = vst [vmem:[#allocation21_spill] sm:$0xff] %v16814_v18  ;;  %v16817_v27 = vpop.f32.mrb[115].mxu0  ;;  %6975 = vmatprep.subr.bf16.mxu1 %v18983_v39  ;;  %v13775_v18 = vld [vmem:[%s18796_s4 + $0x150] sm:$0xff]  }
 0x38d   :  { %19196 = vst [vmem:[#allocation20_spill] sm:$0xff] %v16817_v27 }
 0x38f   :  { %6976 = vmatpush1.bf16.msra.mxu1 %v13774_v26 }
 0x390   :  { %6977 = vmatprep.subr.bf16.mxu1 %v18983_v39 }
 0x392   :  { %v16825_v11 = vpop.f32.mrb[116].mxu0  ;;  %6741 = vmatmul.mubr.bf16.gmra.mrb[84].mxu1 %v19201_v12 }
 0x393   :  { %19197 = vst [vmem:[#allocation31_spill] sm:$0xff] %v16825_v11  ;;  %v16827_v41 = vpop.f32.mrb[117].mxu0  ;;  %6748 = vmatprep.mubr.bf16.mxu1 %v16114_v40  ;;  %6978 = vmatpush1.bf16.msra.mxu1 %v13775_v18 }
 0x394   :  { %19198 = vst [vmem:[#allocation30_spill] sm:$0xff] %v16827_v41  ;;  %v16832_v27 = vpop.f32.mrb[118].mxu0  ;;  %6979 = vmatprep.subr.bf16.mxu1 %v18983_v39 }
 0x395   :  { %19199 = vst [vmem:[#allocation33_spill] sm:$0xff] %v16832_v27  ;;  %v16835_v32 = vpop.f32.mrb[119].mxu0  ;;  %v13776_v27 = vld [vmem:[%s18796_s4 + $0x158] sm:$0xff]  }
 0x396   :  { %19200 = vst [vmem:[#allocation32_spill] sm:$0xff] %v16835_v32 }
 0x397   :  { %6980 = vmatpush1.bf16.msra.mxu1 %v13776_v27 }
 0x398   :  { %6981 = vmatprep.subr.bf16.mxu1 %v18983_v39 }
 0x39a   :  { %v16840_v11 = vpop.f32.mrb[120].mxu0  ;;  %6749 = vmatmul.mubr.bf16.gmra.mrb[88].mxu1 %v19201_v12 }
 0x39b   :  { %19202 = vst [vmem:[#allocation35_spill] sm:$0xff] %v16840_v11  ;;  %v16842_v26 = vpop.f32.mrb[121].mxu0  ;;  %6756 = vmatprep.mubr.bf16.mxu1 %v16114_v40 }
 0x39c   :  { %19203 = vst [vmem:[#allocation34_spill] sm:$0xff] %v16842_v26  ;;  %v16844_v41 = vpop.f32.mrb[122].mxu0 }
 0x39d   :  { %19204 = vst [vmem:[#allocation63_spill] sm:$0xff] %v16844_v41  ;;  %v16846_v30 = vpop.f32.mrb[123].mxu0 }
 0x39e   :  { %19205 = vst [vmem:[#allocation64_spill] sm:$0xff] %v16846_v30  ;;  %v19210_v30 = vld [vmem:[#allocation3_spill] sm:$0xff] }
 0x3a2   :  { %v16854_v18 = vpop.f32.mrb[124].mxu0  ;;  %6757 = vmatmul.mubr.bf16.gmra.mrb[92].mxu1 %v19210_v30 }
 0x3a3   :  { %19206 = vst [vmem:[#allocation49_spill] sm:$0xff] %v16854_v18  ;;  %v16856_v11 = vpop.f32.mrb[125].mxu0  ;;  %6764 = vmatprep.mubr.bf16.mxu1 %v16155_v58 }
 0x3a4   :  { %19207 = vst [vmem:[#allocation48_spill] sm:$0xff] %v16856_v11  ;;  %v16858_v26 = vpop.f32.mrb[126].mxu0 }
 0x3a5   :  { %19208 = vst [vmem:[#allocation51_spill] sm:$0xff] %v16858_v26  ;;  %v16860_v41 = vpop.f32.mrb[127].mxu0  ;;  %v13777_v26 = vld [vmem:[%s18796_s4 + $0x160] sm:$0xff]  }
 0x3a6   :  { %19209 = vst [vmem:[#allocation50_spill] sm:$0xff] %v16860_v41  ;;  %6982 = vmatpush1.bf16.msra.mxu1 %v13777_v26 }
 0x3a7   :  { %6983 = vmatprep.subr.bf16.mxu1 %v18983_v39 }
 0x3aa   :  { %v16864_v32 = vpop.f32.mrb[128].mxu0  ;;  %6765 = vmatmul.mubr.bf16.gmra.mrb[96].mxu1 %v19210_v30 }
 0x3ab   :  { %19211 = vst [vmem:[#allocation53_spill] sm:$0xff] %v16864_v32  ;;  %v16866_v9 = vpop.f32.mrb[129].mxu0  ;;  %6772 = vmatprep.mubr.bf16.mxu1 %v16155_v58 }
 0x3ac   :  { %19212 = vst [vmem:[#allocation52_spill] sm:$0xff] %v16866_v9  ;;  %v16868_v28 = vpop.f32.mrb[130].mxu0 }
 0x3ad   :  { %19213 = vst [vmem:[#allocation46_spill] sm:$0xff] %v16868_v28  ;;  %v16870_v27 = vpop.f32.mrb[131].mxu0 }
 0x3ae   :  { %19214 = vst [vmem:[#allocation47_spill] sm:$0xff] %v16870_v27 }
 0x3b2   :  { %v16878_v18 = vpop.f32.mrb[132].mxu0  ;;  %6773 = vmatmul.mubr.bf16.gmra.mrb[100].mxu1 %v16184_v10 }
 0x3b3   :  { %v16880_v32 = vpop.f32.mrb[133].mxu0  ;;  %6780 = vmatprep.mubr.bf16.mxu1 %v16200_v0 }
 0x3b4   :  { %v16882_v9 = vpop.f32.mrb[134].mxu0 }
 0x3b5   :  { %19215 = vst [vmem:[#allocation57_spill] sm:$0xff] %v16882_v9  ;;  %v16884_v28 = vpop.f32.mrb[135].mxu0  ;;  %v13778_v9 = vld [vmem:[%s18796_s4 + $0x168] sm:$0xff]  }
 0x3b6   :  { %6984 = vmatpush1.bf16.msra.mxu1 %v13778_v9  ;;  %v13780_v9 = vld [vmem:[%s18796_s4 + $0x178] sm:$0xff]  }
 0x3b7   :  { %6985 = vmatprep.subr.bf16.mxu1 %v18983_v39 }
 0x3ba   :  { %v16888_v27 = vpop.f32.mrb[136].mxu0  ;;  %6781 = vmatmul.mubr.bf16.gmra.mrb[104].mxu1 %v16184_v10 }
 0x3bb   :  { %19216 = vst [vmem:[#allocation56_spill] sm:$0xff] %v16888_v27  ;;  %v16890_v41 = vpop.f32.mrb[137].mxu0  ;;  %6788 = vmatprep.mubr.bf16.mxu1 %v16200_v0  ;;  %v13782_v27 = vld [vmem:[%s18796_s4 + $0x188] sm:$0xff]  }
 0x3bc   :  { %v16892_v11 = vpop.f32.mrb[138].mxu0 }
 0x3bd   :  { %19217 = vst [vmem:[#allocation6_spill] sm:$0xff] %v16892_v11  ;;  %v16894_v26 = vpop.f32.mrb[139].mxu0  ;;  %v13779_v11 = vld [vmem:[%s18796_s4 + $0x170] sm:$0xff]  }
 0x3be   :  { %19218 = vst [vmem:[#allocation5_spill] sm:$0xff] %v16894_v26  ;;  %6986 = vmatpush1.bf16.msra.mxu1 %v13779_v11  ;;  %v13781_v11 = vld [vmem:[%s18796_s4 + $0x180] sm:$0xff]   ;;  %v13783_v26 = vld [vmem:[%s18796_s4 + $0x190] sm:$0xff]  }
 0x3bf   :  { %6987 = vmatprep.subr.bf16.mxu1 %v18983_v39 }
 0x3c2   :  { %6789 = vmatmul.mubr.bf16.gmra.mrb[108].mxu1 %v16233_v55 }
 0x3c3   :  { %6796 = vmatprep.mubr.bf16.mxu1 %v16245_v3  ;;  %6988 = vmatpush1.bf16.msra.mxu1 %v13780_v9  ;;  %v19219_v9 = vld [vmem:[#allocation10_spill] sm:$0xff] }
 0x3c4   :  { %7246 = vmatprep.subr.bf16.mxu1 %v18983_v39 }
 0x3ca   :  { %6797 = vmatmul.mubr.bf16.gmra.mrb[112].mxu1 %v16233_v55 }
 0x3cb   :  { %6804 = vmatprep.mubr.bf16.mxu1 %v16245_v3 }
 0x3d2   :  { %6805 = vmatmul.mubr.bf16.gmra.mrb[116].mxu1 %v16279_v13 }
 0x3d3   :  { %6812 = vmatprep.mubr.bf16.mxu1 %v16293_v52 }
 0x3da   :  { %6813 = vmatmul.mubr.bf16.gmra.mrb[120].mxu1 %v16279_v13 }
 0x3db   :  { %6820 = vmatprep.mubr.bf16.mxu1 %v16293_v52 }
 0x3e2   :  { %6821 = vmatmul.mubr.bf16.gmra.mrb[124].mxu1 %v16343_v20 }
 0x3e3   :  { %6828 = vmatprep.mubr.bf16.mxu1 %v16358_v57 }
 0x3ea   :  { %6829 = vmatmul.mubr.bf16.gmra.mrb[128].mxu1 %v19145_v62 }
 0x3eb   :  { %6836 = vmatprep.mubr.bf16.mxu1 %v16358_v57 }
 0x3f2   :  { %6837 = vmatmul.mubr.bf16.gmra.mrb[132].mxu1 %v16397_v6 }
 0x3f3   :  { %6844 = vmatprep.mubr.bf16.mxu1 %v16402_v14 }
 0x3fa   :  { %6845 = vmatmul.mubr.bf16.gmra.mrb[136].mxu1 %v16397_v6 }
 0x3fb   :  { %6852 = vmatprep.mubr.bf16.mxu1 %v16402_v14 }
 0x402   :  { %6853 = vmatmul.mubr.bf16.gmra.mrb[140].mxu1 %v16445_v31 }
 0x403   :  { %6860 = vmatprep.mubr.bf16.mxu1 %v16453_v4 }
 0x40a   :  { %6861 = vmatmul.mubr.bf16.gmra.mrb[144].mxu1 %v16445_v31 }
 0x40b   :  { %6868 = vmatprep.mubr.bf16.mxu1 %v16453_v4 }
 0x412   :  { %6869 = vmatmul.mubr.bf16.gmra.mrb[148].mxu1 %v16489_v7 }
 0x413   :  { %6876 = vmatprep.mubr.bf16.mxu1 %v16503_v38 }
 0x41a   :  { %6877 = vmatmul.mubr.bf16.gmra.mrb[152].mxu1 %v16489_v7 }
 0x41b   :  { %6884 = vmatprep.mubr.bf16.mxu1 %v16503_v38 }
 0x422   :  { %6885 = vmatmul.mubr.bf16.gmra.mrb[156].mxu1 %v16526_v25 }
 0x423   :  { %6892 = vmatprep.mubr.bf16.mxu1 %v16531_v46 }
 0x42a   :  { %6893 = vmatmul.mubr.bf16.gmra.mrb[160].mxu1 %v16526_v25 }
 0x42b   :  { %6900 = vmatprep.mubr.bf16.mxu1 %v16531_v46 }
 0x432   :  { %6901 = vmatmul.mubr.bf16.gmra.mrb[164].mxu1 %v16548_v60 }
 0x433   :  { %6908 = vmatprep.mubr.bf16.mxu1 %v16558_v43 }
 0x43a   :  { %6909 = vmatmul.mubr.bf16.gmra.mrb[168].mxu1 %v16548_v60 }
 0x43b   :  { %6916 = vmatprep.mubr.bf16.mxu1 %v16558_v43 }
 0x442   :  { %6917 = vmatmul.mubr.bf16.gmra.mrb[172].mxu1 %v16573_v56 }
 0x443   :  { %6924 = vmatprep.mubr.bf16.mxu1 %v16580_v48 }
 0x44a   :  { %6925 = vmatmul.mubr.bf16.gmra.mrb[176].mxu1 %v16573_v56 }
 0x44b   :  { %6932 = vmatprep.mubr.bf16.mxu1 %v16580_v48 }
 0x452   :  { %6933 = vmatmul.mubr.bf16.gmra.mrb[180].mxu1 %v16592_v51 }
 0x453   :  { %6940 = vmatprep.mubr.bf16.mxu1 %v16602_v5 }
 0x45a   :  { %6941 = vmatmul.mubr.bf16.gmra.mrb[184].mxu1 %v16592_v51 }
 0x45b   :  { %6948 = vmatprep.mubr.bf16.mxu1 %v16602_v5 }
 0x462   :  { %6949 = vmatmul.mubr.bf16.gmra.mrb[188].mxu1 %v16617_v19 }
 0x463   :  { %6989 = vmatprep.mubr.bf16.mxu1 %v15987_v59 }
 0x46a   :  { %6990 = vmatmul.mubr.bf16.vlgmr.msra.gmra.mrb[64].mxu1 %v19219_v9 }
 0x46b   :  { %7247 = vmatpush1.bf16.msra.mxu1 %v13781_v11  ;;  %6997 = vmatprep.mubr.bf16.mxu1 %v15987_v59  ;;  %v13784_v59 = vld [vmem:[%s18796_s4 + $0x198] sm:$0xff]  }
 0x46c   :  { %7248 = vmatprep.subr.bf16.mxu1 %v18983_v39  ;;  %v19220_v11 = vld [vmem:[#allocation9_spill] sm:$0xff] }
 0x46f   :  { %7249 = vmatpush1.bf16.msra.mxu1 %v13782_v27  ;;  %v13785_v27 = vld [vmem:[%s18796_s4 + $0x1a0] sm:$0xff]  }
 0x470   :  { %7250 = vmatprep.subr.bf16.mxu1 %v18983_v39 }
 0x472   :  { %6998 = vmatmul.mubr.bf16.gmra.mrb[68].mxu1 %v19219_v9 }
 0x473   :  { %7005 = vmatprep.mubr.bf16.mxu1 %v16018_v21  ;;  %7251 = vmatpush1.bf16.msra.mxu1 %v13783_v26  ;;  %v13786_v26 = vld [vmem:[%s18796_s4 + $0x1a8] sm:$0xff]  }
 0x474   :  { %7252 = vmatprep.subr.bf16.mxu1 %v18983_v39 }
 0x477   :  { %7253 = vmatpush1.bf16.msra.mxu1 %v13784_v59  ;;  %v13787_v59 = vld [vmem:[%s18796_s4 + $0x1b0] sm:$0xff]  }
 0x478   :  { %7254 = vmatprep.subr.bf16.mxu1 %v18983_v39 }
 0x47a   :  { %7006 = vmatmul.mubr.bf16.gmra.mrb[72].mxu1 %v19220_v11 }
 0x47b   :  { %7013 = vmatprep.mubr.bf16.mxu1 %v16018_v21  ;;  %7255 = vmatpush1.bf16.msra.mxu1 %v13785_v27  ;;  %v13788_v21 = vld [vmem:[%s18796_s4 + $0x1b8] sm:$0xff]   ;;  %v13789_v27 = vld [vmem:[%s18796_s4 + $0x1c0] sm:$0xff]  }
 0x47c   :  { %7256 = vmatprep.subr.bf16.mxu1 %v18983_v39 }
 0x47f   :  { %7257 = vmatpush1.bf16.msra.mxu1 %v13786_v26  ;;  %v13790_v26 = vld [vmem:[%s18796_s4 + $0x1c8] sm:$0xff]  }
 0x480   :  { %7258 = vmatprep.subr.bf16.mxu1 %v18983_v39 }
 0x482   :  { %7014 = vmatmul.mubr.bf16.gmra.mrb[76].mxu1 %v19220_v11 }
 0x483   :  { %7021 = vmatprep.mubr.bf16.mxu1 %v19201_v12  ;;  %7259 = vmatpush1.bf16.msra.mxu1 %v13787_v59  ;;  %v13791_v59 = vld [vmem:[%s18796_s4 + $0x1d0] sm:$0xff]  }
 0x484   :  { %7260 = vmatprep.subr.bf16.mxu1 %v18983_v39 }
 0x487   :  { %7261 = vmatpush1.bf16.msra.mxu1 %v13788_v21  ;;  %v13793_v21 = vld [vmem:[%s18796_s4 + $0x1e0] sm:$0xff]  }
 0x488   :  { %7262 = vmatprep.subr.bf16.mxu1 %v18983_v39 }
 0x48a   :  { %7022 = vmatmul.mubr.bf16.gmra.mrb[80].mxu1 %v16180_v35 }
 0x48b   :  { %7029 = vmatprep.mubr.bf16.mxu1 %v19201_v12  ;;  %7263 = vmatpush1.bf16.msra.mxu1 %v13789_v27  ;;  %v13792_v12 = vld [vmem:[%s18796_s4 + $0x1d8] sm:$0xff]  }
 0x48c   :  { %7264 = vmatprep.subr.bf16.mxu1 %v18983_v39 }
 0x48f   :  { %7265 = vmatpush1.bf16.msra.mxu1 %v13790_v26 }
 0x490   :  { %7266 = vmatprep.subr.bf16.mxu1 %v18983_v39 }
 0x492   :  { %7030 = vmatmul.mubr.bf16.gmra.mrb[84].mxu1 %v16180_v35 }
 0x493   :  { %7037 = vmatprep.mubr.bf16.mxu1 %v19210_v30  ;;  %7267 = vmatpush1.bf16.msra.mxu1 %v13791_v59 }
 0x494   :  { %7268 = vmatprep.subr.bf16.mxu1 %v18983_v39 }
 0x497   :  { %7269 = vmatpush1.bf16.msra.mxu1 %v13792_v12 }
 0x498   :  { %7270 = vmatprep.subr.bf16.mxu1 %v18983_v39 }
 0x49a   :  { %7038 = vmatmul.mubr.bf16.gmra.mrb[88].mxu1 %v16283_v29 }
 0x49b   :  { %7045 = vmatprep.mubr.bf16.mxu1 %v19210_v30  ;;  %7271 = vmatpush1.bf16.msra.mxu1 %v13793_v21  ;;  %v13794_v30 = vld [vmem:[%s18796_s4 + $0x1e8] sm:$0xff]  }
 0x49c   :  { %7272 = vmatprep.subr.bf16.mxu1 %v18983_v39 }
 0x49f   :  { %7273 = vmatpush1.bf16.msra.mxu1 %v13794_v30 }
 0x4a0   :  { %7274 = vmatprep.subr.bf16.mxu1 %v18983_v39 }
 0x4a2   :  { %7046 = vmatmul.mubr.bf16.gmra.mrb[92].mxu1 %v16283_v29 }
 0x4a3   :  { %7053 = vmatprep.mubr.bf16.mxu1 %v16184_v10 }
 0x4aa   :  { %7054 = vmatmul.mubr.bf16.gmra.mrb[96].mxu1 %v16389_v49 }
 0x4ab   :  { %7061 = vmatprep.mubr.bf16.mxu1 %v16184_v10  ;;  %v13795_v10 = vld [vmem:[%s18796_s4 + $0x1f0] sm:$0xff]  }
 0x4ac   :  { %7275 = vmatpush1.bf16.msra.mxu1 %v13795_v10 }
 0x4ad   :  { %7276 = vmatprep.subr.bf16.mxu1 %v18983_v39 }
 0x4b2   :  { %7062 = vmatmul.mubr.bf16.gmra.mrb[100].mxu1 %v16389_v49 }
 0x4b3   :  { %7069 = vmatprep.mubr.bf16.mxu1 %v16233_v55 }
 0x4ba   :  { %7070 = vmatmul.mubr.bf16.gmra.mrb[104].mxu1 %v16493_v47 }
 0x4bb   :  { %7077 = vmatprep.mubr.bf16.mxu1 %v16233_v55  ;;  %v13796_v55 = vld [vmem:[%s18796_s4 + $0x1f8] sm:$0xff]  }
 0x4bc   :  { %7277 = vmatpush1.bf16.msra.mxu1 %v13796_v55 }
 0x4c2   :  { %7078 = vmatmul.mubr.bf16.gmra.mrb[108].mxu1 %v16493_v47 }
 0x4c3   :  { %7085 = vmatprep.mubr.bf16.mxu1 %v16279_v13 }
 0x4ca   :  { %7086 = vmatmul.mubr.bf16.gmra.mrb[112].mxu1 %v16552_v1 }
 0x4cb   :  { %7093 = vmatprep.mubr.bf16.mxu1 %v16279_v13  ;;  %v13797_v13 = vld [vmem:[%s18799_s7] sm:$0xff]  }
 0x4cc   :  { %9734 = vmatpush1.bf16.msra.mxu0 %v13797_v13 }
 0x4cd   :  { %9735 = vmatprep.subr.bf16.mxu0 %v18983_v39 }
 0x4d2   :  { %7094 = vmatmul.mubr.bf16.gmra.mrb[116].mxu1 %v16552_v1 }
 0x4d3   :  { %7101 = vmatprep.mubr.bf16.mxu1 %v16343_v20 }
 0x4da   :  { %7102 = vmatmul.mubr.bf16.gmra.mrb[120].mxu1 %v16596_v44 }
 0x4db   :  { %7109 = vmatprep.mubr.bf16.mxu1 %v16343_v20  ;;  %v13798_v20 = vld [vmem:[%s18799_s7 + $0x8] sm:$0xff]  }
 0x4dc   :  { %9736 = vmatpush1.bf16.msra.mxu0 %v13798_v20 }
 0x4dd   :  { %9737 = vmatprep.subr.bf16.mxu0 %v18983_v39 }
 0x4e2   :  { %7110 = vmatmul.mubr.bf16.gmra.mrb[124].mxu1 %v16596_v44 }
 0x4e3   :  { %7117 = vmatprep.mubr.bf16.mxu1 %v16397_v6 }
 0x4ea   :  { %7118 = vmatmul.mubr.bf16.gmra.mrb[128].mxu1 %v16627_v22 }
 0x4eb   :  { %7125 = vmatprep.mubr.bf16.mxu1 %v16397_v6  ;;  %v13799_v6 = vld [vmem:[%s18799_s7 + $0x10] sm:$0xff]  }
 0x4ec   :  { %9738 = vmatpush1.bf16.msra.mxu0 %v13799_v6 }
 0x4ed   :  { %9739 = vmatprep.subr.bf16.mxu0 %v18983_v39 }
 0x4f2   :  { %7126 = vmatmul.mubr.bf16.gmra.mrb[132].mxu1 %v16627_v22 }
 0x4f3   :  { %7133 = vmatprep.mubr.bf16.mxu1 %v16445_v31 }
 0x4fa   :  { %7134 = vmatmul.mubr.bf16.gmra.mrb[136].mxu1 %v16639_v17 }
 0x4fb   :  { %7141 = vmatprep.mubr.bf16.mxu1 %v16445_v31  ;;  %v13800_v31 = vld [vmem:[%s18799_s7 + $0x18] sm:$0xff]  }
 0x4fc   :  { %9740 = vmatpush1.bf16.msra.mxu0 %v13800_v31 }
 0x4fd   :  { %9741 = vmatprep.subr.bf16.mxu0 %v18983_v39 }
 0x502   :  { %7142 = vmatmul.mubr.bf16.gmra.mrb[140].mxu1 %v16639_v17 }
 0x503   :  { %7149 = vmatprep.mubr.bf16.mxu1 %v16489_v7 }
 0x50a   :  { %7150 = vmatmul.mubr.bf16.gmra.mrb[144].mxu1 %v16649_v36 }
 0x50b   :  { %7157 = vmatprep.mubr.bf16.mxu1 %v16489_v7  ;;  %v13801_v7 = vld [vmem:[%s18799_s7 + $0x20] sm:$0xff]  }
 0x50c   :  { %9742 = vmatpush1.bf16.msra.mxu0 %v13801_v7 }
 0x50d   :  { %9743 = vmatprep.subr.bf16.mxu0 %v18983_v39 }
 0x512   :  { %7158 = vmatmul.mubr.bf16.gmra.mrb[148].mxu1 %v16649_v36 }
 0x513   :  { %7165 = vmatprep.mubr.bf16.mxu1 %v16526_v25 }
 0x51a   :  { %7166 = vmatmul.mubr.bf16.gmra.mrb[152].mxu1 %v16659_v23 }
 0x51b   :  { %7173 = vmatprep.mubr.bf16.mxu1 %v16526_v25  ;;  %v13803_v25 = vld [vmem:[%s18799_s7 + $0x30] sm:$0xff]  }
 0x522   :  { %7174 = vmatmul.mubr.bf16.gmra.mrb[156].mxu1 %v16659_v23 }
 0x523   :  { %7181 = vmatprep.mubr.bf16.mxu1 %v16548_v60 }
 0x52a   :  { %7182 = vmatmul.mubr.bf16.gmra.mrb[160].mxu1 %v16669_v37 }
 0x52b   :  { %7189 = vmatprep.mubr.bf16.mxu1 %v16548_v60  ;;  %v13814_v60 = vld [vmem:[%s18799_s7 + $0x208] sm:$0xff]  }
 0x532   :  { %7190 = vmatmul.mubr.bf16.gmra.mrb[164].mxu1 %v16669_v37 }
 0x533   :  { %7197 = vmatprep.mubr.bf16.mxu1 %v16573_v56 }
 0x53a   :  { %7198 = vmatmul.mubr.bf16.gmra.mrb[168].mxu1 %v16679_v63 }
 0x53b   :  { %7205 = vmatprep.mubr.bf16.mxu1 %v16573_v56  ;;  %v13816_v56 = vld [vmem:[%s18799_s7 + $0x210] sm:$0xff]  }
 0x542   :  { %7206 = vmatmul.mubr.bf16.gmra.mrb[172].mxu1 %v16679_v63 }
 0x543   :  { %7213 = vmatprep.mubr.bf16.mxu1 %v16592_v51 }
 0x54a   :  { %7214 = vmatmul.mubr.bf16.gmra.mrb[176].mxu1 %v16697_v54 }
 0x54b   :  { %7221 = vmatprep.mubr.bf16.mxu1 %v16592_v51  ;;  %v13817_v51 = vld [vmem:[%s18799_s7 + $0x218] sm:$0xff]  }
 0x552   :  { %7222 = vmatmul.mubr.bf16.gmra.mrb[180].mxu1 %v16697_v54 }
 0x553   :  { %7229 = vmatprep.mubr.bf16.mxu1 %v16617_v19 }
 0x55a   :  { %7230 = vmatmul.mubr.bf16.gmra.mrb[184].mxu1 %v16723_v50 }
 0x55b   :  { %7237 = vmatprep.mubr.bf16.mxu1 %v16617_v19  ;;  %v13820_v19 = vld [vmem:[%s18799_s7 + $0x88] sm:$0xff]  }
 0x562   :  { %7238 = vmatmul.mubr.bf16.gmra.mrb[188].mxu1 %v16723_v50 }
 0x563   :  { %7278 = vmatprep.mubr.bf16.mxu1 %v19219_v9  ;;  %v13822_v9 = vld [vmem:[%s18799_s7 + $0x238] sm:$0xff]  }
 0x56a   :  { %7279 = vmatmul.mubr.bf16.vlgmr.msra.gmra.mrb[64].mxu1 %v15974_v24  ;;  %v13802_v24 = vld [vmem:[%s18799_s7 + $0x28] sm:$0xff]  }
 0x56b   :  { %7286 = vmatprep.mubr.bf16.mxu1 %v19220_v11  ;;  %9744 = vmatpush1.bf16.msra.mxu0 %v13802_v24 }
 0x56c   :  { %9745 = vmatprep.subr.bf16.mxu0 %v18983_v39 }
 0x56f   :  { %9746 = vmatpush1.bf16.msra.mxu0 %v13803_v25 }
 0x570   :  { %9747 = vmatprep.subr.bf16.mxu0 %v18983_v39 }
 0x572   :  { %7287 = vmatmul.mubr.bf16.gmra.mrb[68].mxu1 %v16001_v16 }
 0x573   :  { %7294 = vmatprep.mubr.bf16.mxu1 %v19220_v11 }
 0x57a   :  { %7295 = vmatmul.mubr.bf16.gmra.mrb[72].mxu1 %v16001_v16  ;;  %v13804_v16 = vld [vmem:[%s18799_s7 + $0x38] sm:$0xff]  }
 0x57b   :  { %7302 = vmatprep.mubr.bf16.mxu1 %v16180_v35  ;;  %9748 = vmatpush1.bf16.msra.mxu0 %v13804_v16 }
 0x57c   :  { %9749 = vmatprep.subr.bf16.mxu0 %v18983_v39 }
 0x582   :  { %7303 = vmatmul.mubr.bf16.gmra.mrb[76].mxu1 %v16053_v33 }
 0x583   :  { %7310 = vmatprep.mubr.bf16.mxu1 %v16180_v35  ;;  %v13805_v35 = vld [vmem:[%s18799_s7 + $0x40] sm:$0xff]  }
 0x584   :  { %9750 = vmatpush1.bf16.msra.mxu0 %v13805_v35 }
 0x585   :  { %9751 = vmatprep.subr.bf16.mxu0 %v18983_v39 }
 0x58a   :  { %7311 = vmatmul.mubr.bf16.gmra.mrb[80].mxu1 %v16053_v33  ;;  %v13806_v33 = vld [vmem:[%s18799_s7 + $0x48] sm:$0xff]  }
 0x58b   :  { %7318 = vmatprep.mubr.bf16.mxu1 %v16283_v29  ;;  %9752 = vmatpush1.bf16.msra.mxu0 %v13806_v33 }
 0x58c   :  { %9753 = vmatprep.subr.bf16.mxu0 %v18983_v39 }
 0x592   :  { %7319 = vmatmul.mubr.bf16.gmra.mrb[84].mxu1 %v16114_v40 }
 0x593   :  { %7326 = vmatprep.mubr.bf16.mxu1 %v16283_v29  ;;  %v13807_v29 = vld [vmem:[%s18799_s7 + $0x50] sm:$0xff]  }
 0x594   :  { %9754 = vmatpush1.bf16.msra.mxu0 %v13807_v29 }
 0x595   :  { %9755 = vmatprep.subr.bf16.mxu0 %v18983_v39 }
 0x59a   :  { %7327 = vmatmul.mubr.bf16.gmra.mrb[88].mxu1 %v16114_v40  ;;  %v13808_v40 = vld [vmem:[%s18799_s7 + $0x58] sm:$0xff]  }
 0x59b   :  { %7334 = vmatprep.mubr.bf16.mxu1 %v16389_v49  ;;  %9756 = vmatpush1.bf16.msra.mxu0 %v13808_v40 }
 0x59c   :  { %9757 = vmatprep.subr.bf16.mxu0 %v18983_v39 }
 0x5a2   :  { %7335 = vmatmul.mubr.bf16.gmra.mrb[92].mxu1 %v16155_v58 }
 0x5a3   :  { %7342 = vmatprep.mubr.bf16.mxu1 %v16389_v49  ;;  %v13809_v49 = vld [vmem:[%s18799_s7 + $0x60] sm:$0xff]  }
 0x5a4   :  { %9758 = vmatpush1.bf16.msra.mxu0 %v13809_v49 }
 0x5a5   :  { %9759 = vmatprep.subr.bf16.mxu0 %v18983_v39 }
 0x5aa   :  { %7343 = vmatmul.mubr.bf16.gmra.mrb[96].mxu1 %v16155_v58  ;;  %v13810_v58 = vld [vmem:[%s18799_s7 + $0x68] sm:$0xff]  }
 0x5ab   :  { %7350 = vmatprep.mubr.bf16.mxu1 %v16493_v47  ;;  %9760 = vmatpush1.bf16.msra.mxu0 %v13810_v58 }
 0x5ac   :  { %9761 = vmatprep.subr.bf16.mxu0 %v18983_v39 }
 0x5b2   :  { %7351 = vmatmul.mubr.bf16.gmra.mrb[100].mxu1 %v16200_v0 }
 0x5b3   :  { %7358 = vmatprep.mubr.bf16.mxu1 %v16493_v47  ;;  %v13812_v47 = vld [vmem:[%s18799_s7 + $0x78] sm:$0xff]  }
 0x5ba   :  { %7359 = vmatmul.mubr.bf16.gmra.mrb[104].mxu1 %v16200_v0  ;;  %v13811_v0 = vld [vmem:[%s18799_s7 + $0x70] sm:$0xff]  }
 0x5bb   :  { %7366 = vmatprep.mubr.bf16.mxu1 %v16552_v1  ;;  %9762 = vmatpush1.bf16.msra.mxu0 %v13811_v0 }
 0x5bc   :  { %9763 = vmatprep.subr.bf16.mxu0 %v18983_v39 }
 0x5bf   :  { %9764 = vmatpush1.bf16.msra.mxu0 %v13812_v47 }
 0x5c0   :  { %10022 = vmatprep.subr.bf16.mxu0 %v18983_v39 }
 0x5c2   :  { %7367 = vmatmul.mubr.bf16.gmra.mrb[108].mxu1 %v16245_v3  ;;  %9766 = vmatmul.mubr.bf16.vlgmr.msra.gmra.mrb[144].mxu0 %v18983_v39 }
 0x5c3   :  { %7374 = vmatprep.mubr.bf16.mxu1 %v16552_v1  ;;  %v13815_v1 = vld [vmem:[%s18799_s7 + $0x80] sm:$0xff]  }
 0x5c4   :  { %10023 = vmatpush1.bf16.msra.mxu0 %v13815_v1 }
 0x5c5   :  { %10024 = vmatprep.subr.bf16.mxu0 %v18983_v39 }
 0x5c8   :  { %10025 = vmatpush1.bf16.msra.mxu0 %v13820_v19 }
 0x5c9   :  { %10026 = vmatprep.subr.bf16.mxu0 %v18983_v39 }
 0x5ca   :  { %7375 = vmatmul.mubr.bf16.gmra.mrb[112].mxu1 %v16245_v3  ;;  %v13813_v3 = vld [vmem:[%s18799_s7 + $0x200] sm:$0xff]  }
 0x5cb   :  { %7382 = vmatprep.mubr.bf16.mxu1 %v16596_v44  ;;  %12739 = vmatprep.subr.bf16.mxu1 %v13813_v3 }
 0x5cc   :  { %12740 = vmatpush3.bf16.msra.mxu1 %v13813_v3 }
 0x5cd   :  { %12741 = vmatprep.subr.bf16.mxu1 %v13814_v60 }
 0x5d0   :  { %12742 = vmatpush3.bf16.msra.mxu1 %v13814_v60 }
 0x5d1   :  { %12743 = vmatprep.subr.bf16.mxu1 %v13816_v56 }
 0x5d2   :  { %7383 = vmatmul.mubr.bf16.gmra.mrb[116].mxu1 %v16293_v52 }
 0x5d3   :  { %7390 = vmatprep.mubr.bf16.mxu1 %v16596_v44  ;;  %v13819_v44 = vld [vmem:[%s18799_s7 + $0x228] sm:$0xff]  }
 0x5d4   :  { %12744 = vmatpush3.bf16.msra.mxu1 %v13816_v56 }
 0x5d5   :  { %12745 = vmatprep.subr.bf16.mxu1 %v13817_v51 }
 0x5d8   :  { %12746 = vmatpush3.bf16.msra.mxu1 %v13817_v51 }
 0x5da   :  { %7391 = vmatmul.mubr.bf16.gmra.mrb[120].mxu1 %v16293_v52  ;;  %v13818_v52 = vld [vmem:[%s18799_s7 + $0x220] sm:$0xff]  }
 0x5db   :  { %7398 = vmatprep.mubr.bf16.mxu1 %v19145_v62  ;;  %12747 = vmatprep.subr.bf16.mxu1 %v13818_v52 }
 0x5dc   :  { %12748 = vmatpush3.bf16.msra.mxu1 %v13818_v52 }
 0x5dd   :  { %12749 = vmatprep.subr.bf16.mxu1 %v13819_v44 }
 0x5e0   :  { %12750 = vmatpush3.bf16.msra.mxu1 %v13819_v44 }
 0x5e2   :  { %7399 = vmatmul.mubr.bf16.gmra.mrb[124].mxu1 %v18983_v39 }
 0x5e3   :  { %7406 = vmatprep.mubr.bf16.mxu1 %v16627_v22  ;;  %v13821_v22 = vld [vmem:[%s18799_s7 + $0x230] sm:$0xff]  }
 0x5e4   :  { %12751 = vmatprep.subr.bf16.mxu1 %v13821_v22 }
 0x5e5   :  { %12752 = vmatpush3.bf16.msra.mxu1 %v13821_v22 }
 0x5e6   :  { %12753 = vmatprep.subr.bf16.mxu1 %v13822_v9 }
 0x5e9   :  { %12754 = vmatpush3.bf16.msra.mxu1 %v13822_v9 }
 0x5ea   :  { %7407 = vmatmul.mubr.bf16.gmra.mrb[128].mxu1 %v16358_v57  ;;  %v13823_v57 = vld [vmem:[%s18799_s7 + $0x90] sm:$0xff]  }
 0x5eb   :  { %7414 = vmatprep.mubr.bf16.mxu1 %v16639_v17  ;;  %10027 = vmatpush1.bf16.msra.mxu0 %v13823_v57 }
 0x5ec   :  { %10028 = vmatprep.subr.bf16.mxu0 %v18983_v39 }
 0x5f2   :  { %7415 = vmatmul.mubr.bf16.gmra.mrb[132].mxu1 %v16402_v14 }
 0x5f3   :  { %7422 = vmatprep.mubr.bf16.mxu1 %v16639_v17 }
 0x5fa   :  { %7423 = vmatmul.mubr.bf16.gmra.mrb[136].mxu1 %v16402_v14  ;;  %v13824_v14 = vld [vmem:[%s18799_s7 + $0x98] sm:$0xff]  }
 0x5fb   :  { %7430 = vmatprep.mubr.bf16.mxu1 %v16649_v36  ;;  %10029 = vmatpush1.bf16.msra.mxu0 %v13824_v14 }
 0x5fc   :  { %10030 = vmatprep.subr.bf16.mxu0 %v18983_v39 }
 0x602   :  { %7431 = vmatmul.mubr.bf16.gmra.mrb[140].mxu1 %v16453_v4 }
 0x603   :  { %7438 = vmatprep.mubr.bf16.mxu1 %v16649_v36  ;;  %v17252_v36 = vld [vmem:[%s18800_s5] ss:$0 sm:$0xff] }
 0x60a   :  { %7439 = vmatmul.mubr.bf16.gmra.mrb[144].mxu1 %v16453_v4  ;;  %v13825_v4 = vld [vmem:[%s18799_s7 + $0xa0] sm:$0xff]  }
 0x60b   :  { %7446 = vmatprep.mubr.bf16.mxu1 %v16659_v23  ;;  %10031 = vmatpush1.bf16.msra.mxu0 %v13825_v4 }
 0x60c   :  { %10032 = vmatprep.subr.bf16.mxu0 %v18983_v39 }
 0x612   :  { %7447 = vmatmul.mubr.bf16.gmra.mrb[148].mxu1 %v16503_v38 }
 0x613   :  { %7454 = vmatprep.mubr.bf16.mxu1 %v16659_v23 }
 0x61a   :  { %7455 = vmatmul.mubr.bf16.gmra.mrb[152].mxu1 %v16503_v38  ;;  %v13826_v38 = vld [vmem:[%s18799_s7 + $0xa8] sm:$0xff]  }
 0x61b   :  { %7462 = vmatprep.mubr.bf16.mxu1 %v16669_v37  ;;  %10033 = vmatpush1.bf16.msra.mxu0 %v13826_v38 }
 0x61c   :  { %10034 = vmatprep.subr.bf16.mxu0 %v18983_v39 }
 0x622   :  { %7463 = vmatmul.mubr.bf16.gmra.mrb[156].mxu1 %v16531_v46 }
 0x623   :  { %7470 = vmatprep.mubr.bf16.mxu1 %v16669_v37 }
 0x62a   :  { %7471 = vmatmul.mubr.bf16.gmra.mrb[160].mxu1 %v16531_v46  ;;  %v13827_v46 = vld [vmem:[%s18799_s7 + $0xb0] sm:$0xff]  }
 0x62b   :  { %7478 = vmatprep.mubr.bf16.mxu1 %v16679_v63  ;;  %10035 = vmatpush1.bf16.msra.mxu0 %v13827_v46 }
 0x62c   :  { %10036 = vmatprep.subr.bf16.mxu0 %v18983_v39 }
 0x632   :  { %7479 = vmatmul.mubr.bf16.gmra.mrb[164].mxu1 %v16558_v43 }
 0x633   :  { %7486 = vmatprep.mubr.bf16.mxu1 %v16679_v63 }
 0x63a   :  { %7487 = vmatmul.mubr.bf16.gmra.mrb[168].mxu1 %v16558_v43  ;;  %v17259_v43 = vld [vmem:[%s18801_s6] ss:$0 sm:$0xff] }
 0x63b   :  { %7494 = vmatprep.mubr.bf16.mxu1 %v16697_v54 }
 0x63d   :  { %v7280_v17 = vpop.f32.mrb[64].mxu1 }
 0x63e   :  { %v7570_v23 = vadd.f32 %v16689_v42, %v7280_v17  ;;  %v7282_v37 = vpop.f32.mrb[65].mxu1 }
 0x63f   :  { %v7283_v63 = vpop.f32.mrb[66].mxu1 }
 0x640   :  { %v7831_v11 = vmul.f32 %v17252_v36, %v7570_v23  ;;  %v7573_v27 = vadd.f32 %v16693_v15, %v7283_v63  ;;  %v7285_v26 = vpop.f32.mrb[67].mxu1 }
 0x642   :  { %v7902_v59 = vadd.f32 %v17259_v43, %v7831_v11  ;;  %v7832_v12 = vmul.f32 %v17252_v36, %v7573_v27  ;;  %7495 = vmatmul.mubr.bf16.gmra.mrb[172].mxu1 %v16580_v48  ;;  %v19221_v27 = vld [vmem:[#allocation4_spill] sm:$0xff] }
 0x643   :  { %7502 = vmatprep.mubr.bf16.mxu1 %v16697_v54 }
 0x644   :  { %v8030_v42 = vmul.f32 0.2, %v7902_v59  ;;  %v7903_v21 = vadd.f32 %v17259_v43, %v7832_v12  ;;  %vm7966_vm15 = vcmp.gt.f32.partialorder %v7902_v59, 0.0 }
 0x645   :  { %v7288_v30 = vpop.f32.mrb[68].mxu1 }
 0x646   :  { %vm7967_vm0 = vcmp.gt.f32.partialorder %v7903_v21, 0.0  ;;  %v8031_v10 = vmul.f32 0.2, %v7903_v21  ;;  %v7578_v55 = vadd.f32 %v16687_v8, %v7288_v30  ;;  %v7290_v13 = vpop.f32.mrb[69].mxu1  ;;  %v8094_v20 = vsel %vm7966_vm15, %v7902_v59, %v8030_v42  ;;  %v13828_v8 = vld [vmem:[%s18799_s7 + $0xb8] sm:$0xff]  }
 0x647   :  { %v7291_v15 = vpop.f32.mrb[70].mxu1  ;;  %10037 = vmatpush1.bf16.msra.mxu0 %v13828_v8  ;;  %v19222_v13 = vld [vmem:[#allocation14_spill] sm:$0xff] }
 0x648   :  { %v8095_v6 = vsel %vm7967_vm0, %v7903_v21, %v8031_v10  ;;  %v7833_v31 = vmul.f32 %v17252_v36, %v7578_v55  ;;  %v7581_v7 = vadd.f32 %v16691_v45, %v7291_v15  ;;  %v7293_v24 = vpop.f32.mrb[71].mxu1  ;;  %10038 = vmatprep.subr.bf16.mxu0 %v18983_v39 }
 0x649   :  { %v8158_v25 = vpack.c.bf16 %v8095_v6, %v8094_v20 }
 0x64a   :  { %v7904_v54 = vadd.f32 %v17259_v43, %v7833_v31  ;;  %v7834_v16 = vmul.f32 %v17252_v36, %v7581_v7  ;;  %7503 = vmatmul.mubr.bf16.gmra.mrb[176].mxu1 %v16580_v48 }
 0x64b   :  { %7510 = vmatprep.mubr.bf16.mxu1 %v16723_v50  ;;  %v8335_v35 = vshrl.u32 %v8158_v25, 16  ;;  %v8338_v45 = vshll.u32 %v8158_v25, 16 }
 0x64c   :  { %vm7968_vm1 = vcmp.gt.f32.partialorder %v7904_v54, 0.0  ;;  %v8032_v33 = vmul.f32 0.2, %v7904_v54  ;;  %v7905_v29 = vadd.f32 %v17259_v43, %v7834_v16 }
 0x64d   :  { %v7296_v40 = vpop.f32.mrb[72].mxu1  ;;  %v8337_v49 = vrot.slane %v8335_v35, 7 }
 0x64e   :  { %vm7969_vm2 = vcmp.gt.f32.partialorder %v7905_v29, 0.0  ;;  %v8033_v58 = vmul.f32 0.2, %v7905_v29  ;;  %v7586_v0 = vadd.f32 %v16703_v2, %v7296_v40  ;;  %v7298_v48 = vpop.f32.mrb[73].mxu1  ;;  %v8096_v47 = vsel %vm7968_vm1, %v7904_v54, %v8032_v33  ;;  %v13829_v33 = vld [vmem:[%s18799_s7 + $0xc0] sm:$0xff]  }
 0x64f   :  { %v7299_v3 = vpop.f32.mrb[74].mxu1  ;;  %v8340_v60 = vor.u32 %v8338_v45, %v8337_v49  ;;  %v17285_v44 = vsel %vm14233_vm10, %v8337_v49, 0  ;;  %10039 = vmatpush1.bf16.msra.mxu0 %v13829_v33 }
 0x650   :  { %v8097_v1 = vsel %vm7969_vm2, %v7905_v29, %v8033_v58  ;;  %v7835_v56 = vmul.f32 %v17252_v36, %v7586_v0  ;;  %v7589_v51 = vadd.f32 %v16707_v53, %v7299_v3  ;;  %v7301_v52 = vpop.f32.mrb[75].mxu1  ;;  %v8694_v53 = vshll.u32 %v17285_v44, 16  ;;  %10040 = vmatprep.subr.bf16.mxu0 %v18983_v39 }
 0x651   :  { %v8159_v19 = vpack.c.bf16 %v8097_v1, %v8096_v47  ;;  %v17289_v2 = vsel %vm14233_vm10, 0, %v8340_v60 }
 0x652   :  { %v7906_v22 = vadd.f32 %v17259_v43, %v7835_v56  ;;  %v7836_v9 = vmul.f32 %v17252_v36, %v7589_v51  ;;  %7511 = vmatmul.mubr.bf16.gmra.mrb[180].mxu1 %v16602_v5  ;;  %v8689_v57 = vshll.u32 %v17289_v2, 16  ;;  %v8687_v37 = vshrl.u32 %v17289_v2, 16 }
 0x653   :  { %7518 = vmatprep.mubr.bf16.mxu1 %v16723_v50  ;;  %v8342_v14 = vshrl.u32 %v8159_v19, 16  ;;  %v8345_v17 = vshll.u32 %v8159_v19, 16  ;;  %v8696_v21 = vrot.slane %v8694_v53, 1  ;;  %v19224_v53 = vld [vmem:[#allocation15_spill] sm:$0xff] }
 0x654   :  { %vm7970_vm3 = vcmp.gt.f32.partialorder %v7906_v22, 0.0  ;;  %v8034_v4 = vmul.f32 0.2, %v7906_v22  ;;  %v7907_v38 = vadd.f32 %v17259_v43, %v7836_v9  ;;  %v8691_v46 = vrot.slane %v8689_v57, 1 }
 0x655   :  { %v7304_v23 = vpop.f32.mrb[76].mxu1  ;;  %v8344_v63 = vrot.slane %v8342_v14, 7 }
 0x656   :  { %vm7971_vm4 = vcmp.gt.f32.partialorder %v7907_v38, 0.0  ;;  %v8035_v11 = vmul.f32 0.2, %v7907_v38  ;;  %v7594_v26 = vadd.f32 %v19221_v27, %v7304_v23  ;;  %v7306_v59 = vpop.f32.mrb[77].mxu1  ;;  %v8098_v12 = vsel %vm7970_vm3, %v7906_v22, %v8034_v4 }
 0x657   :  { %v7307_v50 = vpop.f32.mrb[78].mxu1  ;;  %v8692_v42 = vor.u32 %v8691_v46, %v8687_v37  ;;  %v8347_v30 = vor.u32 %v8345_v17, %v8344_v63  ;;  %v8655_v6 = vsel %vm14233_vm10, %v8344_v63, 0 }
 0x658   :  { %v8099_v10 = vsel %vm7971_vm4, %v7907_v38, %v8035_v11  ;;  %v7837_v55 = vmul.f32 %v17252_v36, %v7594_v26  ;;  %v7597_v15 = vadd.f32 %v19222_v13, %v7307_v50  ;;  %v7309_v20 = vpop.f32.mrb[79].mxu1  ;;  %v8706_v35 = vshll.u32 %v8655_v6, 16 }
 0x659   :  { %v8160_v31 = vpack.c.bf16 %v8099_v10, %v8098_v12  ;;  %v17305_v7 = vsel %vm5629_vm14, %v8692_v42, %v8696_v21  ;;  %v17309_v24 = vsel %vm14233_vm10, 0, %v8347_v30  ;;  %v9140_v0 = vrot.slane %v8655_v6, 1 }
 0x65a   :  { %19223 = vst [vmem:[#allocation59_spill] sm:$0xff] %v17305_v7  ;;  %v7908_v25 = vadd.f32 %v17259_v43, %v7837_v55  ;;  %v7838_v54 = vmul.f32 %v17252_v36, %v7597_v15  ;;  %9773 = vmatprep.mubr.bf16.mxu0 %v17305_v7  ;;  %7519 = vmatmul.mubr.bf16.gmra.mrb[184].mxu1 %v16602_v5  ;;  %v8701_v16 = vshll.u32 %v17309_v24, 16  ;;  %v8699_v5 = vshrl.u32 %v17309_v24, 16  ;;  %v19226_v15 = vld [vmem:[#allocation13_spill] sm:$0xff] }
 0x65b   :  { %9774 = vmatmul.mubr.bf16.gmra.mrb[148].mxu0 %v17289_v2  ;;  %7526 = vmatprep.mubr.bf16.mxu1 %v19145_v62  ;;  %v8349_v8 = vshrl.u32 %v8160_v31, 16  ;;  %v8352_v49 = vshll.u32 %v8160_v31, 16  ;;  %v9139_v1 = vrot.slane %v17309_v24, 1  ;;  %v8708_v19 = vrot.slane %v8706_v35, 1 }
 0x65c   :  { %vm7972_vm5 = vcmp.gt.f32.partialorder %v7908_v25, 0.0  ;;  %v8036_v29 = vmul.f32 0.2, %v7908_v25  ;;  %v7909_v45 = vadd.f32 %v17259_v43, %v7838_v54  ;;  %v8703_v40 = vrot.slane %v8701_v16, 1 }
 0x65d   :  { %v7312_v58 = vpop.f32.mrb[80].mxu1  ;;  %v8351_v48 = vrot.slane %v8349_v8, 7  ;;  %v17343_v63 = vsel %vm5879_vm13, %v9139_v1, %v9140_v0 }
 0x65e   :  { %vm7973_vm6 = vcmp.gt.f32.partialorder %v7909_v45, 0.0  ;;  %v8037_v47 = vmul.f32 0.2, %v7909_v45  ;;  %v7602_v3 = vadd.f32 %v16715_v61, %v7312_v58  ;;  %v7314_v60 = vpop.f32.mrb[81].mxu1  ;;  %v8100_v56 = vsel %vm7972_vm5, %v7908_v25, %v8036_v29 }
 0x65f   :  { %v7315_v51 = vpop.f32.mrb[82].mxu1  ;;  %v8704_v52 = vor.u32 %v8703_v40, %v8699_v5  ;;  %v8354_v22 = vor.u32 %v8352_v49, %v8351_v48  ;;  %v8656_v61 = vsel %vm14233_vm10, %v8351_v48, 0  ;;  %v19227_v40 = vld [vmem:[#allocation16_spill] sm:$0xff] }
 0x660   :  { %v8101_v9 = vsel %vm7973_vm6, %v7909_v45, %v8037_v47  ;;  %v7839_v57 = vmul.f32 %v17252_v36, %v7602_v3  ;;  %v7605_v14 = vadd.f32 %v19224_v53, %v7315_v51  ;;  %v7317_v4 = vpop.f32.mrb[83].mxu1  ;;  %v8718_v27 = vshll.u32 %v8656_v61, 16 }
 0x661   :  { %v8161_v38 = vpack.c.bf16 %v8101_v9, %v8100_v56  ;;  %v17332_v46 = vsel %vm5629_vm14, %v8704_v52, %v8708_v19  ;;  %v17336_v17 = vsel %vm14233_vm10, 0, %v8354_v22  ;;  %v9143_v31 = vrot.slane %v8656_v61, 1  ;;  %v13830_v22 = vld [vmem:[%s18799_s7 + $0xc8] sm:$0xff]  }
 0x662   :  { %19225 = vst [vmem:[#allocation58_spill] sm:$0xff] %v17332_v46  ;;  %v7910_v23 = vadd.f32 %v17259_v43, %v7839_v57  ;;  %v7840_v37 = vmul.f32 %v17252_v36, %v7605_v14  ;;  %9781 = vmatprep.mubr.bf16.mxu0 %v17332_v46  ;;  %7527 = vmatmul.mubr.bf16.gmra.mrb[188].mxu1 %v18983_v39  ;;  %v8713_v11 = vshll.u32 %v17336_v17, 16  ;;  %v8711_v50 = vshrl.u32 %v17336_v17, 16 }
 0x663   :  { %9782 = vmatmul.mubr.bf16.gmra.mrb[152].mxu0 %v17309_v24  ;;  %12755 = vmatprep.mubr.bf16.mxu1 %v17343_v63  ;;  %v8356_v26 = vshrl.u32 %v8161_v38, 16  ;;  %v8359_v21 = vshll.u32 %v8161_v38, 16  ;;  %v9142_v10 = vrot.slane %v17336_v17, 1  ;;  %v8720_v16 = vrot.slane %v8718_v27, 1 }
 0x664   :  { %v8038_v59 = vmul.f32 0.2, %v7910_v23  ;;  %v7911_v12 = vadd.f32 %v17259_v43, %v7840_v37  ;;  %v8715_v42 = vrot.slane %v8713_v11, 1  ;;  %vm7974_vm7 = vcmp.gt.f32.partialorder %v7910_v23, 0.0  ;;  %10041 = vmatpush1.bf16.msra.mxu0 %v13830_v22  ;;  %v19229_v11 = vld [vmem:[#allocation17_spill] sm:$0xff] }
 0x665   :  { %v7320_v30 = vpop.f32.mrb[84].mxu1  ;;  %v8358_v55 = vrot.slane %v8356_v26, 7  ;;  %v17360_v48 = vsel %vm5879_vm13, %v9142_v10, %v9143_v31  ;;  %10042 = vmatprep.subr.bf16.mxu0 %v18983_v39 }
 0x666   :  { %vm7975_vm8 = vcmp.gt.f32.partialorder %v7911_v12, 0.0  ;;  %v8039_v13 = vmul.f32 0.2, %v7911_v12  ;;  %v7610_v20 = vadd.f32 %v19226_v15, %v7320_v30  ;;  %v7322_v6 = vpop.f32.mrb[85].mxu1  ;;  %v8716_v54 = vor.u32 %v8715_v42, %v8711_v50 }
 0x667   :  { %v7323_v25 = vpop.f32.mrb[86].mxu1  ;;  %v8361_v35 = vor.u32 %v8359_v21, %v8358_v55  ;;  %v8657_v8 = vsel %vm14233_vm10, %v8358_v55, 0  ;;  %v8102_v33 = vsel %vm7974_vm7, %v7910_v23, %v8038_v59 }
 0x668   :  { %v8103_v29 = vsel %vm7975_vm8, %v7911_v12, %v8039_v13  ;;  %v7841_v45 = vmul.f32 %v17252_v36, %v7610_v20  ;;  %v7613_v49 = vadd.f32 %v19227_v40, %v7323_v25  ;;  %v7325_v58 = vpop.f32.mrb[87].mxu1  ;;  %v17357_v0 = vsel %vm5629_vm14, %v8716_v54, %v8720_v16  ;;  %v19230_v13 = vld [vmem:[#allocation12_spill] sm:$0xff] }
 0x669   :  { %v8162_v5 = vpack.c.bf16 %v8103_v29, %v8102_v33  ;;  %19228 = vst [vmem:[#allocation61_spill] sm:$0xff] %v17357_v0  ;;  %v17364_v47 = vsel %vm14233_vm10, 0, %v8361_v35  ;;  %9789 = vmatprep.mubr.bf16.mxu0 %v17357_v0  ;;  %v9146_v56 = vrot.slane %v8657_v8, 1  ;;  %v8730_v52 = vshll.u32 %v8657_v8, 16 }
 0x66a   :  { %v7912_v3 = vadd.f32 %v17259_v43, %v7841_v45  ;;  %v7842_v60 = vmul.f32 %v17252_v36, %v7613_v49  ;;  %12756 = vmatmul.mubr.bf16.vlgmr.msra.gmra.mrb[192].mxu1 %v17360_v48  ;;  %v9145_v1 = vrot.slane %v17364_v47, 1  ;;  %v8725_v51 = vshll.u32 %v17364_v47, 16 }
 0x66b   :  { %9790 = vmatmul.mubr.bf16.gmra.mrb[156].mxu0 %v17336_v17  ;;  %v8363_v19 = vshrl.u32 %v8162_v5, 16  ;;  %v8723_v14 = vshrl.u32 %v17364_v47, 16  ;;  %v8366_v4 = vshll.u32 %v8162_v5, 16  ;;  %v8732_v50 = vrot.slane %v8730_v52, 1  ;;  %v19232_v52 = vld [vmem:[#allocation18_spill] sm:$0xff] }
 0x66c   :  { %v8040_v9 = vmul.f32 0.2, %v7912_v3  ;;  %v7913_v57 = vadd.f32 %v17259_v43, %v7842_v60  ;;  %v17378_v53 = vsel %vm5879_vm13, %v9145_v1, %v9146_v56  ;;  %vm7976_vm9 = vcmp.gt.f32.partialorder %v7912_v3, 0.0 }
 0x66d   :  { %v7328_v61 = vpop.f32.mrb[88].mxu1  ;;  %12759 = vmatprep.mubr.bf16.mxu1 %v17378_v53  ;;  %v8727_v38 = vrot.slane %v8725_v51, 1  ;;  %v8365_v23 = vrot.slane %v8363_v19, 7 }
 0x66e   :  { %vm7977_vm11 = vcmp.gt.f32.partialorder %v7913_v57, 0.0  ;;  %v8041_v37 = vmul.f32 0.2, %v7913_v57  ;;  %v7618_v27 = vadd.f32 %v19229_v11, %v7328_v61  ;;  %v7330_v26 = vpop.f32.mrb[89].mxu1  ;;  %v8104_v30 = vsel %vm7976_vm9, %v7912_v3, %v8040_v9  ;;  %v19233_v11 = vld [vmem:[#allocation11_spill] sm:$0xff] }
 0x66f   :  { %v7331_v59 = vpop.f32.mrb[90].mxu1  ;;  %v8728_v12 = vor.u32 %v8727_v38, %v8723_v14  ;;  %v8368_v42 = vor.u32 %v8366_v4, %v8365_v23  ;;  %v8658_v21 = vsel %vm14233_vm10, %v8365_v23, 0 }
 0x670   :  { %v8105_v10 = vsel %vm7977_vm11, %v7913_v57, %v8041_v37  ;;  %v7843_v55 = vmul.f32 %v17252_v36, %v7618_v27  ;;  %v7621_v15 = vadd.f32 %v19230_v13, %v7331_v59  ;;  %v7333_v20 = vpop.f32.mrb[91].mxu1  ;;  %v9149_v8 = vrot.slane %v8658_v21, 1 }
 0x671   :  { %v8163_v6 = vpack.c.bf16 %v8105_v10, %v8104_v30  ;;  %v17390_v31 = vsel %vm5629_vm14, %v8728_v12, %v8732_v50  ;;  %v17394_v25 = vsel %vm14233_vm10, 0, %v8368_v42  ;;  %v8742_v29 = vshll.u32 %v8658_v21, 16  ;;  %v13831_v20 = vld [vmem:[%s18799_s7 + $0xd0] sm:$0xff]  }
 0x672   :  { %19231 = vst [vmem:[#allocation60_spill] sm:$0xff] %v17390_v31  ;;  %v7914_v54 = vadd.f32 %v17259_v43, %v7843_v55  ;;  %v7844_v16 = vmul.f32 %v17252_v36, %v7621_v15  ;;  %9797 = vmatprep.mubr.bf16.mxu0 %v17390_v31  ;;  %v9148_v35 = vrot.slane %v17394_v25, 1  ;;  %v8737_v33 = vshll.u32 %v17394_v25, 16  ;;  %10043 = vmatpush1.bf16.msra.mxu0 %v13831_v20 }
 0x673   :  { %9798 = vmatmul.mubr.bf16.gmra.mrb[160].mxu0 %v17364_v47  ;;  %v8370_v45 = vshrl.u32 %v8163_v6, 16  ;;  %v8735_v5 = vshrl.u32 %v17394_v25, 16  ;;  %v8373_v3 = vshll.u32 %v8163_v6, 16  ;;  %v8744_v14 = vrot.slane %v8742_v29, 1  ;;  %10044 = vmatprep.subr.bf16.mxu0 %v18983_v39 }
 0x674   :  { %v8042_v40 = vmul.f32 0.2, %v7914_v54  ;;  %v7915_v49 = vadd.f32 %v17259_v43, %v7844_v16  ;;  %v17404_v58 = vsel %vm5879_vm13, %v9148_v35, %v9149_v8  ;;  %vm7978_vm12 = vcmp.gt.f32.partialorder %v7914_v54, 0.0 }
 0x675   :  { %v7336_v60 = vpop.f32.mrb[92].mxu1  ;;  %12760 = vmatmul.mubr.bf16.gmra.mrb[196].mxu1 %v17404_v58  ;;  %v8739_v1 = vrot.slane %v8737_v33, 1  ;;  %v8372_v56 = vrot.slane %v8370_v45, 7 }
 0x676   :  { %vm7979_vm15 = vcmp.gt.f32.partialorder %v7915_v49, 0.0  ;;  %v8043_v51 = vmul.f32 0.2, %v7915_v49  ;;  %v7626_v19 = vadd.f32 %v19232_v52, %v7336_v60  ;;  %v7338_v22 = vpop.f32.mrb[93].mxu1  ;;  %v8106_v38 = vsel %vm7978_vm12, %v7914_v54, %v8042_v40 }
 0x677   :  { %v7339_v9 = vpop.f32.mrb[94].mxu1  ;;  %v8740_v57 = vor.u32 %v8739_v1, %v8735_v5  ;;  %v8375_v4 = vor.u32 %v8373_v3, %v8372_v56  ;;  %v8659_v61 = vsel %vm14233_vm10, %v8372_v56, 0 }
 0x678   :  { %v8107_v23 = vsel %vm7979_vm15, %v7915_v49, %v8043_v51  ;;  %v7845_v37 = vmul.f32 %v17252_v36, %v7626_v19  ;;  %v7629_v27 = vadd.f32 %v19233_v11, %v7339_v9  ;;  %v7341_v26 = vpop.f32.mrb[95].mxu1  ;;  %v9152_v10 = vrot.slane %v8659_v61, 1  ;;  %v19235_v49 = vld [vmem:[#allocation37_spill] sm:$0xff] }
 0x679   :  { %v8164_v59 = vpack.c.bf16 %v8107_v23, %v8106_v38  ;;  %v17414_v12 = vsel %vm5629_vm14, %v8740_v57, %v8744_v14  ;;  %v17418_v50 = vsel %vm14233_vm10, 0, %v8375_v4  ;;  %v8754_v13 = vshll.u32 %v8659_v61, 16  ;;  %v19236_v57 = vld [vmem:[#allocation40_spill] sm:$0xff] }
 0x67a   :  { %19234 = vst [vmem:[#allocation54_spill] sm:$0xff] %v17414_v12  ;;  %v7916_v42 = vadd.f32 %v17259_v43, %v7845_v37  ;;  %v7846_v21 = vmul.f32 %v17252_v36, %v7629_v27  ;;  %9805 = vmatprep.mubr.bf16.mxu0 %v17414_v12  ;;  %v9151_v30 = vrot.slane %v17418_v50, 1  ;;  %v8749_v55 = vshll.u32 %v17418_v50, 16 }
 0x67b   :  { %9806 = vmatmul.mubr.bf16.gmra.mrb[164].mxu0 %v17394_v25  ;;  %v8377_v15 = vshrl.u32 %v8164_v59, 16  ;;  %v8747_v35 = vshrl.u32 %v17418_v50, 16  ;;  %v8380_v8 = vshll.u32 %v8164_v59, 16  ;;  %v8756_v56 = vrot.slane %v8754_v13, 1 }
 0x67c   :  { %v8044_v6 = vmul.f32 0.2, %v7916_v42  ;;  %v7917_v54 = vadd.f32 %v17259_v43, %v7846_v21  ;;  %v17431_v16 = vsel %vm5879_vm13, %v9151_v30, %v9152_v10  ;;  %vm7980_vm0 = vcmp.gt.f32.partialorder %v7916_v42, 0.0 }
 0x67d   :  { %v7344_v33 = vpop.f32.mrb[96].mxu1  ;;  %12763 = vmatprep.mubr.bf16.mxu1 %v17431_v16  ;;  %v8751_v29 = vrot.slane %v8749_v55, 1  ;;  %v8379_v45 = vrot.slane %v8377_v15, 7 }
 0x67e   :  { %vm7981_vm1 = vcmp.gt.f32.partialorder %v7917_v54, 0.0  ;;  %v8045_v40 = vmul.f32 0.2, %v7917_v54  ;;  %v7634_v5 = vadd.f32 %v19235_v49, %v7344_v33  ;;  %v7346_v3 = vpop.f32.mrb[97].mxu1  ;;  %v8108_v19 = vsel %vm7980_vm0, %v7916_v42, %v8044_v6 }
 0x67f   :  { %v7347_v60 = vpop.f32.mrb[98].mxu1  ;;  %v8752_v1 = vor.u32 %v8751_v29, %v8747_v35  ;;  %v8382_v51 = vor.u32 %v8380_v8, %v8379_v45  ;;  %v8660_v52 = vsel %vm14233_vm10, %v8379_v45, 0  ;;  %v19238_v8 = vld [vmem:[#allocation36_spill] sm:$0xff] }
 0x680   :  { %v8109_v22 = vsel %vm7981_vm1, %v7917_v54, %v8045_v40  ;;  %v7847_v9 = vmul.f32 %v17252_v36, %v7634_v5  ;;  %v7637_v14 = vadd.f32 %v19236_v57, %v7347_v60  ;;  %v7349_v4 = vpop.f32.mrb[99].mxu1  ;;  %v9155_v26 = vrot.slane %v8660_v52, 1 }
 0x681   :  { %v8165_v61 = vpack.c.bf16 %v8109_v22, %v8108_v19  ;;  %v17443_v38 = vsel %vm5629_vm14, %v8752_v1, %v8756_v56  ;;  %v17447_v23 = vsel %vm14233_vm10, 0, %v8382_v51  ;;  %v8766_v42 = vshll.u32 %v8660_v52, 16  ;;  %v19239_v51 = vld [vmem:[#allocation41_spill] sm:$0xff] }
 0x682   :  { %19237 = vst [vmem:[#allocation55_spill] sm:$0xff] %v17443_v38  ;;  %v7918_v37 = vadd.f32 %v17259_v43, %v7847_v9  ;;  %v7848_v11 = vmul.f32 %v17252_v36, %v7637_v14  ;;  %9813 = vmatprep.mubr.bf16.mxu0 %v17443_v38  ;;  %v9154_v27 = vrot.slane %v17447_v23, 1  ;;  %v8761_v59 = vshll.u32 %v17447_v23, 16 }
 0x683   :  { %9814 = vmatmul.mubr.bf16.gmra.mrb[168].mxu0 %v17418_v50  ;;  %v8384_v21 = vshrl.u32 %v8165_v61, 16  ;;  %v8759_v13 = vshrl.u32 %v17447_v23, 16  ;;  %v8387_v15 = vshll.u32 %v8165_v61, 16  ;;  %v8768_v49 = vrot.slane %v8766_v42, 1 }
 0x684   :  { %v8046_v30 = vmul.f32 0.2, %v7918_v37  ;;  %v7919_v10 = vadd.f32 %v17259_v43, %v7848_v11  ;;  %v17457_v55 = vsel %vm5879_vm13, %v9154_v27, %v9155_v26  ;;  %vm7982_vm2 = vcmp.gt.f32.partialorder %v7918_v37, 0.0 }
 0x685   :  { %v7352_v20 = vpop.f32.mrb[100].mxu1  ;;  %12764 = vmatmul.mubr.bf16.gmra.mrb[200].mxu1 %v17457_v55  ;;  %v8763_v6 = vrot.slane %v8761_v59, 1  ;;  %v8386_v54 = vrot.slane %v8384_v21, 7  ;;  %v13832_v59 = vld [vmem:[%s18799_s7 + $0xd8] sm:$0xff]  }
 0x686   :  { %vm7983_vm3 = vcmp.gt.f32.partialorder %v7919_v10, 0.0  ;;  %v8047_v35 = vmul.f32 0.2, %v7919_v10  ;;  %v7642_v33 = vadd.f32 %v19238_v8, %v7352_v20  ;;  %v7354_v29 = vpop.f32.mrb[101].mxu1  ;;  %v8110_v60 = vsel %vm7982_vm2, %v7918_v37, %v8046_v30  ;;  %10045 = vmatpush1.bf16.msra.mxu0 %v13832_v59 }
 0x687   :  { %v7355_v45 = vpop.f32.mrb[102].mxu1  ;;  %v8764_v40 = vor.u32 %v8763_v6, %v8759_v13  ;;  %v8389_v5 = vor.u32 %v8387_v15, %v8386_v54  ;;  %v8661_v3 = vsel %vm14233_vm10, %v8386_v54, 0  ;;  %10046 = vmatprep.subr.bf16.mxu0 %v18983_v39 }
 0x688   :  { %v8111_v1 = vsel %vm7983_vm3, %v7919_v10, %v8047_v35  ;;  %v7849_v56 = vmul.f32 %v17252_v36, %v7642_v33  ;;  %v7645_v52 = vadd.f32 %v19239_v51, %v7355_v45  ;;  %v7357_v19 = vpop.f32.mrb[103].mxu1  ;;  %v9158_v37 = vrot.slane %v8661_v3, 1  ;;  %v19241_v35 = vld [vmem:[#allocation42_spill] sm:$0xff] }
 0x689   :  { %v8166_v22 = vpack.c.bf16 %v8111_v1, %v8110_v60  ;;  %v17467_v9 = vsel %vm5629_vm14, %v8764_v40, %v8768_v49  ;;  %v17471_v57 = vsel %vm14233_vm10, 0, %v8389_v5  ;;  %v8778_v27 = vshll.u32 %v8661_v3, 16 }
 0x68a   :  { %19240 = vst [vmem:[#allocation7_spill] sm:$0xff] %v17467_v9  ;;  %v7920_v14 = vadd.f32 %v17259_v43, %v7849_v56  ;;  %v7850_v4 = vmul.f32 %v17252_v36, %v7645_v52  ;;  %9821 = vmatprep.mubr.bf16.mxu0 %v17467_v9  ;;  %v9157_v61 = vrot.slane %v17471_v57, 1  ;;  %v8773_v11 = vshll.u32 %v17471_v57, 16  ;;  %v19242_v56 = vld [vmem:[#allocation44_spill] sm:$0xff] }
 0x68b   :  { %9822 = vmatmul.mubr.bf16.gmra.mrb[172].mxu0 %v17447_v23  ;;  %v8391_v26 = vshrl.u32 %v8166_v22, 16  ;;  %v8771_v10 = vshrl.u32 %v17471_v57, 16  ;;  %v8394_v13 = vshll.u32 %v8166_v22, 16  ;;  %v8780_v40 = vrot.slane %v8778_v27, 1 }
 0x68c   :  { %v8048_v42 = vmul.f32 0.2, %v7920_v14  ;;  %v7921_v21 = vadd.f32 %v17259_v43, %v7850_v4  ;;  %v17484_v30 = vsel %vm5879_vm13, %v9157_v61, %v9158_v37  ;;  %vm7984_vm4 = vcmp.gt.f32.partialorder %v7920_v14, 0.0 }
 0x68d   :  { %v7360_v15 = vpop.f32.mrb[104].mxu1  ;;  %12767 = vmatprep.mubr.bf16.mxu1 %v17484_v30  ;;  %v8775_v20 = vrot.slane %v8773_v11, 1  ;;  %v8393_v6 = vrot.slane %v8391_v26, 7 }
 0x68e   :  { %vm7985_vm5 = vcmp.gt.f32.partialorder %v7921_v21, 0.0  ;;  %v8049_v54 = vmul.f32 0.2, %v7921_v21  ;;  %v7650_v8 = vadd.f32 %v19241_v35, %v7360_v15  ;;  %v7362_v33 = vpop.f32.mrb[105].mxu1  ;;  %v8112_v3 = vsel %vm7984_vm4, %v7920_v14, %v8048_v42 }
 0x68f   :  { %v7363_v29 = vpop.f32.mrb[106].mxu1  ;;  %v8776_v45 = vor.u32 %v8775_v20, %v8771_v10  ;;  %v8396_v49 = vor.u32 %v8394_v13, %v8393_v6  ;;  %v8662_v5 = vsel %vm14233_vm10, %v8393_v6, 0 }
 0x690   :  { %v8113_v60 = vsel %vm7985_vm5, %v7921_v21, %v8049_v54  ;;  %v7851_v1 = vmul.f32 %v17252_v36, %v7650_v8  ;;  %v7653_v51 = vadd.f32 %v19242_v56, %v7363_v29  ;;  %v7365_v52 = vpop.f32.mrb[107].mxu1  ;;  %v9161_v11 = vrot.slane %v8662_v5, 1  ;;  %v19244_v8 = vld [vmem:[#allocation43_spill] sm:$0xff] }
 0x691   :  { %v8167_v19 = vpack.c.bf16 %v8113_v60, %v8112_v3  ;;  %v17496_v22 = vsel %vm5629_vm14, %v8776_v45, %v8780_v40  ;;  %v17500_v4 = vsel %vm14233_vm10, 0, %v8396_v49  ;;  %v8790_v26 = vshll.u32 %v8662_v5, 16 }
 0x692   :  { %19243 = vst [vmem:[#allocation8_spill] sm:$0xff] %v17496_v22  ;;  %v7922_v61 = vadd.f32 %v17259_v43, %v7851_v1  ;;  %v7852_v37 = vmul.f32 %v17252_v36, %v7653_v51  ;;  %9829 = vmatprep.mubr.bf16.mxu0 %v17496_v22  ;;  %v9160_v14 = vrot.slane %v17500_v4, 1  ;;  %v8785_v27 = vshll.u32 %v17500_v4, 16  ;;  %v19245_v51 = vld [vmem:[#allocation45_spill] sm:$0xff] }
 0x693   :  { %9830 = vmatmul.mubr.bf16.gmra.mrb[176].mxu0 %v17471_v57  ;;  %v8398_v59 = vshrl.u32 %v8167_v19, 16  ;;  %v8783_v13 = vshrl.u32 %v17500_v4, 16  ;;  %v8401_v15 = vshll.u32 %v8167_v19, 16  ;;  %v8792_v49 = vrot.slane %v8790_v26, 1  ;;  %v19251_v22 = vld [vmem:[#allocation25_spill] sm:$0xff] }
 0x694   :  { %v8050_v42 = vmul.f32 0.2, %v7922_v61  ;;  %v7923_v21 = vadd.f32 %v17259_v43, %v7852_v37  ;;  %v17510_v10 = vsel %vm5879_vm13, %v9160_v14, %v9161_v11  ;;  %vm7986_vm6 = vcmp.gt.f32.partialorder %v7922_v61, 0.0 }
 0x695   :  { %v7368_v20 = vpop.f32.mrb[108].mxu1  ;;  %12768 = vmatmul.mubr.bf16.gmra.mrb[204].mxu1 %v17510_v10  ;;  %v8787_v6 = vrot.slane %v8785_v27, 1  ;;  %v8400_v54 = vrot.slane %v8398_v59, 7 }
 0x696   :  { %vm7987_vm7 = vcmp.gt.f32.partialorder %v7923_v21, 0.0  ;;  %v8051_v35 = vmul.f32 0.2, %v7923_v21  ;;  %v7658_v33 = vadd.f32 %v19244_v8, %v7368_v20  ;;  %v7370_v29 = vpop.f32.mrb[109].mxu1  ;;  %v8114_v60 = vsel %vm7986_vm6, %v7922_v61, %v8050_v42 }
 0x697   :  { %v7371_v45 = vpop.f32.mrb[110].mxu1  ;;  %v8788_v40 = vor.u32 %v8787_v6, %v8783_v13  ;;  %v8403_v5 = vor.u32 %v8401_v15, %v8400_v54  ;;  %v8663_v3 = vsel %vm14233_vm10, %v8400_v54, 0  ;;  %v13833_v15 = vld [vmem:[%s18799_s7 + $0xe0] sm:$0xff]  }
 0x698   :  { %v8115_v1 = vsel %vm7987_vm7, %v7923_v21, %v8051_v35  ;;  %v7853_v56 = vmul.f32 %v17252_v36, %v7658_v33  ;;  %v7661_v52 = vadd.f32 %v19245_v51, %v7371_v45  ;;  %v7373_v19 = vpop.f32.mrb[111].mxu1  ;;  %v9164_v59 = vrot.slane %v8663_v3, 1  ;;  %10047 = vmatpush1.bf16.msra.mxu0 %v13833_v15 }
 0x699   :  { %v8168_v37 = vpack.c.bf16 %v8115_v1, %v8114_v60  ;;  %v17520_v14 = vsel %vm5629_vm14, %v8788_v40, %v8792_v49  ;;  %v17524_v11 = vsel %vm14233_vm10, 0, %v8403_v5  ;;  %v8802_v21 = vshll.u32 %v8663_v3, 16  ;;  %v19247_v49 = vld [vmem:[#allocation39_spill] sm:$0xff]  ;;  %10048 = vmatprep.subr.bf16.mxu0 %v18983_v39 }
 0x69a   :  { %19246 = vst [vmem:[#allocation62_spill] sm:$0xff] %v17520_v14  ;;  %v7924_v27 = vadd.f32 %v17259_v43, %v7853_v56  ;;  %v7854_v26 = vmul.f32 %v17252_v36, %v7661_v52  ;;  %9837 = vmatprep.mubr.bf16.mxu0 %v17520_v14  ;;  %v9163_v61 = vrot.slane %v17524_v11, 1  ;;  %v8797_v42 = vshll.u32 %v17524_v11, 16 }
 0x69b   :  { %9838 = vmatmul.mubr.bf16.gmra.mrb[180].mxu0 %v17500_v4  ;;  %v8405_v13 = vshrl.u32 %v8168_v37, 16  ;;  %v8795_v35 = vshrl.u32 %v17524_v11, 16  ;;  %v8408_v8 = vshll.u32 %v8168_v37, 16  ;;  %v8804_v56 = vrot.slane %v8802_v21, 1 }
 0x69c   :  { %v8052_v20 = vmul.f32 0.2, %v7924_v27  ;;  %v7925_v6 = vadd.f32 %v17259_v43, %v7854_v26  ;;  %v17537_v54 = vsel %vm5879_vm13, %v9163_v61, %v9164_v59  ;;  %vm7988_vm8 = vcmp.gt.f32.partialorder %v7924_v27, 0.0  ;;  %v19248_v61 = vld [vmem:[#allocation24_spill] sm:$0xff] }
 0x69d   :  { %v7376_v33 = vpop.f32.mrb[112].mxu1  ;;  %12771 = vmatprep.mubr.bf16.mxu1 %v17537_v54  ;;  %v8799_v29 = vrot.slane %v8797_v42, 1  ;;  %v8407_v45 = vrot.slane %v8405_v13, 7 }
 0x69e   :  { %vm7989_vm9 = vcmp.gt.f32.partialorder %v7925_v6, 0.0  ;;  %v8053_v40 = vmul.f32 0.2, %v7925_v6  ;;  %v7666_v5 = vadd.f32 %v19247_v49, %v7376_v33  ;;  %v7378_v3 = vpop.f32.mrb[113].mxu1  ;;  %v8116_v19 = vsel %vm7988_vm8, %v7924_v27, %v8052_v20 }
 0x69f   :  { %v7379_v60 = vpop.f32.mrb[114].mxu1  ;;  %v8800_v1 = vor.u32 %v8799_v29, %v8795_v35  ;;  %v8410_v51 = vor.u32 %v8408_v8, %v8407_v45  ;;  %v8664_v52 = vsel %vm14233_vm10, %v8407_v45, 0  ;;  %v17561_v45 = vpop.f32.mrb[140].mxu0 }
 0x6a0   :  { %v8117_v37 = vsel %vm7989_vm9, %v7925_v6, %v8053_v40  ;;  %v7855_v26 = vmul.f32 %v17252_v36, %v7666_v5  ;;  %v7669_v59 = vadd.f32 %v19248_v61, %v7379_v60  ;;  %v7381_v42 = vpop.f32.mrb[115].mxu1  ;;  %v9167_v20 = vrot.slane %v8664_v52, 1  ;;  %v17568_v60 = vpop.f32.mrb[141].mxu0 }
 0x6a1   :  { %v8169_v13 = vpack.c.bf16 %v8117_v37, %v8116_v19  ;;  %v17549_v15 = vsel %vm5629_vm14, %v8800_v1, %v8804_v56  ;;  %v17553_v35 = vsel %vm14233_vm10, 0, %v8410_v51  ;;  %v8814_v33 = vshll.u32 %v8664_v52, 16  ;;  %v17571_v19 = vpop.f32.mrb[142].mxu0 }
 0x6a2   :  { %19249 = vst [vmem:[#allocation69_spill] sm:$0xff] %v17549_v15  ;;  %v7926_v21 = vadd.f32 %v17259_v43, %v7855_v26  ;;  %v7856_v8 = vmul.f32 %v17252_v36, %v7669_v59  ;;  %9845 = vmatprep.mubr.bf16.mxu0 %v17549_v15  ;;  %v9166_v27 = vrot.slane %v17553_v35, 1  ;;  %v8809_v6 = vshll.u32 %v17553_v35, 16  ;;  %v19250_v26 = vld [vmem:[#allocation38_spill] sm:$0xff]  ;;  %v17574_v42 = vpop.f32.mrb[143].mxu0 }
 0x6a3   :  { %9846 = vmatmul.mubr.bf16.gmra.mrb[184].mxu0 %v17524_v11  ;;  %v8412_v29 = vshrl.u32 %v8169_v13, 16  ;;  %v8807_v3 = vshrl.u32 %v17553_v35, 16  ;;  %v8415_v1 = vshll.u32 %v8169_v13, 16 }
 0x6a4   :  { %v8054_v40 = vmul.f32 0.2, %v7926_v21  ;;  %v7927_v49 = vadd.f32 %v17259_v43, %v7856_v8  ;;  %v17565_v5 = vsel %vm5879_vm13, %v9166_v27, %v9167_v20  ;;  %vm7990_vm11 = vcmp.gt.f32.partialorder %v7926_v21, 0.0 }
 0x6a5   :  { %v7384_v56 = vpop.f32.mrb[116].mxu1  ;;  %12772 = vmatmul.mubr.bf16.gmra.mrb[208].mxu1 %v17565_v5  ;;  %v8811_v51 = vrot.slane %v8809_v6, 1  ;;  %v8414_v52 = vrot.slane %v8412_v29, 7  ;;  %v8816_v20 = vrot.slane %v8814_v33, 1 }
 0x6a6   :  { %vm7991_vm12 = vcmp.gt.f32.partialorder %v7927_v49, 0.0  ;;  %v8055_v37 = vmul.f32 0.2, %v7927_v49  ;;  %v7674_v61 = vadd.f32 %v19250_v26, %v7384_v56  ;;  %v7386_v59 = vpop.f32.mrb[117].mxu1  ;;  %v8118_v14 = vsel %vm7990_vm11, %v7926_v21, %v8054_v40 }
 0x6a7   :  { %v7387_v8 = vpop.f32.mrb[118].mxu1  ;;  %v8812_v27 = vor.u32 %v8811_v51, %v8807_v3  ;;  %v8417_v15 = vor.u32 %v8415_v1, %v8414_v52  ;;  %v8665_v13 = vsel %vm14233_vm10, %v8414_v52, 0 }
 0x6a8   :  { %v8119_v6 = vsel %vm7991_vm12, %v7927_v49, %v8055_v37  ;;  %v7857_v29 = vmul.f32 %v17252_v36, %v7674_v61  ;;  %v7677_v9 = vadd.f32 %v19251_v22, %v7387_v8  ;;  %v7389_v38 = vpop.f32.mrb[119].mxu1  ;;  %v9170_v40 = vrot.slane %v8665_v13, 1 }
 0x6a9   :  { %v8170_v12 = vpack.c.bf16 %v8119_v6, %v8118_v14  ;;  %v17582_v56 = vsel %vm5629_vm14, %v8812_v27, %v8816_v20  ;;  %v17586_v3 = vsel %vm14233_vm10, 0, %v8417_v15  ;;  %v8826_v22 = vshll.u32 %v8665_v13, 16  ;;  %v13834_v15 = vld [vmem:[%s18799_s7 + $0xe8] sm:$0xff]   ;;  %v19254_v27 = vld [vmem:[#allocation26_spill] sm:$0xff] }
 0x6aa   :  { %19252 = vst [vmem:[#allocation65_spill] sm:$0xff] %v17582_v56  ;;  %v7928_v33 = vadd.f32 %v17259_v43, %v7857_v29  ;;  %v7858_v1 = vmul.f32 %v17252_v36, %v7677_v9  ;;  %9853 = vmatprep.mubr.bf16.mxu0 %v17582_v56  ;;  %v9169_v21 = vrot.slane %v17586_v3, 1  ;;  %v8821_v38 = vshll.u32 %v17586_v3, 16  ;;  %10049 = vmatpush1.bf16.msra.mxu0 %v13834_v15 }
 0x6ab   :  { %9854 = vmatmul.mubr.bf16.gmra.mrb[188].mxu0 %v17553_v35  ;;  %v8419_v14 = vshrl.u32 %v8170_v12, 16  ;;  %v8819_v52 = vshrl.u32 %v17586_v3, 16  ;;  %v8422_v37 = vshll.u32 %v8170_v12, 16  ;;  %10050 = vmatprep.subr.bf16.mxu0 %v18983_v39 }
 0x6ac   :  { %v8056_v49 = vmul.f32 0.2, %v7928_v33  ;;  %v7929_v51 = vadd.f32 %v17259_v43, %v7858_v1  ;;  %v17599_v9 = vsel %vm5879_vm13, %v9169_v21, %v9170_v40  ;;  %vm7992_vm15 = vcmp.gt.f32.partialorder %v7928_v33, 0.0 }
 0x6ad   :  { %19253 = vst [vmem:[#allocation66_spill] sm:$0xff] %v17599_v9  ;;  %v7392_v26 = vpop.f32.mrb[120].mxu1  ;;  %12775 = vmatprep.mubr.bf16.mxu1 %v17599_v9  ;;  %v8823_v61 = vrot.slane %v8821_v38, 1  ;;  %v8421_v59 = vrot.slane %v8419_v14, 7  ;;  %v8828_v1 = vrot.slane %v8826_v22, 1  ;;  %v19255_v14 = vld [vmem:[#allocation28_spill] sm:$0xff] }
 0x6ae   :  { %vm7993_vm0 = vcmp.gt.f32.partialorder %v7929_v51, 0.0  ;;  %v8057_v8 = vmul.f32 0.2, %v7929_v51  ;;  %v7682_v20 = vadd.f32 %v19254_v27, %v7392_v26  ;;  %v7394_v13 = vpop.f32.mrb[121].mxu1  ;;  %v8120_v40 = vsel %vm7992_vm15, %v7928_v33, %v8056_v49 }
 0x6af   :  { %v7395_v6 = vpop.f32.mrb[122].mxu1  ;;  %v8824_v29 = vor.u32 %v8823_v61, %v8819_v52  ;;  %v8424_v21 = vor.u32 %v8422_v37, %v8421_v59  ;;  %v8666_v12 = vsel %vm14233_vm10, %v8421_v59, 0  ;;  %v17626_v59 = vld [vmem:[%s18801_s6] ss:$0 sm:$0xff] }
 0x6b0   :  { %v8121_v56 = vsel %vm7993_vm0, %v7929_v51, %v8057_v8  ;;  %v7859_v38 = vmul.f32 %v17252_v36, %v7682_v20  ;;  %v7685_v15 = vadd.f32 %v19255_v14, %v7395_v6  ;;  %v7397_v31 = vpop.f32.mrb[123].mxu1  ;;  %v9173_v49 = vrot.slane %v8666_v12, 1 }
 0x6b1   :  { %v8171_v0 = vpack.c.bf16 %v8121_v56, %v8120_v40  ;;  %v17611_v26 = vsel %vm5629_vm14, %v8824_v29, %v8828_v1  ;;  %v17615_v52 = vsel %vm14233_vm10, 0, %v8424_v21  ;;  %v8838_v56 = vshll.u32 %v8666_v12, 16  ;;  %v19258_v1 = vld [vmem:[#allocation27_spill] sm:$0xff] }
 0x6b2   :  { %19256 = vst [vmem:[#allocation70_spill] sm:$0xff] %v17611_v26  ;;  %v7930_v22 = vadd.f32 %v17259_v43, %v7859_v38  ;;  %v7860_v37 = vmul.f32 %v17252_v36, %v7685_v15  ;;  %9861 = vmatprep.mubr.bf16.mxu0 %v17611_v26  ;;  %v9172_v33 = vrot.slane %v17615_v52, 1  ;;  %v8833_v31 = vshll.u32 %v17615_v52, 16 }
 0x6b3   :  { %9862 = vmatmul.mubr.bf16.gmra.mrb[192].mxu0 %v17586_v3  ;;  %v8426_v51 = vshrl.u32 %v8171_v0, 16  ;;  %v8831_v8 = vshrl.u32 %v17615_v52, 16  ;;  %v8429_v27 = vshll.u32 %v8171_v0, 16  ;;  %v8840_v14 = vrot.slane %v8838_v56, 1 }
 0x6b4   :  { %v8058_v61 = vmul.f32 0.2, %v7930_v22  ;;  %v7931_v43 = vadd.f32 %v17626_v59, %v7860_v37  ;;  %v17630_v36 = vsel %vm5879_vm13, %v9172_v33, %v9173_v49  ;;  %vm7994_vm1 = vcmp.gt.f32.partialorder %v7930_v22, 0.0  ;;  %v17640_v49 = vld [vmem:[%s18800_s5] ss:$0 sm:$0xff] }
 0x6b5   :  { %19257 = vst [vmem:[#allocation71_spill] sm:$0xff] %v17630_v36  ;;  %v7400_v20 = vpop.f32.mrb[124].mxu1  ;;  %12776 = vmatmul.mubr.bf16.gmra.mrb[212].mxu1 %v17630_v36  ;;  %v8835_v13 = vrot.slane %v8833_v31, 1  ;;  %v8428_v6 = vrot.slane %v8426_v51, 7  ;;  %v19259_v51 = vld [vmem:[#allocation29_spill] sm:$0xff] }
 0x6b6   :  { %vm7995_vm2 = vcmp.gt.f32.partialorder %v7931_v43, 0.0  ;;  %v8059_v29 = vmul.f32 0.2, %v7931_v43  ;;  %v7690_v21 = vadd.f32 %v19258_v1, %v7400_v20  ;;  %v7402_v12 = vpop.f32.mrb[125].mxu1  ;;  %v8122_v33 = vsel %vm7994_vm1, %v7930_v22, %v8058_v61 }
 0x6b7   :  { %v7403_v40 = vpop.f32.mrb[126].mxu1  ;;  %v8836_v38 = vor.u32 %v8835_v13, %v8831_v8  ;;  %v8431_v15 = vor.u32 %v8429_v27, %v8428_v6  ;;  %v8667_v37 = vsel %vm14233_vm10, %v8428_v6, 0 }
 0x6b8   :  { %v8123_v0 = vsel %vm7995_vm2, %v7931_v43, %v8059_v29  ;;  %v7861_v31 = vmul.f32 %v17640_v49, %v7690_v21  ;;  %v7693_v26 = vadd.f32 %v19259_v51, %v7403_v40  ;;  %v7405_v20 = vpop.f32.mrb[127].mxu1  ;;  %v9176_v27 = vrot.slane %v8667_v37, 1  ;;  %v13835_v21 = vld [vmem:[%s18799_s7 + $0xf0] sm:$0xff]  }
 0x6b9   :  { %v8172_v1 = vpack.c.bf16 %v8123_v0, %v8122_v33  ;;  %v17645_v8 = vsel %vm5629_vm14, %v8836_v38, %v8840_v14  ;;  %v17649_v56 = vsel %vm14233_vm10, 0, %v8431_v15  ;;  %v8850_v6 = vshll.u32 %v8667_v37, 16  ;;  %10051 = vmatpush1.bf16.msra.mxu0 %v13835_v21 }
 0x6ba   :  { %19260 = vst [vmem:[#allocation79_spill] sm:$0xff] %v17645_v8  ;;  %19261 = vst [vmem:[#allocation78_spill] sm:$0xff] %v17649_v56  ;;  %v7932_v22 = vadd.f32 %v17626_v59, %v7861_v31  ;;  %v7862_v61 = vmul.f32 %v17640_v49, %v7693_v26  ;;  %9869 = vmatprep.mubr.bf16.mxu0 %v17645_v8  ;;  %v9175_v43 = vrot.slane %v17649_v56, 1  ;;  %v8845_v13 = vshll.u32 %v17649_v56, 16  ;;  %v19263_v31 = vld [vmem:[#allocation23_spill] sm:$0xff] }
 0x6bb   :  { %9870 = vmatmul.mubr.bf16.gmra.mrb[196].mxu0 %v17615_v52  ;;  %v8433_v29 = vshrl.u32 %v8172_v1, 16  ;;  %v8843_v38 = vshrl.u32 %v17649_v56, 16  ;;  %v8436_v14 = vshll.u32 %v8172_v1, 16  ;;  %10052 = vmatprep.subr.bf16.mxu0 %v18983_v39 }
 0x6bc   :  { %v8060_v12 = vmul.f32 0.2, %v7932_v22  ;;  %v7933_v40 = vadd.f32 %v17626_v59, %v7862_v61  ;;  %v17662_v26 = vsel %vm5879_vm13, %v9175_v43, %v9176_v27  ;;  %vm7996_vm3 = vcmp.gt.f32.partialorder %v7932_v22, 0.0 }
 0x6bd   :  { %19262 = vst [vmem:[#allocation67_spill] sm:$0xff] %v17662_v26  ;;  %v7408_v15 = vpop.f32.mrb[128].mxu1  ;;  %12779 = vmatprep.mubr.bf16.mxu1 %v17662_v26  ;;  %v8847_v33 = vrot.slane %v8845_v13, 1  ;;  %v8435_v37 = vrot.slane %v8433_v29, 7  ;;  %v8852_v27 = vrot.slane %v8850_v6, 1  ;;  %v19264_v29 = vld [vmem:[#allocation20_spill] sm:$0xff] }
 0x6be   :  { %vm7997_vm4 = vcmp.gt.f32.partialorder %v7933_v40, 0.0  ;;  %v8061_v0 = vmul.f32 0.2, %v7933_v40  ;;  %v7698_v51 = vadd.f32 %v19263_v31, %v7408_v15  ;;  %v7410_v20 = vpop.f32.mrb[129].mxu1  ;;  %v8124_v46 = vsel %vm7996_vm3, %v7932_v22, %v8060_v12 }
 0x6bf   :  { %v7411_v61 = vpop.f32.mrb[130].mxu1  ;;  %v8848_v43 = vor.u32 %v8847_v33, %v8843_v38  ;;  %v8438_v8 = vor.u32 %v8436_v14, %v8435_v37  ;;  %v8668_v1 = vsel %vm14233_vm10, %v8435_v37, 0 }
 0x6c0   :  { %v8125_v7 = vsel %vm7997_vm4, %v7933_v40, %v8061_v0  ;;  %v7863_v13 = vmul.f32 %v17640_v49, %v7698_v51  ;;  %v7701_v21 = vadd.f32 %v19264_v29, %v7411_v61  ;;  %v7413_v26 = vpop.f32.mrb[131].mxu1  ;;  %v9179_v12 = vrot.slane %v8668_v1, 1 }
 0x6c1   :  { %v8173_v36 = vpack.c.bf16 %v8125_v7, %v8124_v46  ;;  %v17674_v15 = vsel %vm5629_vm14, %v8848_v43, %v8852_v27  ;;  %v17678_v38 = vsel %vm14233_vm10, 0, %v8438_v8  ;;  %v8862_v46 = vshll.u32 %v8668_v1, 16  ;;  %v13836_v8 = vld [vmem:[%s18799_s7 + $0xf8] sm:$0xff]   ;;  %v19268_v27 = vld [vmem:[#allocation22_spill] sm:$0xff] }
 0x6c2   :  { %19265 = vst [vmem:[#allocation75_spill] sm:$0xff] %v17674_v15  ;;  %19266 = vst [vmem:[#allocation74_spill] sm:$0xff] %v17678_v38  ;;  %v7934_v6 = vadd.f32 %v17626_v59, %v7863_v13  ;;  %v7864_v14 = vmul.f32 %v17640_v49, %v7701_v21  ;;  %9877 = vmatprep.mubr.bf16.mxu0 %v17674_v15  ;;  %v9178_v22 = vrot.slane %v17678_v38, 1  ;;  %v8857_v7 = vshll.u32 %v17678_v38, 16 }
 0x6c3   :  { %9878 = vmatmul.mubr.bf16.gmra.mrb[200].mxu0 %v17649_v56  ;;  %v8440_v40 = vshrl.u32 %v8173_v36, 16  ;;  %v8855_v0 = vshrl.u32 %v17678_v38, 16  ;;  %v8443_v31 = vshll.u32 %v8173_v36, 16 }
 0x6c4   :  { %v8062_v26 = vmul.f32 0.2, %v7934_v6  ;;  %v7935_v33 = vadd.f32 %v17626_v59, %v7864_v14  ;;  %v17691_v37 = vsel %vm5879_vm13, %v9178_v22, %v9179_v12  ;;  %vm7998_vm5 = vcmp.gt.f32.partialorder %v7934_v6, 0.0  ;;  %10053 = vmatpush1.bf16.msra.mxu0 %v13836_v8  ;;  %v19270_v8 = vld [vmem:[#allocation21_spill] sm:$0xff] }
 0x6c5   :  { %19267 = vst [vmem:[#allocation77_spill] sm:$0xff] %v17691_v37  ;;  %v7416_v51 = vpop.f32.mrb[132].mxu1  ;;  %12780 = vmatmul.mubr.bf16.gmra.mrb[216].mxu1 %v17691_v37  ;;  %v8859_v20 = vrot.slane %v8857_v7, 1  ;;  %v8442_v61 = vrot.slane %v8440_v40, 7  ;;  %10311 = vmatprep.subr.bf16.mxu0 %v18983_v39  ;;  %v8864_v14 = vrot.slane %v8862_v46, 1 }
 0x6c6   :  { %vm7999_vm6 = vcmp.gt.f32.partialorder %v7935_v33, 0.0  ;;  %v8063_v43 = vmul.f32 0.2, %v7935_v33  ;;  %v7706_v1 = vadd.f32 %v19268_v27, %v7416_v51  ;;  %v7418_v13 = vpop.f32.mrb[133].mxu1  ;;  %v8126_v12 = vsel %vm7998_vm5, %v7934_v6, %v8062_v26 }
 0x6c7   :  { %v7419_v29 = vpop.f32.mrb[134].mxu1  ;;  %v8860_v21 = vor.u32 %v8859_v20, %v8855_v0  ;;  %v8445_v22 = vor.u32 %v8443_v31, %v8442_v61  ;;  %v17699_v36 = vsel %vm14233_vm10, %v8442_v61, 0 }
 0x6c8   :  { %19269 = vst [vmem:[#allocation76_spill] sm:$0xff] %v17699_v36  ;;  %v8127_v7 = vsel %vm7999_vm6, %v7935_v33, %v8063_v43  ;;  %v7865_v40 = vmul.f32 %v17640_v49, %v7706_v1  ;;  %v7709_v15 = vadd.f32 %v19270_v8, %v7419_v29  ;;  %v7421_v37 = vpop.f32.mrb[135].mxu1  ;;  %v9287_v26 = vrot.slane %v17699_v36, 1  ;;  %v19274_v29 = vld [vmem:[#allocation30_spill] sm:$0xff] }
 0x6c9   :  { %v8174_v51 = vpack.c.bf16 %v8127_v7, %v8126_v12  ;;  %v17705_v27 = vsel %vm5629_vm14, %v8860_v21, %v8864_v14  ;;  %v17709_v46 = vsel %vm14233_vm10, 0, %v8445_v22 }
 0x6ca   :  { %19271 = vst [vmem:[#allocation73_spill] sm:$0xff] %v17705_v27  ;;  %19272 = vst [vmem:[#allocation72_spill] sm:$0xff] %v17709_v46  ;;  %v7936_v0 = vadd.f32 %v17626_v59, %v7865_v40  ;;  %v7866_v31 = vmul.f32 %v17640_v49, %v7709_v15  ;;  %9885 = vmatprep.mubr.bf16.mxu0 %v17705_v27  ;;  %v9286_v6 = vrot.slane %v17709_v46, 1  ;;  %v19279_v46 = vld [vmem:[#allocation33_spill] sm:$0xff] }
 0x6cb   :  { %9886 = vmatmul.mubr.bf16.gmra.mrb[204].mxu0 %v17678_v38  ;;  %v8447_v33 = vshrl.u32 %v8174_v51, 16  ;;  %v8450_v43 = vshll.u32 %v8174_v51, 16 }
 0x6cc   :  { %vm8000_vm7 = vcmp.gt.f32.partialorder %v7936_v0, 0.0  ;;  %v8064_v37 = vmul.f32 0.2, %v7936_v0  ;;  %v7937_v20 = vadd.f32 %v17626_v59, %v7866_v31  ;;  %v17719_v61 = vsel %vm5879_vm13, %v9286_v6, %v9287_v26  ;;  %9893 = vmatprep.mubr.bf16.mxu0 %v19145_v62  ;;  %v19275_v31 = vld [vmem:[#allocation32_spill] sm:$0xff] }
 0x6cd   :  { %19273 = vst [vmem:[#allocation68_spill] sm:$0xff] %v17719_v61  ;;  %v7424_v15 = vpop.f32.mrb[136].mxu1  ;;  %12783 = vmatprep.mubr.bf16.mxu1 %v17719_v61  ;;  %v8449_v1 = vrot.slane %v8447_v33, 7 }
 0x6ce   :  { %vm8001_vm8 = vcmp.gt.f32.partialorder %v7937_v20, 0.0  ;;  %v8065_v13 = vmul.f32 0.2, %v7937_v20  ;;  %v7714_v21 = vadd.f32 %v19274_v29, %v7424_v15  ;;  %v7426_v14 = vpop.f32.mrb[137].mxu1  ;;  %12784 = vmatmul.mubr.bf16.gmra.mrb[220].mxu1 %v19145_v62  ;;  %v8128_v22 = vsel %vm8000_vm7, %v7936_v0, %v8064_v37 }
 0x6cf   :  { %v7427_v12 = vpop.f32.mrb[138].mxu1  ;;  %v8452_v7 = vor.u32 %v8450_v43, %v8449_v1  ;;  %v17729_v26 = vsel %vm14233_vm10, %v8449_v1, 0 }
 0x6d0   :  { %v8129_v40 = vsel %vm8001_vm8, %v7937_v20, %v8065_v13  ;;  %v7867_v8 = vmul.f32 %v17640_v49, %v7714_v21  ;;  %v7717_v6 = vadd.f32 %v19275_v31, %v7427_v12  ;;  %v7429_v51 = vpop.f32.mrb[139].mxu1  ;;  %19276 = vst [vmem:[#allocation19_spill] sm:$0xff] %v17729_v26  ;;  %v8874_v20 = vshll.u32 %v17729_v26, 16 }
 0x6d1   :  { %v8175_v33 = vpack.c.bf16 %v8129_v40, %v8128_v22  ;;  %v17733_v15 = vsel %vm14233_vm10, 0, %v8452_v7 }
 0x6d2   :  { %19277 = vst [vmem:[#allocation2_spill] sm:$0xff] %v17733_v15  ;;  %v7938_v29 = vadd.f32 %v17626_v59, %v7867_v8  ;;  %v7868_v0 = vmul.f32 %v17640_v49, %v7717_v6  ;;  %v8869_v37 = vshll.u32 %v17733_v15, 16  ;;  %v8867_v12 = vshrl.u32 %v17733_v15, 16  ;;  %v19278_v8 = vld [vmem:[#allocation31_spill] sm:$0xff] }
 0x6d3   :  { %9894 = vmatmul.mubr.bf16.gmra.mrb[208].mxu0 %v18983_v39  ;;  %v8454_v43 = vshrl.u32 %v8175_v33, 16  ;;  %v8457_v14 = vshll.u32 %v8175_v33, 16  ;;  %v8876_v61 = vrot.slane %v8874_v20, 1 }
 0x6d4   :  { %v8066_v13 = vmul.f32 0.2, %v7938_v29  ;;  %v7939_v1 = vadd.f32 %v17626_v59, %v7868_v0  ;;  %v8871_v21 = vrot.slane %v8869_v37, 1  ;;  %vm8002_vm9 = vcmp.gt.f32.partialorder %v7938_v29, 0.0 }
 0x6d5   :  { %v7432_v22 = vpop.f32.mrb[140].mxu1  ;;  %v8456_v7 = vrot.slane %v8454_v43, 7 }
 0x6d6   :  { %vm8003_vm11 = vcmp.gt.f32.partialorder %v7939_v1, 0.0  ;;  %v8067_v40 = vmul.f32 0.2, %v7939_v1  ;;  %v7722_v31 = vadd.f32 %v19278_v8, %v7432_v22  ;;  %v7434_v6 = vpop.f32.mrb[141].mxu1  ;;  %v8872_v36 = vor.u32 %v8871_v21, %v8867_v12 }
 0x6d7   :  { %v7435_v51 = vpop.f32.mrb[142].mxu1  ;;  %v8459_v27 = vor.u32 %v8457_v14, %v8456_v7  ;;  %v8671_v26 = vsel %vm14233_vm10, %v8456_v7, 0  ;;  %v8130_v0 = vsel %vm8002_vm9, %v7938_v29, %v8066_v13 }
 0x6d8   :  { %v8131_v37 = vsel %vm8003_vm11, %v7939_v1, %v8067_v40  ;;  %v7869_v33 = vmul.f32 %v17640_v49, %v7722_v31  ;;  %v7725_v38 = vadd.f32 %v19279_v46, %v7435_v51  ;;  %v7437_v56 = vpop.f32.mrb[143].mxu1  ;;  %v17748_v9 = vsel %vm5629_vm14, %v8872_v36, %v8876_v61  ;;  %v19283_v31 = vld [vmem:[#allocation34_spill] sm:$0xff] }
 0x6d9   :  { %v8176_v43 = vpack.c.bf16 %v8131_v37, %v8130_v0  ;;  %19280 = vst [vmem:[#allocation3_spill] sm:$0xff] %v17748_v9  ;;  %v17752_v22 = vsel %vm14233_vm10, 0, %v8459_v27  ;;  %9901 = vmatprep.mubr.bf16.mxu0 %v17748_v9  ;;  %v9185_v13 = vrot.slane %v8671_v26, 1  ;;  %v8886_v46 = vshll.u32 %v8671_v26, 16  ;;  %v19284_v9 = vld [vmem:[#allocation64_spill] sm:$0xff] }
 0x6da   :  { %19281 = vst [vmem:[#allocation10_spill] sm:$0xff] %v17752_v22  ;;  %v7940_v20 = vadd.f32 %v17626_v59, %v7869_v33  ;;  %v7870_v21 = vmul.f32 %v17640_v49, %v7725_v38  ;;  %v9184_v29 = vrot.slane %v17752_v22, 1  ;;  %v8881_v56 = vshll.u32 %v17752_v22, 16 }
 0x6db   :  { %9902 = vmatmul.mubr.bf16.gmra.mrb[212].mxu0 %v17733_v15  ;;  %v8461_v36 = vshrl.u32 %v8176_v43, 16  ;;  %v8879_v14 = vshrl.u32 %v17752_v22, 16  ;;  %v8464_v38 = vshll.u32 %v8176_v43, 16  ;;  %v8888_v37 = vrot.slane %v8886_v46, 1 }
 0x6dc   :  { %v8068_v61 = vmul.f32 0.2, %v7940_v20  ;;  %v7941_v1 = vadd.f32 %v17626_v59, %v7870_v21  ;;  %v17762_v27 = vsel %vm5879_vm13, %v9184_v29, %v9185_v13  ;;  %vm8004_vm12 = vcmp.gt.f32.partialorder %v7940_v20, 0.0 }
 0x6dd   :  { %19282 = vst [vmem:[#allocation9_spill] sm:$0xff] %v17762_v27  ;;  %v7440_v12 = vpop.f32.mrb[144].mxu1  ;;  %12787 = vmatprep.mubr.bf16.mxu1 %v17762_v27  ;;  %v8883_v7 = vrot.slane %v8881_v56, 1  ;;  %v8463_v40 = vrot.slane %v8461_v36, 7 }
 0x6de   :  { %vm8005_vm15 = vcmp.gt.f32.partialorder %v7941_v1, 0.0  ;;  %v8069_v8 = vmul.f32 0.2, %v7941_v1  ;;  %v7730_v26 = vadd.f32 %v19283_v31, %v7440_v12  ;;  %v7442_v6 = vpop.f32.mrb[145].mxu1  ;;  %v8132_v29 = vsel %vm8004_vm12, %v7940_v20, %v8068_v61 }
 0x6df   :  { %v7443_v51 = vpop.f32.mrb[146].mxu1  ;;  %v8884_v0 = vor.u32 %v8883_v7, %v8879_v14  ;;  %v8466_v33 = vor.u32 %v8464_v38, %v8463_v40  ;;  %v8672_v21 = vsel %vm14233_vm10, %v8463_v40, 0 }
 0x6e0   :  { %v8133_v43 = vsel %vm8005_vm15, %v7941_v1, %v8069_v8  ;;  %v7871_v13 = vmul.f32 %v17640_v49, %v7730_v26  ;;  %v7733_v27 = vadd.f32 %v19284_v9, %v7443_v51  ;;  %v7445_v56 = vpop.f32.mrb[147].mxu1  ;;  %v9188_v61 = vrot.slane %v8672_v21, 1 }
 0x6e1   :  { %v8177_v36 = vpack.c.bf16 %v8133_v43, %v8132_v29  ;;  %v17772_v15 = vsel %vm5629_vm14, %v8884_v0, %v8888_v37  ;;  %v17776_v12 = vsel %vm14233_vm10, 0, %v8466_v33  ;;  %v8898_v1 = vshll.u32 %v8672_v21, 16  ;;  %v19288_v37 = vld [vmem:[#allocation35_spill] sm:$0xff] }
 0x6e2   :  { %19285 = vst [vmem:[#allocation4_spill] sm:$0xff] %v17772_v15  ;;  %19286 = vst [vmem:[#allocation14_spill] sm:$0xff] %v17776_v12  ;;  %v7942_v46 = vadd.f32 %v17626_v59, %v7871_v13  ;;  %v7872_v14 = vmul.f32 %v17640_v49, %v7733_v27  ;;  %9909 = vmatprep.mubr.bf16.mxu0 %v17772_v15  ;;  %v9187_v20 = vrot.slane %v17776_v12, 1  ;;  %v8893_v9 = vshll.u32 %v17776_v12, 16  ;;  %v19289_v15 = vld [vmem:[#allocation63_spill] sm:$0xff] }
 0x6e3   :  { %9910 = vmatmul.mubr.bf16.gmra.mrb[216].mxu0 %v17752_v22  ;;  %v8468_v38 = vshrl.u32 %v8177_v36, 16  ;;  %v8891_v31 = vshrl.u32 %v17776_v12, 16  ;;  %v8471_v27 = vshll.u32 %v8177_v36, 16  ;;  %v8900_v13 = vrot.slane %v8898_v1, 1 }
 0x6e4   :  { %v8070_v7 = vmul.f32 0.2, %v7942_v46  ;;  %v7943_v40 = vadd.f32 %v17626_v59, %v7872_v14  ;;  %v17786_v8 = vsel %vm5879_vm13, %v9187_v20, %v9188_v61  ;;  %vm8006_vm0 = vcmp.gt.f32.partialorder %v7942_v46, 0.0 }
 0x6e5   :  { %19287 = vst [vmem:[#allocation15_spill] sm:$0xff] %v17786_v8  ;;  %v7448_v26 = vpop.f32.mrb[148].mxu1  ;;  %12788 = vmatmul.mubr.bf16.gmra.mrb[224].mxu1 %v17786_v8  ;;  %v8895_v6 = vrot.slane %v8893_v9, 1  ;;  %v8470_v51 = vrot.slane %v8468_v38, 7 }
 0x6e6   :  { %vm8007_vm1 = vcmp.gt.f32.partialorder %v7943_v40, 0.0  ;;  %v8071_v0 = vmul.f32 0.2, %v7943_v40  ;;  %v7738_v33 = vadd.f32 %v19288_v37, %v7448_v26  ;;  %v7450_v21 = vpop.f32.mrb[149].mxu1  ;;  %v8134_v20 = vsel %vm8006_vm0, %v7942_v46, %v8070_v7 }
 0x6e7   :  { %v7451_v29 = vpop.f32.mrb[150].mxu1  ;;  %v8896_v43 = vor.u32 %v8895_v6, %v8891_v31  ;;  %v8473_v56 = vor.u32 %v8471_v27, %v8470_v51  ;;  %v8673_v14 = vsel %vm14233_vm10, %v8470_v51, 0 }
 0x6e8   :  { %v8135_v36 = vsel %vm8007_vm1, %v7943_v40, %v8071_v0  ;;  %v7873_v61 = vmul.f32 %v17640_v49, %v7738_v33  ;;  %v7741_v8 = vadd.f32 %v19289_v15, %v7451_v29  ;;  %v7453_v9 = vpop.f32.mrb[151].mxu1  ;;  %v9191_v7 = vrot.slane %v8673_v14, 1 }
 0x6e9   :  { %v8178_v38 = vpack.c.bf16 %v8135_v36, %v8134_v20  ;;  %v17796_v22 = vsel %vm5629_vm14, %v8896_v43, %v8900_v13  ;;  %v17800_v26 = vsel %vm14233_vm10, 0, %v8473_v56  ;;  %v8910_v40 = vshll.u32 %v8673_v14, 16  ;;  %v19293_v13 = vld [vmem:[#allocation48_spill] sm:$0xff] }
 0x6ea   :  { %19290 = vst [vmem:[#allocation13_spill] sm:$0xff] %v17796_v22  ;;  %19291 = vst [vmem:[#allocation16_spill] sm:$0xff] %v17800_v26  ;;  %v7944_v1 = vadd.f32 %v17626_v59, %v7873_v61  ;;  %v7874_v31 = vmul.f32 %v17640_v49, %v7741_v8  ;;  %9917 = vmatprep.mubr.bf16.mxu0 %v17796_v22  ;;  %v9190_v46 = vrot.slane %v17800_v26, 1  ;;  %v8905_v15 = vshll.u32 %v17800_v26, 16  ;;  %v19294_v22 = vld [vmem:[#allocation50_spill] sm:$0xff] }
 0x6eb   :  { %9918 = vmatmul.mubr.bf16.gmra.mrb[220].mxu0 %v17776_v12  ;;  %v8475_v27 = vshrl.u32 %v8178_v38, 16  ;;  %v8903_v37 = vshrl.u32 %v17800_v26, 16  ;;  %v8478_v8 = vshll.u32 %v8178_v38, 16  ;;  %v8912_v61 = vrot.slane %v8910_v40, 1 }
 0x6ec   :  { %v8072_v6 = vmul.f32 0.2, %v7944_v1  ;;  %v7945_v51 = vadd.f32 %v17626_v59, %v7874_v31  ;;  %v17810_v0 = vsel %vm5879_vm13, %v9190_v46, %v9191_v7  ;;  %vm8008_vm2 = vcmp.gt.f32.partialorder %v7944_v1, 0.0 }
 0x6ed   :  { %19292 = vst [vmem:[#allocation17_spill] sm:$0xff] %v17810_v0  ;;  %v7456_v33 = vpop.f32.mrb[152].mxu1  ;;  %12791 = vmatprep.mubr.bf16.mxu1 %v17810_v0  ;;  %v8907_v21 = vrot.slane %v8905_v15, 1  ;;  %v8477_v29 = vrot.slane %v8475_v27, 7 }
 0x6ee   :  { %vm8009_vm3 = vcmp.gt.f32.partialorder %v7945_v51, 0.0  ;;  %v8073_v43 = vmul.f32 0.2, %v7945_v51  ;;  %v7746_v56 = vadd.f32 %v19293_v13, %v7456_v33  ;;  %v7458_v14 = vpop.f32.mrb[153].mxu1  ;;  %v8136_v46 = vsel %vm8008_vm2, %v7944_v1, %v8072_v6 }
 0x6ef   :  { %v7459_v20 = vpop.f32.mrb[154].mxu1  ;;  %v8908_v36 = vor.u32 %v8907_v21, %v8903_v37  ;;  %v8480_v9 = vor.u32 %v8478_v8, %v8477_v29  ;;  %v8674_v31 = vsel %vm14233_vm10, %v8477_v29, 0 }
 0x6f0   :  { %v8137_v38 = vsel %vm8009_vm3, %v7945_v51, %v8073_v43  ;;  %v7875_v7 = vmul.f32 %v17640_v49, %v7746_v56  ;;  %v7749_v0 = vadd.f32 %v19294_v22, %v7459_v20  ;;  %v7461_v15 = vpop.f32.mrb[155].mxu1  ;;  %v9194_v6 = vrot.slane %v8674_v31, 1 }
 0x6f1   :  { %v8179_v27 = vpack.c.bf16 %v8137_v38, %v8136_v46  ;;  %v17820_v12 = vsel %vm5629_vm14, %v8908_v36, %v8912_v61  ;;  %v17824_v33 = vsel %vm14233_vm10, 0, %v8480_v9  ;;  %v8922_v51 = vshll.u32 %v8674_v31, 16  ;;  %v19298_v61 = vld [vmem:[#allocation49_spill] sm:$0xff] }
 0x6f2   :  { %19295 = vst [vmem:[#allocation12_spill] sm:$0xff] %v17820_v12  ;;  %19296 = vst [vmem:[#allocation18_spill] sm:$0xff] %v17824_v33  ;;  %v7946_v40 = vadd.f32 %v17626_v59, %v7875_v7  ;;  %v7876_v37 = vmul.f32 %v17640_v49, %v7749_v0  ;;  %9925 = vmatprep.mubr.bf16.mxu0 %v17820_v12  ;;  %v9193_v1 = vrot.slane %v17824_v33, 1  ;;  %v8917_v22 = vshll.u32 %v17824_v33, 16  ;;  %v19299_v12 = vld [vmem:[#allocation51_spill] sm:$0xff] }
 0x6f3   :  { %9926 = vmatmul.mubr.bf16.gmra.mrb[224].mxu0 %v17800_v26  ;;  %v8482_v8 = vshrl.u32 %v8179_v27, 16  ;;  %v8915_v13 = vshrl.u32 %v17824_v33, 16  ;;  %v8485_v0 = vshll.u32 %v8179_v27, 16  ;;  %v8924_v7 = vrot.slane %v8922_v51, 1 }
 0x6f4   :  { %v8074_v21 = vmul.f32 0.2, %v7946_v40  ;;  %v7947_v29 = vadd.f32 %v17626_v59, %v7876_v37  ;;  %v17834_v43 = vsel %vm5879_vm13, %v9193_v1, %v9194_v6  ;;  %vm8010_vm4 = vcmp.gt.f32.partialorder %v7946_v40, 0.0 }
 0x6f5   :  { %19297 = vst [vmem:[#allocation11_spill] sm:$0xff] %v17834_v43  ;;  %v7464_v56 = vpop.f32.mrb[156].mxu1  ;;  %12792 = vmatmul.mubr.bf16.gmra.mrb[228].mxu1 %v17834_v43  ;;  %v8919_v14 = vrot.slane %v8917_v22, 1  ;;  %v8484_v20 = vrot.slane %v8482_v8, 7 }
 0x6f6   :  { %vm8011_vm5 = vcmp.gt.f32.partialorder %v7947_v29, 0.0  ;;  %v8075_v36 = vmul.f32 0.2, %v7947_v29  ;;  %v7754_v9 = vadd.f32 %v19298_v61, %v7464_v56  ;;  %v7466_v31 = vpop.f32.mrb[157].mxu1  ;;  %v8138_v1 = vsel %vm8010_vm4, %v7946_v40, %v8074_v21 }
 0x6f7   :  { %v7467_v46 = vpop.f32.mrb[158].mxu1  ;;  %v8920_v38 = vor.u32 %v8919_v14, %v8915_v13  ;;  %v8487_v15 = vor.u32 %v8485_v0, %v8484_v20  ;;  %v8675_v37 = vsel %vm14233_vm10, %v8484_v20, 0 }
 0x6f8   :  { %v8139_v27 = vsel %vm8011_vm5, %v7947_v29, %v8075_v36  ;;  %v7877_v6 = vmul.f32 %v17640_v49, %v7754_v9  ;;  %v7757_v43 = vadd.f32 %v19299_v12, %v7467_v46  ;;  %v7469_v22 = vpop.f32.mrb[159].mxu1  ;;  %v9197_v21 = vrot.slane %v8675_v37, 1 }
 0x6f9   :  { %v8180_v8 = vpack.c.bf16 %v8139_v27, %v8138_v1  ;;  %v17844_v26 = vsel %vm5629_vm14, %v8920_v38, %v8924_v7  ;;  %v17848_v56 = vsel %vm14233_vm10, 0, %v8487_v15  ;;  %v8934_v29 = vshll.u32 %v8675_v37, 16  ;;  %v19303_v7 = vld [vmem:[#allocation52_spill] sm:$0xff] }
 0x6fa   :  { %19300 = vst [vmem:[#allocation37_spill] sm:$0xff] %v17844_v26  ;;  %19301 = vst [vmem:[#allocation40_spill] sm:$0xff] %v17848_v56  ;;  %v7948_v51 = vadd.f32 %v17626_v59, %v7877_v6  ;;  %v7878_v13 = vmul.f32 %v17640_v49, %v7757_v43  ;;  %9933 = vmatprep.mubr.bf16.mxu0 %v17844_v26  ;;  %v9196_v40 = vrot.slane %v17848_v56, 1  ;;  %v8929_v12 = vshll.u32 %v17848_v56, 16  ;;  %v19304_v26 = vld [vmem:[#allocation47_spill] sm:$0xff] }
 0x6fb   :  { %9934 = vmatmul.mubr.bf16.gmra.mrb[228].mxu0 %v17824_v33  ;;  %v8489_v0 = vshrl.u32 %v8180_v8, 16  ;;  %v8927_v61 = vshrl.u32 %v17848_v56, 16  ;;  %v8492_v43 = vshll.u32 %v8180_v8, 16  ;;  %v8936_v6 = vrot.slane %v8934_v29, 1 }
 0x6fc   :  { %v8076_v14 = vmul.f32 0.2, %v7948_v51  ;;  %v7949_v20 = vadd.f32 %v17626_v59, %v7878_v13  ;;  %v17858_v36 = vsel %vm5879_vm13, %v9196_v40, %v9197_v21  ;;  %vm8012_vm6 = vcmp.gt.f32.partialorder %v7948_v51, 0.0 }
 0x6fd   :  { %19302 = vst [vmem:[#allocation36_spill] sm:$0xff] %v17858_v36  ;;  %v7472_v9 = vpop.f32.mrb[160].mxu1  ;;  %12795 = vmatprep.mubr.bf16.mxu1 %v17858_v36  ;;  %v8931_v31 = vrot.slane %v8929_v12, 1  ;;  %v8491_v46 = vrot.slane %v8489_v0, 7 }
 0x6fe   :  { %vm8013_vm7 = vcmp.gt.f32.partialorder %v7949_v20, 0.0  ;;  %v8077_v38 = vmul.f32 0.2, %v7949_v20  ;;  %v7762_v15 = vadd.f32 %v19303_v7, %v7472_v9  ;;  %v7474_v37 = vpop.f32.mrb[161].mxu1  ;;  %v8140_v40 = vsel %vm8012_vm6, %v7948_v51, %v8076_v14 }
 0x6ff   :  { %v7475_v1 = vpop.f32.mrb[162].mxu1  ;;  %v8932_v27 = vor.u32 %v8931_v31, %v8927_v61  ;;  %v8494_v22 = vor.u32 %v8492_v43, %v8491_v46  ;;  %v8676_v13 = vsel %vm14233_vm10, %v8491_v46, 0 }
 0x700   :  { %v8141_v8 = vsel %vm8013_vm7, %v7949_v20, %v8077_v38  ;;  %v7879_v21 = vmul.f32 %v17640_v49, %v7762_v15  ;;  %v7765_v36 = vadd.f32 %v19304_v26, %v7475_v1  ;;  %v7477_v12 = vpop.f32.mrb[163].mxu1  ;;  %v9200_v14 = vrot.slane %v8676_v13, 1 }
 0x701   :  { %v8181_v0 = vpack.c.bf16 %v8141_v8, %v8140_v40  ;;  %v17868_v33 = vsel %vm5629_vm14, %v8932_v27, %v8936_v6  ;;  %v17872_v9 = vsel %vm14233_vm10, 0, %v8494_v22  ;;  %v8946_v20 = vshll.u32 %v8676_v13, 16  ;;  %v19307_v6 = vld [vmem:[#allocation53_spill] sm:$0xff] }
 0x702   :  { %19305 = vst [vmem:[#allocation41_spill] sm:$0xff] %v17868_v33  ;;  %v7950_v29 = vadd.f32 %v17626_v59, %v7879_v21  ;;  %v7880_v61 = vmul.f32 %v17640_v49, %v7765_v36  ;;  %9941 = vmatprep.mubr.bf16.mxu0 %v17868_v33  ;;  %v9199_v51 = vrot.slane %v17872_v9, 1  ;;  %v8941_v26 = vshll.u32 %v17872_v9, 16  ;;  %v19308_v33 = vld [vmem:[#allocation46_spill] sm:$0xff] }
 0x703   :  { %9942 = vmatmul.mubr.bf16.gmra.mrb[232].mxu0 %v17848_v56  ;;  %v8496_v43 = vshrl.u32 %v8181_v0, 16  ;;  %v8939_v7 = vshrl.u32 %v17872_v9, 16  ;;  %v8499_v36 = vshll.u32 %v8181_v0, 16  ;;  %v8948_v21 = vrot.slane %v8946_v20, 1 }
 0x704   :  { %v8078_v31 = vmul.f32 0.2, %v7950_v29  ;;  %v7951_v46 = vadd.f32 %v17626_v59, %v7880_v61  ;;  %v17882_v38 = vsel %vm5879_vm13, %v9199_v51, %v9200_v14  ;;  %vm8014_vm8 = vcmp.gt.f32.partialorder %v7950_v29, 0.0 }
 0x705   :  { %19306 = vst [vmem:[#allocation42_spill] sm:$0xff] %v17882_v38  ;;  %v7480_v15 = vpop.f32.mrb[164].mxu1  ;;  %12796 = vmatmul.mubr.bf16.gmra.mrb[232].mxu1 %v17882_v38  ;;  %v8943_v37 = vrot.slane %v8941_v26, 1  ;;  %v8498_v1 = vrot.slane %v8496_v43, 7 }
 0x706   :  { %vm8015_vm9 = vcmp.gt.f32.partialorder %v7951_v46, 0.0  ;;  %v8079_v27 = vmul.f32 0.2, %v7951_v46  ;;  %v7770_v22 = vadd.f32 %v19307_v6, %v7480_v15  ;;  %v7482_v13 = vpop.f32.mrb[165].mxu1  ;;  %v8142_v51 = vsel %vm8014_vm8, %v7950_v29, %v8078_v31 }
 0x707   :  { %v7483_v40 = vpop.f32.mrb[166].mxu1  ;;  %v8944_v8 = vor.u32 %v8943_v37, %v8939_v7  ;;  %v8501_v12 = vor.u32 %v8499_v36, %v8498_v1  ;;  %v8677_v61 = vsel %vm14233_vm10, %v8498_v1, 0 }
 0x708   :  { %v8143_v0 = vsel %vm8015_vm9, %v7951_v46, %v8079_v27  ;;  %v7881_v14 = vmul.f32 %v17640_v49, %v7770_v22  ;;  %v7773_v38 = vadd.f32 %v19308_v33, %v7483_v40  ;;  %v7485_v26 = vpop.f32.mrb[167].mxu1  ;;  %v9203_v31 = vrot.slane %v8677_v61, 1 }
 0x709   :  { %v8182_v43 = vpack.c.bf16 %v8143_v0, %v8142_v51  ;;  %v17892_v56 = vsel %vm5629_vm14, %v8944_v8, %v8948_v21  ;;  %v17896_v15 = vsel %vm14233_vm10, 0, %v8501_v12  ;;  %v8958_v46 = vshll.u32 %v8677_v61, 16 }
 0x70a   :  { %19309 = vst [vmem:[#allocation44_spill] sm:$0xff] %v17892_v56  ;;  %19310 = vst [vmem:[#allocation43_spill] sm:$0xff] %v17896_v15  ;;  %v7952_v20 = vadd.f32 %v17626_v59, %v7881_v14  ;;  %v7882_v7 = vmul.f32 %v17640_v49, %v7773_v38  ;;  %9949 = vmatprep.mubr.bf16.mxu0 %v17892_v56  ;;  %v9202_v29 = vrot.slane %v17896_v15, 1  ;;  %v8953_v33 = vshll.u32 %v17896_v15, 16 }
 0x70b   :  { %9950 = vmatmul.mubr.bf16.gmra.mrb[236].mxu0 %v17872_v9  ;;  %v8503_v36 = vshrl.u32 %v8182_v43, 16  ;;  %v8951_v6 = vshrl.u32 %v17896_v15, 16  ;;  %v8506_v38 = vshll.u32 %v8182_v43, 16  ;;  %v8960_v0 = vrot.slane %v8958_v46, 1 }
 0x70c   :  { %v8080_v37 = vmul.f32 0.2, %v7952_v20  ;;  %v7953_v1 = vadd.f32 %v17626_v59, %v7882_v7  ;;  %v17906_v27 = vsel %vm5879_vm13, %v9202_v29, %v9203_v31  ;;  %vm8016_vm11 = vcmp.gt.f32.partialorder %v7952_v20, 0.0 }
 0x70d   :  { %v7488_v22 = vpop.f32.mrb[168].mxu1  ;;  %12799 = vmatprep.mubr.bf16.mxu1 %v17906_v27  ;;  %v8955_v13 = vrot.slane %v8953_v33, 1  ;;  %v8505_v40 = vrot.slane %v8503_v36, 7 }
 0x70e   :  { %vm8017_vm12 = vcmp.gt.f32.partialorder %v7953_v1, 0.0  ;;  %v8081_v8 = vmul.f32 0.2, %v7953_v1  ;;  %v7778_v21 = vadd.f32 %v16880_v32, %v7488_v22  ;;  %v7490_v12 = vpop.f32.mrb[169].mxu1  ;;  %v8144_v7 = vsel %vm8016_vm11, %v7952_v20, %v8080_v37 }
 0x70f   :  { %v7491_v61 = vpop.f32.mrb[170].mxu1  ;;  %v8956_v51 = vor.u32 %v8955_v13, %v8951_v6  ;;  %v8508_v14 = vor.u32 %v8506_v38, %v8505_v40  ;;  %v8678_v26 = vsel %vm14233_vm10, %v8505_v40, 0 }
 0x710   :  { %v8145_v43 = vsel %vm8017_vm12, %v7953_v1, %v8081_v8  ;;  %v7883_v29 = vmul.f32 %v17640_v49, %v7778_v21  ;;  %v7781_v31 = vadd.f32 %v16884_v28, %v7491_v61  ;;  %v7493_v33 = vpop.f32.mrb[171].mxu1  ;;  %v9206_v37 = vrot.slane %v8678_v26, 1 }
 0x711   :  { %v8183_v36 = vpack.c.bf16 %v8145_v43, %v8144_v7  ;;  %v17916_v56 = vsel %vm5629_vm14, %v8956_v51, %v8960_v0  ;;  %v17920_v32 = vsel %vm14233_vm10, 0, %v8508_v14  ;;  %v8970_v1 = vshll.u32 %v8678_v26, 16 }
 0x712   :  { %19311 = vst [vmem:[#allocation45_spill] sm:$0xff] %v17916_v56  ;;  %19312 = vst [vmem:[#allocation39_spill] sm:$0xff] %v17920_v32  ;;  %v7954_v46 = vadd.f32 %v17626_v59, %v7883_v29  ;;  %v7884_v6 = vmul.f32 %v17640_v49, %v7781_v31  ;;  %9957 = vmatprep.mubr.bf16.mxu0 %v17916_v56  ;;  %v9205_v20 = vrot.slane %v17920_v32, 1  ;;  %v8965_v28 = vshll.u32 %v17920_v32, 16 }
 0x713   :  { %9958 = vmatmul.mubr.bf16.gmra.mrb[240].mxu0 %v17896_v15  ;;  %v8510_v38 = vshrl.u32 %v8183_v36, 16  ;;  %v8963_v8 = vshrl.u32 %v17920_v32, 16  ;;  %v8513_v21 = vshll.u32 %v8183_v36, 16  ;;  %v8972_v29 = vrot.slane %v8970_v1, 1 }
 0x714   :  { %v8082_v22 = vmul.f32 0.2, %v7954_v46  ;;  %v7955_v13 = vadd.f32 %v17626_v59, %v7884_v6  ;;  %v17930_v40 = vsel %vm5879_vm13, %v9205_v20, %v9206_v37  ;;  %vm8018_vm15 = vcmp.gt.f32.partialorder %v7954_v46, 0.0  ;;  %v19314_v37 = vld [vmem:[#allocation57_spill] sm:$0xff] }
 0x715   :  { %19313 = vst [vmem:[#allocation24_spill] sm:$0xff] %v17930_v40  ;;  %v7496_v12 = vpop.f32.mrb[172].mxu1  ;;  %12800 = vmatmul.mubr.bf16.gmra.mrb[236].mxu1 %v17930_v40  ;;  %v8967_v61 = vrot.slane %v8965_v28, 1  ;;  %v8512_v51 = vrot.slane %v8510_v38, 7 }
 0x716   :  { %vm8019_vm0 = vcmp.gt.f32.partialorder %v7955_v13, 0.0  ;;  %v8083_v0 = vmul.f32 0.2, %v7955_v13  ;;  %v7786_v14 = vadd.f32 %v16878_v18, %v7496_v12  ;;  %v7498_v26 = vpop.f32.mrb[173].mxu1  ;;  %v8146_v6 = vsel %vm8018_vm15, %v7954_v46, %v8082_v22 }
 0x717   :  { %v7499_v7 = vpop.f32.mrb[174].mxu1  ;;  %v8968_v43 = vor.u32 %v8967_v61, %v8963_v8  ;;  %v8515_v31 = vor.u32 %v8513_v21, %v8512_v51  ;;  %v8679_v33 = vsel %vm14233_vm10, %v8512_v51, 0 }
 0x718   :  { %v8147_v36 = vsel %vm8019_vm0, %v7955_v13, %v8083_v0  ;;  %v7885_v20 = vmul.f32 %v17640_v49, %v7786_v14  ;;  %v7789_v56 = vadd.f32 %v19314_v37, %v7499_v7  ;;  %v7501_v28 = vpop.f32.mrb[175].mxu1  ;;  %v9209_v22 = vrot.slane %v8679_v33, 1 }
 0x719   :  { %v8184_v38 = vpack.c.bf16 %v8147_v36, %v8146_v6  ;;  %v17940_v40 = vsel %vm5629_vm14, %v8968_v43, %v8972_v29  ;;  %v17944_v18 = vsel %vm14233_vm10, 0, %v8515_v31  ;;  %v8982_v21 = vshll.u32 %v8679_v33, 16 }
 0x71a   :  { %19315 = vst [vmem:[#allocation38_spill] sm:$0xff] %v17940_v40  ;;  %19316 = vst [vmem:[#allocation25_spill] sm:$0xff] %v17944_v18  ;;  %v7956_v1 = vadd.f32 %v17626_v59, %v7885_v20  ;;  %v7886_v8 = vmul.f32 %v17640_v49, %v7789_v56  ;;  %9965 = vmatprep.mubr.bf16.mxu0 %v17940_v40  ;;  %v9208_v46 = vrot.slane %v17944_v18, 1  ;;  %v8977_v13 = vshll.u32 %v17944_v18, 16 }
 0x71b   :  { %9966 = vmatmul.mubr.bf16.gmra.mrb[244].mxu0 %v17920_v32  ;;  %v8517_v12 = vshrl.u32 %v8184_v38, 16  ;;  %v8975_v14 = vshrl.u32 %v17944_v18, 16  ;;  %v8520_v56 = vshll.u32 %v8184_v38, 16  ;;  %v8984_v20 = vrot.slane %v8982_v21, 1 }
 0x71c   :  { %v8084_v61 = vmul.f32 0.2, %v7956_v1  ;;  %v7957_v51 = vadd.f32 %v17626_v59, %v7886_v8  ;;  %v17954_v0 = vsel %vm5879_vm13, %v9208_v46, %v9209_v22  ;;  %vm8020_vm1 = vcmp.gt.f32.partialorder %v7956_v1, 0.0  ;;  %v19318_v22 = vld [vmem:[#allocation5_spill] sm:$0xff] }
 0x71d   :  { %19317 = vst [vmem:[#allocation26_spill] sm:$0xff] %v17954_v0  ;;  %v7504_v26 = vpop.f32.mrb[176].mxu1  ;;  %12803 = vmatprep.mubr.bf16.mxu1 %v17954_v0  ;;  %v8979_v7 = vrot.slane %v8977_v13, 1  ;;  %v8519_v43 = vrot.slane %v8517_v12, 7 }
 0x71e   :  { %vm8021_vm2 = vcmp.gt.f32.partialorder %v7957_v51, 0.0  ;;  %v8085_v29 = vmul.f32 0.2, %v7957_v51  ;;  %v7794_v31 = vadd.f32 %v16890_v41, %v7504_v26  ;;  %v7506_v33 = vpop.f32.mrb[177].mxu1  ;;  %v8148_v8 = vsel %vm8020_vm1, %v7956_v1, %v8084_v61 }
 0x71f   :  { %v7507_v6 = vpop.f32.mrb[178].mxu1  ;;  %v8980_v36 = vor.u32 %v8979_v7, %v8975_v14  ;;  %v8522_v37 = vor.u32 %v8520_v56, %v8519_v43  ;;  %v8680_v28 = vsel %vm14233_vm10, %v8519_v43, 0 }
 0x720   :  { %v8149_v38 = vsel %vm8021_vm2, %v7957_v51, %v8085_v29  ;;  %v7887_v46 = vmul.f32 %v17640_v49, %v7794_v31  ;;  %v7797_v40 = vadd.f32 %v19318_v22, %v7507_v6  ;;  %v7509_v13 = vpop.f32.mrb[179].mxu1  ;;  %v9212_v61 = vrot.slane %v8680_v28, 1 }
 0x721   :  { %v8185_v12 = vpack.c.bf16 %v8149_v38, %v8148_v8  ;;  %v17964_v0 = vsel %vm5629_vm14, %v8980_v36, %v8984_v20  ;;  %v17968_v41 = vsel %vm14233_vm10, 0, %v8522_v37  ;;  %v8994_v56 = vshll.u32 %v8680_v28, 16  ;;  %v19322_v37 = vld [vmem:[#allocation56_spill] sm:$0xff] }
 0x722   :  { %19319 = vst [vmem:[#allocation28_spill] sm:$0xff] %v17964_v0  ;;  %19320 = vst [vmem:[#allocation27_spill] sm:$0xff] %v17968_v41  ;;  %v7958_v21 = vadd.f32 %v17626_v59, %v7887_v46  ;;  %v7888_v14 = vmul.f32 %v17640_v49, %v7797_v40  ;;  %9973 = vmatprep.mubr.bf16.mxu0 %v17964_v0  ;;  %v9211_v1 = vrot.slane %v17968_v41, 1  ;;  %v8989_v51 = vshll.u32 %v17968_v41, 16 }
 0x723   :  { %9974 = vmatmul.mubr.bf16.gmra.mrb[248].mxu0 %v17944_v18  ;;  %v8524_v26 = vshrl.u32 %v8185_v12, 16  ;;  %v8987_v31 = vshrl.u32 %v17968_v41, 16  ;;  %v8527_v40 = vshll.u32 %v8185_v12, 16 }
 0x724   :  { %v8086_v7 = vmul.f32 0.2, %v7958_v21  ;;  %v7959_v43 = vadd.f32 %v17626_v59, %v7888_v14  ;;  %v17978_v29 = vsel %vm5879_vm13, %v9211_v1, %v9212_v61  ;;  %vm8022_vm3 = vcmp.gt.f32.partialorder %v7958_v21, 0.0  ;;  %v19323_v61 = vld [vmem:[#allocation6_spill] sm:$0xff] }
 0x725   :  { %19321 = vst [vmem:[#allocation29_spill] sm:$0xff] %v17978_v29  ;;  %v7512_v33 = vpop.f32.mrb[180].mxu1  ;;  %12804 = vmatmul.mubr.bf16.gmra.mrb[240].mxu1 %v17978_v29  ;;  %v8991_v6 = vrot.slane %v8989_v51, 1  ;;  %v8526_v36 = vrot.slane %v8524_v26, 7  ;;  %v8996_v59 = vrot.slane %v8994_v56, 1 }
 0x726   :  { %vm8023_vm4 = vcmp.gt.f32.partialorder %v7959_v43, 0.0  ;;  %v8087_v20 = vmul.f32 0.2, %v7959_v43  ;;  %v7802_v28 = vadd.f32 %v19322_v37, %v7512_v33  ;;  %v7514_v8 = vpop.f32.mrb[181].mxu1  ;;  %v8150_v14 = vsel %vm8022_vm3, %v7958_v21, %v8086_v7  ;;  %v17997_v56 = vld [vmem:[%s18801_s6] ss:$0 sm:$0xff] }
 0x727   :  { %v7515_v38 = vpop.f32.mrb[182].mxu1  ;;  %v8992_v46 = vor.u32 %v8991_v6, %v8987_v31  ;;  %v8529_v22 = vor.u32 %v8527_v40, %v8526_v36  ;;  %v8681_v13 = vsel %vm14233_vm10, %v8526_v36, 0 }
 0x728   :  { %v8151_v12 = vsel %vm8023_vm4, %v7959_v43, %v8087_v20  ;;  %v7889_v1 = vmul.f32 %v17640_v49, %v7802_v28  ;;  %v7805_v0 = vadd.f32 %v19323_v61, %v7515_v38  ;;  %v7517_v51 = vpop.f32.mrb[183].mxu1  ;;  %v9215_v31 = vrot.slane %v8681_v13, 1 }
 0x729   :  { %v8186_v26 = vpack.c.bf16 %v8151_v12, %v8150_v14  ;;  %v17988_v29 = vsel %vm5629_vm14, %v8992_v46, %v8996_v59  ;;  %v17992_v33 = vsel %vm14233_vm10, 0, %v8529_v22  ;;  %v9006_v6 = vshll.u32 %v8681_v13, 16 }
 0x72a   :  { %19324 = vst [vmem:[#allocation23_spill] sm:$0xff] %v17988_v29  ;;  %19325 = vst [vmem:[#allocation20_spill] sm:$0xff] %v17992_v33  ;;  %v7960_v21 = vadd.f32 %v17997_v56, %v7889_v1  ;;  %v7890_v7 = vmul.f32 %v17640_v49, %v7805_v0  ;;  %9981 = vmatprep.mubr.bf16.mxu0 %v17988_v29  ;;  %v9214_v43 = vrot.slane %v17992_v33, 1  ;;  %v9001_v40 = vshll.u32 %v17992_v33, 16 }
 0x72b   :  { %9982 = vmatmul.mubr.bf16.gmra.mrb[252].mxu0 %v17968_v41  ;;  %v8531_v36 = vshrl.u32 %v8186_v26, 16  ;;  %v8999_v8 = vshrl.u32 %v17992_v33, 16  ;;  %v8534_v49 = vshll.u32 %v8186_v26, 16  ;;  %v9008_v1 = vrot.slane %v9006_v6, 1 }
 0x72c   :  { %v8088_v20 = vmul.f32 0.2, %v7960_v21  ;;  %v7961_v37 = vadd.f32 %v17997_v56, %v7890_v7  ;;  %v18007_v28 = vsel %vm5879_vm13, %v9214_v43, %v9215_v31  ;;  %vm8024_vm5 = vcmp.gt.f32.partialorder %v7960_v21, 0.0  ;;  %v14002_v43 = vld [vmem:[%s18800_s5] ss:$0 sm:$0xff] }
 0x72d   :  { %v7520_v0 = vpop.f32.mrb[184].mxu1  ;;  %12807 = vmatprep.mubr.bf16.mxu1 %v18007_v28  ;;  %v9003_v38 = vrot.slane %v9001_v40, 1  ;;  %v8533_v46 = vrot.slane %v8531_v36, 7 }
 0x72e   :  { %vm8025_vm6 = vcmp.gt.f32.partialorder %v7961_v37, 0.0  ;;  %v8089_v59 = vmul.f32 0.2, %v7961_v37  ;;  %v7810_v22 = vadd.f32 %v17568_v60, %v7520_v0  ;;  %v7522_v13 = vpop.f32.mrb[185].mxu1  ;;  %v8152_v7 = vsel %vm8024_vm5, %v7960_v21, %v8088_v20 }
 0x72f   :  { %v7523_v14 = vpop.f32.mrb[186].mxu1  ;;  %v9004_v12 = vor.u32 %v9003_v38, %v8999_v8  ;;  %v8536_v61 = vor.u32 %v8534_v49, %v8533_v46  ;;  %v8682_v51 = vsel %vm14233_vm10, %v8533_v46, 0 }
 0x730   :  { %v8153_v26 = vsel %vm8025_vm6, %v7961_v37, %v8089_v59  ;;  %v7891_v31 = vmul.f32 %v14002_v43, %v7810_v22  ;;  %v7813_v40 = vadd.f32 %v17574_v42, %v7523_v14  ;;  %v7525_v36 = vpop.f32.mrb[187].mxu1  ;;  %v9218_v37 = vrot.slane %v8682_v51, 1 }
 0x731   :  { %v8187_v29 = vpack.c.bf16 %v8153_v26, %v8152_v7  ;;  %v18019_v60 = vsel %vm5629_vm14, %v9004_v12, %v9008_v1  ;;  %v18023_v6 = vsel %vm14233_vm10, 0, %v8536_v61  ;;  %v9018_v49 = vshll.u32 %v8682_v51, 16 }
 0x732   :  { %19326 = vst [vmem:[#allocation22_spill] sm:$0xff] %v18019_v60  ;;  %19327 = vst [vmem:[#allocation21_spill] sm:$0xff] %v18023_v6  ;;  %v7962_v8 = vadd.f32 %v17997_v56, %v7891_v31  ;;  %v7892_v21 = vmul.f32 %v14002_v43, %v7813_v40  ;;  %9989 = vmatprep.mubr.bf16.mxu0 %v18019_v60  ;;  %v9217_v20 = vrot.slane %v18023_v6, 1  ;;  %v9013_v42 = vshll.u32 %v18023_v6, 16 }
 0x733   :  { %9990 = vmatmul.mubr.bf16.gmra.mrb[0].mxu0 %v17992_v33  ;;  %v8538_v0 = vshrl.u32 %v8187_v29, 16  ;;  %v9011_v22 = vshrl.u32 %v18023_v6, 16  ;;  %v8541_v13 = vshll.u32 %v8187_v29, 16  ;;  %v9020_v40 = vrot.slane %v9018_v49, 1 }
 0x734   :  { %v8090_v38 = vmul.f32 0.2, %v7962_v8  ;;  %v7963_v46 = vadd.f32 %v17997_v56, %v7892_v21  ;;  %v18032_v59 = vsel %vm5879_vm13, %v9217_v20, %v9218_v37  ;;  %vm8026_vm7 = vcmp.gt.f32.partialorder %v7962_v8, 0.0 }
 0x735   :  { %19328 = vst [vmem:[#allocation30_spill] sm:$0xff] %v18032_v59  ;;  %v7528_v14 = vpop.f32.mrb[188].mxu1  ;;  %12808 = vmatmul.mubr.bf16.gmra.mrb[244].mxu1 %v18032_v59  ;;  %v9015_v12 = vrot.slane %v9013_v42, 1  ;;  %v8540_v1 = vrot.slane %v8538_v0, 7 }
 0x736   :  { %vm8027_vm8 = vcmp.gt.f32.partialorder %v7963_v46, 0.0  ;;  %v8091_v61 = vmul.f32 0.2, %v7963_v46  ;;  %v7818_v51 = vadd.f32 %v17561_v45, %v7528_v14  ;;  %v7530_v7 = vpop.f32.mrb[189].mxu1  ;;  %v8154_v20 = vsel %vm8026_vm7, %v7962_v8, %v8090_v38 }
 0x737   :  { %v7531_v26 = vpop.f32.mrb[190].mxu1  ;;  %v9016_v31 = vor.u32 %v9015_v12, %v9011_v22  ;;  %v8543_v36 = vor.u32 %v8541_v13, %v8540_v1  ;;  %v8683_v21 = vsel %vm14233_vm10, %v8540_v1, 0 }
 0x738   :  { %v8155_v29 = vsel %vm8027_vm8, %v7963_v46, %v8091_v61  ;;  %v7893_v37 = vmul.f32 %v14002_v43, %v7818_v51  ;;  %v7821_v60 = vadd.f32 %v17571_v19, %v7531_v26  ;;  %v7533_v59 = vpop.f32.mrb[191].mxu1  ;;  %v9221_v38 = vrot.slane %v8683_v21, 1 }
 0x739   :  { %v8188_v42 = vpack.c.bf16 %v8155_v29, %v8154_v20  ;;  %v18041_v0 = vsel %vm5629_vm14, %v9016_v31, %v9020_v40  ;;  %v18045_v45 = vsel %vm14233_vm10, 0, %v8543_v36  ;;  %v9030_v46 = vshll.u32 %v8683_v21, 16 }
 0x73a   :  { %19329 = vst [vmem:[#allocation32_spill] sm:$0xff] %v18045_v45  ;;  %v7964_v49 = vadd.f32 %v17997_v56, %v7893_v37  ;;  %v7894_v22 = vmul.f32 %v14002_v43, %v7821_v60  ;;  %9997 = vmatprep.mubr.bf16.mxu0 %v18041_v0  ;;  %v9220_v8 = vrot.slane %v18045_v45, 1  ;;  %v9025_v19 = vshll.u32 %v18045_v45, 16 }
 0x73b   :  { %9998 = vmatmul.mubr.bf16.gmra.mrb[4].mxu0 %v18023_v6  ;;  %v8545_v59 = vshrl.u32 %v8188_v42, 16  ;;  %v9023_v1 = vshrl.u32 %v18045_v45, 16  ;;  %v8548_v43 = vshll.u32 %v8188_v42, 16  ;;  %v9032_v40 = vrot.slane %v9030_v46, 1 }
 0x73c   :  { %v8092_v13 = vmul.f32 0.2, %v7964_v49  ;;  %v7965_v14 = vadd.f32 %v17997_v56, %v7894_v22  ;;  %v18054_v12 = vsel %vm5879_vm13, %v9220_v8, %v9221_v38  ;;  %vm8028_vm9 = vcmp.gt.f32.partialorder %v7964_v49, 0.0 }
 0x73d   :  { %v18057_v60 = vpop.f32.mrb[192].mxu1  ;;  %12811 = vmatprep.mubr.bf16.mxu1 %v18054_v12  ;;  %v9027_v61 = vrot.slane %v9025_v19, 1  ;;  %v8547_v51 = vrot.slane %v8545_v59, 7 }
 0x73e   :  { %19330 = vst [vmem:[#allocation31_spill] sm:$0xff] %v18057_v60  ;;  %vm8029_vm11 = vcmp.gt.f32.partialorder %v7965_v14, 0.0  ;;  %v8093_v7 = vmul.f32 0.2, %v7965_v14  ;;  %v18060_v26 = vpop.f32.mrb[193].mxu1  ;;  %v8156_v20 = vsel %vm8028_vm9, %v7964_v49, %v8092_v13  ;;  %v19385_v60 = vld [vmem:[#allocation14_spill] sm:$0xff] }
 0x73f   :  { %19331 = vst [vmem:[#allocation33_spill] sm:$0xff] %v18060_v26  ;;  %v18062_v31 = vpop.f32.mrb[194].mxu1  ;;  %v9028_v56 = vor.u32 %v9027_v61, %v9023_v1  ;;  %v8550_v36 = vor.u32 %v8548_v43, %v8547_v51  ;;  %v8684_v21 = vsel %vm14233_vm10, %v8547_v51, 0  ;;  %v19394_v26 = vld [vmem:[#allocation17_spill] sm:$0xff] }
 0x740   :  { %19332 = vst [vmem:[#allocation34_spill] sm:$0xff] %v18062_v31  ;;  %v8157_v29 = vsel %vm8029_vm11, %v7965_v14, %v8093_v7  ;;  %v18066_v37 = vpop.f32.mrb[195].mxu1  ;;  %v9224_v19 = vrot.slane %v8684_v21, 1  ;;  %v9042_v59 = vshll.u32 %v8684_v21, 16 }
 0x741   :  { %19333 = vst [vmem:[#allocation64_spill] sm:$0xff] %v18066_v37  ;;  %v8189_v42 = vpack.c.bf16 %v8157_v29, %v8156_v20  ;;  %v18069_v22 = vsel %vm5629_vm14, %v9028_v56, %v9032_v40  ;;  %v18073_v8 = vsel %vm14233_vm10, 0, %v8550_v36  ;;  %v19386_v37 = vld [vmem:[#allocation9_spill] sm:$0xff] }
 0x742   :  { %19334 = vst [vmem:[#allocation35_spill] sm:$0xff] %v18073_v8  ;;  %10005 = vmatprep.mubr.bf16.mxu0 %v18069_v22  ;;  %v9223_v38 = vrot.slane %v18073_v8, 1  ;;  %v9037_v46 = vshll.u32 %v18073_v8, 16  ;;  %v9035_v14 = vshrl.u32 %v18073_v8, 16  ;;  %v9044_v7 = vrot.slane %v9042_v59, 1 }
 0x743   :  { %10006 = vmatmul.mubr.bf16.gmra.mrb[8].mxu0 %v18045_v45  ;;  %v8552_v49 = vshrl.u32 %v8189_v42, 16  ;;  %v8555_v43 = vshll.u32 %v8189_v42, 16 }
 0x744   :  { %v18080_v13 = vsel %vm5879_vm13, %v9223_v38, %v9224_v19  ;;  %v9039_v1 = vrot.slane %v9037_v46, 1 }
 0x745   :  { %12812 = vmatmul.mubr.bf16.gmra.mrb[248].mxu1 %v18080_v13  ;;  %v8554_v61 = vrot.slane %v8552_v49, 7  ;;  %v13838_v49 = vld [vmem:[%s18799_s7 + $0x108] sm:$0xff]  }
 0x746   :  { %v9040_v51 = vor.u32 %v9039_v1, %v9035_v14  ;;  %v9136_v14 = vrot.slane %v17289_v2, 1 }
 0x747   :  { %v8557_v56 = vor.u32 %v8555_v43, %v8554_v61  ;;  %v18086_v40 = vsel %vm14233_vm10, %v8554_v61, 0  ;;  %v9137_v43 = vrot.slane %v17285_v44, 1  ;;  %v13839_v61 = vld [vmem:[%s18799_s7 + $0x110] sm:$0xff]   ;;  %v13840_v44 = vld [vmem:[%s18799_s7 + $0x118] sm:$0xff]  }
 0x748   :  { %v18088_v36 = vpop.f32.mrb[196].mxu1  ;;  %v18091_v21 = vsel %vm5629_vm14, %v9040_v51, %v9044_v7  ;;  %v9290_v19 = vrot.slane %v18086_v40, 1 }
 0x749   :  { %19335 = vst [vmem:[#allocation63_spill] sm:$0xff] %v18088_v36  ;;  %10013 = vmatprep.mubr.bf16.mxu0 %v18091_v21  ;;  %v18094_v20 = vpop.f32.mrb[197].mxu1  ;;  %v18098_v29 = vsel %vm14233_vm10, 0, %v8557_v56  ;;  %v18133_v7 = vsel %vm5879_vm13, %v9136_v14, %v9137_v43  ;;  %v19379_v36 = vld [vmem:[#allocation10_spill] sm:$0xff] }
 0x74a   :  { %19336 = vst [vmem:[#allocation48_spill] sm:$0xff] %v18094_v20  ;;  %v18100_v42 = vpop.f32.mrb[198].mxu1  ;;  %v9289_v38 = vrot.slane %v18098_v29, 1  ;;  %v19381_v20 = vld [vmem:[#allocation19_spill] sm:$0xff] }
 0x74b   :  { %19337 = vst [vmem:[#allocation50_spill] sm:$0xff] %v18100_v42  ;;  %10014 = vmatmul.mubr.bf16.gmra.mrb[12].mxu0 %v18073_v8  ;;  %v18105_v46 = vpop.f32.mrb[199].mxu1  ;;  %v19378_v42 = vld [vmem:[#allocation2_spill] sm:$0xff] }
 0x74c   :  { %19338 = vst [vmem:[#allocation49_spill] sm:$0xff] %v18105_v46  ;;  %10054 = vmatprep.mubr.bf16.mxu0 %v17289_v2  ;;  %v18109_v59 = vsel %vm5879_vm13, %v9289_v38, %v9290_v19  ;;  %v13841_v38 = vld [vmem:[%s18799_s7 + $0x120] sm:$0xff]   ;;  %v13842_v19 = vld [vmem:[%s18799_s7 + $0x128] sm:$0xff]  }
 0x74d   :  { %12815 = vmatprep.mubr.bf16.mxu1 %v18109_v59 }
 0x74e   :  { %12816 = vmatmul.mubr.bf16.gmra.mrb[252].mxu1 %v19145_v62 }
 0x753   :  { %10055 = vmatmul.mubr.bf16.vlgmr.msra.gmra.mrb[144].mxu0 %v19145_v62 }
 0x754   :  { %10312 = vmatpush1.bf16.msra.mxu0 %v13837_v34  ;;  %10062 = vmatprep.mubr.bf16.mxu0 %v17309_v24 }
 0x755   :  { %10313 = vmatprep.subr.bf16.mxu0 %v18983_v39 }
 0x758   :  { %v18123_v1 = vpop.f32.mrb[200].mxu1  ;;  %10314 = vmatpush1.bf16.msra.mxu0 %v13838_v49  ;;  %v13843_v49 = vld [vmem:[%s18799_s7 + $0x130] sm:$0xff]  }
 0x759   :  { %19339 = vst [vmem:[#allocation51_spill] sm:$0xff] %v18123_v1  ;;  %v18129_v51 = vpop.f32.mrb[201].mxu1  ;;  %10315 = vmatprep.subr.bf16.mxu0 %v18983_v39  ;;  %v19371_v1 = vld [vmem:[#allocation67_spill] sm:$0xff] }
 0x75a   :  { %19340 = vst [vmem:[#allocation52_spill] sm:$0xff] %v18129_v51  ;;  %v18135_v56 = vpop.f32.mrb[202].mxu1 }
 0x75b   :  { %19341 = vst [vmem:[#allocation47_spill] sm:$0xff] %v18135_v56  ;;  %10063 = vmatmul.mubr.bf16.gmra.mrb[148].mxu0 %v18133_v7  ;;  %v18138_v2 = vpop.f32.mrb[203].mxu1  ;;  %v19370_v56 = vld [vmem:[#allocation74_spill] sm:$0xff] }
 0x75c   :  { %19342 = vst [vmem:[#allocation53_spill] sm:$0xff] %v18138_v2  ;;  %10070 = vmatprep.mubr.bf16.mxu0 %v17336_v17  ;;  %10316 = vmatpush1.bf16.msra.mxu0 %v13839_v61  ;;  %v19372_v2 = vld [vmem:[#allocation72_spill] sm:$0xff] }
 0x75d   :  { %10317 = vmatprep.subr.bf16.mxu0 %v18983_v39 }
 0x760   :  { %10318 = vmatpush1.bf16.msra.mxu0 %v13840_v44  ;;  %v13844_v44 = vld [vmem:[%s18799_s7 + $0x138] sm:$0xff]  }
 0x761   :  { %10319 = vmatprep.subr.bf16.mxu0 %v18983_v39 }
 0x763   :  { %10071 = vmatmul.mubr.bf16.gmra.mrb[152].mxu0 %v17343_v63 }
 0x764   :  { %10078 = vmatprep.mubr.bf16.mxu0 %v17364_v47  ;;  %10320 = vmatpush1.bf16.msra.mxu0 %v13841_v38  ;;  %v13845_v38 = vld [vmem:[%s18799_s7 + $0x140] sm:$0xff]  }
 0x765   :  { %10321 = vmatprep.subr.bf16.mxu0 %v18983_v39 }
 0x768   :  { %v18155_v34 = vpop.f32.mrb[204].mxu1  ;;  %10322 = vmatpush1.bf16.msra.mxu0 %v13842_v19  ;;  %v13846_v19 = vld [vmem:[%s18799_s7 + $0x148] sm:$0xff]  }
 0x769   :  { %19343 = vst [vmem:[#allocation46_spill] sm:$0xff] %v18155_v34  ;;  %v18160_v14 = vpop.f32.mrb[205].mxu1  ;;  %10323 = vmatprep.subr.bf16.mxu0 %v18983_v39 }
 0x76a   :  { %19344 = vst [vmem:[#allocation57_spill] sm:$0xff] %v18160_v14  ;;  %v18163_v43 = vpop.f32.mrb[206].mxu1 }
 0x76b   :  { %19345 = vst [vmem:[#allocation5_spill] sm:$0xff] %v18163_v43  ;;  %10079 = vmatmul.mubr.bf16.gmra.mrb[156].mxu0 %v17360_v48  ;;  %v18166_v61 = vpop.f32.mrb[207].mxu1 }
 0x76c   :  { %19346 = vst [vmem:[#allocation56_spill] sm:$0xff] %v18166_v61  ;;  %10086 = vmatprep.mubr.bf16.mxu0 %v17394_v25  ;;  %10324 = vmatpush1.bf16.msra.mxu0 %v13843_v49 }
 0x76d   :  { %10325 = vmatprep.subr.bf16.mxu0 %v18983_v39 }
 0x770   :  { %10326 = vmatpush1.bf16.msra.mxu0 %v13844_v44  ;;  %v13847_v44 = vld [vmem:[%s18799_s7 + $0x150] sm:$0xff]  }
 0x771   :  { %10327 = vmatprep.subr.bf16.mxu0 %v18983_v39 }
 0x773   :  { %10087 = vmatmul.mubr.bf16.gmra.mrb[160].mxu0 %v17378_v53 }
 0x774   :  { %10094 = vmatprep.mubr.bf16.mxu0 %v17418_v50  ;;  %10328 = vmatpush1.bf16.msra.mxu0 %v13845_v38 }
 0x775   :  { %10329 = vmatprep.subr.bf16.mxu0 %v18983_v39 }
 0x778   :  { %v18183_v49 = vpop.f32.mrb[208].mxu1  ;;  %10330 = vmatpush1.bf16.msra.mxu0 %v13846_v19  ;;  %v13848_v19 = vld [vmem:[%s18799_s7 + $0x158] sm:$0xff]  }
 0x779   :  { %19347 = vst [vmem:[#allocation6_spill] sm:$0xff] %v18183_v49  ;;  %v18188_v43 = vpop.f32.mrb[209].mxu1  ;;  %10331 = vmatprep.subr.bf16.mxu0 %v18983_v39 }
 0x77a   :  { %19348 = vst [vmem:[#allocation80_spill] sm:$0xff] %v18188_v43  ;;  %v18191_v34 = vpop.f32.mrb[210].mxu1 }
 0x77b   :  { %19349 = vst [vmem:[#allocation81_spill] sm:$0xff] %v18191_v34  ;;  %10095 = vmatmul.mubr.bf16.gmra.mrb[164].mxu0 %v17404_v58  ;;  %v18194_v38 = vpop.f32.mrb[211].mxu1 }
 0x77c   :  { %19350 = vst [vmem:[#allocation82_spill] sm:$0xff] %v18194_v38  ;;  %10102 = vmatprep.mubr.bf16.mxu0 %v17447_v23  ;;  %10332 = vmatpush1.bf16.msra.mxu0 %v13847_v44 }
 0x77d   :  { %10333 = vmatprep.subr.bf16.mxu0 %v18983_v39 }
 0x780   :  { %10334 = vmatpush1.bf16.msra.mxu0 %v13848_v19  ;;  %v13849_v19 = vld [vmem:[%s18799_s7 + $0x160] sm:$0xff]  }
 0x781   :  { %10335 = vmatprep.subr.bf16.mxu0 %v18983_v39 }
 0x783   :  { %10103 = vmatmul.mubr.bf16.gmra.mrb[168].mxu0 %v17431_v16 }
 0x784   :  { %10110 = vmatprep.mubr.bf16.mxu0 %v17471_v57  ;;  %10336 = vmatpush1.bf16.msra.mxu0 %v13849_v19 }
 0x785   :  { %10337 = vmatprep.subr.bf16.mxu0 %v18983_v39 }
 0x788   :  { %v18204_v34 = vpop.f32.mrb[212].mxu1 }
 0x789   :  { %19351 = vst [vmem:[#allocation83_spill] sm:$0xff] %v18204_v34  ;;  %v18206_v49 = vpop.f32.mrb[213].mxu1 }
 0x78a   :  { %19352 = vst [vmem:[#allocation84_spill] sm:$0xff] %v18206_v49  ;;  %v18208_v38 = vpop.f32.mrb[214].mxu1 }
 0x78b   :  { %19353 = vst [vmem:[#allocation85_spill] sm:$0xff] %v18208_v38  ;;  %10111 = vmatmul.mubr.bf16.gmra.mrb[172].mxu0 %v17457_v55  ;;  %v18211_v44 = vpop.f32.mrb[215].mxu1 }
 0x78c   :  { %19354 = vst [vmem:[#allocation86_spill] sm:$0xff] %v18211_v44  ;;  %10118 = vmatprep.mubr.bf16.mxu0 %v17500_v4 }
 0x793   :  { %10119 = vmatmul.mubr.bf16.gmra.mrb[176].mxu0 %v17484_v30 }
 0x794   :  { %10126 = vmatprep.mubr.bf16.mxu0 %v17524_v11 }
 0x798   :  { %v18220_v34 = vpop.f32.mrb[216].mxu1 }
 0x799   :  { %19355 = vst [vmem:[#allocation87_spill] sm:$0xff] %v18220_v34  ;;  %v18222_v38 = vpop.f32.mrb[217].mxu1  ;;  %v13850_v34 = vld [vmem:[%s18799_s7 + $0x168] sm:$0xff]  }
 0x79a   :  { %19356 = vst [vmem:[#allocation88_spill] sm:$0xff] %v18222_v38  ;;  %v18224_v49 = vpop.f32.mrb[218].mxu1  ;;  %10338 = vmatpush1.bf16.msra.mxu0 %v13850_v34  ;;  %v19368_v38 = vld [vmem:[#allocation71_spill] sm:$0xff] }
 0x79b   :  { %19357 = vst [vmem:[#allocation89_spill] sm:$0xff] %v18224_v49  ;;  %10127 = vmatmul.mubr.bf16.gmra.mrb[180].mxu0 %v17510_v10  ;;  %v18227_v44 = vpop.f32.mrb[219].mxu1  ;;  %10339 = vmatprep.subr.bf16.mxu0 %v18983_v39 }
 0x79c   :  { %19358 = vst [vmem:[#allocation90_spill] sm:$0xff] %v18227_v44  ;;  %10134 = vmatprep.mubr.bf16.mxu0 %v17553_v35 }
 0x7a1   :  { %v18230_v43 = vpop.f32.mrb[220].mxu1 }
 0x7a2   :  { %19359 = vst [vmem:[#allocation91_spill] sm:$0xff] %v18230_v43  ;;  %v18232_v61 = vpop.f32.mrb[221].mxu1  ;;  %v19363_v43 = vld [vmem:[#allocation66_spill] sm:$0xff] }
 0x7a3   :  { %19360 = vst [vmem:[#allocation92_spill] sm:$0xff] %v18232_v61  ;;  %10135 = vmatmul.mubr.bf16.gmra.mrb[184].mxu0 %v17537_v54  ;;  %v18235_v19 = vpop.f32.mrb[222].mxu1  ;;  %v19364_v61 = vld [vmem:[#allocation78_spill] sm:$0xff] }
 0x7a4   :  { %19361 = vst [vmem:[#allocation93_spill] sm:$0xff] %v18235_v19  ;;  %10142 = vmatprep.mubr.bf16.mxu0 %v17586_v3  ;;  %v18241_v49 = vpop.f32.mrb[223].mxu1  ;;  %v13851_v19 = vld [vmem:[%s18799_s7 + $0x170] sm:$0xff]  }
 0x7a5   :  { %19362 = vst [vmem:[#allocation94_spill] sm:$0xff] %v18241_v49  ;;  %10340 = vmatpush1.bf16.msra.mxu0 %v13851_v19  ;;  %v13852_v19 = vld [vmem:[%s18799_s7 + $0x178] sm:$0xff]  }
 0x7a6   :  { %10341 = vmatprep.subr.bf16.mxu0 %v18983_v39 }
 0x7a9   :  { %10342 = vmatpush1.bf16.msra.mxu0 %v13852_v19  ;;  %v9181_v19 = vrot.slane %v19378_v42, 1 }
 0x7aa   :  { %10600 = vmatprep.subr.bf16.mxu0 %v18983_v39 }
 0x7ab   :  { %10143 = vmatmul.mubr.bf16.gmra.mrb[188].mxu0 %v17565_v5 }
 0x7ac   :  { %10150 = vmatprep.mubr.bf16.mxu0 %v17615_v52 }
 0x7b3   :  { %10151 = vmatmul.mubr.bf16.gmra.mrb[192].mxu0 %v19363_v43 }
 0x7b4   :  { %10158 = vmatprep.mubr.bf16.mxu0 %v19364_v61 }
 0x7b8   :  { %v18252_v44 = vpop.f32.mrb[224].mxu1 }
 0x7b9   :  { %19365 = vst [vmem:[#allocation66_spill] sm:$0xff] %v18252_v44  ;;  %v18254_v34 = vpop.f32.mrb[225].mxu1 }
 0x7ba   :  { %19366 = vst [vmem:[#allocation78_spill] sm:$0xff] %v18254_v34  ;;  %v18256_v49 = vpop.f32.mrb[226].mxu1 }
 0x7bb   :  { %19367 = vst [vmem:[#allocation95_spill] sm:$0xff] %v18256_v49  ;;  %10159 = vmatmul.mubr.bf16.gmra.mrb[196].mxu0 %v19368_v38  ;;  %v18259_v14 = vpop.f32.mrb[227].mxu1 }
 0x7bc   :  { %19369 = vst [vmem:[#allocation71_spill] sm:$0xff] %v18259_v14  ;;  %10166 = vmatprep.mubr.bf16.mxu0 %v19370_v56  ;;  %v19376_v14 = vld [vmem:[#allocation77_spill] sm:$0xff] }
 0x7c3   :  { %10167 = vmatmul.mubr.bf16.gmra.mrb[200].mxu0 %v19371_v1 }
 0x7c4   :  { %10174 = vmatprep.mubr.bf16.mxu0 %v19372_v2 }
 0x7c8   :  { %v18268_v44 = vpop.f32.mrb[228].mxu1 }
 0x7c9   :  { %19373 = vst [vmem:[#allocation74_spill] sm:$0xff] %v18268_v44  ;;  %v18270_v49 = vpop.f32.mrb[229].mxu1  ;;  %v9182_v44 = vrot.slane %v19381_v20, 1 }
 0x7ca   :  { %19374 = vst [vmem:[#allocation67_spill] sm:$0xff] %v18270_v49  ;;  %v18272_v34 = vpop.f32.mrb[230].mxu1 }
 0x7cb   :  { %19375 = vst [vmem:[#allocation72_spill] sm:$0xff] %v18272_v34  ;;  %10175 = vmatmul.mubr.bf16.gmra.mrb[204].mxu0 %v19376_v14  ;;  %v18275_v51 = vpop.f32.mrb[231].mxu1  ;;  %v18287_v34 = vsel %vm5879_vm13, %v9181_v19, %v9182_v44  ;;  %v19391_v44 = vld [vmem:[#allocation15_spill] sm:$0xff] }
 0x7cc   :  { %19377 = vst [vmem:[#allocation77_spill] sm:$0xff] %v18275_v51  ;;  %10182 = vmatprep.mubr.bf16.mxu0 %v19378_v42  ;;  %v19387_v42 = vld [vmem:[#allocation16_spill] sm:$0xff] }
 0x7d3   :  { %10183 = vmatmul.mubr.bf16.gmra.mrb[208].mxu0 %v19145_v62 }
 0x7d4   :  { %10190 = vmatprep.mubr.bf16.mxu0 %v19379_v36 }
 0x7d8   :  { %v18281_v46 = vpop.f32.mrb[232].mxu1 }
 0x7d9   :  { %19380 = vst [vmem:[#allocation2_spill] sm:$0xff] %v18281_v46  ;;  %v18284_v31 = vpop.f32.mrb[233].mxu1 }
 0x7da   :  { %19382 = vst [vmem:[#allocation19_spill] sm:$0xff] %v18284_v31  ;;  %v18289_v49 = vpop.f32.mrb[234].mxu1 }
 0x7db   :  { %19383 = vst [vmem:[#allocation96_spill] sm:$0xff] %v18289_v49  ;;  %10191 = vmatmul.mubr.bf16.gmra.mrb[212].mxu0 %v18287_v34  ;;  %v18292_v51 = vpop.f32.mrb[235].mxu1  ;;  %v19393_v49 = vld [vmem:[#allocation18_spill] sm:$0xff] }
 0x7dc   :  { %19384 = vst [vmem:[#allocation97_spill] sm:$0xff] %v18292_v51  ;;  %10198 = vmatprep.mubr.bf16.mxu0 %v19385_v60  ;;  %v19395_v51 = vld [vmem:[#allocation40_spill] sm:$0xff] }
 0x7e3   :  { %10199 = vmatmul.mubr.bf16.gmra.mrb[216].mxu0 %v19386_v37 }
 0x7e4   :  { %10206 = vmatprep.mubr.bf16.mxu0 %v19387_v42 }
 0x7e8   :  { %v18297_v46 = vpop.f32.mrb[236].mxu1 }
 0x7e9   :  { %19388 = vst [vmem:[#allocation9_spill] sm:$0xff] %v18297_v46  ;;  %v18299_v20 = vpop.f32.mrb[237].mxu1  ;;  %v19399_v46 = vld [vmem:[#allocation11_spill] sm:$0xff] }
 0x7ea   :  { %19389 = vst [vmem:[#allocation98_spill] sm:$0xff] %v18299_v20  ;;  %v18301_v31 = vpop.f32.mrb[238].mxu1 }
 0x7eb   :  { %19390 = vst [vmem:[#allocation99_spill] sm:$0xff] %v18301_v31  ;;  %10207 = vmatmul.mubr.bf16.gmra.mrb[220].mxu0 %v19391_v44  ;;  %v18304_v19 = vpop.f32.mrb[239].mxu1  ;;  %v19401_v31 = vld [vmem:[#allocation36_spill] sm:$0xff] }
 0x7ec   :  { %19392 = vst [vmem:[#allocation15_spill] sm:$0xff] %v18304_v19  ;;  %10214 = vmatprep.mubr.bf16.mxu0 %v19393_v49 }
 0x7f3   :  { %10215 = vmatmul.mubr.bf16.gmra.mrb[224].mxu0 %v19394_v26 }
 0x7f4   :  { %10222 = vmatprep.mubr.bf16.mxu0 %v19395_v51 }
 0x7f8   :  { %v18309_v60 = vpop.f32.mrb[240].mxu1 }
 0x7f9   :  { %19396 = vst [vmem:[#allocation17_spill] sm:$0xff] %v18309_v60  ;;  %v18311_v36 = vpop.f32.mrb[241].mxu1  ;;  %v19405_v60 = vld [vmem:[#allocation42_spill] sm:$0xff] }
 0x7fa   :  { %19397 = vst [vmem:[#allocation100_spill] sm:$0xff] %v18311_v36  ;;  %v18313_v42 = vpop.f32.mrb[242].mxu1 }
 0x7fb   :  { %19398 = vst [vmem:[#allocation101_spill] sm:$0xff] %v18313_v42  ;;  %10223 = vmatmul.mubr.bf16.gmra.mrb[228].mxu0 %v19399_v46  ;;  %v18316_v20 = vpop.f32.mrb[243].mxu1 }
 0x7fc   :  { %19400 = vst [vmem:[#allocation11_spill] sm:$0xff] %v18316_v20  ;;  %10230 = vmatprep.mubr.bf16.mxu0 %v17872_v9 }
 0x803   :  { %10231 = vmatmul.mubr.bf16.gmra.mrb[232].mxu0 %v19401_v31 }
 0x804   :  { %10238 = vmatprep.mubr.bf16.mxu0 %v17896_v15 }
 0x808   :  { %v18321_v19 = vpop.f32.mrb[244].mxu1 }
 0x809   :  { %19402 = vst [vmem:[#allocation36_spill] sm:$0xff] %v18321_v19  ;;  %v18323_v49 = vpop.f32.mrb[245].mxu1  ;;  %v19410_v19 = vld [vmem:[#allocation24_spill] sm:$0xff] }
 0x80a   :  { %19403 = vst [vmem:[#allocation102_spill] sm:$0xff] %v18323_v49  ;;  %v18325_v51 = vpop.f32.mrb[246].mxu1 }
 0x80b   :  { %19404 = vst [vmem:[#allocation103_spill] sm:$0xff] %v18325_v51  ;;  %10239 = vmatmul.mubr.bf16.gmra.mrb[236].mxu0 %v19405_v60  ;;  %v18328_v36 = vpop.f32.mrb[247].mxu1  ;;  %v19412_v51 = vld [vmem:[#allocation26_spill] sm:$0xff] }
 0x80c   :  { %19406 = vst [vmem:[#allocation42_spill] sm:$0xff] %v18328_v36  ;;  %10246 = vmatprep.mubr.bf16.mxu0 %v17920_v32  ;;  %v19413_v36 = vld [vmem:[#allocation29_spill] sm:$0xff]  ;;  %v19433_v32 = vld [vmem:[#allocation4_spill] sm:$0xff] }
 0x813   :  { %10247 = vmatmul.mubr.bf16.gmra.mrb[240].mxu0 %v17906_v27 }
 0x814   :  { %10254 = vmatprep.mubr.bf16.mxu0 %v17944_v18 }
 0x818   :  { %v18333_v42 = vpop.f32.mrb[248].mxu1 }
 0x819   :  { %19407 = vst [vmem:[#allocation104_spill] sm:$0xff] %v18333_v42  ;;  %v18335_v20 = vpop.f32.mrb[249].mxu1  ;;  %v19414_v42 = vld [vmem:[#allocation30_spill] sm:$0xff] }
 0x81a   :  { %19408 = vst [vmem:[#allocation105_spill] sm:$0xff] %v18335_v20  ;;  %v18337_v15 = vpop.f32.mrb[250].mxu1  ;;  %v13854_v20 = vld [vmem:[%s18799_s7 + $0x188] sm:$0xff]  }
 0x81b   :  { %19409 = vst [vmem:[#allocation106_spill] sm:$0xff] %v18337_v15  ;;  %10255 = vmatmul.mubr.bf16.gmra.mrb[244].mxu0 %v19410_v19  ;;  %v18340_v49 = vpop.f32.mrb[251].mxu1  ;;  %v13853_v15 = vld [vmem:[%s18799_s7 + $0x180] sm:$0xff]  }
 0x81c   :  { %19411 = vst [vmem:[#allocation24_spill] sm:$0xff] %v18340_v49  ;;  %10262 = vmatprep.mubr.bf16.mxu0 %v17968_v41  ;;  %v19415_v49 = vld [vmem:[#allocation59_spill] sm:$0xff] }
 0x823   :  { %10263 = vmatmul.mubr.bf16.gmra.mrb[248].mxu0 %v19412_v51 }
 0x824   :  { %10270 = vmatprep.mubr.bf16.mxu0 %v17992_v33 }
 0x82b   :  { %10271 = vmatmul.mubr.bf16.gmra.mrb[252].mxu0 %v19413_v36 }
 0x82c   :  { %10278 = vmatprep.mubr.bf16.mxu0 %v18023_v6  ;;  %v19430_v6 = vld [vmem:[#allocation68_spill] sm:$0xff] }
 0x833   :  { %10279 = vmatmul.mubr.bf16.gmra.mrb[0].mxu0 %v18007_v28 }
 0x834   :  { %10286 = vmatprep.mubr.bf16.mxu0 %v18045_v45  ;;  %v19429_v45 = vld [vmem:[#allocation73_spill] sm:$0xff] }
 0x83b   :  { %10287 = vmatmul.mubr.bf16.gmra.mrb[4].mxu0 %v19414_v42 }
 0x83c   :  { %10294 = vmatprep.mubr.bf16.mxu0 %v18073_v8  ;;  %v19416_v8 = vld [vmem:[#allocation58_spill] sm:$0xff] }
 0x843   :  { %10295 = vmatmul.mubr.bf16.gmra.mrb[8].mxu0 %v18054_v12 }
 0x844   :  { %10302 = vmatprep.mubr.bf16.mxu0 %v18098_v29 }
 0x84b   :  { %10303 = vmatmul.mubr.bf16.gmra.mrb[12].mxu0 %v18080_v13 }
 0x84c   :  { %10343 = vmatprep.mubr.bf16.mxu0 %v18133_v7  ;;  %v13855_v7 = vld [vmem:[%s18799_s7 + $0x190] sm:$0xff]  }
 0x853   :  { %10344 = vmatmul.mubr.bf16.vlgmr.msra.gmra.mrb[144].mxu0 %v19415_v49  ;;  %v19417_v49 = vld [vmem:[#allocation61_spill] sm:$0xff] }
 0x854   :  { %10601 = vmatpush1.bf16.msra.mxu0 %v13853_v15  ;;  %10351 = vmatprep.mubr.bf16.mxu0 %v17343_v63  ;;  %v13856_v63 = vld [vmem:[%s18799_s7 + $0x198] sm:$0xff]   ;;  %v13857_v15 = vld [vmem:[%s18799_s7 + $0x1a0] sm:$0xff]  }
 0x855   :  { %10602 = vmatprep.subr.bf16.mxu0 %v18983_v39 }
 0x858   :  { %10603 = vmatpush1.bf16.msra.mxu0 %v13854_v20  ;;  %v13859_v20 = vld [vmem:[%s18799_s7 + $0x1b0] sm:$0xff]  }
 0x859   :  { %10604 = vmatprep.subr.bf16.mxu0 %v18983_v39 }
 0x85b   :  { %10352 = vmatmul.mubr.bf16.gmra.mrb[148].mxu0 %v19416_v8 }
 0x85c   :  { %10359 = vmatprep.mubr.bf16.mxu0 %v17360_v48  ;;  %10605 = vmatpush1.bf16.msra.mxu0 %v13855_v7  ;;  %v13858_v48 = vld [vmem:[%s18799_s7 + $0x1a8] sm:$0xff]   ;;  %v19418_v7 = vld [vmem:[#allocation60_spill] sm:$0xff] }
 0x85d   :  { %10606 = vmatprep.subr.bf16.mxu0 %v18983_v39 }
 0x860   :  { %10607 = vmatpush1.bf16.msra.mxu0 %v13856_v63  ;;  %v13861_v63 = vld [vmem:[%s18799_s7 + $0x1c0] sm:$0xff]  }
 0x861   :  { %10608 = vmatprep.subr.bf16.mxu0 %v18983_v39 }
 0x863   :  { %10360 = vmatmul.mubr.bf16.gmra.mrb[152].mxu0 %v19417_v49 }
 0x864   :  { %10367 = vmatprep.mubr.bf16.mxu0 %v17378_v53  ;;  %10609 = vmatpush1.bf16.msra.mxu0 %v13857_v15  ;;  %v13860_v53 = vld [vmem:[%s18799_s7 + $0x1b8] sm:$0xff]   ;;  %v19419_v15 = vld [vmem:[#allocation54_spill] sm:$0xff] }
 0x865   :  { %10610 = vmatprep.subr.bf16.mxu0 %v18983_v39 }
 0x868   :  { %10611 = vmatpush1.bf16.msra.mxu0 %v13858_v48  ;;  %v13863_v48 = vld [vmem:[%s18799_s7 + $0x1d0] sm:$0xff]  }
 0x869   :  { %10612 = vmatprep.subr.bf16.mxu0 %v18983_v39 }
 0x86b   :  { %10368 = vmatmul.mubr.bf16.gmra.mrb[156].mxu0 %v19418_v7 }
 0x86c   :  { %10375 = vmatprep.mubr.bf16.mxu0 %v17404_v58  ;;  %10613 = vmatpush1.bf16.msra.mxu0 %v13859_v20  ;;  %v13862_v58 = vld [vmem:[%s18799_s7 + $0x1c8] sm:$0xff]  }
 0x86d   :  { %10614 = vmatprep.subr.bf16.mxu0 %v18983_v39  ;;  %v19420_v20 = vld [vmem:[#allocation55_spill] sm:$0xff] }
 0x870   :  { %10615 = vmatpush1.bf16.msra.mxu0 %v13860_v53  ;;  %v13864_v53 = vld [vmem:[%s18799_s7 + $0x1d8] sm:$0xff]  }
 0x871   :  { %10616 = vmatprep.subr.bf16.mxu0 %v18983_v39 }
 0x873   :  { %10376 = vmatmul.mubr.bf16.gmra.mrb[160].mxu0 %v19419_v15 }
 0x874   :  { %10383 = vmatprep.mubr.bf16.mxu0 %v17431_v16  ;;  %10617 = vmatpush1.bf16.msra.mxu0 %v13861_v63  ;;  %v19421_v16 = vld [vmem:[#allocation7_spill] sm:$0xff]  ;;  %v19422_v63 = vld [vmem:[#allocation8_spill] sm:$0xff] }
 0x875   :  { %10618 = vmatprep.subr.bf16.mxu0 %v18983_v39 }
 0x878   :  { %10619 = vmatpush1.bf16.msra.mxu0 %v13862_v58  ;;  %v19423_v58 = vld [vmem:[#allocation62_spill] sm:$0xff] }
 0x879   :  { %10620 = vmatprep.subr.bf16.mxu0 %v18983_v39 }
 0x87b   :  { %10384 = vmatmul.mubr.bf16.gmra.mrb[164].mxu0 %v19420_v20 }
 0x87c   :  { %10391 = vmatprep.mubr.bf16.mxu0 %v17457_v55  ;;  %10621 = vmatpush1.bf16.msra.mxu0 %v13863_v48  ;;  %v13865_v55 = vld [vmem:[%s18799_s7 + $0x1e0] sm:$0xff]   ;;  %v19424_v48 = vld [vmem:[#allocation69_spill] sm:$0xff] }
 0x87d   :  { %10622 = vmatprep.subr.bf16.mxu0 %v18983_v39 }
 0x880   :  { %10623 = vmatpush1.bf16.msra.mxu0 %v13864_v53  ;;  %v19426_v53 = vld [vmem:[#allocation70_spill] sm:$0xff] }
 0x881   :  { %10624 = vmatprep.subr.bf16.mxu0 %v18983_v39 }
 0x883   :  { %10392 = vmatmul.mubr.bf16.gmra.mrb[168].mxu0 %v19421_v16 }
 0x884   :  { %10399 = vmatprep.mubr.bf16.mxu0 %v17484_v30  ;;  %10625 = vmatpush1.bf16.msra.mxu0 %v13865_v55  ;;  %v19425_v30 = vld [vmem:[#allocation65_spill] sm:$0xff]  ;;  %v19428_v55 = vld [vmem:[#allocation75_spill] sm:$0xff] }
 0x885   :  { %10626 = vmatprep.subr.bf16.mxu0 %v18983_v39 }
 0x88b   :  { %10400 = vmatmul.mubr.bf16.gmra.mrb[172].mxu0 %v19422_v63 }
 0x88c   :  { %10407 = vmatprep.mubr.bf16.mxu0 %v17510_v10  ;;  %v13866_v10 = vld [vmem:[%s18799_s7 + $0x1e8] sm:$0xff]  }
 0x88d   :  { %10627 = vmatpush1.bf16.msra.mxu0 %v13866_v10 }
 0x88e   :  { %10628 = vmatprep.subr.bf16.mxu0 %v18983_v39 }
 0x893   :  { %10408 = vmatmul.mubr.bf16.gmra.mrb[176].mxu0 %v19423_v58 }
 0x894   :  { %10415 = vmatprep.mubr.bf16.mxu0 %v17537_v54  ;;  %v19427_v54 = vld [vmem:[#allocation79_spill] sm:$0xff] }
 0x89b   :  { %10416 = vmatmul.mubr.bf16.gmra.mrb[180].mxu0 %v19424_v48 }
 0x89c   :  { %10423 = vmatprep.mubr.bf16.mxu0 %v17565_v5  ;;  %v13867_v5 = vld [vmem:[%s18799_s7 + $0x1f0] sm:$0xff]  }
 0x89d   :  { %10629 = vmatpush1.bf16.msra.mxu0 %v13867_v5  ;;  %v19431_v5 = vld [vmem:[#allocation76_spill] sm:$0xff] }
 0x89e   :  { %10630 = vmatprep.subr.bf16.mxu0 %v18983_v39  ;;  %v9264_v33 = vshll.u32 %v19431_v5, 16  ;;  %v19460_v5 = vld [vmem:[#allocation48_spill] sm:$0xff] }
 0x8a0   :  { %v9266_v18 = vrot.slane %v9264_v33, 1  ;;  %v19435_v33 = vld [vmem:[#allocation12_spill] sm:$0xff] }
 0x8a3   :  { %10424 = vmatmul.mubr.bf16.gmra.mrb[184].mxu0 %v19425_v30 }
 0x8a4   :  { %10431 = vmatprep.mubr.bf16.mxu0 %v19363_v43  ;;  %v9259_v43 = vshll.u32 %v19372_v2, 16 }
 0x8a6   :  { %v9261_v10 = vrot.slane %v9259_v43, 1  ;;  %v19432_v43 = vld [vmem:[#allocation3_spill] sm:$0xff] }
 0x8ab   :  { %10432 = vmatmul.mubr.bf16.gmra.mrb[188].mxu0 %v19426_v53 }
 0x8ac   :  { %10439 = vmatprep.mubr.bf16.mxu0 %v19368_v38  ;;  %v13868_v38 = vld [vmem:[%s18799_s7 + $0x1f8] sm:$0xff]  }
 0x8ad   :  { %10631 = vmatpush1.bf16.msra.mxu0 %v13868_v38 }
 0x8b3   :  { %10440 = vmatmul.mubr.bf16.gmra.mrb[192].mxu0 %v19427_v54 }
 0x8b4   :  { %10447 = vmatprep.mubr.bf16.mxu0 %v19371_v1  ;;  %v9257_v1 = vshrl.u32 %v19372_v2, 16 }
 0x8b6   :  { %v9262_v41 = vor.u32 %v9261_v10, %v9257_v1 }
 0x8bb   :  { %10448 = vmatmul.mubr.bf16.gmra.mrb[196].mxu0 %v19428_v55 }
 0x8bc   :  { %10455 = vmatprep.mubr.bf16.mxu0 %v19376_v14  ;;  %v18452_v14 = vsel %vm5629_vm14, %v9262_v41, %v9266_v18  ;;  %v19436_v18 = vld [vmem:[#allocation37_spill] sm:$0xff] }
 0x8bd   :  { %v19437_v41 = vld [vmem:[#allocation41_spill] sm:$0xff] }
 0x8c3   :  { %10456 = vmatmul.mubr.bf16.gmra.mrb[200].mxu0 %v19429_v45 }
 0x8c4   :  { %10463 = vmatprep.mubr.bf16.mxu0 %v19430_v6  ;;  %v19434_v6 = vld [vmem:[#allocation13_spill] sm:$0xff] }
 0x8cb   :  { %10464 = vmatmul.mubr.bf16.gmra.mrb[204].mxu0 %v18452_v14 }
 0x8cc   :  { %10471 = vmatprep.mubr.bf16.mxu0 %v18287_v34  ;;  %v19439_v34 = vld [vmem:[#allocation45_spill] sm:$0xff] }
 0x8d3   :  { %10472 = vmatmul.mubr.bf16.gmra.mrb[208].mxu0 %v19432_v43 }
 0x8d4   :  { %10479 = vmatprep.mubr.bf16.mxu0 %v19386_v37  ;;  %v19438_v37 = vld [vmem:[#allocation44_spill] sm:$0xff] }
 0x8db   :  { %10480 = vmatmul.mubr.bf16.gmra.mrb[212].mxu0 %v19433_v32 }
 0x8dc   :  { %10487 = vmatprep.mubr.bf16.mxu0 %v19391_v44 }
 0x8e3   :  { %10488 = vmatmul.mubr.bf16.gmra.mrb[216].mxu0 %v19434_v6 }
 0x8e4   :  { %10495 = vmatprep.mubr.bf16.mxu0 %v19394_v26  ;;  %v19440_v26 = vld [vmem:[#allocation38_spill] sm:$0xff] }
 0x8eb   :  { %10496 = vmatmul.mubr.bf16.gmra.mrb[220].mxu0 %v19435_v33 }
 0x8ec   :  { %10503 = vmatprep.mubr.bf16.mxu0 %v19399_v46  ;;  %v19441_v46 = vld [vmem:[#allocation28_spill] sm:$0xff] }
 0x8f3   :  { %10504 = vmatmul.mubr.bf16.gmra.mrb[224].mxu0 %v19436_v18 }
 0x8f4   :  { %10511 = vmatprep.mubr.bf16.mxu0 %v19401_v31  ;;  %v19442_v31 = vld [vmem:[#allocation23_spill] sm:$0xff] }
 0x8fb   :  { %10512 = vmatmul.mubr.bf16.gmra.mrb[228].mxu0 %v19437_v41 }
 0x8fc   :  { %10519 = vmatprep.mubr.bf16.mxu0 %v19405_v60  ;;  %v19443_v60 = vld [vmem:[#allocation22_spill] sm:$0xff] }
 0x903   :  { %10520 = vmatmul.mubr.bf16.gmra.mrb[232].mxu0 %v19438_v37 }
 0x904   :  { %10527 = vmatprep.mubr.bf16.mxu0 %v17906_v27  ;;  %v9271_v27 = vshll.u32 %v18098_v29, 16 }
 0x90b   :  { %10528 = vmatmul.mubr.bf16.gmra.mrb[236].mxu0 %v19439_v34 }
 0x90c   :  { %10535 = vmatprep.mubr.bf16.mxu0 %v19410_v19 }
 0x913   :  { %10536 = vmatmul.mubr.bf16.gmra.mrb[240].mxu0 %v19440_v26 }
 0x914   :  { %10543 = vmatprep.mubr.bf16.mxu0 %v19412_v51  ;;  %v9273_v51 = vrot.slane %v9271_v27, 1  ;;  %v19463_v27 = vld [vmem:[#allocation63_spill] sm:$0xff] }
 0x91b   :  { %10544 = vmatmul.mubr.bf16.gmra.mrb[244].mxu0 %v19441_v46 }
 0x91c   :  { %10551 = vmatprep.mubr.bf16.mxu0 %v19413_v36  ;;  %v9276_v36 = vshll.u32 %v18086_v40, 16 }
 0x91e   :  { %v9278_v44 = vrot.slane %v9276_v36, 1 }
 0x923   :  { %10552 = vmatmul.mubr.bf16.gmra.mrb[248].mxu0 %v19442_v31 }
 0x924   :  { %10559 = vmatprep.mubr.bf16.mxu0 %v18007_v28  ;;  %v9269_v28 = vshrl.u32 %v18098_v29, 16 }
 0x92b   :  { %10560 = vmatmul.mubr.bf16.gmra.mrb[252].mxu0 %v19443_v60 }
 0x92c   :  { %10567 = vmatprep.mubr.bf16.mxu0 %v19414_v42  ;;  %v9274_v42 = vor.u32 %v9273_v51, %v9269_v28 }
 0x92e   :  { %v18490_v19 = vsel %vm5629_vm14, %v9274_v42, %v9278_v44  ;;  %v19464_v42 = vld [vmem:[#allocation50_spill] sm:$0xff] }
 0x933   :  { %10568 = vmatmul.mubr.bf16.gmra.mrb[0].mxu0 %v18041_v0 }
 0x934   :  { %10575 = vmatprep.mubr.bf16.mxu0 %v18054_v12  ;;  %v19454_v12 = vld [vmem:[#allocation33_spill] sm:$0xff] }
 0x93b   :  { %10576 = vmatmul.mubr.bf16.gmra.mrb[4].mxu0 %v18069_v22 }
 0x93c   :  { %10583 = vmatprep.mubr.bf16.mxu0 %v18080_v13 }
 0x943   :  { %10584 = vmatmul.mubr.bf16.gmra.mrb[8].mxu0 %v18091_v21 }
 0x944   :  { %10591 = vmatprep.mubr.bf16.mxu0 %v18109_v59  ;;  %v19455_v59 = vld [vmem:[#allocation64_spill] sm:$0xff] }
 0x94b   :  { %10592 = vmatmul.mubr.bf16.gmra.mrb[12].mxu0 %v18490_v19 }
 0x94c   :  { %10632 = vmatprep.mubr.bf16.mxu0 %v19416_v8 }
 0x953   :  { %10633 = vmatmul.mubr.bf16.vlgmr.msra.gmra.mrb[144].mxu0 %v17309_v24  ;;  %v19444_v24 = vld [vmem:[#allocation10_spill] sm:$0xff] }
 0x954   :  { %10640 = vmatprep.mubr.bf16.mxu0 %v19417_v49 }
 0x95b   :  { %10641 = vmatmul.mubr.bf16.gmra.mrb[148].mxu0 %v17336_v17  ;;  %v19445_v17 = vld [vmem:[#allocation14_spill] sm:$0xff] }
 0x95c   :  { %10648 = vmatprep.mubr.bf16.mxu0 %v19418_v7 }
 0x963   :  { %10649 = vmatmul.mubr.bf16.gmra.mrb[152].mxu0 %v17364_v47  ;;  %v19446_v47 = vld [vmem:[#allocation16_spill] sm:$0xff] }
 0x964   :  { %10656 = vmatprep.mubr.bf16.mxu0 %v19419_v15  ;;  %v19457_v15 = vld [vmem:[#allocation31_spill] sm:$0xff] }
 0x96b   :  { %10657 = vmatmul.mubr.bf16.gmra.mrb[156].mxu0 %v17394_v25  ;;  %v19447_v25 = vld [vmem:[#allocation18_spill] sm:$0xff] }
 0x96c   :  { %10664 = vmatprep.mubr.bf16.mxu0 %v19420_v20 }
 0x973   :  { %10665 = vmatmul.mubr.bf16.gmra.mrb[160].mxu0 %v17418_v50  ;;  %v19448_v50 = vld [vmem:[#allocation40_spill] sm:$0xff] }
 0x974   :  { %10672 = vmatprep.mubr.bf16.mxu0 %v19421_v16 }
 0x97b   :  { %10673 = vmatmul.mubr.bf16.gmra.mrb[164].mxu0 %v17447_v23  ;;  %v19449_v23 = vld [vmem:[#allocation43_spill] sm:$0xff] }
 0x97c   :  { %10680 = vmatprep.mubr.bf16.mxu0 %v19422_v63 }
 0x983   :  { %10681 = vmatmul.mubr.bf16.gmra.mrb[168].mxu0 %v17471_v57  ;;  %v19450_v57 = vld [vmem:[#allocation39_spill] sm:$0xff] }
 0x984   :  { %10688 = vmatprep.mubr.bf16.mxu0 %v19423_v58  ;;  %v19458_v58 = vld [vmem:[#allocation34_spill] sm:$0xff] }
 0x98b   :  { %10689 = vmatmul.mubr.bf16.gmra.mrb[172].mxu0 %v17500_v4  ;;  %v19451_v4 = vld [vmem:[#allocation25_spill] sm:$0xff] }
 0x98c   :  { %10696 = vmatprep.mubr.bf16.mxu0 %v19424_v48 }
 0x993   :  { %10697 = vmatmul.mubr.bf16.gmra.mrb[176].mxu0 %v17524_v11  ;;  %v19452_v11 = vld [vmem:[#allocation27_spill] sm:$0xff] }
 0x994   :  { %10704 = vmatprep.mubr.bf16.mxu0 %v19425_v30  ;;  %v19459_v30 = vld [vmem:[#allocation32_spill] sm:$0xff] }
 0x99b   :  { %10705 = vmatmul.mubr.bf16.gmra.mrb[180].mxu0 %v17553_v35  ;;  %v19453_v35 = vld [vmem:[#allocation20_spill] sm:$0xff] }
 0x99c   :  { %10712 = vmatprep.mubr.bf16.mxu0 %v19426_v53 }
 0x9a3   :  { %10713 = vmatmul.mubr.bf16.gmra.mrb[184].mxu0 %v17586_v3  ;;  %v18551_v3 = vld [vmem:[%s18802_s8] ss:$0 sm:$0xff] }
 0x9a4   :  { %10720 = vmatprep.mubr.bf16.mxu0 %v19427_v54 }
 0x9ab   :  { %10721 = vmatmul.mubr.bf16.gmra.mrb[188].mxu0 %v17615_v52 }
 0x9ac   :  { %10728 = vmatprep.mubr.bf16.mxu0 %v19428_v55 }
 0x9b3   :  { %10729 = vmatmul.mubr.bf16.gmra.mrb[192].mxu0 %v19364_v61 }
 0x9b4   :  { %10736 = vmatprep.mubr.bf16.mxu0 %v19429_v45 }
 0x9bb   :  { %10737 = vmatmul.mubr.bf16.gmra.mrb[196].mxu0 %v19370_v56 }
 0x9bc   :  { %10744 = vmatprep.mubr.bf16.mxu0 %v18452_v14 }
 0x9c3   :  { %10745 = vmatmul.mubr.bf16.gmra.mrb[200].mxu0 %v19372_v2  ;;  %v19456_v2 = vld [vmem:[#allocation21_spill] sm:$0xff] }
 0x9c4   :  { %10752 = vmatprep.mubr.bf16.mxu0 %v19145_v62 }
 0x9cb   :  { %10753 = vmatmul.mubr.bf16.gmra.mrb[204].mxu0 %v18983_v39 }
 0x9cc   :  { %10760 = vmatprep.mubr.bf16.mxu0 %v19433_v32 }
 0x9d3   :  { %10761 = vmatmul.mubr.bf16.gmra.mrb[208].mxu0 %v19444_v24 }
 0x9d4   :  { %10768 = vmatprep.mubr.bf16.mxu0 %v19434_v6 }
 0x9db   :  { %10769 = vmatmul.mubr.bf16.gmra.mrb[212].mxu0 %v19445_v17 }
 0x9dc   :  { %10776 = vmatprep.mubr.bf16.mxu0 %v19435_v33  ;;  %v19461_v33 = vld [vmem:[#allocation49_spill] sm:$0xff] }
 0x9e3   :  { %10777 = vmatmul.mubr.bf16.gmra.mrb[216].mxu0 %v19446_v47 }
 0x9e4   :  { %10784 = vmatprep.mubr.bf16.mxu0 %v19436_v18  ;;  %v19462_v18 = vld [vmem:[#allocation35_spill] sm:$0xff] }
 0x9eb   :  { %10785 = vmatmul.mubr.bf16.gmra.mrb[220].mxu0 %v19447_v25 }
 0x9ec   :  { %10792 = vmatprep.mubr.bf16.mxu0 %v19437_v41 }
 0x9f3   :  { %10793 = vmatmul.mubr.bf16.gmra.mrb[224].mxu0 %v19448_v50 }
 0x9f4   :  { %10800 = vmatprep.mubr.bf16.mxu0 %v19438_v37 }
 0x9fb   :  { %10801 = vmatmul.mubr.bf16.gmra.mrb[228].mxu0 %v17872_v9 }
 0x9fc   :  { %10808 = vmatprep.mubr.bf16.mxu0 %v19439_v34 }
 0xa03   :  { %10809 = vmatmul.mubr.bf16.gmra.mrb[232].mxu0 %v19449_v23 }
 0xa04   :  { %10816 = vmatprep.mubr.bf16.mxu0 %v19440_v26 }
 0xa0b   :  { %10817 = vmatmul.mubr.bf16.gmra.mrb[236].mxu0 %v19450_v57  ;;  %v19465_v57 = vld [vmem:[#allocation52_spill] sm:$0xff] }
 0xa0c   :  { %10824 = vmatprep.mubr.bf16.mxu0 %v19441_v46 }
 0xa13   :  { %10825 = vmatmul.mubr.bf16.gmra.mrb[240].mxu0 %v19451_v4 }
 0xa14   :  { %10832 = vmatprep.mubr.bf16.mxu0 %v19442_v31 }
 0xa1b   :  { %10833 = vmatmul.mubr.bf16.gmra.mrb[244].mxu0 %v19452_v11 }
 0xa1c   :  { %10840 = vmatprep.mubr.bf16.mxu0 %v19443_v60 }
 0xa23   :  { %10841 = vmatmul.mubr.bf16.gmra.mrb[248].mxu0 %v19453_v35 }
 0xa24   :  { %10848 = vmatprep.mubr.bf16.mxu0 %v18041_v0 }
 0xa26   :  { %v10634_v52 = vpop.f32.mrb[144].mxu0 }
 0xa27   :  { %v12819_v9 = vadd.f32 %v18551_v3, %v10634_v52  ;;  %v10636_v32 = vpop.f32.mrb[145].mxu0 }
 0xa28   :  { %v10637_v45 = vpop.f32.mrb[146].mxu0 }
 0xa29   :  { %v10924_v8 = vadd.f32 %v12819_v9, %v19454_v12  ;;  %v12820_v13 = vadd.f32 %v18551_v3, %v10637_v45  ;;  %v10639_v40 = vpop.f32.mrb[147].mxu0 }
 0xa2a   :  { %v19467_v40 = vld [vmem:[#allocation51_spill] sm:$0xff] }
 0xa2b   :  { %v10927_v56 = vadd.f32 %v12820_v13, %v19455_v59  ;;  %10849 = vmatmul.mubr.bf16.gmra.mrb[252].mxu0 %v19456_v2  ;;  %13869 = vtanh.f32 %v10924_v8 }
 0xa2c   :  { %10856 = vmatprep.mubr.bf16.mxu0 %v18069_v22 }
 0xa2d   :  { %13871 = vtanh.f32 %v10927_v56 }
 0xa2e   :  { %v10642_v0 = vpop.f32.mrb[148].mxu0 }
 0xa2f   :  { %v12821_v61 = vadd.f32 %v18551_v3, %v10642_v0  ;;  %v10644_v49 = vpop.f32.mrb[149].mxu0 }
 0xa30   :  { %v10645_v7 = vpop.f32.mrb[150].mxu0 }
 0xa31   :  { %v10932_v20 = vadd.f32 %v12821_v61, %v19457_v15  ;;  %v12822_v16 = vadd.f32 %v18551_v3, %v10645_v7  ;;  %v10647_v63 = vpop.f32.mrb[151].mxu0 }
 0xa33   :  { %v10935_v48 = vadd.f32 %v12822_v16, %v19458_v58  ;;  %10857 = vmatmul.mubr.bf16.gmra.mrb[0].mxu0 %v19459_v30  ;;  %13873 = vtanh.f32 %v10932_v20  ;;  %v19469_v58 = vld [vmem:[#allocation57_spill] sm:$0xff] }
 0xa34   :  { %10864 = vmatprep.mubr.bf16.mxu0 %v18091_v21 }
 0xa35   :  { %13875 = vtanh.f32 %v10935_v48  ;;  %v13870_v22 = vpop.eup %13869 }
 0xa36   :  { %v10650_v53 = vpop.f32.mrb[152].mxu0 }
 0xa37   :  { %v13872_v54 = vpop.eup %13871  ;;  %v12823_v55 = vadd.f32 %v18551_v3, %v10650_v53  ;;  %v10652_v10 = vpop.f32.mrb[153].mxu0  ;;  %v19470_v53 = vld [vmem:[#allocation56_spill] sm:$0xff] }
 0xa38   :  { %v12087_v38 = vpack.c.bf16 %v13872_v54, %v13870_v22  ;;  %v10653_v1 = vpop.f32.mrb[154].mxu0 }
 0xa39   :  { %v10940_v14 = vadd.f32 %v12823_v55, %v19460_v5  ;;  %v12824_v43 = vadd.f32 %v18551_v3, %v10653_v1  ;;  %v10655_v6 = vpop.f32.mrb[155].mxu0 }
 0xa3a   :  { %12088 = vst [vmem:[%s18803_s9] sm:$0xff] %v12087_v38   ;;  %v19471_v6 = vld [vmem:[#allocation46_spill] sm:$0xff] }
 0xa3b   :  { %v10943_v21 = vadd.f32 %v12824_v43, %v19461_v33  ;;  %10865 = vmatmul.mubr.bf16.gmra.mrb[4].mxu0 %v19462_v18  ;;  %13877 = vtanh.f32 %v10940_v14 }
 0xa3c   :  { %10872 = vmatprep.mubr.bf16.mxu0 %v18490_v19 }
 0xa3d   :  { %13879 = vtanh.f32 %v10943_v21  ;;  %v13874_v41 = vpop.eup %13873 }
 0xa3e   :  { %v10658_v37 = vpop.f32.mrb[156].mxu0 }
 0xa3f   :  { %v13876_v34 = vpop.eup %13875  ;;  %v12825_v26 = vadd.f32 %v18551_v3, %v10658_v37  ;;  %v10660_v46 = vpop.f32.mrb[157].mxu0 }
 0xa40   :  { %v12092_v31 = vpack.c.bf16 %v13876_v34, %v13874_v41  ;;  %v10661_v60 = vpop.f32.mrb[158].mxu0  ;;  %v19472_v41 = vld [vmem:[#allocation5_spill] sm:$0xff] }
 0xa41   :  { %v10948_v51 = vadd.f32 %v12825_v26, %v19463_v27  ;;  %v12826_v36 = vadd.f32 %v18551_v3, %v10661_v60  ;;  %v10663_v28 = vpop.f32.mrb[159].mxu0 }
 0xa42   :  { %12244 = vst [vmem:[%s18803_s9 + $0x8] sm:$0xff] %v12092_v31  }
 0xa43   :  { %v10951_v44 = vadd.f32 %v12826_v36, %v19464_v42  ;;  %10873 = vmatmul.mubr.bf16.gmra.mrb[8].mxu0 %v18098_v29  ;;  %13881 = vtanh.f32 %v10948_v51  ;;  %v19466_v29 = vld [vmem:[#allocation53_spill] sm:$0xff]  ;;  %v19473_v36 = vld [vmem:[#allocation80_spill] sm:$0xff] }
 0xa44   :  { %10880 = vmatprep.mubr.bf16.mxu0 %v19145_v62 }
 0xa45   :  { %13883 = vtanh.f32 %v10951_v44  ;;  %v13878_v19 = vpop.eup %13877 }
 0xa46   :  { %v10666_v24 = vpop.f32.mrb[160].mxu0 }
 0xa47   :  { %v13880_v17 = vpop.eup %13879  ;;  %v12827_v47 = vadd.f32 %v18551_v3, %v10666_v24  ;;  %v10668_v25 = vpop.f32.mrb[161].mxu0 }
 0xa48   :  { %v12097_v50 = vpack.c.bf16 %v13880_v17, %v13878_v19  ;;  %v10669_v23 = vpop.f32.mrb[162].mxu0  ;;  %v19474_v19 = vld [vmem:[#allocation82_spill] sm:$0xff] }
 0xa49   :  { %v10956_v4 = vadd.f32 %v12827_v47, %v19465_v57  ;;  %v12828_v11 = vadd.f32 %v18551_v3, %v10669_v23  ;;  %v10671_v35 = vpop.f32.mrb[163].mxu0 }
 0xa4a   :  { %12245 = vst [vmem:[%s18803_s9 + $0x10] sm:$0xff] %v12097_v50  }
 0xa4b   :  { %v10959_v62 = vadd.f32 %v12828_v11, %v19466_v29  ;;  %10881 = vmatmul.mubr.bf16.gmra.mrb[12].mxu0 %v18983_v39  ;;  %13885 = vtanh.f32 %v10956_v4  ;;  %v19468_v39 = vld [vmem:[#allocation47_spill] sm:$0xff]  ;;  %v19475_v11 = vld [vmem:[#allocation6_spill] sm:$0xff] }
 0xa4d   :  { %13887 = vtanh.f32 %v10959_v62  ;;  %v13882_v52 = vpop.eup %13881 }
 0xa4e   :  { %v10674_v9 = vpop.f32.mrb[164].mxu0 }
 0xa4f   :  { %v13884_v32 = vpop.eup %13883  ;;  %v12829_v45 = vadd.f32 %v18551_v3, %v10674_v9  ;;  %v10676_v12 = vpop.f32.mrb[165].mxu0 }
 0xa50   :  { %v12102_v8 = vpack.c.bf16 %v13884_v32, %v13882_v52  ;;  %v10677_v13 = vpop.f32.mrb[166].mxu0  ;;  %v19476_v52 = vld [vmem:[#allocation81_spill] sm:$0xff] }
 0xa51   :  { %v10964_v59 = vadd.f32 %v12829_v45, %v19467_v40  ;;  %v12830_v56 = vadd.f32 %v18551_v3, %v10677_v13  ;;  %v10679_v2 = vpop.f32.mrb[167].mxu0 }
 0xa52   :  { %12246 = vst [vmem:[%s18803_s9 + $0x18] sm:$0xff] %v12102_v8  }
 0xa53   :  { %v10967_v0 = vadd.f32 %v12830_v56, %v19468_v39  ;;  %13889 = vtanh.f32 %v10964_v59  ;;  %v19477_v56 = vld [vmem:[#allocation84_spill] sm:$0xff] }
 0xa55   :  { %13891 = vtanh.f32 %v10967_v0  ;;  %v13886_v61 = vpop.eup %13885 }
 0xa56   :  { %v10682_v49 = vpop.f32.mrb[168].mxu0 }
 0xa57   :  { %v13888_v7 = vpop.eup %13887  ;;  %v12831_v15 = vadd.f32 %v18551_v3, %v10682_v49  ;;  %v10684_v20 = vpop.f32.mrb[169].mxu0 }
 0xa58   :  { %v12107_v16 = vpack.c.bf16 %v13888_v7, %v13886_v61  ;;  %v10685_v63 = vpop.f32.mrb[170].mxu0  ;;  %v19478_v61 = vld [vmem:[#allocation86_spill] sm:$0xff] }
 0xa59   :  { %v10972_v48 = vadd.f32 %v12831_v15, %v19469_v58  ;;  %v12832_v30 = vadd.f32 %v18551_v3, %v10685_v63  ;;  %v10687_v22 = vpop.f32.mrb[171].mxu0 }
 0xa5a   :  { %12247 = vst [vmem:[%s18803_s9 + $0x20] sm:$0xff] %v12107_v16  }
 0xa5b   :  { %v10975_v54 = vadd.f32 %v12832_v30, %v19470_v53  ;;  %13893 = vtanh.f32 %v10972_v48  ;;  %v19479_v30 = vld [vmem:[#allocation83_spill] sm:$0xff] }
 0xa5d   :  { %13895 = vtanh.f32 %v10975_v54  ;;  %v13890_v55 = vpop.eup %13889 }
 0xa5e   :  { %v10690_v10 = vpop.f32.mrb[172].mxu0 }
 0xa5f   :  { %v13892_v38 = vpop.eup %13891  ;;  %v12833_v1 = vadd.f32 %v18551_v3, %v10690_v10  ;;  %v10692_v5 = vpop.f32.mrb[173].mxu0 }
 0xa60   :  { %v12112_v14 = vpack.c.bf16 %v13892_v38, %v13890_v55  ;;  %v10693_v43 = vpop.f32.mrb[174].mxu0  ;;  %v19480_v55 = vld [vmem:[#allocation85_spill] sm:$0xff] }
 0xa61   :  { %v10980_v33 = vadd.f32 %v12833_v1, %v19471_v6  ;;  %v12834_v21 = vadd.f32 %v18551_v3, %v10693_v43  ;;  %v10695_v18 = vpop.f32.mrb[175].mxu0 }
 0xa62   :  { %12248 = vst [vmem:[%s18803_s9 + $0x28] sm:$0xff] %v12112_v14  }
 0xa63   :  { %v10983_v37 = vadd.f32 %v12834_v21, %v19472_v41  ;;  %13897 = vtanh.f32 %v10980_v33  ;;  %v19481_v21 = vld [vmem:[#allocation88_spill] sm:$0xff] }
 0xa65   :  { %13899 = vtanh.f32 %v10983_v37  ;;  %v13894_v34 = vpop.eup %13893 }
 0xa66   :  { %v10698_v26 = vpop.f32.mrb[176].mxu0 }
 0xa67   :  { %v13896_v46 = vpop.eup %13895  ;;  %v12835_v31 = vadd.f32 %v18551_v3, %v10698_v26  ;;  %v10700_v60 = vpop.f32.mrb[177].mxu0 }
 0xa68   :  { %v12117_v27 = vpack.c.bf16 %v13896_v46, %v13894_v34  ;;  %v10701_v51 = vpop.f32.mrb[178].mxu0  ;;  %v19482_v34 = vld [vmem:[#allocation90_spill] sm:$0xff] }
 0xa69   :  { %v10988_v28 = vadd.f32 %v12835_v31, %v19473_v36  ;;  %v12836_v42 = vadd.f32 %v18551_v3, %v10701_v51  ;;  %v10703_v44 = vpop.f32.mrb[179].mxu0 }
 0xa6a   :  { %12249 = vst [vmem:[%s18803_s9 + $0x30] sm:$0xff] %v12117_v27  }
 0xa6b   :  { %v10991_v24 = vadd.f32 %v12836_v42, %v19474_v19  ;;  %13901 = vtanh.f32 %v10988_v28  ;;  %v19483_v42 = vld [vmem:[#allocation87_spill] sm:$0xff] }
 0xa6d   :  { %13903 = vtanh.f32 %v10991_v24  ;;  %v13898_v17 = vpop.eup %13897 }
 0xa6e   :  { %v10706_v47 = vpop.f32.mrb[180].mxu0 }
 0xa6f   :  { %v13900_v25 = vpop.eup %13899  ;;  %v12837_v50 = vadd.f32 %v18551_v3, %v10706_v47  ;;  %v10708_v23 = vpop.f32.mrb[181].mxu0 }
 0xa70   :  { %v12122_v57 = vpack.c.bf16 %v13900_v25, %v13898_v17  ;;  %v10709_v4 = vpop.f32.mrb[182].mxu0  ;;  %v19484_v17 = vld [vmem:[#allocation89_spill] sm:$0xff] }
 0xa71   :  { %v10996_v35 = vadd.f32 %v12837_v50, %v19475_v11  ;;  %v12838_v29 = vadd.f32 %v18551_v3, %v10709_v4  ;;  %v10711_v62 = vpop.f32.mrb[183].mxu0 }
 0xa72   :  { %12250 = vst [vmem:[%s18803_s9 + $0x38] sm:$0xff] %v12122_v57  }
 0xa73   :  { %v10999_v9 = vadd.f32 %v12838_v29, %v19476_v52  ;;  %13905 = vtanh.f32 %v10996_v35  ;;  %v19485_v29 = vld [vmem:[#allocation92_spill] sm:$0xff] }
 0xa75   :  { %13907 = vtanh.f32 %v10999_v9  ;;  %v13902_v32 = vpop.eup %13901 }
 0xa76   :  { %v10714_v45 = vpop.f32.mrb[184].mxu0 }
 0xa77   :  { %v13904_v12 = vpop.eup %13903  ;;  %v12839_v8 = vadd.f32 %v18551_v3, %v10714_v45  ;;  %v10716_v13 = vpop.f32.mrb[185].mxu0 }
 0xa78   :  { %v12127_v40 = vpack.c.bf16 %v13904_v12, %v13902_v32  ;;  %v10717_v59 = vpop.f32.mrb[186].mxu0  ;;  %v19486_v32 = vld [vmem:[#allocation94_spill] sm:$0xff] }
 0xa79   :  { %v11004_v2 = vadd.f32 %v12839_v8, %v19477_v56  ;;  %v12840_v39 = vadd.f32 %v18551_v3, %v10717_v59  ;;  %v10719_v0 = vpop.f32.mrb[187].mxu0 }
 0xa7a   :  { %12251 = vst [vmem:[%s18803_s9 + $0x40] sm:$0xff] %v12127_v40  }
 0xa7b   :  { %v11007_v49 = vadd.f32 %v12840_v39, %v19478_v61  ;;  %13909 = vtanh.f32 %v11004_v2  ;;  %v19487_v39 = vld [vmem:[#allocation91_spill] sm:$0xff] }
 0xa7d   :  { %13911 = vtanh.f32 %v11007_v49  ;;  %v13906_v7 = vpop.eup %13905 }
 0xa7e   :  { %v10722_v15 = vpop.f32.mrb[188].mxu0 }
 0xa7f   :  { %v13908_v20 = vpop.eup %13907  ;;  %v12841_v16 = vadd.f32 %v18551_v3, %v10722_v15  ;;  %v10724_v63 = vpop.f32.mrb[189].mxu0  ;;  %v19488_v15 = vld [vmem:[#allocation93_spill] sm:$0xff] }
 0xa80   :  { %v12132_v58 = vpack.c.bf16 %v13908_v20, %v13906_v7  ;;  %v10725_v48 = vpop.f32.mrb[190].mxu0  ;;  %v18667_v7 = vpop.f32.mrb[252].mxu1 }
 0xa81   :  { %v11012_v22 = vadd.f32 %v12841_v16, %v19479_v30  ;;  %v12842_v53 = vadd.f32 %v18551_v3, %v10725_v48  ;;  %v10727_v54 = vpop.f32.mrb[191].mxu0  ;;  %v18670_v16 = vpop.f32.mrb[253].mxu1 }
 0xa82   :  { %12252 = vst [vmem:[%s18803_s9 + $0x48] sm:$0xff] %v12132_v58   ;;  %v18672_v63 = vpop.f32.mrb[254].mxu1 }
 0xa83   :  { %v11015_v10 = vadd.f32 %v12842_v53, %v19480_v55  ;;  %13913 = vtanh.f32 %v11012_v22  ;;  %v18674_v58 = vpop.f32.mrb[255].mxu1 }
 0xa85   :  { %13915 = vtanh.f32 %v11015_v10  ;;  %v13910_v38 = vpop.eup %13909 }
 0xa86   :  { %v10730_v1 = vpop.f32.mrb[192].mxu0 }
 0xa87   :  { %v13912_v5 = vpop.eup %13911  ;;  %v12843_v14 = vadd.f32 %v18551_v3, %v10730_v1  ;;  %v10732_v43 = vpop.f32.mrb[193].mxu0 }
 0xa88   :  { %v12137_v6 = vpack.c.bf16 %v13912_v5, %v13910_v38  ;;  %v10733_v33 = vpop.f32.mrb[194].mxu0  ;;  %v19489_v38 = vld [vmem:[#allocation78_spill] sm:$0xff]  ;;  %v19490_v43 = vld [vmem:[#allocation71_spill] sm:$0xff] }
 0xa89   :  { %v11020_v18 = vadd.f32 %v12843_v14, %v19481_v21  ;;  %v12844_v41 = vadd.f32 %v18551_v3, %v10733_v33  ;;  %v10735_v37 = vpop.f32.mrb[195].mxu0 }
 0xa8a   :  { %12253 = vst [vmem:[%s18803_s9 + $0x50] sm:$0xff] %v12137_v6  }
 0xa8b   :  { %v11023_v26 = vadd.f32 %v12844_v41, %v19482_v34  ;;  %13917 = vtanh.f32 %v11020_v18 }
 0xa8d   :  { %13919 = vtanh.f32 %v11023_v26  ;;  %v13914_v46 = vpop.eup %13913 }
 0xa8e   :  { %v10738_v31 = vpop.f32.mrb[196].mxu0 }
 0xa8f   :  { %v13916_v60 = vpop.eup %13915  ;;  %v12845_v27 = vadd.f32 %v18551_v3, %v10738_v31  ;;  %v10740_v51 = vpop.f32.mrb[197].mxu0 }
 0xa90   :  { %v12142_v36 = vpack.c.bf16 %v13916_v60, %v13914_v46  ;;  %v10741_v28 = vpop.f32.mrb[198].mxu0  ;;  %v19491_v46 = vld [vmem:[#allocation66_spill] sm:$0xff]  ;;  %v19492_v51 = vld [vmem:[#allocation95_spill] sm:$0xff] }
 0xa91   :  { %v11028_v44 = vadd.f32 %v12845_v27, %v19483_v42  ;;  %v12846_v19 = vadd.f32 %v18551_v3, %v10741_v28  ;;  %v10743_v24 = vpop.f32.mrb[199].mxu0 }
 0xa92   :  { %12254 = vst [vmem:[%s18803_s9 + $0x58] sm:$0xff] %v12142_v36  }
 0xa93   :  { %v11031_v47 = vadd.f32 %v12846_v19, %v19484_v17  ;;  %13921 = vtanh.f32 %v11028_v44 }
 0xa95   :  { %13923 = vtanh.f32 %v11031_v47  ;;  %v13918_v25 = vpop.eup %13917 }
 0xa96   :  { %v10746_v50 = vpop.f32.mrb[200].mxu0 }
 0xa97   :  { %v13920_v23 = vpop.eup %13919  ;;  %v12847_v57 = vadd.f32 %v18551_v3, %v10746_v50  ;;  %v10748_v4 = vpop.f32.mrb[201].mxu0 }
 0xa98   :  { %v12147_v11 = vpack.c.bf16 %v13920_v23, %v13918_v25  ;;  %v10749_v35 = vpop.f32.mrb[202].mxu0  ;;  %v19493_v25 = vld [vmem:[#allocation67_spill] sm:$0xff]  ;;  %v19494_v4 = vld [vmem:[#allocation77_spill] sm:$0xff] }
 0xa99   :  { %v11036_v62 = vadd.f32 %v12847_v57, %v19485_v29  ;;  %v12848_v52 = vadd.f32 %v18551_v3, %v10749_v35  ;;  %v10751_v9 = vpop.f32.mrb[203].mxu0 }
 0xa9a   :  { %12255 = vst [vmem:[%s18803_s9 + $0x60] sm:$0xff] %v12147_v11  }
 0xa9b   :  { %v11039_v45 = vadd.f32 %v12848_v52, %v19486_v32  ;;  %13925 = vtanh.f32 %v11036_v62 }
 0xa9d   :  { %13927 = vtanh.f32 %v11039_v45  ;;  %v13922_v12 = vpop.eup %13921 }
 0xa9e   :  { %v10754_v8 = vpop.f32.mrb[204].mxu0 }
 0xa9f   :  { %v13924_v13 = vpop.eup %13923  ;;  %v12849_v40 = vadd.f32 %v18551_v3, %v10754_v8  ;;  %v10756_v59 = vpop.f32.mrb[205].mxu0 }
 0xaa0   :  { %v12152_v56 = vpack.c.bf16 %v13924_v13, %v13922_v12  ;;  %v10757_v2 = vpop.f32.mrb[206].mxu0  ;;  %v19495_v12 = vld [vmem:[#allocation74_spill] sm:$0xff]  ;;  %v19496_v59 = vld [vmem:[#allocation72_spill] sm:$0xff] }
 0xaa1   :  { %v11044_v0 = vadd.f32 %v12849_v40, %v19487_v39  ;;  %v12850_v61 = vadd.f32 %v18551_v3, %v10757_v2  ;;  %v10759_v49 = vpop.f32.mrb[207].mxu0 }
 0xaa2   :  { %12256 = vst [vmem:[%s18803_s9 + $0x68] sm:$0xff] %v12152_v56  }
 0xaa3   :  { %v11047_v20 = vadd.f32 %v12850_v61, %v19488_v15  ;;  %13929 = vtanh.f32 %v11044_v0 }
 0xaa5   :  { %13931 = vtanh.f32 %v11047_v20  ;;  %v13926_v48 = vpop.eup %13925 }
 0xaa6   :  { %v10762_v30 = vpop.f32.mrb[208].mxu0 }
 0xaa7   :  { %v13928_v22 = vpop.eup %13927  ;;  %v12851_v53 = vadd.f32 %v18551_v3, %v10762_v30  ;;  %v10764_v54 = vpop.f32.mrb[209].mxu0 }
 0xaa8   :  { %v12157_v55 = vpack.c.bf16 %v13928_v22, %v13926_v48  ;;  %v10765_v10 = vpop.f32.mrb[210].mxu0  ;;  %v19497_v48 = vld [vmem:[#allocation19_spill] sm:$0xff]  ;;  %v19498_v54 = vld [vmem:[#allocation97_spill] sm:$0xff] }
 0xaa9   :  { %v11052_v1 = vadd.f32 %v12851_v53, %v19489_v38  ;;  %v12852_v5 = vadd.f32 %v18551_v3, %v10765_v10  ;;  %v10767_v14 = vpop.f32.mrb[211].mxu0 }
 0xaaa   :  { %12257 = vst [vmem:[%s18803_s9 + $0x70] sm:$0xff] %v12157_v55  }
 0xaab   :  { %v11055_v6 = vadd.f32 %v12852_v5, %v19490_v43  ;;  %13933 = vtanh.f32 %v11052_v1 }
 0xaad   :  { %13935 = vtanh.f32 %v11055_v6  ;;  %v13930_v33 = vpop.eup %13929 }
 0xaae   :  { %v10770_v21 = vpop.f32.mrb[212].mxu0 }
 0xaaf   :  { %v13932_v18 = vpop.eup %13931  ;;  %v12853_v41 = vadd.f32 %v18551_v3, %v10770_v21  ;;  %v10772_v37 = vpop.f32.mrb[213].mxu0 }
 0xab0   :  { %v12162_v34 = vpack.c.bf16 %v13932_v18, %v13930_v33  ;;  %v10773_v26 = vpop.f32.mrb[214].mxu0  ;;  %v19499_v33 = vld [vmem:[#allocation2_spill] sm:$0xff]  ;;  %v19500_v37 = vld [vmem:[#allocation96_spill] sm:$0xff] }
 0xab1   :  { %v11060_v31 = vadd.f32 %v12853_v41, %v19491_v46  ;;  %v12854_v60 = vadd.f32 %v18551_v3, %v10773_v26  ;;  %v10775_v27 = vpop.f32.mrb[215].mxu0 }
 0xab2   :  { %12258 = vst [vmem:[%s18803_s9 + $0x78] sm:$0xff] %v12162_v34  }
 0xab3   :  { %v11063_v36 = vadd.f32 %v12854_v60, %v19492_v51  ;;  %13937 = vtanh.f32 %v11060_v31 }
 0xab5   :  { %13939 = vtanh.f32 %v11063_v36  ;;  %v13934_v28 = vpop.eup %13933 }
 0xab6   :  { %v10778_v42 = vpop.f32.mrb[216].mxu0 }
 0xab7   :  { %v13936_v44 = vpop.eup %13935  ;;  %v12855_v19 = vadd.f32 %v18551_v3, %v10778_v42  ;;  %v10780_v24 = vpop.f32.mrb[217].mxu0 }
 0xab8   :  { %v12167_v17 = vpack.c.bf16 %v13936_v44, %v13934_v28  ;;  %v10781_v47 = vpop.f32.mrb[218].mxu0  ;;  %v19501_v28 = vld [vmem:[#allocation98_spill] sm:$0xff]  ;;  %v19502_v24 = vld [vmem:[#allocation15_spill] sm:$0xff] }
 0xab9   :  { %v11068_v50 = vadd.f32 %v12855_v19, %v19493_v25  ;;  %v12856_v23 = vadd.f32 %v18551_v3, %v10781_v47  ;;  %v10783_v57 = vpop.f32.mrb[219].mxu0 }
 0xaba   :  { %12259 = vst [vmem:[%s18803_s9 + $0x80] sm:$0xff] %v12167_v17  }
 0xabb   :  { %v11071_v11 = vadd.f32 %v12856_v23, %v19494_v4  ;;  %13941 = vtanh.f32 %v11068_v50 }
 0xabd   :  { %13943 = vtanh.f32 %v11071_v11  ;;  %v13938_v35 = vpop.eup %13937 }
 0xabe   :  { %v10786_v29 = vpop.f32.mrb[220].mxu0 }
 0xabf   :  { %v13940_v62 = vpop.eup %13939  ;;  %v12857_v52 = vadd.f32 %v18551_v3, %v10786_v29  ;;  %v10788_v9 = vpop.f32.mrb[221].mxu0 }
 0xac0   :  { %v12172_v32 = vpack.c.bf16 %v13940_v62, %v13938_v35  ;;  %v10789_v45 = vpop.f32.mrb[222].mxu0  ;;  %v19503_v35 = vld [vmem:[#allocation9_spill] sm:$0xff]  ;;  %v19504_v9 = vld [vmem:[#allocation99_spill] sm:$0xff] }
 0xac1   :  { %v11076_v8 = vadd.f32 %v12857_v52, %v19495_v12  ;;  %v12858_v13 = vadd.f32 %v18551_v3, %v10789_v45  ;;  %v10791_v40 = vpop.f32.mrb[223].mxu0 }
 0xac2   :  { %12260 = vst [vmem:[%s18803_s9 + $0x88] sm:$0xff] %v12172_v32  }
 0xac3   :  { %v11079_v56 = vadd.f32 %v12858_v13, %v19496_v59  ;;  %13945 = vtanh.f32 %v11076_v8 }
 0xac5   :  { %13947 = vtanh.f32 %v11079_v56  ;;  %v13942_v2 = vpop.eup %13941 }
 0xac6   :  { %v10794_v39 = vpop.f32.mrb[224].mxu0 }
 0xac7   :  { %v13944_v0 = vpop.eup %13943  ;;  %v12859_v61 = vadd.f32 %v18551_v3, %v10794_v39  ;;  %v10796_v49 = vpop.f32.mrb[225].mxu0 }
 0xac8   :  { %v12177_v15 = vpack.c.bf16 %v13944_v0, %v13942_v2  ;;  %v10797_v20 = vpop.f32.mrb[226].mxu0  ;;  %v19505_v2 = vld [vmem:[#allocation100_spill] sm:$0xff]  ;;  %v19506_v49 = vld [vmem:[#allocation11_spill] sm:$0xff] }
 0xac9   :  { %v11084_v30 = vadd.f32 %v12859_v61, %v19497_v48  ;;  %v12860_v22 = vadd.f32 %v18551_v3, %v10797_v20  ;;  %v10799_v53 = vpop.f32.mrb[227].mxu0 }
 0xaca   :  { %12261 = vst [vmem:[%s18803_s9 + $0x90] sm:$0xff] %v12177_v15  }
 0xacb   :  { %v11087_v55 = vadd.f32 %v12860_v22, %v19498_v54  ;;  %13949 = vtanh.f32 %v11084_v30 }
 0xacd   :  { %13951 = vtanh.f32 %v11087_v55  ;;  %v13946_v10 = vpop.eup %13945 }
 0xace   :  { %v10802_v38 = vpop.f32.mrb[228].mxu0 }
 0xacf   :  { %v13948_v1 = vpop.eup %13947  ;;  %v12861_v5 = vadd.f32 %v18551_v3, %v10802_v38  ;;  %v10804_v14 = vpop.f32.mrb[229].mxu0 }
 0xad0   :  { %v12182_v43 = vpack.c.bf16 %v13948_v1, %v13946_v10  ;;  %v10805_v6 = vpop.f32.mrb[230].mxu0  ;;  %v19507_v10 = vld [vmem:[#allocation17_spill] sm:$0xff] }
 0xad1   :  { %v11092_v21 = vadd.f32 %v12861_v5, %v19499_v33  ;;  %v12862_v18 = vadd.f32 %v18551_v3, %v10805_v6  ;;  %v10807_v41 = vpop.f32.mrb[231].mxu0  ;;  %v19508_v14 = vld [vmem:[#allocation101_spill] sm:$0xff] }
 0xad2   :  { %12262 = vst [vmem:[%s18803_s9 + $0x98] sm:$0xff] %v12182_v43  }
 0xad3   :  { %v11095_v34 = vadd.f32 %v12862_v18, %v19500_v37  ;;  %13953 = vtanh.f32 %v11092_v21 }
 0xad5   :  { %13955 = vtanh.f32 %v11095_v34  ;;  %v13950_v26 = vpop.eup %13949 }
 0xad6   :  { %v10810_v46 = vpop.f32.mrb[232].mxu0 }
 0xad7   :  { %v13952_v31 = vpop.eup %13951  ;;  %v12863_v60 = vadd.f32 %v18551_v3, %v10810_v46  ;;  %v10812_v27 = vpop.f32.mrb[233].mxu0 }
 0xad8   :  { %v12187_v51 = vpack.c.bf16 %v13952_v31, %v13950_v26  ;;  %v10813_v36 = vpop.f32.mrb[234].mxu0  ;;  %v19509_v26 = vld [vmem:[#allocation102_spill] sm:$0xff] }
 0xad9   :  { %v11100_v42 = vadd.f32 %v12863_v60, %v19501_v28  ;;  %v12864_v44 = vadd.f32 %v18551_v3, %v10813_v36  ;;  %v10815_v19 = vpop.f32.mrb[235].mxu0  ;;  %v19510_v27 = vld [vmem:[#allocation42_spill] sm:$0xff] }
 0xada   :  { %12263 = vst [vmem:[%s18803_s9 + $0xa0] sm:$0xff] %v12187_v51  }
 0xadb   :  { %v11103_v17 = vadd.f32 %v12864_v44, %v19502_v24  ;;  %13957 = vtanh.f32 %v11100_v42 }
 0xadd   :  { %13959 = vtanh.f32 %v11103_v17  ;;  %v13954_v47 = vpop.eup %13953 }
 0xade   :  { %v10818_v25 = vpop.f32.mrb[236].mxu0 }
 0xadf   :  { %v13956_v50 = vpop.eup %13955  ;;  %v12865_v23 = vadd.f32 %v18551_v3, %v10818_v25  ;;  %v10820_v57 = vpop.f32.mrb[237].mxu0 }
 0xae0   :  { %v12192_v4 = vpack.c.bf16 %v13956_v50, %v13954_v47  ;;  %v10821_v11 = vpop.f32.mrb[238].mxu0  ;;  %v19511_v47 = vld [vmem:[#allocation36_spill] sm:$0xff]  ;;  %v19512_v57 = vld [vmem:[#allocation103_spill] sm:$0xff] }
 0xae1   :  { %v11108_v29 = vadd.f32 %v12865_v23, %v19503_v35  ;;  %v12866_v62 = vadd.f32 %v18551_v3, %v10821_v11  ;;  %v10823_v52 = vpop.f32.mrb[239].mxu0 }
 0xae2   :  { %12264 = vst [vmem:[%s18803_s9 + $0xa8] sm:$0xff] %v12192_v4  }
 0xae3   :  { %v11111_v32 = vadd.f32 %v12866_v62, %v19504_v9  ;;  %13961 = vtanh.f32 %v11108_v29 }
 0xae5   :  { %13963 = vtanh.f32 %v11111_v32  ;;  %v13958_v45 = vpop.eup %13957 }
 0xae6   :  { %v10826_v12 = vpop.f32.mrb[240].mxu0 }
 0xae7   :  { %v13960_v8 = vpop.eup %13959  ;;  %v12867_v13 = vadd.f32 %v18551_v3, %v10826_v12  ;;  %v10828_v40 = vpop.f32.mrb[241].mxu0 }
 0xae8   :  { %v12197_v59 = vpack.c.bf16 %v13960_v8, %v13958_v45  ;;  %v10829_v56 = vpop.f32.mrb[242].mxu0  ;;  %v19513_v45 = vld [vmem:[#allocation105_spill] sm:$0xff]  ;;  %v19514_v40 = vld [vmem:[#allocation24_spill] sm:$0xff] }
 0xae9   :  { %v11116_v39 = vadd.f32 %v12867_v13, %v19505_v2  ;;  %v12868_v0 = vadd.f32 %v18551_v3, %v10829_v56  ;;  %v10831_v61 = vpop.f32.mrb[243].mxu0 }
 0xaea   :  { %12265 = vst [vmem:[%s18803_s9 + $0xb0] sm:$0xff] %v12197_v59  }
 0xaeb   :  { %v11119_v15 = vadd.f32 %v12868_v0, %v19506_v49  ;;  %13965 = vtanh.f32 %v11116_v39 }
 0xaed   :  { %13967 = vtanh.f32 %v11119_v15  ;;  %v13962_v20 = vpop.eup %13961 }
 0xaee   :  { %v10834_v48 = vpop.f32.mrb[244].mxu0 }
 0xaef   :  { %v13964_v30 = vpop.eup %13963  ;;  %v12869_v22 = vadd.f32 %v18551_v3, %v10834_v48  ;;  %v10836_v53 = vpop.f32.mrb[245].mxu0 }
 0xaf0   :  { %v12202_v54 = vpack.c.bf16 %v13964_v30, %v13962_v20  ;;  %v10837_v55 = vpop.f32.mrb[246].mxu0  ;;  %v19515_v20 = vld [vmem:[#allocation104_spill] sm:$0xff]  ;;  %v19516_v53 = vld [vmem:[#allocation106_spill] sm:$0xff] }
 0xaf1   :  { %v11124_v38 = vadd.f32 %v12869_v22, %v19507_v10  ;;  %v12870_v1 = vadd.f32 %v18551_v3, %v10837_v55  ;;  %v10839_v5 = vpop.f32.mrb[247].mxu0 }
 0xaf2   :  { %12266 = vst [vmem:[%s18803_s9 + $0xb8] sm:$0xff] %v12202_v54  }
 0xaf3   :  { %v11127_v43 = vadd.f32 %v12870_v1, %v19508_v14  ;;  %13969 = vtanh.f32 %v11124_v38 }
 0xaf5   :  { %13971 = vtanh.f32 %v11127_v43  ;;  %v13966_v6 = vpop.eup %13965 }
 0xaf6   :  { %v10842_v33 = vpop.f32.mrb[248].mxu0 }
 0xaf7   :  { %v13968_v21 = vpop.eup %13967  ;;  %v12871_v18 = vadd.f32 %v18551_v3, %v10842_v33  ;;  %v10844_v41 = vpop.f32.mrb[249].mxu0 }
 0xaf8   :  { %v12207_v37 = vpack.c.bf16 %v13968_v21, %v13966_v6  ;;  %v10845_v34 = vpop.f32.mrb[250].mxu0 }
 0xaf9   :  { %v11132_v46 = vadd.f32 %v12871_v18, %v19509_v26  ;;  %v12872_v31 = vadd.f32 %v18551_v3, %v10845_v34  ;;  %v10847_v60 = vpop.f32.mrb[251].mxu0 }
 0xafa   :  { %12267 = vst [vmem:[%s18803_s9 + $0xc0] sm:$0xff] %v12207_v37  }
 0xafb   :  { %v11135_v51 = vadd.f32 %v12872_v31, %v19510_v27  ;;  %13973 = vtanh.f32 %v11132_v46 }
 0xafd   :  { %13975 = vtanh.f32 %v11135_v51  ;;  %v13970_v36 = vpop.eup %13969 }
 0xafe   :  { %v10850_v28 = vpop.f32.mrb[252].mxu0 }
 0xaff   :  { %v13972_v42 = vpop.eup %13971  ;;  %v12873_v44 = vadd.f32 %v18551_v3, %v10850_v28  ;;  %v10852_v19 = vpop.f32.mrb[253].mxu0 }
 0xb00   :  { %v12212_v24 = vpack.c.bf16 %v13972_v42, %v13970_v36  ;;  %v10853_v17 = vpop.f32.mrb[254].mxu0 }
 0xb01   :  { %v11140_v25 = vadd.f32 %v12873_v44, %v19511_v47  ;;  %v12874_v50 = vadd.f32 %v18551_v3, %v10853_v17  ;;  %v10855_v23 = vpop.f32.mrb[255].mxu0 }
 0xb02   :  { %12268 = vst [vmem:[%s18803_s9 + $0xc8] sm:$0xff] %v12212_v24  }
 0xb03   :  { %v11143_v4 = vadd.f32 %v12874_v50, %v19512_v57  ;;  %13977 = vtanh.f32 %v11140_v25 }
 0xb05   :  { %13979 = vtanh.f32 %v11143_v4  ;;  %v13974_v11 = vpop.eup %13973 }
 0xb06   :  { %v10858_v35 = vpop.f32.mrb[0].mxu0 }
 0xb07   :  { %v13976_v29 = vpop.eup %13975  ;;  %v12875_v62 = vadd.f32 %v18551_v3, %v10858_v35  ;;  %v10860_v52 = vpop.f32.mrb[1].mxu0 }
 0xb08   :  { %v12217_v9 = vpack.c.bf16 %v13976_v29, %v13974_v11  ;;  %v10861_v32 = vpop.f32.mrb[2].mxu0 }
 0xb09   :  { %v11148_v12 = vadd.f32 %v12875_v62, %v19513_v45  ;;  %v12876_v8 = vadd.f32 %v18551_v3, %v10861_v32  ;;  %v10863_v13 = vpop.f32.mrb[3].mxu0 }
 0xb0a   :  { %12269 = vst [vmem:[%s18803_s9 + $0xd0] sm:$0xff] %v12217_v9  }
 0xb0b   :  { %v11151_v59 = vadd.f32 %v12876_v8, %v19514_v40  ;;  %13981 = vtanh.f32 %v11148_v12 }
 0xb0d   :  { %13983 = vtanh.f32 %v11151_v59  ;;  %v13978_v56 = vpop.eup %13977 }
 0xb0e   :  { %v10866_v2 = vpop.f32.mrb[4].mxu0 }
 0xb0f   :  { %v13980_v39 = vpop.eup %13979  ;;  %v12877_v0 = vadd.f32 %v18551_v3, %v10866_v2  ;;  %v10868_v61 = vpop.f32.mrb[5].mxu0 }
 0xb10   :  { %v12222_v49 = vpack.c.bf16 %v13980_v39, %v13978_v56  ;;  %v10869_v15 = vpop.f32.mrb[6].mxu0 }
 0xb11   :  { %v11156_v48 = vadd.f32 %v12877_v0, %v19515_v20  ;;  %v12878_v30 = vadd.f32 %v18551_v3, %v10869_v15  ;;  %v10871_v22 = vpop.f32.mrb[7].mxu0 }
 0xb12   :  { %12270 = vst [vmem:[%s18803_s9 + $0xd8] sm:$0xff] %v12222_v49  }
 0xb13   :  { %v11159_v54 = vadd.f32 %v12878_v30, %v19516_v53  ;;  %13985 = vtanh.f32 %v11156_v48 }
 0xb15   :  { %13987 = vtanh.f32 %v11159_v54  ;;  %v13982_v55 = vpop.eup %13981 }
 0xb16   :  { %v10874_v10 = vpop.f32.mrb[8].mxu0 }
 0xb17   :  { %v13984_v38 = vpop.eup %13983  ;;  %v12879_v1 = vadd.f32 %v18551_v3, %v10874_v10  ;;  %v10876_v5 = vpop.f32.mrb[9].mxu0 }
 0xb18   :  { %v12227_v14 = vpack.c.bf16 %v13984_v38, %v13982_v55  ;;  %v10877_v43 = vpop.f32.mrb[10].mxu0 }
 0xb19   :  { %v12880_v6 = vadd.f32 %v18551_v3, %v10877_v43  ;;  %v11164_v33 = vadd.f32 %v12879_v1, %v18670_v16  ;;  %v10879_v21 = vpop.f32.mrb[11].mxu0 }
 0xb1a   :  { %12271 = vst [vmem:[%s18803_s9 + $0xe0] sm:$0xff] %v12227_v14  }
 0xb1b   :  { %v11167_v18 = vadd.f32 %v12880_v6, %v18674_v58  ;;  %13989 = vtanh.f32 %v11164_v33 }
 0xb1d   :  { %13991 = vtanh.f32 %v11167_v18  ;;  %v13986_v41 = vpop.eup %13985 }
 0xb1e   :  { %v10882_v37 = vpop.f32.mrb[12].mxu0 }
 0xb1f   :  { %v13988_v34 = vpop.eup %13987  ;;  %v12881_v26 = vadd.f32 %v18551_v3, %v10882_v37  ;;  %v10884_v46 = vpop.f32.mrb[13].mxu0 }
 0xb20   :  { %v12232_v31 = vpack.c.bf16 %v13988_v34, %v13986_v41  ;;  %v10885_v60 = vpop.f32.mrb[14].mxu0 }
 0xb21   :  { %v11172_v27 = vadd.f32 %v12881_v26, %v18667_v7  ;;  %v12882_v16 = vadd.f32 %v18551_v3, %v10885_v60  ;;  %v10887_v51 = vpop.f32.mrb[15].mxu0 }
 0xb22   :  { %12272 = vst [vmem:[%s18803_s9 + $0xe8] sm:$0xff] %v12232_v31  }
 0xb23   :  { %v11175_v58 = vadd.f32 %v12882_v16, %v18672_v63  ;;  %13993 = vtanh.f32 %v11172_v27 }
 0xb25   :  { %13995 = vtanh.f32 %v11175_v58  ;;  %v13990_v36 = vpop.eup %13989 }
 0xb27   :  { %v13992_v28 = vpop.eup %13991 }
 0xb28   :  { %v12237_v42 = vpack.c.bf16 %v13992_v28, %v13990_v36 }
 0xb2a   :  { %12273 = vst [vmem:[%s18803_s9 + $0xf0] sm:$0xff] %v12237_v42  }
 0xb2d   :  { %v13994_v44 = vpop.eup %13993 }
 0xb2f   :  { %v13996_v7 = vpop.eup %13995 }
 0xb30   :  { %v12242_v19 = vpack.c.bf16 %v13996_v7, %v13994_v44 }
 0xb32   :  { %12274 = vst [vmem:[%s18803_s9 + $0xf8] sm:$0xff] %v12242_v19  }

</bundles_post_ra>
